<compile_context>
chip_gen: v5e
topology: v5e:2x2
jax: 0.10.0
libtpu: 0.0.40
codegen_flags: <defaults>
</compile_context>

<pallas_src>
import functools

import jax
import jax.numpy as jnp
from jax.experimental import pallas as pl
from jax.experimental.pallas import tpu as pltpu


# ----------------------------------------------------------------------------
# Helpers
# ----------------------------------------------------------------------------
def _round_up(x, m):
    return ((x + m - 1) // m) * m


_VMEM_LIMIT = 32 * 1024 * 1024      # scoped VMEM limit (safe on v5e/v6e/v7x)
_VMEM_BUDGET = 20 * 1024 * 1024     # conservative per-call tile budget


def _pick_tm(M, per_row_bytes, fixed_bytes, *, min_steps=1):
    """Largest power-of-two row tile that fits the VMEM budget."""
    Mr = _round_up(M, 8)
    for tm in (1024, 512, 256, 128, 64, 32, 16, 8):
        if tm > Mr:
            continue
        if min_steps > 1 and tm * min_steps > Mr and tm > 8:
            continue  # keep >=2 grid steps so v7x can shard across its 2 TCs
        if 2 * tm * per_row_bytes + 2 * fixed_bytes <= _VMEM_BUDGET:
            return tm
    return 8


def _compiler_params(n_parallel):
    return pltpu.CompilerParams(
        dimension_semantics=("parallel",) * n_parallel,
        vmem_limit_bytes=_VMEM_LIMIT,
    )


# ----------------------------------------------------------------------------
# Pallas kernels
# ----------------------------------------------------------------------------
def _gemm_kernel(a_ref, b_ref, t_ref, o_ref, *, relu):
    # out = maybe_relu(A @ B + shift); bf16 operands, f32 accumulate/epilogue.
    acc = jnp.dot(a_ref[...], b_ref[...], preferred_element_type=jnp.float32)
    y = acc + t_ref[...]
    if relu:
        y = jnp.maximum(y, 0.0)
    o_ref[...] = y.astype(o_ref.dtype)


def _stage_kernel(a1_ref, a2_ref, b1_ref, t1_ref, b2_ref, t2_ref,
                  be1_ref, be2_ref, t3_ref, o_ref):
    # One crossing stage, fully fused:
    #   ya = relu(BN1(1x1 conv(Xa)))            (A1 @ B1 + T1)
    #   yb = relu(BN2(3x3/s2 conv(Xb)))         (A2 @ B2 + T2)
    #   c  = relu(BN3(end([ya, yb])))           (ya @ Be1 + yb @ Be2 + T3)
    ya = jnp.maximum(
        jnp.dot(a1_ref[...], b1_ref[...], preferred_element_type=jnp.float32)
        + t1_ref[...], 0.0)
    yb = jnp.maximum(
        jnp.dot(a2_ref[...], b2_ref[...], preferred_element_type=jnp.float32)
        + t2_ref[...], 0.0)
    acc = jnp.dot(ya.astype(jnp.bfloat16), be1_ref[...],
                  preferred_element_type=jnp.float32)
    acc = acc + jnp.dot(yb.astype(jnp.bfloat16), be2_ref[...],
                        preferred_element_type=jnp.float32)
    o_ref[...] = jnp.maximum(acc + t3_ref[...], 0.0).astype(o_ref.dtype)


def _deconv_head_kernel(a_ref, b_ref, t_ref, w_ref, bb_ref, o_ref):
    # Last deconv + end_up fused: y = relu(A @ B + T); out = y @ w_end + b_end
    # (w_end has a single output column -> do it as a lane reduction).
    acc = jnp.dot(a_ref[...], b_ref[...], preferred_element_type=jnp.float32)
    y = jnp.maximum(acc + t_ref[...], 0.0)
    o_ref[...] = jnp.sum(y * w_ref[...], axis=-1, keepdims=True) + bb_ref[...]


# ----------------------------------------------------------------------------
# pallas_call wrappers
# ----------------------------------------------------------------------------
def fused_gemm(A, B, T, *, relu, out_dtype):
    """A: (G, M, K) bf16, B: (G, K, N) bf16, T: (1, N) f32 -> (G, M, N)."""
    G, M, K = A.shape
    Np = B.shape[2]
    out_size = jnp.dtype(out_dtype).itemsize
    TM = _pick_tm(M, K * 2 + Np * out_size, K * Np * 2 + Np * 4)
    Mp = _round_up(M, TM)
    if Mp != M:
        A = jnp.pad(A, ((0, 0), (0, Mp - M), (0, 0)))
    out = pl.pallas_call(
        functools.partial(_gemm_kernel, relu=relu),
        out_shape=jax.ShapeDtypeStruct((G, Mp, Np), out_dtype),
        grid_spec=pltpu.PrefetchScalarGridSpec(
            num_scalar_prefetch=0,
            grid=(G, Mp // TM),
            in_specs=[
                pl.BlockSpec((None, TM, K), lambda g, i: (g, i, 0)),
                pl.BlockSpec((None, K, Np), lambda g, i: (g, 0, 0)),
                pl.BlockSpec((1, Np), lambda g, i: (0, 0)),
            ],
            out_specs=pl.BlockSpec((None, TM, Np), lambda g, i: (g, i, 0)),
        ),
        compiler_params=_compiler_params(2),
    )(A, B, T)
    if Mp != M:
        out = out[:, :M, :]
    return out


def fused_stage(A1, A2, sp, *, out_dtype=jnp.bfloat16):
    """Fused crossing stage (see _stage_kernel).  A1: (M,K1), A2: (M,K2)."""
    M, K1 = A1.shape
    K2 = A2.shape[1]
    Nmid = sp["B1"].shape[1]
    Nout = sp["Be1"].shape[1]
    per_row = (K1 + K2) * 2 + Nout * 2 + 2 * Nmid * 4      # A tiles + out + ya/yb
    fixed = (K1 * Nmid + K2 * Nmid + 2 * Nmid * Nout) * 2 + (2 * Nmid + Nout) * 4
    TM = _pick_tm(M, per_row, fixed, min_steps=2)
    Mp = _round_up(M, TM)
    if Mp != M:
        A1 = jnp.pad(A1, ((0, Mp - M), (0, 0)))
        A2 = jnp.pad(A2, ((0, Mp - M), (0, 0)))
    out = pl.pallas_call(
        _stage_kernel,
        out_shape=jax.ShapeDtypeStruct((Mp, Nout), out_dtype),
        grid_spec=pltpu.PrefetchScalarGridSpec(
            num_scalar_prefetch=0,
            grid=(Mp // TM,),
            in_specs=[
                pl.BlockSpec((TM, K1), lambda i: (i, 0)),
                pl.BlockSpec((TM, K2), lambda i: (i, 0)),
                pl.BlockSpec((K1, Nmid), lambda i: (0, 0)),
                pl.BlockSpec((1, Nmid), lambda i: (0, 0)),
                pl.BlockSpec((K2, Nmid), lambda i: (0, 0)),
                pl.BlockSpec((1, Nmid), lambda i: (0, 0)),
                pl.BlockSpec((Nmid, Nout), lambda i: (0, 0)),
                pl.BlockSpec((Nmid, Nout), lambda i: (0, 0)),
                pl.BlockSpec((1, Nout), lambda i: (0, 0)),
            ],
            out_specs=pl.BlockSpec((TM, Nout), lambda i: (i, 0)),
        ),
        compiler_params=_compiler_params(1),
    )(A1, A2, sp["B1"], sp["T1"], sp["B2"], sp["T2"],
      sp["Be1"], sp["Be2"], sp["T3"])
    if Mp != M:
        out = out[:M]
    return out


def fused_deconv_head(A, B, T, w_end, b_end):
    """Last deconv + end_up.  A: (G,M,K) bf16 -> (G, M, 1) f32."""
    G, M, K = A.shape
    Np = B.shape[2]
    TM = _pick_tm(M, K * 2 + Np * 4 + 4, K * Np * 2 + Np * 8 + 4)
    Mp = _round_up(M, TM)
    if Mp != M:
        A = jnp.pad(A, ((0, 0), (0, Mp - M), (0, 0)))
    out = pl.pallas_call(
        _deconv_head_kernel,
        out_shape=jax.ShapeDtypeStruct((G, Mp, 1), jnp.float32),
        grid_spec=pltpu.PrefetchScalarGridSpec(
            num_scalar_prefetch=0,
            grid=(G, Mp // TM),
            in_specs=[
                pl.BlockSpec((None, TM, K), lambda g, i: (g, i, 0)),
                pl.BlockSpec((None, K, Np), lambda g, i: (g, 0, 0)),
                pl.BlockSpec((1, Np), lambda g, i: (0, 0)),
                pl.BlockSpec((1, Np), lambda g, i: (0, 0)),
                pl.BlockSpec((1, 1), lambda g, i: (0, 0)),
            ],
            out_specs=pl.BlockSpec((None, TM, 1), lambda g, i: (g, i, 0)),
        ),
        compiler_params=_compiler_params(2),
    )(A, B, T, w_end, b_end)
    if Mp != M:
        out = out[:, :M, :]
    return out


# ----------------------------------------------------------------------------
# Host-side (XLA) glue: im2col, sub-pixel deconv taps, pixel shuffle
# ----------------------------------------------------------------------------
def _im2col(x, k, stride, pad):
    N, H, W, C = x.shape
    xp = jnp.pad(x, ((0, 0), (pad, pad), (pad, pad), (0, 0)))
    Ho = (H + 2 * pad - k) // stride + 1
    Wo = (W + 2 * pad - k) // stride + 1
    taps = []
    for ky in range(k):
        for kx in range(k):
            taps.append(xp[:, ky:ky + stride * Ho:stride,
                           kx:kx + stride * Wo:stride, :])
    return jnp.concatenate(taps, axis=-1).reshape(N * Ho * Wo, k * k * C)


def _deconv_phase_cols(x):
    """Sub-pixel taps for ConvTranspose2d(4,2,1): (N,H,W,C) -> (4, N*H*W, 4C)."""
    N, H, W, C = x.shape
    xp = jnp.pad(x, ((0, 0), (1, 1), (1, 1), (0, 0)))
    cols = []
    for py in (0, 1):
        for px in (0, 1):
            taps = []
            for dy in (0, 1):
                for dx in (0, 1):
                    taps.append(xp[:, py + dy:py + dy + H,
                                   px + dx:px + dx + W, :])
            cols.append(jnp.concatenate(taps, axis=-1).reshape(N * H * W, 4 * C))
    return jnp.stack(cols, axis=0)


def _pixel_shuffle(y4, N, H, W):
    """Phase-major (4, N*H*W, C) -> spatially interleaved (N, 2H, 2W, C)."""
    C = y4.shape[-1]
    y = y4.reshape(2, 2, N, H, W, C)
    y = jnp.transpose(y, (2, 3, 0, 4, 1, 5))
    return y.reshape(N, 2 * H, 2 * W, C)


# ----------------------------------------------------------------------------
# One-time parameter preparation (fold conv bias + eval-mode BN, cast to bf16)
# ----------------------------------------------------------------------------
def _fold_conv(w_oihw, bias, bn_scale, bn_shift):
    cout, cin, kh, kw = w_oihw.shape
    Wm = jnp.transpose(w_oihw, (2, 3, 1, 0)).reshape(kh * kw * cin, cout)
    B = (Wm * bn_scale[None, :]).astype(jnp.bfloat16)
    T = (bn_shift + bn_scale * bias)[None, :].astype(jnp.float32)
    return B, T


def _deconv_phase_weights(w_iohw):
    """ConvTranspose2d(4,2,1) weight (Cin,Cout,4,4) -> 4 phase-wise 2x2 conv
    weight matrices, shape (4, 4*Cin, Cout)."""
    mats = []
    for py in (0, 1):
        for px in (0, 1):
            taps = []
            for dy in (0, 1):
                for dx in (0, 1):
                    ky = (3 - 2 * dy) if py == 0 else (2 - 2 * dy)
                    kx = (3 - 2 * dx) if px == 0 else (2 - 2 * dx)
                    taps.append(w_iohw[:, :, ky, kx])
            mats.append(jnp.concatenate(taps, axis=0))
    return jnp.stack(mats, axis=0)


def _fold_deconv(w_iohw, bias, bn_scale, bn_shift):
    Bph = _deconv_phase_weights(w_iohw)
    B = (Bph * bn_scale[None, None, :]).astype(jnp.bfloat16)
    T = (bn_shift + bn_scale * bias)[None, :].astype(jnp.float32)
    return B, T


def prepare_params(p):
    q = {}

    def stage(up, bn1, aux, bn2, end, bn3):
        B1, T1 = _fold_conv(*p[up], *p[bn1])
        B2, T2 = _fold_conv(*p[aux], *p[bn2])
        w_end, b_end = p[end]
        s3, t3 = p[bn3]
        Wm = jnp.transpose(w_end, (2, 3, 1, 0)).reshape(w_end.shape[1],
                                                        w_end.shape[0])
        cmid = Wm.shape[0] // 2
        Be = (Wm * s3[None, :]).astype(jnp.bfloat16)
        return {"B1": B1, "T1": T1, "B2": B2, "T2": T2,
                "Be1": Be[:cmid], "Be2": Be[cmid:],
                "T3": (t3 + s3 * b_end)[None, :].astype(jnp.float32)}

    q["S1"] = stage("O1_upconv", "O1_bn_1", "O1_aux", "O1_bn_2", "O1_end", "O1_bn_3")
    q["S2"] = stage("O2_upconv", "O2_bn_1", "O2_aux", "O2_bn_2", "O2_end", "O2_bn_3")
    q["S3"] = stage("O3_upconv", "O3_bn_1", "O3_aux", "O3_bn_2", "O3_end", "O3_bn_3")

    for i, (dk, bk) in enumerate([("O1_DeConv", "O1_bn_4"),
                                  ("O2_DeConv", "O2_bn_4"),
                                  ("O3_DeConv", "O3_bn_4"),
                                  ("O4_DeConv", "O4_bn_2")], start=1):
        B, T = _fold_deconv(*p[dk], *p[bk])
        q[f"D{i}"] = {"B": B, "T": T}

    B4, T4 = _fold_conv(*p["O4_upconv"], *p["O4_bn_1"])
    q["C4"] = {"B": B4[None], "T": T4}                      # 1x1 conv, G = 1

    w_end, b_end = p["end_up"]
    q["end_w"] = w_end[:, :, 0, 0].astype(jnp.float32)      # (1, d_model//16)
    q["end_b"] = b_end.reshape(1, 1).astype(jnp.float32)
    return q


# ----------------------------------------------------------------------------
# Raw parameter initialization (mirrors the PyTorch module's __init__)
# ----------------------------------------------------------------------------
def _conv_params(key, cout, cin, k):
    kw_, kb_ = jax.random.split(key)
    fan_in = cin * k * k
    w = jax.random.normal(kw_, (cout, cin, k, k), jnp.float32) * (2.0 / fan_in) ** 0.5
    bound = 1.0 / (fan_in ** 0.5)
    b = jax.random.uniform(kb_, (cout,), jnp.float32, -bound, bound)
    return w, b


def _deconv_params(key, cin, cout, k):
    kw_, kb_ = jax.random.split(key)
    fan_in = cout * k * k  # PyTorch fan_in for ConvTranspose2d (cin, cout, k, k)
    w = jax.random.normal(kw_, (cin, cout, k, k), jnp.float32) * (2.0 / fan_in) ** 0.5
    bound = 1.0 / (fan_in ** 0.5)
    b = jax.random.uniform(kb_, (cout,), jnp.float32, -bound, bound)
    return w, b


def _bn_params(c, eps=1e-5):
    # eval-mode BN with default init: gamma=1, beta=0, mean=0, var=1
    scale = jnp.ones((c,), jnp.float32) / jnp.sqrt(1.0 + eps)
    shift = jnp.zeros((c,), jnp.float32)
    return scale, shift


def init_params(key, feat_dim, d_model):
    ks = iter(jax.random.split(key, 16))
    p = {}
    p["O1_upconv"] = _conv_params(next(ks), feat_dim[1], feat_dim[0], 1)
    p["O1_bn_1"] = _bn_params(feat_dim[1])
    p["O1_aux"] = _conv_params(next(ks), feat_dim[1], feat_dim[1], 3)
    p["O1_bn_2"] = _bn_params(feat_dim[1])
    p["O1_end"] = _conv_params(next(ks), d_model, feat_dim[1] * 2, 1)
    p["O1_bn_3"] = _bn_params(d_model)
    p["O1_DeConv"] = _deconv_params(next(ks), d_model * 2, d_model // 2, 4)
    p["O1_bn_4"] = _bn_params(d_model // 2)

    p["O2_upconv"] = _conv_params(next(ks), feat_dim[2], feat_dim[1], 1)
    p["O2_bn_1"] = _bn_params(feat_dim[2])
    p["O2_aux"] = _conv_params(next(ks), feat_dim[2], feat_dim[2], 3)
    p["O2_bn_2"] = _bn_params(feat_dim[2])
    p["O2_end"] = _conv_params(next(ks), d_model // 2, feat_dim[2] * 2, 1)
    p["O2_bn_3"] = _bn_params(d_model // 2)
    p["O2_DeConv"] = _deconv_params(next(ks), d_model, d_model // 4, 4)
    p["O2_bn_4"] = _bn_params(d_model // 4)

    p["O3_upconv"] = _conv_params(next(ks), feat_dim[3], feat_dim[2], 1)
    p["O3_bn_1"] = _bn_params(feat_dim[3])
    p["O3_aux"] = _conv_params(next(ks), feat_dim[3], feat_dim[3], 3)
    p["O3_bn_2"] = _bn_params(feat_dim[3])
    p["O3_end"] = _conv_params(next(ks), d_model // 4, feat_dim[3] * 2, 1)
    p["O3_bn_3"] = _bn_params(d_model // 4)
    p["O3_DeConv"] = _deconv_params(next(ks), d_model // 2, d_model // 8, 4)
    p["O3_bn_4"] = _bn_params(d_model // 8)

    p["O4_upconv"] = _conv_params(next(ks), d_model // 8, feat_dim[3], 1)
    p["O4_bn_1"] = _bn_params(d_model // 8)
    p["O4_DeConv"] = _deconv_params(next(ks), d_model // 4, d_model // 16, 4)
    p["O4_bn_2"] = _bn_params(d_model // 16)

    p["end_up"] = _conv_params(next(ks), 1, d_model // 16, 1)
    return p


# ----------------------------------------------------------------------------
# Forward pass (mirrors Double_Crossing_UpSample.forward)
# ----------------------------------------------------------------------------
def _run_stage(Xa, Xb, sp):
    N, H, W, C = Xa.shape
    A1 = Xa.reshape(N * H * W, C)
    A2 = _im2col(Xb, k=3, stride=2, pad=1)
    out = fused_stage(A1, A2, sp)
    return out.reshape(N, H, W, -1)


def _run_deconv(feat, dp, head=None):
    N, H, W, _ = feat.shape
    A = _deconv_phase_cols(feat)
    if head is None:
        y4 = fused_gemm(A, dp["B"], dp["T"], relu=True, out_dtype=jnp.bfloat16)
    else:
        y4 = fused_deconv_head(A, dp["B"], dp["T"], head[0], head[1])
    return _pixel_shuffle(y4, N, H, W)


def _run_conv1x1(x, cp):
    N, H, W, C = x.shape
    A = x.reshape(1, N * H * W, C)
    out = fused_gemm(A, cp["B"], cp["T"], relu=True, out_dtype=jnp.bfloat16)
    return out[0].reshape(N, H, W, -1)


@jax.jit
def double_crossing_upsample(prep, net_nchw, X_nchw):
    # layout: NCHW -> NHWC, bf16 activations (f32 accumulate inside kernels)
    to_nhwc = lambda t: jnp.transpose(t, (0, 2, 3, 1)).astype(jnp.bfloat16)
    net = to_nhwc(net_nchw)
    X1, X2, X3, X4 = (to_nhwc(t) for t in X_nchw)

    c1 = _run_stage(X1, X2, prep["S1"])
    feat = jnp.concatenate([net, c1], axis=-1)
    feat = _run_deconv(feat, prep["D1"])

    c2 = _run_stage(X2, X3, prep["S2"])
    feat = jnp.concatenate([feat, c2], axis=-1)
    feat = _run_deconv(feat, prep["D2"])

    c3 = _run_stage(X3, X4, prep["S3"])
    feat = jnp.concatenate([feat, c3], axis=-1)
    feat = _run_deconv(feat, prep["D3"])

    c4 = _run_conv1x1(X4, prep["C4"])
    feat = jnp.concatenate([feat, c4], axis=-1)
    out = _run_deconv(feat, prep["D4"], head=(prep["end_w"], prep["end_b"]))

    return jnp.transpose(out, (0, 3, 1, 2))  # back to NCHW, f32


# ----------------------------------------------------------------------------
if __name__ == "__main__":
    feat_dim = [16, 12, 8, 8]
    d_model = 32
    N = 2
    H1 = 4  # X1 / net resolution; X2=2*H1, X3=4*H1, X4=8*H1

    root = jax.random.PRNGKey(0)
    kp, k1, k2, k3, k4, k5 = jax.random.split(root, 6)
    params = init_params(kp, feat_dim, d_model)
    prep = prepare_params(params)

    # layout: inputs built in NCHW (PyTorch convention)
    X1 = jax.random.normal(k1, (N, feat_dim[0], H1, H1), jnp.float32)
    X2 = jax.random.normal(k2, (N, feat_dim[1], 2 * H1, 2 * H1), jnp.float32)
    X3 = jax.random.normal(k3, (N, feat_dim[2], 4 * H1, 4 * H1), jnp.float32)
    X4 = jax.random.normal(k4, (N, feat_dim[3], 8 * H1, 8 * H1), jnp.float32)
    net = jax.random.normal(k5, (N, d_model, H1, H1), jnp.float32)

    out = double_crossing_upsample(prep, net, (X1, X2, X3, X4))
    out = jax.block_until_ready(out)
    assert out.shape == (N, 1, 16 * H1, 16 * H1), out.shape
    assert bool(jnp.isfinite(out).all())
    print("KERNEL_OK")
</pallas_src>

<mosaic_0001>
module attributes {stable_mosaic.version = 11 : i64} {
  func.func @_stage_kernel(%arg0: i32, %arg1: memref<16x16xbf16, #tpu.memory_space<vmem>>, %arg2: memref<16x108xbf16, #tpu.memory_space<vmem>>, %arg3: memref<16x12xbf16, #tpu.memory_space<vmem>>, %arg4: memref<1x12xf32, #tpu.memory_space<vmem>>, %arg5: memref<108x12xbf16, #tpu.memory_space<vmem>>, %arg6: memref<1x12xf32, #tpu.memory_space<vmem>>, %arg7: memref<12x32xbf16, #tpu.memory_space<vmem>>, %arg8: memref<12x32xbf16, #tpu.memory_space<vmem>>, %arg9: memref<1x32xf32, #tpu.memory_space<vmem>>, %arg10: memref<16x32xbf16, #tpu.memory_space<vmem>>) attributes {dimension_semantics = [#tpu.dimension_semantics<parallel>], iteration_bounds = array<i64: 2>, scalar_prefetch = 0 : i64, scratch_operands = 0 : i64, tpu.core_type = #tpu.core_type<tc>, window_params = [{transform_indices = @transform_0, window_bounds = array<i64: 16, 16>}, {transform_indices = @transform_1, window_bounds = array<i64: 16, 108>}, {pipeline_mode = #tpu.pipeline_mode<synchronous>, transform_indices = @transform_2, window_bounds = array<i64: 16, 12>}, {pipeline_mode = #tpu.pipeline_mode<synchronous>, transform_indices = @transform_3, window_bounds = array<i64: 1, 12>}, {pipeline_mode = #tpu.pipeline_mode<synchronous>, transform_indices = @transform_4, window_bounds = array<i64: 108, 12>}, {pipeline_mode = #tpu.pipeline_mode<synchronous>, transform_indices = @transform_5, window_bounds = array<i64: 1, 12>}, {pipeline_mode = #tpu.pipeline_mode<synchronous>, transform_indices = @transform_6, window_bounds = array<i64: 12, 32>}, {pipeline_mode = #tpu.pipeline_mode<synchronous>, transform_indices = @transform_7, window_bounds = array<i64: 12, 32>}, {pipeline_mode = #tpu.pipeline_mode<synchronous>, transform_indices = @transform_8, window_bounds = array<i64: 1, 32>}, {transform_indices = @transform_9, window_bounds = array<i64: 16, 32>}]} {
    %c0 = arith.constant 0 : index
    %c0_0 = arith.constant 0 : index
    %0 = vector.load %arg1[%c0, %c0_0] : memref<16x16xbf16, #tpu.memory_space<vmem>>, vector<16x16xbf16>
    %c0_1 = arith.constant 0 : index
    %c0_2 = arith.constant 0 : index
    %1 = vector.load %arg3[%c0_1, %c0_2] : memref<16x12xbf16, #tpu.memory_space<vmem>>, vector<16x12xbf16>
    %cst = arith.constant dense<0.000000e+00> : vector<16x12xf32>
    %2 = tpu.matmul %0, %1, %cst {dimension_numbers = #tpu.dot_dimension_numbers<[1], [0], [0], [1], [0, 0, 1, 1], [], []>} : vector<16x16xbf16>, vector<16x12xbf16>, vector<16x12xf32> -> vector<16x12xf32>
    %c0_3 = arith.constant 0 : index
    %c0_4 = arith.constant 0 : index
    %3 = vector.load %arg4[%c0_3, %c0_4] : memref<1x12xf32, #tpu.memory_space<vmem>>, vector<1x12xf32>
    %4 = vector.broadcast %3 : vector<1x12xf32> to vector<16x12xf32>
    %5 = arith.addf %2, %4 : vector<16x12xf32>
    %cst_5 = arith.constant 0.000000e+00 : f32
    %6 = vector.broadcast %cst_5 : f32 to vector<16x12xf32>
    %7 = arith.maximumf %5, %6 : vector<16x12xf32>
    %c0_6 = arith.constant 0 : index
    %c0_7 = arith.constant 0 : index
    %8 = vector.load %arg2[%c0_6, %c0_7] : memref<16x108xbf16, #tpu.memory_space<vmem>>, vector<16x108xbf16>
    %c0_8 = arith.constant 0 : index
    %c0_9 = arith.constant 0 : index
    %9 = vector.load %arg5[%c0_8, %c0_9] : memref<108x12xbf16, #tpu.memory_space<vmem>>, vector<108x12xbf16>
    %cst_10 = arith.constant dense<0.000000e+00> : vector<16x12xf32>
    %10 = tpu.matmul %8, %9, %cst_10 {dimension_numbers = #tpu.dot_dimension_numbers<[1], [0], [0], [1], [0, 0, 1, 1], [], []>} : vector<16x108xbf16>, vector<108x12xbf16>, vector<16x12xf32> -> vector<16x12xf32>
    %c0_11 = arith.constant 0 : index
    %c0_12 = arith.constant 0 : index
    %11 = vector.load %arg6[%c0_11, %c0_12] : memref<1x12xf32, #tpu.memory_space<vmem>>, vector<1x12xf32>
    %12 = vector.broadcast %11 : vector<1x12xf32> to vector<16x12xf32>
    %13 = arith.addf %10, %12 : vector<16x12xf32>
    %cst_13 = arith.constant 0.000000e+00 : f32
    %14 = vector.broadcast %cst_13 : f32 to vector<16x12xf32>
    %15 = arith.maximumf %13, %14 : vector<16x12xf32>
    %16 = arith.truncf %7 : vector<16x12xf32> to vector<16x12xbf16>
    %c0_14 = arith.constant 0 : index
    %c0_15 = arith.constant 0 : index
    %17 = vector.load %arg7[%c0_14, %c0_15] : memref<12x32xbf16, #tpu.memory_space<vmem>>, vector<12x32xbf16>
    %cst_16 = arith.constant dense<0.000000e+00> : vector<16x32xf32>
    %18 = tpu.matmul %16, %17, %cst_16 {dimension_numbers = #tpu.dot_dimension_numbers<[1], [0], [0], [1], [0, 0, 1, 1], [], []>} : vector<16x12xbf16>, vector<12x32xbf16>, vector<16x32xf32> -> vector<16x32xf32>
    %19 = arith.truncf %15 : vector<16x12xf32> to vector<16x12xbf16>
    %c0_17 = arith.constant 0 : index
    %c0_18 = arith.constant 0 : index
    %20 = vector.load %arg8[%c0_17, %c0_18] : memref<12x32xbf16, #tpu.memory_space<vmem>>, vector<12x32xbf16>
    %cst_19 = arith.constant dense<0.000000e+00> : vector<16x32xf32>
    %21 = tpu.matmul %19, %20, %cst_19 {dimension_numbers = #tpu.dot_dimension_numbers<[1], [0], [0], [1], [0, 0, 1, 1], [], []>} : vector<16x12xbf16>, vector<12x32xbf16>, vector<16x32xf32> -> vector<16x32xf32>
    %22 = arith.addf %18, %21 : vector<16x32xf32>
    %c0_20 = arith.constant 0 : index
    %c0_21 = arith.constant 0 : index
    %23 = vector.load %arg9[%c0_20, %c0_21] : memref<1x32xf32, #tpu.memory_space<vmem>>, vector<1x32xf32>
    %24 = vector.broadcast %23 : vector<1x32xf32> to vector<16x32xf32>
    %25 = arith.addf %22, %24 : vector<16x32xf32>
    %cst_22 = arith.constant 0.000000e+00 : f32
    %26 = vector.broadcast %cst_22 : f32 to vector<16x32xf32>
    %27 = arith.maximumf %25, %26 : vector<16x32xf32>
    %28 = arith.truncf %27 : vector<16x32xf32> to vector<16x32xbf16>
    %c0_23 = arith.constant 0 : index
    %c0_24 = arith.constant 0 : index
    %29 = vector.load %arg10[%c0_23, %c0_24] : memref<16x32xbf16, #tpu.memory_space<vmem>>, vector<16x32xbf16>
    tpu.vector_store %arg10[%c0_23, %c0_24], %28 {strides = array<i32>} : memref<16x32xbf16, #tpu.memory_space<vmem>>, vector<16x32xbf16>,
    return
  }
  func.func @transform_0(%arg0: i32) -> (i32, i32) {
    %c0_i32 = arith.constant 0 : i32
    %c0_i32_0 = arith.constant 0 : i32
    return %arg0, %c0_i32 : i32, i32
  }
  func.func @transform_1(%arg0: i32) -> (i32, i32) {
    %c0_i32 = arith.constant 0 : i32
    %c0_i32_0 = arith.constant 0 : i32
    return %arg0, %c0_i32 : i32, i32
  }
  func.func @transform_2(%arg0: i32) -> (i32, i32) {
    %c0_i32 = arith.constant 0 : i32
    %c0_i32_0 = arith.constant 0 : i32
    %c0_i32_1 = arith.constant 0 : i32
    return %c0_i32, %c0_i32_0 : i32, i32
  }
  func.func @transform_3(%arg0: i32) -> (i32, i32) {
    %c0_i32 = arith.constant 0 : i32
    %c0_i32_0 = arith.constant 0 : i32
    %c0_i32_1 = arith.constant 0 : i32
    return %c0_i32, %c0_i32_0 : i32, i32
  }
  func.func @transform_4(%arg0: i32) -> (i32, i32) {
    %c0_i32 = arith.constant 0 : i32
    %c0_i32_0 = arith.constant 0 : i32
    %c0_i32_1 = arith.constant 0 : i32
    return %c0_i32, %c0_i32_0 : i32, i32
  }
  func.func @transform_5(%arg0: i32) -> (i32, i32) {
    %c0_i32 = arith.constant 0 : i32
    %c0_i32_0 = arith.constant 0 : i32
    %c0_i32_1 = arith.constant 0 : i32
    return %c0_i32, %c0_i32_0 : i32, i32
  }
  func.func @transform_6(%arg0: i32) -> (i32, i32) {
    %c0_i32 = arith.constant 0 : i32
    %c0_i32_0 = arith.constant 0 : i32
    %c0_i32_1 = arith.constant 0 : i32
    return %c0_i32, %c0_i32_0 : i32, i32
  }
  func.func @transform_7(%arg0: i32) -> (i32, i32) {
    %c0_i32 = arith.constant 0 : i32
    %c0_i32_0 = arith.constant 0 : i32
    %c0_i32_1 = arith.constant 0 : i32
    return %c0_i32, %c0_i32_0 : i32, i32
  }
  func.func @transform_8(%arg0: i32) -> (i32, i32) {
    %c0_i32 = arith.constant 0 : i32
    %c0_i32_0 = arith.constant 0 : i32
    %c0_i32_1 = arith.constant 0 : i32
    return %c0_i32, %c0_i32_0 : i32, i32
  }
  func.func @transform_9(%arg0: i32) -> (i32, i32) {
    %c0_i32 = arith.constant 0 : i32
    %c0_i32_0 = arith.constant 0 : i32
    return %arg0, %c0_i32 : i32, i32
  }
}

module attributes {stable_mosaic.version = 11 : i64} {
  func.func @_stage_kernel(%arg0: i32, %arg1: memref<64x12xbf16, #tpu.memory_space<vmem>>, %arg2: memref<64x72xbf16, #tpu.memory_space<vmem>>, %arg3: memref<12x8xbf16, #tpu.memory_space<vmem>>, %arg4: memref<1x8xf32, #tpu.memory_space<vmem>>, %arg5: memref<72x8xbf16, #tpu.memory_space<vmem>>, %arg6: memref<1x8xf32, #tpu.memory_space<vmem>>, %arg7: memref<8x16xbf16, #tpu.memory_space<vmem>>, %arg8: memref<8x16xbf16, #tpu.memory_space<vmem>>, %arg9: memref<1x16xf32, #tpu.memory_space<vmem>>, %arg10: memref<64x16xbf16, #tpu.memory_space<vmem>>) attributes {dimension_semantics = [#tpu.dimension_semantics<parallel>], iteration_bounds = array<i64: 2>, scalar_prefetch = 0 : i64, scratch_operands = 0 : i64, tpu.core_type = #tpu.core_type<tc>, window_params = [{transform_indices = @transform_0, window_bounds = array<i64: 64, 12>}, {transform_indices = @transform_1, window_bounds = array<i64: 64, 72>}, {pipeline_mode = #tpu.pipeline_mode<synchronous>, transform_indices = @transform_2, window_bounds = array<i64: 12, 8>}, {pipeline_mode = #tpu.pipeline_mode<synchronous>, transform_indices = @transform_3, window_bounds = array<i64: 1, 8>}, {pipeline_mode = #tpu.pipeline_mode<synchronous>, transform_indices = @transform_4, window_bounds = array<i64: 72, 8>}, {pipeline_mode = #tpu.pipeline_mode<synchronous>, transform_indices = @transform_5, window_bounds = array<i64: 1, 8>}, {pipeline_mode = #tpu.pipeline_mode<synchronous>, transform_indices = @transform_6, window_bounds = array<i64: 8, 16>}, {pipeline_mode = #tpu.pipeline_mode<synchronous>, transform_indices = @transform_7, window_bounds = array<i64: 8, 16>}, {pipeline_mode = #tpu.pipeline_mode<synchronous>, transform_indices = @transform_8, window_bounds = array<i64: 1, 16>}, {transform_indices = @transform_9, window_bounds = array<i64: 64, 16>}]} {
    %c0 = arith.constant 0 : index
    %c0_0 = arith.constant 0 : index
    %0 = vector.load %arg1[%c0, %c0_0] : memref<64x12xbf16, #tpu.memory_space<vmem>>, vector<64x12xbf16>
    %c0_1 = arith.constant 0 : index
    %c0_2 = arith.constant 0 : index
    %1 = vector.load %arg3[%c0_1, %c0_2] : memref<12x8xbf16, #tpu.memory_space<vmem>>, vector<12x8xbf16>
    %cst = arith.constant dense<0.000000e+00> : vector<64x8xf32>
    %2 = tpu.matmul %0, %1, %cst {dimension_numbers = #tpu.dot_dimension_numbers<[1], [0], [0], [1], [0, 0, 1, 1], [], []>} : vector<64x12xbf16>, vector<12x8xbf16>, vector<64x8xf32> -> vector<64x8xf32>
    %c0_3 = arith.constant 0 : index
    %c0_4 = arith.constant 0 : index
    %3 = vector.load %arg4[%c0_3, %c0_4] : memref<1x8xf32, #tpu.memory_space<vmem>>, vector<1x8xf32>
    %4 = vector.broadcast %3 : vector<1x8xf32> to vector<64x8xf32>
    %5 = arith.addf %2, %4 : vector<64x8xf32>
    %cst_5 = arith.constant 0.000000e+00 : f32
    %6 = vector.broadcast %cst_5 : f32 to vector<64x8xf32>
    %7 = arith.maximumf %5, %6 : vector<64x8xf32>
    %c0_6 = arith.constant 0 : index
    %c0_7 = arith.constant 0 : index
    %8 = vector.load %arg2[%c0_6, %c0_7] : memref<64x72xbf16, #tpu.memory_space<vmem>>, vector<64x72xbf16>
    %c0_8 = arith.constant 0 : index
    %c0_9 = arith.constant 0 : index
    %9 = vector.load %arg5[%c0_8, %c0_9] : memref<72x8xbf16, #tpu.memory_space<vmem>>, vector<72x8xbf16>
    %cst_10 = arith.constant dense<0.000000e+00> : vector<64x8xf32>
    %10 = tpu.matmul %8, %9, %cst_10 {dimension_numbers = #tpu.dot_dimension_numbers<[1], [0], [0], [1], [0, 0, 1, 1], [], []>} : vector<64x72xbf16>, vector<72x8xbf16>, vector<64x8xf32> -> vector<64x8xf32>
    %c0_11 = arith.constant 0 : index
    %c0_12 = arith.constant 0 : index
    %11 = vector.load %arg6[%c0_11, %c0_12] : memref<1x8xf32, #tpu.memory_space<vmem>>, vector<1x8xf32>
    %12 = vector.broadcast %11 : vector<1x8xf32> to vector<64x8xf32>
    %13 = arith.addf %10, %12 : vector<64x8xf32>
    %cst_13 = arith.constant 0.000000e+00 : f32
    %14 = vector.broadcast %cst_13 : f32 to vector<64x8xf32>
    %15 = arith.maximumf %13, %14 : vector<64x8xf32>
    %16 = arith.truncf %7 : vector<64x8xf32> to vector<64x8xbf16>
    %c0_14 = arith.constant 0 : index
    %c0_15 = arith.constant 0 : index
    %17 = vector.load %arg7[%c0_14, %c0_15] : memref<8x16xbf16, #tpu.memory_space<vmem>>, vector<8x16xbf16>
    %cst_16 = arith.constant dense<0.000000e+00> : vector<64x16xf32>
    %18 = tpu.matmul %16, %17, %cst_16 {dimension_numbers = #tpu.dot_dimension_numbers<[1], [0], [0], [1], [0, 0, 1, 1], [], []>} : vector<64x8xbf16>, vector<8x16xbf16>, vector<64x16xf32> -> vector<64x16xf32>
    %19 = arith.truncf %15 : vector<64x8xf32> to vector<64x8xbf16>
    %c0_17 = arith.constant 0 : index
    %c0_18 = arith.constant 0 : index
    %20 = vector.load %arg8[%c0_17, %c0_18] : memref<8x16xbf16, #tpu.memory_space<vmem>>, vector<8x16xbf16>
    %cst_19 = arith.constant dense<0.000000e+00> : vector<64x16xf32>
    %21 = tpu.matmul %19, %20, %cst_19 {dimension_numbers = #tpu.dot_dimension_numbers<[1], [0], [0], [1], [0, 0, 1, 1], [], []>} : vector<64x8xbf16>, vector<8x16xbf16>, vector<64x16xf32> -> vector<64x16xf32>
    %22 = arith.addf %18, %21 : vector<64x16xf32>
    %c0_20 = arith.constant 0 : index
    %c0_21 = arith.constant 0 : index
    %23 = vector.load %arg9[%c0_20, %c0_21] : memref<1x16xf32, #tpu.memory_space<vmem>>, vector<1x16xf32>
    %24 = vector.broadcast %23 : vector<1x16xf32> to vector<64x16xf32>
    %25 = arith.addf %22, %24 : vector<64x16xf32>
    %cst_22 = arith.constant 0.000000e+00 : f32
    %26 = vector.broadcast %cst_22 : f32 to vector<64x16xf32>
    %27 = arith.maximumf %25, %26 : vector<64x16xf32>
    %28 = arith.truncf %27 : vector<64x16xf32> to vector<64x16xbf16>
    %c0_23 = arith.constant 0 : index
    %c0_24 = arith.constant 0 : index
    %29 = vector.load %arg10[%c0_23, %c0_24] : memref<64x16xbf16, #tpu.memory_space<vmem>>, vector<64x16xbf16>
    tpu.vector_store %arg10[%c0_23, %c0_24], %28 {strides = array<i32>} : memref<64x16xbf16, #tpu.memory_space<vmem>>, vector<64x16xbf16>,
    return
  }
  func.func @transform_0(%arg0: i32) -> (i32, i32) {
    %c0_i32 = arith.constant 0 : i32
    %c0_i32_0 = arith.constant 0 : i32
    return %arg0, %c0_i32 : i32, i32
  }
  func.func @transform_1(%arg0: i32) -> (i32, i32) {
    %c0_i32 = arith.constant 0 : i32
    %c0_i32_0 = arith.constant 0 : i32
    return %arg0, %c0_i32 : i32, i32
  }
  func.func @transform_2(%arg0: i32) -> (i32, i32) {
    %c0_i32 = arith.constant 0 : i32
    %c0_i32_0 = arith.constant 0 : i32
    %c0_i32_1 = arith.constant 0 : i32
    return %c0_i32, %c0_i32_0 : i32, i32
  }
  func.func @transform_3(%arg0: i32) -> (i32, i32) {
    %c0_i32 = arith.constant 0 : i32
    %c0_i32_0 = arith.constant 0 : i32
    %c0_i32_1 = arith.constant 0 : i32
    return %c0_i32, %c0_i32_0 : i32, i32
  }
  func.func @transform_4(%arg0: i32) -> (i32, i32) {
    %c0_i32 = arith.constant 0 : i32
    %c0_i32_0 = arith.constant 0 : i32
    %c0_i32_1 = arith.constant 0 : i32
    return %c0_i32, %c0_i32_0 : i32, i32
  }
  func.func @transform_5(%arg0: i32) -> (i32, i32) {
    %c0_i32 = arith.constant 0 : i32
    %c0_i32_0 = arith.constant 0 : i32
    %c0_i32_1 = arith.constant 0 : i32
    return %c0_i32, %c0_i32_0 : i32, i32
  }
  func.func @transform_6(%arg0: i32) -> (i32, i32) {
    %c0_i32 = arith.constant 0 : i32
    %c0_i32_0 = arith.constant 0 : i32
    %c0_i32_1 = arith.constant 0 : i32
    return %c0_i32, %c0_i32_0 : i32, i32
  }
  func.func @transform_7(%arg0: i32) -> (i32, i32) {
    %c0_i32 = arith.constant 0 : i32
    %c0_i32_0 = arith.constant 0 : i32
    %c0_i32_1 = arith.constant 0 : i32
    return %c0_i32, %c0_i32_0 : i32, i32
  }
  func.func @transform_8(%arg0: i32) -> (i32, i32) {
    %c0_i32 = arith.constant 0 : i32
    %c0_i32_0 = arith.constant 0 : i32
    %c0_i32_1 = arith.constant 0 : i32
    return %c0_i32, %c0_i32_0 : i32, i32
  }
  func.func @transform_9(%arg0: i32) -> (i32, i32) {
    %c0_i32 = arith.constant 0 : i32
    %c0_i32_0 = arith.constant 0 : i32
    return %arg0, %c0_i32 : i32, i32
  }
}

module attributes {stable_mosaic.version = 11 : i64} {
  func.func @_stage_kernel(%arg0: i32, %arg1: memref<256x8xbf16, #tpu.memory_space<vmem>>, %arg2: memref<256x72xbf16, #tpu.memory_space<vmem>>, %arg3: memref<8x8xbf16, #tpu.memory_space<vmem>>, %arg4: memref<1x8xf32, #tpu.memory_space<vmem>>, %arg5: memref<72x8xbf16, #tpu.memory_space<vmem>>, %arg6: memref<1x8xf32, #tpu.memory_space<vmem>>, %arg7: memref<8x8xbf16, #tpu.memory_space<vmem>>, %arg8: memref<8x8xbf16, #tpu.memory_space<vmem>>, %arg9: memref<1x8xf32, #tpu.memory_space<vmem>>, %arg10: memref<256x8xbf16, #tpu.memory_space<vmem>>) attributes {dimension_semantics = [#tpu.dimension_semantics<parallel>], iteration_bounds = array<i64: 2>, scalar_prefetch = 0 : i64, scratch_operands = 0 : i64, tpu.core_type = #tpu.core_type<tc>, window_params = [{transform_indices = @transform_0, window_bounds = array<i64: 256, 8>}, {transform_indices = @transform_1, window_bounds = array<i64: 256, 72>}, {pipeline_mode = #tpu.pipeline_mode<synchronous>, transform_indices = @transform_2, window_bounds = array<i64: 8, 8>}, {pipeline_mode = #tpu.pipeline_mode<synchronous>, transform_indices = @transform_3, window_bounds = array<i64: 1, 8>}, {pipeline_mode = #tpu.pipeline_mode<synchronous>, transform_indices = @transform_4, window_bounds = array<i64: 72, 8>}, {pipeline_mode = #tpu.pipeline_mode<synchronous>, transform_indices = @transform_5, window_bounds = array<i64: 1, 8>}, {pipeline_mode = #tpu.pipeline_mode<synchronous>, transform_indices = @transform_6, window_bounds = array<i64: 8, 8>}, {pipeline_mode = #tpu.pipeline_mode<synchronous>, transform_indices = @transform_7, window_bounds = array<i64: 8, 8>}, {pipeline_mode = #tpu.pipeline_mode<synchronous>, transform_indices = @transform_8, window_bounds = array<i64: 1, 8>}, {transform_indices = @transform_9, window_bounds = array<i64: 256, 8>}]} {
    %c0 = arith.constant 0 : index
    %c0_0 = arith.constant 0 : index
    %0 = vector.load %arg1[%c0, %c0_0] : memref<256x8xbf16, #tpu.memory_space<vmem>>, vector<256x8xbf16>
    %c0_1 = arith.constant 0 : index
    %c0_2 = arith.constant 0 : index
    %1 = vector.load %arg3[%c0_1, %c0_2] : memref<8x8xbf16, #tpu.memory_space<vmem>>, vector<8x8xbf16>
    %cst = arith.constant dense<0.000000e+00> : vector<256x8xf32>
    %2 = tpu.matmul %0, %1, %cst {dimension_numbers = #tpu.dot_dimension_numbers<[1], [0], [0], [1], [0, 0, 1, 1], [], []>} : vector<256x8xbf16>, vector<8x8xbf16>, vector<256x8xf32> -> vector<256x8xf32>
    %c0_3 = arith.constant 0 : index
    %c0_4 = arith.constant 0 : index
    %3 = vector.load %arg4[%c0_3, %c0_4] : memref<1x8xf32, #tpu.memory_space<vmem>>, vector<1x8xf32>
    %4 = vector.broadcast %3 : vector<1x8xf32> to vector<256x8xf32>
    %5 = arith.addf %2, %4 : vector<256x8xf32>
    %cst_5 = arith.constant 0.000000e+00 : f32
    %6 = vector.broadcast %cst_5 : f32 to vector<256x8xf32>
    %7 = arith.maximumf %5, %6 : vector<256x8xf32>
    %c0_6 = arith.constant 0 : index
    %c0_7 = arith.constant 0 : index
    %8 = vector.load %arg2[%c0_6, %c0_7] : memref<256x72xbf16, #tpu.memory_space<vmem>>, vector<256x72xbf16>
    %c0_8 = arith.constant 0 : index
    %c0_9 = arith.constant 0 : index
    %9 = vector.load %arg5[%c0_8, %c0_9] : memref<72x8xbf16, #tpu.memory_space<vmem>>, vector<72x8xbf16>
    %cst_10 = arith.constant dense<0.000000e+00> : vector<256x8xf32>
    %10 = tpu.matmul %8, %9, %cst_10 {dimension_numbers = #tpu.dot_dimension_numbers<[1], [0], [0], [1], [0, 0, 1, 1], [], []>} : vector<256x72xbf16>, vector<72x8xbf16>, vector<256x8xf32> -> vector<256x8xf32>
    %c0_11 = arith.constant 0 : index
    %c0_12 = arith.constant 0 : index
    %11 = vector.load %arg6[%c0_11, %c0_12] : memref<1x8xf32, #tpu.memory_space<vmem>>, vector<1x8xf32>
    %12 = vector.broadcast %11 : vector<1x8xf32> to vector<256x8xf32>
    %13 = arith.addf %10, %12 : vector<256x8xf32>
    %cst_13 = arith.constant 0.000000e+00 : f32
    %14 = vector.broadcast %cst_13 : f32 to vector<256x8xf32>
    %15 = arith.maximumf %13, %14 : vector<256x8xf32>
    %16 = arith.truncf %7 : vector<256x8xf32> to vector<256x8xbf16>
    %c0_14 = arith.constant 0 : index
    %c0_15 = arith.constant 0 : index
    %17 = vector.load %arg7[%c0_14, %c0_15] : memref<8x8xbf16, #tpu.memory_space<vmem>>, vector<8x8xbf16>
    %cst_16 = arith.constant dense<0.000000e+00> : vector<256x8xf32>
    %18 = tpu.matmul %16, %17, %cst_16 {dimension_numbers = #tpu.dot_dimension_numbers<[1], [0], [0], [1], [0, 0, 1, 1], [], []>} : vector<256x8xbf16>, vector<8x8xbf16>, vector<256x8xf32> -> vector<256x8xf32>
    %19 = arith.truncf %15 : vector<256x8xf32> to vector<256x8xbf16>
    %c0_17 = arith.constant 0 : index
    %c0_18 = arith.constant 0 : index
    %20 = vector.load %arg8[%c0_17, %c0_18] : memref<8x8xbf16, #tpu.memory_space<vmem>>, vector<8x8xbf16>
    %cst_19 = arith.constant dense<0.000000e+00> : vector<256x8xf32>
    %21 = tpu.matmul %19, %20, %cst_19 {dimension_numbers = #tpu.dot_dimension_numbers<[1], [0], [0], [1], [0, 0, 1, 1], [], []>} : vector<256x8xbf16>, vector<8x8xbf16>, vector<256x8xf32> -> vector<256x8xf32>
    %22 = arith.addf %18, %21 : vector<256x8xf32>
    %c0_20 = arith.constant 0 : index
    %c0_21 = arith.constant 0 : index
    %23 = vector.load %arg9[%c0_20, %c0_21] : memref<1x8xf32, #tpu.memory_space<vmem>>, vector<1x8xf32>
    %24 = vector.broadcast %23 : vector<1x8xf32> to vector<256x8xf32>
    %25 = arith.addf %22, %24 : vector<256x8xf32>
    %cst_22 = arith.constant 0.000000e+00 : f32
    %26 = vector.broadcast %cst_22 : f32 to vector<256x8xf32>
    %27 = arith.maximumf %25, %26 : vector<256x8xf32>
    %28 = arith.truncf %27 : vector<256x8xf32> to vector<256x8xbf16>
    %c0_23 = arith.constant 0 : index
    %c0_24 = arith.constant 0 : index
    %29 = vector.load %arg10[%c0_23, %c0_24] : memref<256x8xbf16, #tpu.memory_space<vmem>>, vector<256x8xbf16>
    tpu.vector_store %arg10[%c0_23, %c0_24], %28 {strides = array<i32>} : memref<256x8xbf16, #tpu.memory_space<vmem>>, vector<256x8xbf16>,
    return
  }
  func.func @transform_0(%arg0: i32) -> (i32, i32) {
    %c0_i32 = arith.constant 0 : i32
    %c0_i32_0 = arith.constant 0 : i32
    return %arg0, %c0_i32 : i32, i32
  }
  func.func @transform_1(%arg0: i32) -> (i32, i32) {
    %c0_i32 = arith.constant 0 : i32
    %c0_i32_0 = arith.constant 0 : i32
    return %arg0, %c0_i32 : i32, i32
  }
  func.func @transform_2(%arg0: i32) -> (i32, i32) {
    %c0_i32 = arith.constant 0 : i32
    %c0_i32_0 = arith.constant 0 : i32
    %c0_i32_1 = arith.constant 0 : i32
    return %c0_i32, %c0_i32_0 : i32, i32
  }
  func.func @transform_3(%arg0: i32) -> (i32, i32) {
    %c0_i32 = arith.constant 0 : i32
    %c0_i32_0 = arith.constant 0 : i32
    %c0_i32_1 = arith.constant 0 : i32
    return %c0_i32, %c0_i32_0 : i32, i32
  }
  func.func @transform_4(%arg0: i32) -> (i32, i32) {
    %c0_i32 = arith.constant 0 : i32
    %c0_i32_0 = arith.constant 0 : i32
    %c0_i32_1 = arith.constant 0 : i32
    return %c0_i32, %c0_i32_0 : i32, i32
  }
  func.func @transform_5(%arg0: i32) -> (i32, i32) {
    %c0_i32 = arith.constant 0 : i32
    %c0_i32_0 = arith.constant 0 : i32
    %c0_i32_1 = arith.constant 0 : i32
    return %c0_i32, %c0_i32_0 : i32, i32
  }
  func.func @transform_6(%arg0: i32) -> (i32, i32) {
    %c0_i32 = arith.constant 0 : i32
    %c0_i32_0 = arith.constant 0 : i32
    %c0_i32_1 = arith.constant 0 : i32
    return %c0_i32, %c0_i32_0 : i32, i32
  }
  func.func @transform_7(%arg0: i32) -> (i32, i32) {
    %c0_i32 = arith.constant 0 : i32
    %c0_i32_0 = arith.constant 0 : i32
    %c0_i32_1 = arith.constant 0 : i32
    return %c0_i32, %c0_i32_0 : i32, i32
  }
  func.func @transform_8(%arg0: i32) -> (i32, i32) {
    %c0_i32 = arith.constant 0 : i32
    %c0_i32_0 = arith.constant 0 : i32
    %c0_i32_1 = arith.constant 0 : i32
    return %c0_i32, %c0_i32_0 : i32, i32
  }
  func.func @transform_9(%arg0: i32) -> (i32, i32) {
    %c0_i32 = arith.constant 0 : i32
    %c0_i32_0 = arith.constant 0 : i32
    return %arg0, %c0_i32 : i32, i32
  }
}

module attributes {stable_mosaic.version = 11 : i64} {
  func.func @_gemm_kernel(%arg0: i32, %arg1: i32, %arg2: memref<1x32x256xbf16, #tpu.memory_space<vmem>>, %arg3: memref<1x256x16xbf16, #tpu.memory_space<vmem>>, %arg4: memref<1x16xf32, #tpu.memory_space<vmem>>, %arg5: memref<1x32x16xbf16, #tpu.memory_space<vmem>>) attributes {dimension_semantics = [#tpu.dimension_semantics<parallel>, #tpu.dimension_semantics<parallel>], iteration_bounds = array<i64: 4, 1>, scalar_prefetch = 0 : i64, scratch_operands = 0 : i64, tpu.core_type = #tpu.core_type<tc>, window_params = [{transform_indices = @transform_0, window_bounds = array<i64: 1, 32, 256>}, {transform_indices = @transform_1, window_bounds = array<i64: 1, 256, 16>}, {pipeline_mode = #tpu.pipeline_mode<synchronous>, transform_indices = @transform_2, window_bounds = array<i64: 1, 16>}, {transform_indices = @transform_3, window_bounds = array<i64: 1, 32, 16>}]} {
    %c0 = arith.constant 0 : index
    %c0_0 = arith.constant 0 : index
    %c0_1 = arith.constant 0 : index
    %0 = vector.load %arg2[%c0, %c0_0, %c0_1] : memref<1x32x256xbf16, #tpu.memory_space<vmem>>, vector<1x32x256xbf16>
    %1 = vector.shape_cast %0 : vector<1x32x256xbf16> to vector<32x256xbf16>
    %c0_2 = arith.constant 0 : index
    %c0_3 = arith.constant 0 : index
    %c0_4 = arith.constant 0 : index
    %2 = vector.load %arg3[%c0_2, %c0_3, %c0_4] : memref<1x256x16xbf16, #tpu.memory_space<vmem>>, vector<1x256x16xbf16>
    %3 = vector.shape_cast %2 : vector<1x256x16xbf16> to vector<256x16xbf16>
    %cst = arith.constant dense<0.000000e+00> : vector<32x16xf32>
    %4 = tpu.matmul %1, %3, %cst {dimension_numbers = #tpu.dot_dimension_numbers<[1], [0], [0], [1], [0, 0, 1, 1], [], []>} : vector<32x256xbf16>, vector<256x16xbf16>, vector<32x16xf32> -> vector<32x16xf32>
    %c0_5 = arith.constant 0 : index
    %c0_6 = arith.constant 0 : index
    %5 = vector.load %arg4[%c0_5, %c0_6] : memref<1x16xf32, #tpu.memory_space<vmem>>, vector<1x16xf32>
    %6 = vector.broadcast %5 : vector<1x16xf32> to vector<32x16xf32>
    %7 = arith.addf %4, %6 : vector<32x16xf32>
    %cst_7 = arith.constant 0.000000e+00 : f32
    %8 = vector.broadcast %cst_7 : f32 to vector<32x16xf32>
    %9 = arith.maximumf %7, %8 : vector<32x16xf32>
    %10 = arith.truncf %9 : vector<32x16xf32> to vector<32x16xbf16>
    %c0_8 = arith.constant 0 : index
    %c0_9 = arith.constant 0 : index
    %c0_10 = arith.constant 0 : index
    %11 = vector.load %arg5[%c0_8, %c0_9, %c0_10] : memref<1x32x16xbf16, #tpu.memory_space<vmem>>, vector<1x32x16xbf16>
    %12 = vector.shape_cast %11 : vector<1x32x16xbf16> to vector<32x16xbf16>
    %13 = vector.shape_cast %10 : vector<32x16xbf16> to vector<1x32x16xbf16>
    tpu.vector_store %arg5[%c0_8, %c0_9, %c0_10], %13 {strides = array<i32>} : memref<1x32x16xbf16, #tpu.memory_space<vmem>>, vector<1x32x16xbf16>,
    return
  }
  func.func @transform_0(%arg0: i32, %arg1: i32) -> (i32, i32, i32) {
    %c0_i32 = arith.constant 0 : i32
    %c0_i32_0 = arith.constant 0 : i32
    return %arg0, %arg1, %c0_i32 : i32, i32, i32
  }
  func.func @transform_1(%arg0: i32, %arg1: i32) -> (i32, i32, i32) {
    %c0_i32 = arith.constant 0 : i32
    %c0_i32_0 = arith.constant 0 : i32
    %c0_i32_1 = arith.constant 0 : i32
    return %arg0, %c0_i32, %c0_i32_0 : i32, i32, i32
  }
  func.func @transform_2(%arg0: i32, %arg1: i32) -> (i32, i32) {
    %c0_i32 = arith.constant 0 : i32
    %c0_i32_0 = arith.constant 0 : i32
    %c0_i32_1 = arith.constant 0 : i32
    return %c0_i32, %c0_i32_0 : i32, i32
  }
  func.func @transform_3(%arg0: i32, %arg1: i32) -> (i32, i32, i32) {
    %c0_i32 = arith.constant 0 : i32
    %c0_i32_0 = arith.constant 0 : i32
    return %arg0, %arg1, %c0_i32 : i32, i32, i32
  }
}

module attributes {stable_mosaic.version = 11 : i64} {
  func.func @_gemm_kernel(%arg0: i32, %arg1: i32, %arg2: memref<1x128x128xbf16, #tpu.memory_space<vmem>>, %arg3: memref<1x128x8xbf16, #tpu.memory_space<vmem>>, %arg4: memref<1x8xf32, #tpu.memory_space<vmem>>, %arg5: memref<1x128x8xbf16, #tpu.memory_space<vmem>>) attributes {dimension_semantics = [#tpu.dimension_semantics<parallel>, #tpu.dimension_semantics<parallel>], iteration_bounds = array<i64: 4, 1>, scalar_prefetch = 0 : i64, scratch_operands = 0 : i64, tpu.core_type = #tpu.core_type<tc>, window_params = [{transform_indices = @transform_0, window_bounds = array<i64: 1, 128, 128>}, {transform_indices = @transform_1, window_bounds = array<i64: 1, 128, 8>}, {pipeline_mode = #tpu.pipeline_mode<synchronous>, transform_indices = @transform_2, window_bounds = array<i64: 1, 8>}, {transform_indices = @transform_3, window_bounds = array<i64: 1, 128, 8>}]} {
    %c0 = arith.constant 0 : index
    %c0_0 = arith.constant 0 : index
    %c0_1 = arith.constant 0 : index
    %0 = vector.load %arg2[%c0, %c0_0, %c0_1] : memref<1x128x128xbf16, #tpu.memory_space<vmem>>, vector<1x128x128xbf16>
    %1 = vector.shape_cast %0 : vector<1x128x128xbf16> to vector<128x128xbf16>
    %c0_2 = arith.constant 0 : index
    %c0_3 = arith.constant 0 : index
    %c0_4 = arith.constant 0 : index
    %2 = vector.load %arg3[%c0_2, %c0_3, %c0_4] : memref<1x128x8xbf16, #tpu.memory_space<vmem>>, vector<1x128x8xbf16>
    %3 = vector.shape_cast %2 : vector<1x128x8xbf16> to vector<128x8xbf16>
    %cst = arith.constant dense<0.000000e+00> : vector<128x8xf32>
    %4 = tpu.matmul %1, %3, %cst {dimension_numbers = #tpu.dot_dimension_numbers<[1], [0], [0], [1], [0, 0, 1, 1], [], []>} : vector<128x128xbf16>, vector<128x8xbf16>, vector<128x8xf32> -> vector<128x8xf32>
    %c0_5 = arith.constant 0 : index
    %c0_6 = arith.constant 0 : index
    %5 = vector.load %arg4[%c0_5, %c0_6] : memref<1x8xf32, #tpu.memory_space<vmem>>, vector<1x8xf32>
    %6 = vector.broadcast %5 : vector<1x8xf32> to vector<128x8xf32>
    %7 = arith.addf %4, %6 : vector<128x8xf32>
    %cst_7 = arith.constant 0.000000e+00 : f32
    %8 = vector.broadcast %cst_7 : f32 to vector<128x8xf32>
    %9 = arith.maximumf %7, %8 : vector<128x8xf32>
    %10 = arith.truncf %9 : vector<128x8xf32> to vector<128x8xbf16>
    %c0_8 = arith.constant 0 : index
    %c0_9 = arith.constant 0 : index
    %c0_10 = arith.constant 0 : index
    %11 = vector.load %arg5[%c0_8, %c0_9, %c0_10] : memref<1x128x8xbf16, #tpu.memory_space<vmem>>, vector<1x128x8xbf16>
    %12 = vector.shape_cast %11 : vector<1x128x8xbf16> to vector<128x8xbf16>
    %13 = vector.shape_cast %10 : vector<128x8xbf16> to vector<1x128x8xbf16>
    tpu.vector_store %arg5[%c0_8, %c0_9, %c0_10], %13 {strides = array<i32>} : memref<1x128x8xbf16, #tpu.memory_space<vmem>>, vector<1x128x8xbf16>,
    return
  }
  func.func @transform_0(%arg0: i32, %arg1: i32) -> (i32, i32, i32) {
    %c0_i32 = arith.constant 0 : i32
    %c0_i32_0 = arith.constant 0 : i32
    return %arg0, %arg1, %c0_i32 : i32, i32, i32
  }
  func.func @transform_1(%arg0: i32, %arg1: i32) -> (i32, i32, i32) {
    %c0_i32 = arith.constant 0 : i32
    %c0_i32_0 = arith.constant 0 : i32
    %c0_i32_1 = arith.constant 0 : i32
    return %arg0, %c0_i32, %c0_i32_0 : i32, i32, i32
  }
  func.func @transform_2(%arg0: i32, %arg1: i32) -> (i32, i32) {
    %c0_i32 = arith.constant 0 : i32
    %c0_i32_0 = arith.constant 0 : i32
    %c0_i32_1 = arith.constant 0 : i32
    return %c0_i32, %c0_i32_0 : i32, i32
  }
  func.func @transform_3(%arg0: i32, %arg1: i32) -> (i32, i32, i32) {
    %c0_i32 = arith.constant 0 : i32
    %c0_i32_0 = arith.constant 0 : i32
    return %arg0, %arg1, %c0_i32 : i32, i32, i32
  }
}

module attributes {stable_mosaic.version = 11 : i64} {
  func.func @_gemm_kernel(%arg0: i32, %arg1: i32, %arg2: memref<1x1024x8xbf16, #tpu.memory_space<vmem>>, %arg3: memref<1x8x4xbf16, #tpu.memory_space<vmem>>, %arg4: memref<1x4xf32, #tpu.memory_space<vmem>>, %arg5: memref<1x1024x4xbf16, #tpu.memory_space<vmem>>) attributes {dimension_semantics = [#tpu.dimension_semantics<parallel>, #tpu.dimension_semantics<parallel>], iteration_bounds = array<i64: 1, 2>, scalar_prefetch = 0 : i64, scratch_operands = 0 : i64, tpu.core_type = #tpu.core_type<tc>, window_params = [{transform_indices = @transform_0, window_bounds = array<i64: 1, 1024, 8>}, {transform_indices = @transform_1, window_bounds = array<i64: 1, 8, 4>}, {pipeline_mode = #tpu.pipeline_mode<synchronous>, transform_indices = @transform_2, window_bounds = array<i64: 1, 4>}, {transform_indices = @transform_3, window_bounds = array<i64: 1, 1024, 4>}]} {
    %c0 = arith.constant 0 : index
    %c0_0 = arith.constant 0 : index
    %c0_1 = arith.constant 0 : index
    %0 = vector.load %arg2[%c0, %c0_0, %c0_1] : memref<1x1024x8xbf16, #tpu.memory_space<vmem>>, vector<1x1024x8xbf16>
    %1 = vector.shape_cast %0 : vector<1x1024x8xbf16> to vector<1024x8xbf16>
    %c0_2 = arith.constant 0 : index
    %c0_3 = arith.constant 0 : index
    %c0_4 = arith.constant 0 : index
    %2 = vector.load %arg3[%c0_2, %c0_3, %c0_4] : memref<1x8x4xbf16, #tpu.memory_space<vmem>>, vector<1x8x4xbf16>
    %3 = vector.shape_cast %2 : vector<1x8x4xbf16> to vector<8x4xbf16>
    %cst = arith.constant dense<0.000000e+00> : vector<1024x4xf32>
    %4 = tpu.matmul %1, %3, %cst {dimension_numbers = #tpu.dot_dimension_numbers<[1], [0], [0], [1], [0, 0, 1, 1], [], []>} : vector<1024x8xbf16>, vector<8x4xbf16>, vector<1024x4xf32> -> vector<1024x4xf32>
    %c0_5 = arith.constant 0 : index
    %c0_6 = arith.constant 0 : index
    %5 = vector.load %arg4[%c0_5, %c0_6] : memref<1x4xf32, #tpu.memory_space<vmem>>, vector<1x4xf32>
    %6 = vector.broadcast %5 : vector<1x4xf32> to vector<1024x4xf32>
    %7 = arith.addf %4, %6 : vector<1024x4xf32>
    %cst_7 = arith.constant 0.000000e+00 : f32
    %8 = vector.broadcast %cst_7 : f32 to vector<1024x4xf32>
    %9 = arith.maximumf %7, %8 : vector<1024x4xf32>
    %10 = arith.truncf %9 : vector<1024x4xf32> to vector<1024x4xbf16>
    %c0_8 = arith.constant 0 : index
    %c0_9 = arith.constant 0 : index
    %c0_10 = arith.constant 0 : index
    %11 = vector.load %arg5[%c0_8, %c0_9, %c0_10] : memref<1x1024x4xbf16, #tpu.memory_space<vmem>>, vector<1x1024x4xbf16>
    %12 = vector.shape_cast %11 : vector<1x1024x4xbf16> to vector<1024x4xbf16>
    %13 = vector.shape_cast %10 : vector<1024x4xbf16> to vector<1x1024x4xbf16>
    tpu.vector_store %arg5[%c0_8, %c0_9, %c0_10], %13 {strides = array<i32>} : memref<1x1024x4xbf16, #tpu.memory_space<vmem>>, vector<1x1024x4xbf16>,
    return
  }
  func.func @transform_0(%arg0: i32, %arg1: i32) -> (i32, i32, i32) {
    %c0_i32 = arith.constant 0 : i32
    %c0_i32_0 = arith.constant 0 : i32
    return %arg0, %arg1, %c0_i32 : i32, i32, i32
  }
  func.func @transform_1(%arg0: i32, %arg1: i32) -> (i32, i32, i32) {
    %c0_i32 = arith.constant 0 : i32
    %c0_i32_0 = arith.constant 0 : i32
    %c0_i32_1 = arith.constant 0 : i32
    return %arg0, %c0_i32, %c0_i32_0 : i32, i32, i32
  }
  func.func @transform_2(%arg0: i32, %arg1: i32) -> (i32, i32) {
    %c0_i32 = arith.constant 0 : i32
    %c0_i32_0 = arith.constant 0 : i32
    %c0_i32_1 = arith.constant 0 : i32
    return %c0_i32, %c0_i32_0 : i32, i32
  }
  func.func @transform_3(%arg0: i32, %arg1: i32) -> (i32, i32, i32) {
    %c0_i32 = arith.constant 0 : i32
    %c0_i32_0 = arith.constant 0 : i32
    return %arg0, %arg1, %c0_i32 : i32, i32, i32
  }
}

module attributes {stable_mosaic.version = 11 : i64} {
  func.func @_gemm_kernel(%arg0: i32, %arg1: i32, %arg2: memref<1x512x64xbf16, #tpu.memory_space<vmem>>, %arg3: memref<1x64x4xbf16, #tpu.memory_space<vmem>>, %arg4: memref<1x4xf32, #tpu.memory_space<vmem>>, %arg5: memref<1x512x4xbf16, #tpu.memory_space<vmem>>) attributes {dimension_semantics = [#tpu.dimension_semantics<parallel>, #tpu.dimension_semantics<parallel>], iteration_bounds = array<i64: 4, 1>, scalar_prefetch = 0 : i64, scratch_operands = 0 : i64, tpu.core_type = #tpu.core_type<tc>, window_params = [{transform_indices = @transform_0, window_bounds = array<i64: 1, 512, 64>}, {transform_indices = @transform_1, window_bounds = array<i64: 1, 64, 4>}, {pipeline_mode = #tpu.pipeline_mode<synchronous>, transform_indices = @transform_2, window_bounds = array<i64: 1, 4>}, {transform_indices = @transform_3, window_bounds = array<i64: 1, 512, 4>}]} {
    %c0 = arith.constant 0 : index
    %c0_0 = arith.constant 0 : index
    %c0_1 = arith.constant 0 : index
    %0 = vector.load %arg2[%c0, %c0_0, %c0_1] : memref<1x512x64xbf16, #tpu.memory_space<vmem>>, vector<1x512x64xbf16>
    %1 = vector.shape_cast %0 : vector<1x512x64xbf16> to vector<512x64xbf16>
    %c0_2 = arith.constant 0 : index
    %c0_3 = arith.constant 0 : index
    %c0_4 = arith.constant 0 : index
    %2 = vector.load %arg3[%c0_2, %c0_3, %c0_4] : memref<1x64x4xbf16, #tpu.memory_space<vmem>>, vector<1x64x4xbf16>
    %3 = vector.shape_cast %2 : vector<1x64x4xbf16> to vector<64x4xbf16>
    %cst = arith.constant dense<0.000000e+00> : vector<512x4xf32>
    %4 = tpu.matmul %1, %3, %cst {dimension_numbers = #tpu.dot_dimension_numbers<[1], [0], [0], [1], [0, 0, 1, 1], [], []>} : vector<512x64xbf16>, vector<64x4xbf16>, vector<512x4xf32> -> vector<512x4xf32>
    %c0_5 = arith.constant 0 : index
    %c0_6 = arith.constant 0 : index
    %5 = vector.load %arg4[%c0_5, %c0_6] : memref<1x4xf32, #tpu.memory_space<vmem>>, vector<1x4xf32>
    %6 = vector.broadcast %5 : vector<1x4xf32> to vector<512x4xf32>
    %7 = arith.addf %4, %6 : vector<512x4xf32>
    %cst_7 = arith.constant 0.000000e+00 : f32
    %8 = vector.broadcast %cst_7 : f32 to vector<512x4xf32>
    %9 = arith.maximumf %7, %8 : vector<512x4xf32>
    %10 = arith.truncf %9 : vector<512x4xf32> to vector<512x4xbf16>
    %c0_8 = arith.constant 0 : index
    %c0_9 = arith.constant 0 : index
    %c0_10 = arith.constant 0 : index
    %11 = vector.load %arg5[%c0_8, %c0_9, %c0_10] : memref<1x512x4xbf16, #tpu.memory_space<vmem>>, vector<1x512x4xbf16>
    %12 = vector.shape_cast %11 : vector<1x512x4xbf16> to vector<512x4xbf16>
    %13 = vector.shape_cast %10 : vector<512x4xbf16> to vector<1x512x4xbf16>
    tpu.vector_store %arg5[%c0_8, %c0_9, %c0_10], %13 {strides = array<i32>} : memref<1x512x4xbf16, #tpu.memory_space<vmem>>, vector<1x512x4xbf16>,
    return
  }
  func.func @transform_0(%arg0: i32, %arg1: i32) -> (i32, i32, i32) {
    %c0_i32 = arith.constant 0 : i32
    %c0_i32_0 = arith.constant 0 : i32
    return %arg0, %arg1, %c0_i32 : i32, i32, i32
  }
  func.func @transform_1(%arg0: i32, %arg1: i32) -> (i32, i32, i32) {
    %c0_i32 = arith.constant 0 : i32
    %c0_i32_0 = arith.constant 0 : i32
    %c0_i32_1 = arith.constant 0 : i32
    return %arg0, %c0_i32, %c0_i32_0 : i32, i32, i32
  }
  func.func @transform_2(%arg0: i32, %arg1: i32) -> (i32, i32) {
    %c0_i32 = arith.constant 0 : i32
    %c0_i32_0 = arith.constant 0 : i32
    %c0_i32_1 = arith.constant 0 : i32
    return %c0_i32, %c0_i32_0 : i32, i32
  }
  func.func @transform_3(%arg0: i32, %arg1: i32) -> (i32, i32, i32) {
    %c0_i32 = arith.constant 0 : i32
    %c0_i32_0 = arith.constant 0 : i32
    return %arg0, %arg1, %c0_i32 : i32, i32, i32
  }
}

module attributes {stable_mosaic.version = 11 : i64} {
  func.func @_deconv_head_kernel(%arg0: i32, %arg1: i32, %arg2: memref<1x1024x32xbf16, #tpu.memory_space<vmem>>, %arg3: memref<1x32x2xbf16, #tpu.memory_space<vmem>>, %arg4: memref<1x2xf32, #tpu.memory_space<vmem>>, %arg5: memref<1x2xf32, #tpu.memory_space<vmem>>, %arg6: memref<1x1xf32, #tpu.memory_space<vmem>>, %arg7: memref<1x1024x1xf32, #tpu.memory_space<vmem>>) attributes {dimension_semantics = [#tpu.dimension_semantics<parallel>, #tpu.dimension_semantics<parallel>], iteration_bounds = array<i64: 4, 2>, scalar_prefetch = 0 : i64, scratch_operands = 0 : i64, tpu.core_type = #tpu.core_type<tc>, window_params = [{transform_indices = @transform_0, window_bounds = array<i64: 1, 1024, 32>}, {transform_indices = @transform_1, window_bounds = array<i64: 1, 32, 2>}, {pipeline_mode = #tpu.pipeline_mode<synchronous>, transform_indices = @transform_2, window_bounds = array<i64: 1, 2>}, {pipeline_mode = #tpu.pipeline_mode<synchronous>, transform_indices = @transform_3, window_bounds = array<i64: 1, 2>}, {pipeline_mode = #tpu.pipeline_mode<synchronous>, transform_indices = @transform_4, window_bounds = array<i64: 1, 1>}, {transform_indices = @transform_5, window_bounds = array<i64: 1, 1024, 1>}]} {
    %c0 = arith.constant 0 : index
    %c0_0 = arith.constant 0 : index
    %c0_1 = arith.constant 0 : index
    %0 = vector.load %arg2[%c0, %c0_0, %c0_1] : memref<1x1024x32xbf16, #tpu.memory_space<vmem>>, vector<1x1024x32xbf16>
    %1 = vector.shape_cast %0 : vector<1x1024x32xbf16> to vector<1024x32xbf16>
    %c0_2 = arith.constant 0 : index
    %c0_3 = arith.constant 0 : index
    %c0_4 = arith.constant 0 : index
    %2 = vector.load %arg3[%c0_2, %c0_3, %c0_4] : memref<1x32x2xbf16, #tpu.memory_space<vmem>>, vector<1x32x2xbf16>
    %3 = vector.shape_cast %2 : vector<1x32x2xbf16> to vector<32x2xbf16>
    %cst = arith.constant dense<0.000000e+00> : vector<1024x2xf32>
    %4 = tpu.matmul %1, %3, %cst {dimension_numbers = #tpu.dot_dimension_numbers<[1], [0], [0], [1], [0, 0, 1, 1], [], []>} : vector<1024x32xbf16>, vector<32x2xbf16>, vector<1024x2xf32> -> vector<1024x2xf32>
    %c0_5 = arith.constant 0 : index
    %c0_6 = arith.constant 0 : index
    %5 = vector.load %arg4[%c0_5, %c0_6] : memref<1x2xf32, #tpu.memory_space<vmem>>, vector<1x2xf32>
    %6 = vector.broadcast %5 : vector<1x2xf32> to vector<1024x2xf32>
    %7 = arith.addf %4, %6 : vector<1024x2xf32>
    %cst_7 = arith.constant 0.000000e+00 : f32
    %8 = vector.broadcast %cst_7 : f32 to vector<1024x2xf32>
    %9 = arith.maximumf %7, %8 : vector<1024x2xf32>
    %c0_8 = arith.constant 0 : index
    %c0_9 = arith.constant 0 : index
    %10 = vector.load %arg5[%c0_8, %c0_9] : memref<1x2xf32, #tpu.memory_space<vmem>>, vector<1x2xf32>
    %11 = vector.broadcast %10 : vector<1x2xf32> to vector<1024x2xf32>
    %12 = arith.mulf %9, %11 : vector<1024x2xf32>
    %cst_10 = arith.constant dense<0.000000e+00> : vector<1024xf32>
    %13 = vector.multi_reduction <add>, %12, %cst_10 [1] : vector<1024x2xf32> to vector<1024xf32>
    %14 = vector.shape_cast %13 : vector<1024xf32> to vector<1024x1xf32>
    %c0_11 = arith.constant 0 : index
    %c0_12 = arith.constant 0 : index
    %15 = vector.load %arg6[%c0_11, %c0_12] : memref<1x1xf32, #tpu.memory_space<vmem>>, vector<1x1xf32>
    %16 = vector.broadcast %15 : vector<1x1xf32> to vector<1024x1xf32>
    %17 = arith.addf %14, %16 : vector<1024x1xf32>
    %c0_13 = arith.constant 0 : index
    %c0_14 = arith.constant 0 : index
    %c0_15 = arith.constant 0 : index
    %18 = vector.load %arg7[%c0_13, %c0_14, %c0_15] : memref<1x1024x1xf32, #tpu.memory_space<vmem>>, vector<1x1024x1xf32>
    %19 = vector.shape_cast %18 : vector<1x1024x1xf32> to vector<1024x1xf32>
    %20 = vector.shape_cast %17 : vector<1024x1xf32> to vector<1x1024x1xf32>
    tpu.vector_store %arg7[%c0_13, %c0_14, %c0_15], %20 {strides = array<i32>} : memref<1x1024x1xf32, #tpu.memory_space<vmem>>, vector<1x1024x1xf32>,
    return
  }
  func.func @transform_0(%arg0: i32, %arg1: i32) -> (i32, i32, i32) {
    %c0_i32 = arith.constant 0 : i32
    %c0_i32_0 = arith.constant 0 : i32
    return %arg0, %arg1, %c0_i32 : i32, i32, i32
  }
  func.func @transform_1(%arg0: i32, %arg1: i32) -> (i32, i32, i32) {
    %c0_i32 = arith.constant 0 : i32
    %c0_i32_0 = arith.constant 0 : i32
    %c0_i32_1 = arith.constant 0 : i32
    return %arg0, %c0_i32, %c0_i32_0 : i32, i32, i32
  }
  func.func @transform_2(%arg0: i32, %arg1: i32) -> (i32, i32) {
    %c0_i32 = arith.constant 0 : i32
    %c0_i32_0 = arith.constant 0 : i32
    %c0_i32_1 = arith.constant 0 : i32
    return %c0_i32, %c0_i32_0 : i32, i32
  }
  func.func @transform_3(%arg0: i32, %arg1: i32) -> (i32, i32) {
    %c0_i32 = arith.constant 0 : i32
    %c0_i32_0 = arith.constant 0 : i32
    %c0_i32_1 = arith.constant 0 : i32
    return %c0_i32, %c0_i32_0 : i32, i32
  }
  func.func @transform_4(%arg0: i32, %arg1: i32) -> (i32, i32) {
    %c0_i32 = arith.constant 0 : i32
    %c0_i32_0 = arith.constant 0 : i32
    %c0_i32_1 = arith.constant 0 : i32
    return %c0_i32, %c0_i32_0 : i32, i32
  }
  func.func @transform_5(%arg0: i32, %arg1: i32) -> (i32, i32, i32) {
    %c0_i32 = arith.constant 0 : i32
    %c0_i32_0 = arith.constant 0 : i32
    return %arg0, %arg1, %c0_i32 : i32, i32, i32
  }
}

</mosaic_0001>

<bundles_post_ra>
// kernel: double_crossing_upsample.8
= control target key start
LH: loop header
LB: loop body
LE: loop exit
PB: predicated region body
PF: predicated region fallthrough
CT: control target
= control target key end

     0   :  { %14 = vsyncpa [#allocation3], 0  ;;  %s1325_s0 = inlined_call_operand.vmem [shape: bf16[32,16], index: 0, kind: input, shape index: {}]   ;;  %s1326_s1 = inlined_call_operand.vmem [shape: bf16[32,108], index: 1, kind: input, shape index: {}]   ;;  %s1327_s2 = inlined_call_operand.hbm [shape: bf16[16,12], index: 2, kind: input, shape index: {}]   ;;  %s1328_s3 = inlined_call_operand.hbm [shape: f32[1,12], index: 3, kind: input, shape index: {}]   ;;  %s1329_s4 = inlined_call_operand.vmem [shape: bf16[108,12], index: 4, kind: input, shape index: {}]   ;;  %s1330_s5 = inlined_call_operand.hbm [shape: f32[1,12], index: 5, kind: input, shape index: {}]   ;;  %s1331_s6 = inlined_call_operand.hbm [shape: bf16[12,32], index: 6, kind: input, shape index: {}]   ;;  %s1332_s7 = inlined_call_operand.hbm [shape: bf16[12,32], index: 7, kind: input, shape index: {}]   ;;  %s1333_s8 = inlined_call_operand.hbm [shape: f32[1,32], index: 8, kind: input, shape index: {}]   ;;  %s1334_s9 = inlined_call_operand.vmem [shape: bf16[32,32], index: 9, kind: output, shape index: {}]  }
   0x1   :  { %15 = vsyncpa [#allocation5], 0 }
   0x2   :  { %16 = vsyncpa [#allocation8], 0 }
   0x3   :  { %17 = vsyncpa [#allocation11], 0  ;;  %s1205_s30 = smov 0  }
   0x4 LB: > { %s279_s12 = sshll.u32 %s1328_s3, 4  ;;  %s780_s13 = sadd.s32 4294967295, %s1145_s30   ;;  %s1145_s30 = sphi %s1205_s30, %s23_s30   ;;  %s280_s12 = int_to_ptr.hbm [resolvable:$true] %s279_s12 }
   0x5   : > { %p782_p0 = scmp.ge.s32.totalorder %s1145_s30, 1  ;;  %p253_p1 = scmp.lt.s32.totalorder %s1145_s30, 3 }
   0x6   : > { %p1218_p2 = scmp.eq.s32.totalorder %s780_s13, 0  ;;  %s1147_s16 = smov [#allocation4]  }
   0x7   : > { %p1222_p3 = pnand %p782_p0, %p253_p1  ;;  %s281_s17 = sshll.u32 %s1147_s16, 4  ;;  %s282_s17 = int_to_ptr.vmem [resolvable:$true] %s281_s17 }
   0x8   : > { %s305_s20 = sshll.u32 %s1331_s6, 4  ;;  %s1148_s22 = smov [#allocation7]   ;;  %s306_s20 = int_to_ptr.hbm [resolvable:$true] %s305_s20 }
   0x9   : > { %p893_p4 = pneg %p1222_p3  ;;  %s307_s23 = sshll.u32 %s1148_s22, 4  ;;  %s308_s23 = int_to_ptr.vmem [resolvable:$true] %s307_s23 }
   0xa   : > { %s264_s26 = sshll.u32 %s1327_s2, 4  ;;  %s1149_s27 = smov 64   ;;  %s265_s26 = int_to_ptr.hbm [resolvable:$true] %s264_s26 }
   0xb   : > { %p1233_p5 = pnand %p1218_p2, %p893_p4  ;;  %s1150_s28 = smov 4  }
   0xc   : > { %s1151_s29 = smov [#allocation2]   ;;  %s294_s18 = sshll.u32 %s1330_s5, 4  ;;  %s295_s18 = int_to_ptr.hbm [resolvable:$true] %s294_s18 }
   0xd   : > { %899 = dma.hbm_to_vmem [thread:$0]  (!%p1233_p5), %s280_s12, 16, %s282_s17, [#allocation5]  }
   0xe   : > { %905 = dma.hbm_to_vmem [thread:$0]  (!%p1233_p5), %s306_s20, 128, %s308_s23, [#allocation8], %s1149_s27, %s1149_s27, %s1150_s28  }
   0xf   : > { %s266_s10 = sshll.u32 %s1151_s29, 4  ;;  %s319_s12 = sshll.u32 %s1332_s7, 4  ;;  %s267_s10 = int_to_ptr.vmem [resolvable:$true] %s266_s10  ;;  %s320_s12 = int_to_ptr.hbm [resolvable:$true] %s319_s12 }
  0x10   : > { %896 = dma.hbm_to_vmem [thread:$0]  (!%p1233_p5), %s265_s26, 128, %s267_s10, [#allocation3], %s1149_s27, %s1149_s27, %s1150_s28  }
  0x11   : > { %s1152_s17 = smov [#allocation6]   ;;  %s1153_s20 = smov [#allocation9]  }
  0x12   : > { %s296_s24 = sshll.u32 %s1152_s17, 4  ;;  %s321_s23 = sshll.u32 %s1153_s20, 4  ;;  %s297_s24 = int_to_ptr.vmem [resolvable:$true] %s296_s24  ;;  %s322_s23 = int_to_ptr.vmem [resolvable:$true] %s321_s23 }
  0x13   : > { %902 = dma.hbm_to_vmem [thread:$0]  (!%p1233_p5), %s295_s18, 16, %s297_s24, [#allocation5]  }
  0x14   : > { %s334_s11 = sshll.u32 %s1333_s8, 4  ;;  %s1154_s26 = smov [#allocation10]   ;;  %s335_s11 = int_to_ptr.hbm [resolvable:$true] %s334_s11 }
  0x15   : > { %908 = dma.hbm_to_vmem [thread:$0]  (!%p1233_p5), %s320_s12, 128, %s322_s23, [#allocation8], %s1149_s27, %s1149_s27, %s1150_s28  }
  0x16   : > { %s336_s10 = sshll.u32 %s1154_s26, 4  ;;  %367 = sbr.rel (%p1222_p3) target bundleno = 355 (0x163), region = 56  ;;  %s337_s10 = int_to_ptr.vmem [resolvable:$true] %s336_s10 }
  0x17   : > { %911 = dma.hbm_to_vmem [thread:$0]  (!%p1233_p5), %s335_s11, 16, %s337_s10, [#allocation11]  }
  0x1b   : > { %1128 = dma.done.wait (%p1218_p2), [#allocation3], 128  }
  0x1c   : > { %1130 = vsyncadd (%p1218_p2), [#allocation3], 4294967168 }
  0x1d   : > { %1132 = dma.done.wait (%p1218_p2), [#allocation5], 32  }
  0x1e   : > { %1134 = vsyncadd (%p1218_p2), [#allocation5], 4294967264 }
  0x1f   : > { %1136 = dma.done.wait (%p1218_p2), [#allocation8], 256  }
  0x20   : > { %1138 = vsyncadd (%p1218_p2), [#allocation8], 4294967040 }
  0x21   : > { %1140 = dma.done.wait (%p1218_p2), [#allocation11], 16  }
  0x22   : > { %1142 = vsyncadd (%p1218_p2), [#allocation11], 4294967280  ;;  %s797_s15 = sshll.u32 %s780_s13, 1  ;;  %v842_v0 = vld [vmem:[%s1329_s4 + $0x30] sm:$0xf]  ;;  %vm562_vm0 = vcmask 1045504  }
  0x23   : > { %p435_p6 = scmp.lt.s32.totalorder %s797_s15, 3  ;;  %v866_v1 = vld [vmem:[%s1329_s4 + $0x30] sm:$0x30]  ;;  %v858_v3 = vld [vmem:[#allocation2] sm:$0xff]  ;;  %vm472_vm1 = vcmask 130048   ;;  %v865_v6 = vld [vmem:[%s1329_s4 + $0x28] sm:$0xff] }
  0x24   : > { %v843_v2 = vor.u32 %v866_v1, %v842_v0  ;;  %483 = vmatpush.bf16.msra.mxu0 %v858_v3  ;;  %v864_v7 = vld [vmem:[%s1329_s4 + $0x20] sm:$0xff]  ;;  %v863_v8 = vld [vmem:[%s1329_s4 + $0x18] sm:$0xff]  ;;  %v862_v9 = vld [vmem:[%s1329_s4 + $0x10] sm:$0xff]  ;;  %vm558_vm2 = vcmask 883712   ;;  %vm593_vm3 = vcmask 97280   ;;  %vm649_vm4 = vcmask 257024  }
  0x25   : > { %s1339_s15 = smov (!%p435_p6, %s797_s15), 3  ;;  %v861_v10 = vld [vmem:[%s1329_s4 + $0x8] sm:$0xff]  ;;  %v860_v11 = vld [vmem:[%s1329_s4] sm:$0xff]  ;;  %v867_v14 = vld [vmem:[#allocation7] sm:$0x30] }
  0x26   : > { %s1281_s21 = sshll.u32 %s1339_s15, 2  ;;  %v564_v5 = vsel %vm562_vm0, %v843_v2, 0  ;;  %v852_v13 = vld [vmem:[#allocation7] sm:$0xf]  ;;  %v940_v18 = vld [vmem:[#allocation4] ss:$0 sm:$0xff] }
  0x27   : > { %s438_s16 = scalar_lea.vmem %s1325_s0, %s1281_s21  ;;  %567 = vmatpush.bf16.msra.mxu1 %v564_v5  ;;  %v853_v15 = vor.u32 %v867_v14, %v852_v13  ;;  %v847_v19 = vld [vmem:[#allocation9] sm:$0xf]  ;;  %v868_v20 = vld [vmem:[#allocation9] sm:$0x30]  ;;  %v941_v30 = vld [vmem:[#allocation6] ss:$0 sm:$0xff]  ;;  %s450_s22 = scalar_lea.vmem %s1334_s9, %s1281_s21 }
  0x28   : > { %v857_v4 = vld [vmem:[%s438_s16] sm:$0xff]  ;;  %s444_s16 = scalar_lea.vmem %s1326_s1, %s1281_s21  ;;  %v848_v21 = vor.u32 %v868_v20, %v847_v19  ;;  %v942_v38 = vld [vmem:[#allocation10] ss:$0 sm:$0xff] }
  0x29   : > { %811 = vmatmul.msk.bf16.vlgmr.msra.gmra.mxu0 %vm472_vm1, %v857_v4  ;;  %v859_v12 = vld [vmem:[%s444_s16] sm:$0xff]  ;;  %v623_v16 = vsel %vm562_vm0, %v853_v15, 0 }
  0x2a   : > { %632 = vmatpush.bf16.msra.mxu3 %v623_v16  ;;  %v598_v22 = vsel %vm562_vm0, %v848_v21, 0 }
  0x2b   : > { %568 = vmatpush.bf16.msra.mxu1 %v865_v6  ;;  %607 = vmatpush.bf16.msra.mxu2 %v598_v22 }
  0x2f   : > { %569 = vmatpush.bf16.msra.mxu1 %v864_v7 }
  0x33   : > { %570 = vmatpush.bf16.msra.mxu1 %v863_v8 }
  0x37   : > { %571 = vmatpush.bf16.msra.mxu1 %v862_v9 }
  0x3b   : > { %572 = vmatpush.bf16.msra.mxu1 %v861_v10 }
  0x3f   : > { %573 = vmatpush.bf16.msra.mxu1 %v860_v11 }
  0x42   : > { %844 = vmatmul.msk.bf16.vlgmr.msra.gmra.mxu1 %vm558_vm2, %v859_v12 }
  0xa6   : > { %v485_v17 = vpop.f32.mrf.mxu0 }
  0xa7   : > { %v486_v23 = vadd.f32 %v940_v18, %v485_v17 }
  0xa9   : > { %v490_v25 = vmax.f32 %v486_v23, 0.0 }
  0xae   : > { %v487_v24 = vpop.f32.mrf.mxu0 }
  0xaf   : > { %v488_v26 = vadd.f32 %v940_v18, %v487_v24 }
  0xb1   : > { %v491_v27 = vmax.f32 %v488_v26, 0.0 }
  0xb3   : > { %v582_v28 = vpack.c.bf16 %v491_v27, %v490_v25 }
  0xb5   : > { %854 = vmatmul.msk.bf16.vlgmr.msra.gmra.mxu3 %vm593_vm3, %v582_v28 }
  0xbf   : > { %v575_v29 = vpop.f32.mrf.mxu1 }
  0xc0   : > { %v576_v31 = vadd.f32 %v941_v30, %v575_v29 }
  0xc2   : > { %v580_v34 = vmax.f32 %v576_v31, 0.0 }
  0xc7   : > { %v577_v32 = vpop.f32.mrf.mxu1 }
  0xc8   : > { %v578_v33 = vadd.f32 %v941_v30, %v577_v32 }
  0xca   : > { %v581_v35 = vmax.f32 %v578_v33, 0.0 }
  0xcc   : > { %v585_v36 = vpack.c.bf16 %v581_v35, %v580_v34 }
  0xce   : > { %849 = vmatmul.msk.bf16.vlgmr.msra.gmra.mxu2 %vm593_vm3, %v585_v36 }
 0x138   : > { %v634_v37 = vpop.f32.mrf.mxu3 }
 0x140   : > { %v636_v44 = vpop.f32.mrf.mxu3 }
 0x151   : > { %v609_v39 = vpop.f32.mrf.mxu2 }
 0x152   : > { %v635_v40 = vadd.f32 %v634_v37, %v609_v39 }
 0x154   : > { %v643_v41 = vadd.f32 %v942_v38, %v635_v40 }
 0x156   : > { %v645_v42 = vmax.f32 %v643_v41, 0.0 }
 0x158   : > { %v647_v43 = vpack.c.bf16 %v645_v42, %v645_v42 }
 0x159   : > { %v611_v45 = vpop.f32.mrf.mxu2 }
 0x15a   : > { %650 = vst.msk [vmem:[%s450_s22] sm:$0xf] %vm649_vm4, %v647_v43  ;;  %v637_v46 = vadd.f32 %v636_v44, %v611_v45 }
 0x15c   : > { %v644_v47 = vadd.f32 %v942_v38, %v637_v46 }
 0x15e   : > { %v646_v48 = vmax.f32 %v644_v47, 0.0 }
 0x160   : > { %v648_v49 = vpack.c.bf16 %v646_v48, %v646_v48 }
 0x162   : > { %651 = vst.msk [vmem:[%s450_s22 + $0x4] sm:$0xf] %vm649_vm4, %v648_v49 }
 0x163 PF: > { %s23_s30 = sadd.s32 1, %s1145_s30  }
 0x164   : > { %p20_p7 = scmp.ge.s32.totalorder %s23_s30, 4  }
 0x166   :  { %22 = sbr.rel (!%p20_p7) target bundleno = 4 (0x4), region = 114 }
 0x16b   :  { %674 = vsyncpa [#allocation3], 1 }
 0x16c   :  { %676 = vsyncpa [#allocation3 + $0x1], 1 }
 0x16d   :  { %677 = vsyncpa [#allocation5], 1 }
 0x16e   :  { %678 = vsyncpa [#allocation8], 1 }
 0x16f   :  { %679 = vsyncpa [#allocation11], 1 }

// kernel: double_crossing_upsample.10
= control target key start
LH: loop header
LB: loop body
LE: loop exit
PB: predicated region body
PF: predicated region fallthrough
CT: control target
= control target key end

     0   :  { %s941_s30 = smov 0   ;;  %s1035_s0 = inlined_call_operand.vmem [shape: bf16[128,12], index: 0, kind: input, shape index: {}]   ;;  %s1036_s1 = inlined_call_operand.vmem [shape: bf16[128,72], index: 1, kind: input, shape index: {}]   ;;  %s1037_s2 = inlined_call_operand.vmem [shape: bf16[12,8], index: 2, kind: input, shape index: {}]   ;;  %s1038_s3 = inlined_call_operand.vmem [shape: f32[1,8], index: 3, kind: input, shape index: {}]   ;;  %s1039_s4 = inlined_call_operand.vmem [shape: bf16[72,8], index: 4, kind: input, shape index: {}]   ;;  %s1040_s5 = inlined_call_operand.vmem [shape: f32[1,8], index: 5, kind: input, shape index: {}]   ;;  %s1041_s6 = inlined_call_operand.vmem [shape: bf16[8,16], index: 6, kind: input, shape index: {}]   ;;  %s1042_s7 = inlined_call_operand.vmem [shape: bf16[8,16], index: 7, kind: input, shape index: {}]   ;;  %s1043_s8 = inlined_call_operand.vmem [shape: f32[1,16], index: 8, kind: input, shape index: {}]   ;;  %s1044_s9 = inlined_call_operand.vmem [shape: bf16[128,16], index: 9, kind: output, shape index: {}]  }
   0x1 LB: > { %s778_s10 = sadd.s32 4294967295, %s889_s30   ;;  %p782_p0 = scmp.ge.s32.totalorder %s889_s30, 1  ;;  %s889_s30 = sphi %s941_s30, %s19_s30  }
   0x2   : > { %p299_p1 = scmp.lt.s32.totalorder %s889_s30, 3 }
   0x4   : > { %p300_p2 = pnand %p782_p0, %p299_p1 }
   0x5   : > { %s783_s17 = sshll.u32 (!%p300_p2), %s778_s10, 3 }
   0x6   : > { %303 = sbr.rel (%p300_p2) target bundleno = 373 (0x175), region = 56  ;;  %p341_p3 = scmp.lt.s32.totalorder (!%p300_p2), %s783_s17, 15 }
   0xb   : > { %v468_v0 = vld [vmem:[%s1039_s4 + $0x20] sm:$0xf]  ;;  %v863_v3 = vld [vmem:[%s1037_s2] sm:$0x30]  ;;  %vm411_vm0 = vcmask 1045504   ;;  %vm533_vm1 = vcmask 1043456  }
   0xc   : > { %v807_v1 = vld [vmem:[%s1037_s2] sm:$0xf]  ;;  %v510_v2 = vunpack.c.l.b16 %v468_v0  ;;  %s1046_s17 = smov (!%p341_p3, %s783_s17), 15  ;;  %v871_v8 = vld [vmem:[%s1039_s4 + $0x18] sm:$0xff]  ;;  %vm398_vm2 = vcmask 97280   ;;  %v870_v10 = vld [vmem:[%s1039_s4 + $0x10] sm:$0xff] }
   0xd   : > { %v808_v4 = vor.u32 %v863_v3, %v807_v1  ;;  %s959_s18 = sshll.u32 %s1046_s17, 2  ;;  %v869_v11 = vld [vmem:[%s1039_s4 + $0x8] sm:$0xff]  ;;  %v868_v12 = vld [vmem:[%s1039_s4] sm:$0xff]  ;;  %vm520_vm3 = vcmask 588800   ;;  %vm584_vm4 = vcmask 64512   ;;  %vm701_vm5 = vcmask 125952  }
   0xe   : > { %v515_v5 = vpack.c.b16 %v510_v2, %v510_v2  ;;  %s344_s23 = scalar_lea.vmem %s1035_s0, %s959_s18  ;;  %s350_s12 = scalar_lea.vmem %s1036_s1, %s959_s18  ;;  %v578_v20 = vld [vmem:[%s1041_s6] sm:$0xf] }
   0xf   : > { %v413_v6 = vsel %vm411_vm0, %v808_v4, 0  ;;  %v859_v9 = vld [vmem:[%s344_s23] sm:$0xff]  ;;  %v860_v14 = vld [vmem:[%s344_s23 + $0x8] sm:$0xff]  ;;  %v861_v16 = vld [vmem:[%s344_s23 + $0x10] sm:$0xff]  ;;  %v642_v21 = vsel %vm533_vm1, %v578_v20, 0  ;;  %s1014_s26 = scalar_lea.vmem %s1044_s9, %s959_s18 }
  0x10   : > { %v535_v7 = vsel %vm533_vm1, %v515_v5, 0  ;;  %422 = vmatpush.bf16.msra.mxu0 %v413_v6  ;;  %v864_v13 = vld [vmem:[%s350_s12] sm:$0xff]  ;;  %v865_v15 = vld [vmem:[%s350_s12 + $0x8] sm:$0xff]  ;;  %v866_v17 = vld [vmem:[%s350_s12 + $0x10] sm:$0xff]  ;;  %651 = vmatpush.bf16.msra.mxu3 %v642_v21 }
  0x11   : > { %540 = vmatpush.bf16.msra.mxu1 %v535_v7  ;;  %v862_v18 = vld [vmem:[%s344_s23 + $0x18] sm:$0xff]  ;;  %v583_v22 = vld [vmem:[%s1042_s7] sm:$0xf] }
  0x12   : > { %v867_v19 = vld [vmem:[%s350_s12 + $0x18] sm:$0xff]  ;;  %v598_v23 = vsel %vm533_vm1, %v583_v22, 0  ;;  %v880_v25 = vld [vmem:[%s1038_s3] ss:$0 sm:$0xff] }
  0x13   : > { %809 = vmatmul.msk.bf16.vlgmr.msra.gmra.mxu0 %vm398_vm2, %v859_v9  ;;  %607 = vmatpush.bf16.msra.mxu2 %v598_v23  ;;  %v881_v34 = vld [vmem:[%s1040_s5] ss:$0 sm:$0xff] }
  0x14   : > { %v882_v20 = vld [vmem:[%s1043_s8] ss:$0 sm:$0xff] }
  0x15   : > { %541 = vmatpush.bf16.msra.mxu1 %v871_v8 }
  0x19   : > { %542 = vmatpush.bf16.msra.mxu1 %v870_v10 }
  0x1d   : > { %543 = vmatpush.bf16.msra.mxu1 %v869_v11 }
  0x21   : > { %544 = vmatpush.bf16.msra.mxu1 %v868_v12 }
  0x23   : > { %810 = vmatmul.msk.bf16.gmra.mxu0 %vm398_vm2, %v860_v14 }
  0x24   : > { %845 = vmatmul.msk.bf16.vlgmr.msra.gmra.mxu1 %vm520_vm3, %v864_v13 }
  0x33   : > { %811 = vmatmul.msk.bf16.gmra.mxu0 %vm398_vm2, %v861_v16 }
  0x34   : > { %846 = vmatmul.msk.bf16.gmra.mxu1 %vm520_vm3, %v865_v15 }
  0x43   : > { %812 = vmatmul.msk.bf16.gmra.mxu0 %vm398_vm2, %v862_v18 }
  0x44   : > { %847 = vmatmul.msk.bf16.gmra.mxu1 %vm520_vm3, %v866_v17 }
  0x54   : > { %848 = vmatmul.msk.bf16.gmra.mxu1 %vm520_vm3, %v867_v19 }
  0x90   : > { %v424_v24 = vpop.f32.mrf.mxu0 }
  0x91   : > { %v425_v26 = vadd.f32 %v880_v25, %v424_v24 }
  0x93   : > { %v444_v28 = vmax.f32 %v425_v26, 0.0 }
  0x98   : > { %v426_v27 = vpop.f32.mrf.mxu0 }
  0x99   : > { %v427_v29 = vadd.f32 %v880_v25, %v426_v27 }
  0x9b   : > { %v445_v30 = vmax.f32 %v427_v29, 0.0 }
  0x9d   : > { %v574_v31 = vpack.c.bf16 %v445_v30, %v444_v28 }
  0x9f   : > { %853 = vmatmul.msk.bf16.vlgmr.msra.gmra.mxu3 %vm584_vm4, %v574_v31 }
  0xa0   : > { %v429_v33 = vpop.f32.mrf.mxu0 }
  0xa1   : > { %v546_v32 = vpop.f32.mrf.mxu1  ;;  %v430_v35 = vadd.f32 %v880_v25, %v429_v33 }
  0xa2   : > { %v547_v36 = vadd.f32 %v881_v34, %v546_v32 }
  0xa3   : > { %v446_v40 = vmax.f32 %v430_v35, 0.0 }
  0xa4   : > { %v566_v42 = vmax.f32 %v547_v36, 0.0 }
  0xa8   : > { %v431_v39 = vpop.f32.mrf.mxu0 }
  0xa9   : > { %v548_v37 = vpop.f32.mrf.mxu1  ;;  %v432_v41 = vadd.f32 %v880_v25, %v431_v39 }
  0xaa   : > { %v549_v38 = vadd.f32 %v881_v34, %v548_v37 }
  0xab   : > { %v447_v44 = vmax.f32 %v432_v41, 0.0 }
  0xac   : > { %v567_v43 = vmax.f32 %v549_v38, 0.0 }
  0xad   : > { %v575_v46 = vpack.c.bf16 %v447_v44, %v446_v40 }
  0xae   : > { %v579_v45 = vpack.c.bf16 %v567_v43, %v566_v42 }
  0xaf   : > { %854 = vmatmul.msk.bf16.gmra.mxu3 %vm584_vm4, %v575_v46 }
  0xb0   : > { %849 = vmatmul.msk.bf16.vlgmr.msra.gmra.mxu2 %vm584_vm4, %v579_v45  ;;  %v434_v48 = vpop.f32.mrf.mxu0 }
  0xb1   : > { %v551_v47 = vpop.f32.mrf.mxu1  ;;  %v435_v49 = vadd.f32 %v880_v25, %v434_v48 }
  0xb2   : > { %v552_v50 = vadd.f32 %v881_v34, %v551_v47 }
  0xb3   : > { %v448_v54 = vmax.f32 %v435_v49, 0.0 }
  0xb4   : > { %v568_v56 = vmax.f32 %v552_v50, 0.0 }
  0xb8   : > { %v436_v53 = vpop.f32.mrf.mxu0 }
  0xb9   : > { %v553_v51 = vpop.f32.mrf.mxu1  ;;  %v437_v55 = vadd.f32 %v880_v25, %v436_v53 }
  0xba   : > { %v554_v52 = vadd.f32 %v881_v34, %v553_v51 }
  0xbb   : > { %v449_v58 = vmax.f32 %v437_v55, 0.0 }
  0xbc   : > { %v569_v57 = vmax.f32 %v554_v52, 0.0 }
  0xbd   : > { %v576_v60 = vpack.c.bf16 %v449_v58, %v448_v54 }
  0xbe   : > { %v580_v59 = vpack.c.bf16 %v569_v57, %v568_v56 }
  0xbf   : > { %855 = vmatmul.msk.bf16.gmra.mxu3 %vm584_vm4, %v576_v60 }
  0xc0   : > { %850 = vmatmul.msk.bf16.gmra.mxu2 %vm584_vm4, %v580_v59  ;;  %v439_v62 = vpop.f32.mrf.mxu0 }
  0xc1   : > { %v556_v61 = vpop.f32.mrf.mxu1  ;;  %v440_v63 = vadd.f32 %v880_v25, %v439_v62 }
  0xc2   : > { %v557_v0 = vadd.f32 %v881_v34, %v556_v61 }
  0xc3   : > { %v450_v4 = vmax.f32 %v440_v63, 0.0 }
  0xc4   : > { %v570_v6 = vmax.f32 %v557_v0, 0.0 }
  0xc8   : > { %v441_v3 = vpop.f32.mrf.mxu0 }
  0xc9   : > { %v558_v1 = vpop.f32.mrf.mxu1  ;;  %v442_v5 = vadd.f32 %v880_v25, %v441_v3 }
  0xca   : > { %v559_v2 = vadd.f32 %v881_v34, %v558_v1 }
  0xcb   : > { %v451_v8 = vmax.f32 %v442_v5, 0.0 }
  0xcc   : > { %v571_v7 = vmax.f32 %v559_v2, 0.0 }
  0xcd   : > { %v577_v10 = vpack.c.bf16 %v451_v8, %v450_v4 }
  0xce   : > { %v581_v9 = vpack.c.bf16 %v571_v7, %v570_v6 }
  0xcf   : > { %856 = vmatmul.msk.bf16.gmra.mxu3 %vm584_vm4, %v577_v10 }
  0xd0   : > { %851 = vmatmul.msk.bf16.gmra.mxu2 %vm584_vm4, %v581_v9 }
  0xd1   : > { %v561_v11 = vpop.f32.mrf.mxu1 }
  0xd2   : > { %v562_v12 = vadd.f32 %v881_v34, %v561_v11 }
  0xd4   : > { %v572_v15 = vmax.f32 %v562_v12, 0.0 }
  0xd9   : > { %v563_v13 = vpop.f32.mrf.mxu1 }
  0xda   : > { %v564_v14 = vadd.f32 %v881_v34, %v563_v13 }
  0xdc   : > { %v573_v16 = vmax.f32 %v564_v14, 0.0 }
  0xde   : > { %v582_v17 = vpack.c.bf16 %v573_v16, %v572_v15 }
  0xe0   : > { %852 = vmatmul.msk.bf16.gmra.mxu2 %vm584_vm4, %v582_v17 }
 0x122   : > { %v653_v18 = vpop.f32.mrf.mxu3 }
 0x12a   : > { %v655_v19 = vpop.f32.mrf.mxu3 }
 0x132   : > { %v658_v25 = vpop.f32.mrf.mxu3 }
 0x133   : > { %v609_v21 = vpop.f32.mrf.mxu2 }
 0x134   : > { %v654_v22 = vadd.f32 %v653_v18, %v609_v21 }
 0x136   : > { %v677_v23 = vadd.f32 %v882_v20, %v654_v22 }
 0x138   : > { %v685_v24 = vmax.f32 %v677_v23, 0.0 }
 0x13a   : > { %v693_v26 = vpack.c.bf16 %v685_v24, %v685_v24  ;;  %v660_v32 = vpop.f32.mrf.mxu3 }
 0x13b   : > { %v611_v27 = vpop.f32.mrf.mxu2 }
 0x13c   : > { %702 = vst.msk [vmem:[%s1014_s26] sm:$0xf] %vm701_vm5, %v693_v26  ;;  %v656_v28 = vadd.f32 %v655_v19, %v611_v27 }
 0x13e   : > { %v678_v29 = vadd.f32 %v882_v20, %v656_v28 }
 0x140   : > { %v686_v30 = vmax.f32 %v678_v29, 0.0 }
 0x142   : > { %v694_v31 = vpack.c.bf16 %v686_v30, %v686_v30  ;;  %v663_v40 = vpop.f32.mrf.mxu3 }
 0x143   : > { %v614_v33 = vpop.f32.mrf.mxu2 }
 0x144   : > { %703 = vst.msk [vmem:[%s1014_s26 + $0x4] sm:$0xf] %vm701_vm5, %v694_v31  ;;  %v659_v34 = vadd.f32 %v658_v25, %v614_v33 }
 0x146   : > { %v679_v35 = vadd.f32 %v882_v20, %v659_v34 }
 0x148   : > { %v687_v36 = vmax.f32 %v679_v35, 0.0 }
 0x14a   : > { %v695_v37 = vpack.c.bf16 %v687_v36, %v687_v36  ;;  %v665_v47 = vpop.f32.mrf.mxu3 }
 0x14b   : > { %v616_v38 = vpop.f32.mrf.mxu2 }
 0x14c   : > { %704 = vst.msk [vmem:[%s1014_s26 + $0x8] sm:$0xf] %vm701_vm5, %v695_v37  ;;  %v661_v39 = vadd.f32 %v660_v32, %v616_v38 }
 0x14e   : > { %v680_v41 = vadd.f32 %v882_v20, %v661_v39 }
 0x150   : > { %v688_v42 = vmax.f32 %v680_v41, 0.0 }
 0x152   : > { %v696_v43 = vpack.c.bf16 %v688_v42, %v688_v42  ;;  %v668_v54 = vpop.f32.mrf.mxu3 }
 0x153   : > { %v619_v44 = vpop.f32.mrf.mxu2 }
 0x154   : > { %705 = vst.msk [vmem:[%s1014_s26 + $0xc] sm:$0xf] %vm701_vm5, %v696_v43  ;;  %v664_v45 = vadd.f32 %v663_v40, %v619_v44 }
 0x156   : > { %v681_v46 = vadd.f32 %v882_v20, %v664_v45 }
 0x158   : > { %v689_v48 = vmax.f32 %v681_v46, 0.0 }
 0x15a   : > { %v697_v49 = vpack.c.bf16 %v689_v48, %v689_v48  ;;  %v670_v61 = vpop.f32.mrf.mxu3 }
 0x15b   : > { %v621_v50 = vpop.f32.mrf.mxu2 }
 0x15c   : > { %706 = vst.msk [vmem:[%s1014_s26 + $0x10] sm:$0xf] %vm701_vm5, %v697_v49  ;;  %v666_v51 = vadd.f32 %v665_v47, %v621_v50 }
 0x15e   : > { %v682_v52 = vadd.f32 %v882_v20, %v666_v51 }
 0x160   : > { %v690_v53 = vmax.f32 %v682_v52, 0.0 }
 0x162   : > { %v698_v55 = vpack.c.bf16 %v690_v53, %v690_v53 }
 0x163   : > { %v624_v56 = vpop.f32.mrf.mxu2 }
 0x164   : > { %707 = vst.msk [vmem:[%s1014_s26 + $0x14] sm:$0xf] %vm701_vm5, %v698_v55  ;;  %v669_v57 = vadd.f32 %v668_v54, %v624_v56 }
 0x166   : > { %v683_v58 = vadd.f32 %v882_v20, %v669_v57 }
 0x168   : > { %v691_v59 = vmax.f32 %v683_v58, 0.0 }
 0x16a   : > { %v699_v60 = vpack.c.bf16 %v691_v59, %v691_v59 }
 0x16b   : > { %v626_v62 = vpop.f32.mrf.mxu2 }
 0x16c   : > { %708 = vst.msk [vmem:[%s1014_s26 + $0x18] sm:$0xf] %vm701_vm5, %v699_v60  ;;  %v671_v63 = vadd.f32 %v670_v61, %v626_v62 }
 0x16e   : > { %v684_v0 = vadd.f32 %v882_v20, %v671_v63 }
 0x170   : > { %v692_v1 = vmax.f32 %v684_v0, 0.0 }
 0x172   : > { %v700_v2 = vpack.c.bf16 %v692_v1, %v692_v1 }
 0x174   : > { %709 = vst.msk [vmem:[%s1014_s26 + $0x1c] sm:$0xf] %vm701_vm5, %v700_v2 }
 0x175 PF: > { %s19_s30 = sadd.s32 1, %s889_s30  }
 0x176   : > { %p16_p4 = scmp.ge.s32.totalorder %s19_s30, 4  }
 0x178   :  { %18 = sbr.rel (!%p16_p4) target bundleno = 1 (0x1), region = 89 }

// kernel: double_crossing_upsample.12
= control target key start
LH: loop header
LB: loop body
LE: loop exit
PB: predicated region body
PF: predicated region fallthrough
CT: control target
= control target key end

     0   :  { %s1816_s30 = smov 0   ;;  %s2146_s0 = inlined_call_operand.vmem [shape: bf16[512,8], index: 0, kind: input, shape index: {}]   ;;  %s2147_s1 = inlined_call_operand.vmem [shape: bf16[512,72], index: 1, kind: input, shape index: {}]   ;;  %s2148_s2 = inlined_call_operand.vmem [shape: bf16[8,8], index: 2, kind: input, shape index: {}]   ;;  %s2149_s3 = inlined_call_operand.vmem [shape: f32[1,8], index: 3, kind: input, shape index: {}]   ;;  %s2150_s4 = inlined_call_operand.vmem [shape: bf16[72,8], index: 4, kind: input, shape index: {}]   ;;  %s2151_s5 = inlined_call_operand.vmem [shape: f32[1,8], index: 5, kind: input, shape index: {}]   ;;  %s2152_s6 = inlined_call_operand.vmem [shape: bf16[8,8], index: 6, kind: input, shape index: {}]   ;;  %s2153_s7 = inlined_call_operand.vmem [shape: bf16[8,8], index: 7, kind: input, shape index: {}]   ;;  %s2154_s8 = inlined_call_operand.vmem [shape: f32[1,8], index: 8, kind: input, shape index: {}]   ;;  %s2155_s9 = inlined_call_operand.vmem [shape: bf16[512,8], index: 9, kind: output, shape index: {}]  }
   0x1 LB: > { %s1490_s10 = sadd.s32 4294967295, %s1764_s30   ;;  %p1494_p0 = scmp.ge.s32.totalorder %s1764_s30, 1  ;;  %s1764_s30 = sphi %s1816_s30, %s19_s30  }
   0x2   : > { %p299_p1 = scmp.lt.s32.totalorder %s1764_s30, 3 }
   0x4   : > { %p300_p2 = pnand %p1494_p0, %p299_p1 }
   0x5   : > { %s1495_s15 = sshll.u32 (!%p300_p2), %s1490_s10, 5 }
   0x6   : > { %303 = sbr.rel (%p300_p2) target bundleno = 565 (0x235), region = 56  ;;  %p341_p3 = scmp.lt.s32.totalorder (!%p300_p2), %s1495_s15, 63 }
   0xb   : > { %vm525_vm0 = vcmask 1043456   ;;  %v690_v0 = vld [vmem:[%s2150_s4 + $0x20] sm:$0xf]  ;;  %s2157_s15 = smov (!%p341_p3, %s1495_s15), 63  ;;  %vm476_vm1 = vcmask 64512   ;;  %v1746_v6 = vld [vmem:[%s2150_s4 + $0x18] sm:$0xff] }
   0xc   : > { %v391_v1 = vld [vmem:[%s2148_s2] sm:$0xf]  ;;  %v792_v2 = vunpack.c.l.b16 %v690_v0  ;;  %s1832_s16 = sshll.u32 %s2157_s15, 2  ;;  %v1745_v8 = vld [vmem:[%s2150_s4 + $0x10] sm:$0xff]  ;;  %v1744_v9 = vld [vmem:[%s2150_s4 + $0x8] sm:$0xff]  ;;  %vm802_vm2 = vcmask 588800  }
   0xd   : > { %v527_v3 = vsel %vm525_vm0, %v391_v1, 0  ;;  %s1838_s19 = scalar_lea.vmem %s2146_s0, %s1832_s16  ;;  %v1743_v10 = vld [vmem:[%s2150_s4] sm:$0xff]  ;;  %s1858_s10 = scalar_lea.vmem %s2147_s1, %s1832_s16  ;;  %vm1389_vm3 = vcmask 60416  }
   0xe   : > { %536 = vmatpush.bf16.msra.mxu0 %v527_v3  ;;  %v797_v4 = vpack.c.b16 %v792_v2, %v792_v2  ;;  %v1711_v7 = vld [vmem:[%s1838_s19] sm:$0xff]  ;;  %v1712_v12 = vld [vmem:[%s1838_s19 + $0x8] sm:$0xff]  ;;  %v1713_v14 = vld [vmem:[%s1838_s19 + $0x10] sm:$0xff]  ;;  %s2009_s24 = scalar_lea.vmem %s2155_s9, %s1832_s16 }
   0xf   : > { %v1727_v11 = vld [vmem:[%s1858_s10] sm:$0xff]  ;;  %v1728_v13 = vld [vmem:[%s1858_s10 + $0x8] sm:$0xff]  ;;  %v1729_v15 = vld [vmem:[%s1858_s10 + $0x10] sm:$0xff] }
  0x10   : > { %v852_v5 = vsel %vm525_vm0, %v797_v4, 0  ;;  %v1714_v16 = vld [vmem:[%s1838_s19 + $0x18] sm:$0xff]  ;;  %v1715_v18 = vld [vmem:[%s1838_s19 + $0x20] sm:$0xff]  ;;  %v1716_v20 = vld [vmem:[%s1838_s19 + $0x28] sm:$0xff] }
  0x11   : > { %857 = vmatpush.bf16.msra.mxu1 %v852_v5  ;;  %1565 = vmatmul.msk.bf16.vlgmr.msra.gmra.mxu0 %vm476_vm1, %v1711_v7  ;;  %v1730_v17 = vld [vmem:[%s1858_s10 + $0x18] sm:$0xff]  ;;  %v1731_v19 = vld [vmem:[%s1858_s10 + $0x20] sm:$0xff]  ;;  %v1732_v21 = vld [vmem:[%s1858_s10 + $0x28] sm:$0xff] }
  0x12   : > { %v1717_v22 = vld [vmem:[%s1838_s19 + $0x30] sm:$0xff]  ;;  %v991_v23 = vld [vmem:[%s2152_s6] sm:$0xf]  ;;  %v1718_v26 = vld [vmem:[%s1838_s19 + $0x38] sm:$0xff] }
  0x13   : > { %v1198_v24 = vsel %vm525_vm0, %v991_v23, 0  ;;  %v1733_v25 = vld [vmem:[%s1858_s10 + $0x30] sm:$0xff]  ;;  %v1008_v27 = vld [vmem:[%s2153_s7] sm:$0xf]  ;;  %v1734_v29 = vld [vmem:[%s1858_s10 + $0x38] sm:$0xff] }
  0x14   : > { %1207 = vmatpush.bf16.msra.mxu3 %v1198_v24  ;;  %v1058_v28 = vsel %vm525_vm0, %v1008_v27, 0  ;;  %v1719_v30 = vld [vmem:[%s1838_s19 + $0x40] sm:$0xff]  ;;  %v1720_v40 = vld [vmem:[%s1838_s19 + $0x48] sm:$0xff]  ;;  %v1721_v57 = vld [vmem:[%s1838_s19 + $0x50] sm:$0xff] }
  0x15   : > { %858 = vmatpush.bf16.msra.mxu1 %v1746_v6  ;;  %1067 = vmatpush.bf16.msra.mxu2 %v1058_v28  ;;  %v1901_v32 = vld [vmem:[%s2149_s3] ss:$0 sm:$0xff]  ;;  %v1736_v56 = vld [vmem:[%s1858_s10 + $0x48] sm:$0xff]  ;;  %v1738_v24 = vld [vmem:[%s1858_s10 + $0x58] sm:$0xff] }
  0x16   : > { %v1735_v39 = vld [vmem:[%s1858_s10 + $0x40] sm:$0xff] }
  0x17   : > { %v1913_v43 = vld [vmem:[%s2151_s5] ss:$0 sm:$0xff] }
  0x19   : > { %859 = vmatpush.bf16.msra.mxu1 %v1745_v8  ;;  %v1737_v8 = vld [vmem:[%s1858_s10 + $0x50] sm:$0xff] }
  0x1d   : > { %860 = vmatpush.bf16.msra.mxu1 %v1744_v9  ;;  %v1722_v9 = vld [vmem:[%s1838_s19 + $0x58] sm:$0xff] }
  0x21   : > { %861 = vmatpush.bf16.msra.mxu1 %v1743_v10  ;;  %1566 = vmatmul.msk.bf16.gmra.mxu0 %vm476_vm1, %v1712_v12 }
  0x24   : > { %1661 = vmatmul.msk.bf16.vlgmr.msra.gmra.mxu1 %vm802_vm2, %v1727_v11 }
  0x31   : > { %1567 = vmatmul.msk.bf16.gmra.mxu0 %vm476_vm1, %v1713_v14 }
  0x34   : > { %1662 = vmatmul.msk.bf16.gmra.mxu1 %vm802_vm2, %v1728_v13 }
  0x41   : > { %1568 = vmatmul.msk.bf16.gmra.mxu0 %vm476_vm1, %v1714_v16 }
  0x44   : > { %1663 = vmatmul.msk.bf16.gmra.mxu1 %vm802_vm2, %v1729_v15 }
  0x51   : > { %1569 = vmatmul.msk.bf16.gmra.mxu0 %vm476_vm1, %v1715_v18 }
  0x54   : > { %1664 = vmatmul.msk.bf16.gmra.mxu1 %vm802_vm2, %v1730_v17 }
  0x61   : > { %1570 = vmatmul.msk.bf16.gmra.mxu0 %vm476_vm1, %v1716_v20 }
  0x64   : > { %1665 = vmatmul.msk.bf16.gmra.mxu1 %vm802_vm2, %v1731_v19 }
  0x71   : > { %1571 = vmatmul.msk.bf16.gmra.mxu0 %vm476_vm1, %v1717_v22 }
  0x74   : > { %1666 = vmatmul.msk.bf16.gmra.mxu1 %vm802_vm2, %v1732_v21 }
  0x81   : > { %1572 = vmatmul.msk.bf16.gmra.mxu0 %vm476_vm1, %v1718_v26 }
  0x84   : > { %1667 = vmatmul.msk.bf16.gmra.mxu1 %vm802_vm2, %v1733_v25  ;;  %v1723_v25 = vld [vmem:[%s1838_s19 + $0x60] sm:$0xff] }
  0x8e   : > { %v538_v31 = vpop.f32.mrf.mxu0 }
  0x8f   : > { %v539_v33 = vadd.f32 %v1901_v32, %v538_v31 }
  0x91   : > { %1573 = vmatmul.msk.bf16.gmra.mxu0 %vm476_vm1, %v1719_v30  ;;  %v618_v35 = vmax.f32 %v539_v33, 0.0 }
  0x94   : > { %1668 = vmatmul.msk.bf16.gmra.mxu1 %vm802_vm2, %v1734_v29 }
  0x96   : > { %v540_v34 = vpop.f32.mrf.mxu0 }
  0x97   : > { %v541_v36 = vadd.f32 %v1901_v32, %v540_v34 }
  0x99   : > { %v619_v37 = vmax.f32 %v541_v36, 0.0 }
  0x9b   : > { %v975_v38 = vpack.c.bf16 %v619_v37, %v618_v35 }
  0x9d   : > { %1693 = vmatmul.msk.bf16.vlgmr.msra.gmra.mxu3 %vm476_vm1, %v975_v38 }
  0x9e   : > { %v543_v42 = vpop.f32.mrf.mxu0 }
  0x9f   : > { %v544_v44 = vadd.f32 %v1901_v32, %v543_v42  ;;  %v1724_v42 = vld [vmem:[%s1838_s19 + $0x68] sm:$0xff] }
  0xa1   : > { %v863_v41 = vpop.f32.mrf.mxu1  ;;  %1574 = vmatmul.msk.bf16.gmra.mxu0 %vm476_vm1, %v1720_v40  ;;  %v620_v48 = vmax.f32 %v544_v44, 0.0 }
  0xa2   : > { %v864_v45 = vadd.f32 %v1913_v43, %v863_v41  ;;  %v1739_v41 = vld [vmem:[%s1858_s10 + $0x60] sm:$0xff] }
  0xa4   : > { %1669 = vmatmul.msk.bf16.gmra.mxu1 %vm802_vm2, %v1735_v39  ;;  %v943_v51 = vmax.f32 %v864_v45, 0.0 }
  0xa6   : > { %v545_v47 = vpop.f32.mrf.mxu0 }
  0xa7   : > { %v546_v50 = vadd.f32 %v1901_v32, %v545_v47 }
  0xa9   : > { %v865_v46 = vpop.f32.mrf.mxu1  ;;  %v621_v53 = vmax.f32 %v546_v50, 0.0 }
  0xaa   : > { %v866_v49 = vadd.f32 %v1913_v43, %v865_v46 }
  0xab   : > { %v976_v55 = vpack.c.bf16 %v621_v53, %v620_v48 }
  0xac   : > { %v944_v52 = vmax.f32 %v866_v49, 0.0 }
  0xad   : > { %1694 = vmatmul.msk.bf16.gmra.mxu3 %vm476_vm1, %v976_v55 }
  0xae   : > { %v992_v54 = vpack.c.bf16 %v944_v52, %v943_v51  ;;  %v548_v59 = vpop.f32.mrf.mxu0 }
  0xaf   : > { %v549_v60 = vadd.f32 %v1901_v32, %v548_v59  ;;  %v1725_v59 = vld [vmem:[%s1838_s19 + $0x70] sm:$0xff] }
  0xb0   : > { %1677 = vmatmul.msk.bf16.vlgmr.msra.gmra.mxu2 %vm476_vm1, %v992_v54 }
  0xb1   : > { %v868_v58 = vpop.f32.mrf.mxu1  ;;  %1575 = vmatmul.msk.bf16.gmra.mxu0 %vm476_vm1, %v1721_v57  ;;  %v622_v0 = vmax.f32 %v549_v60, 0.0 }
  0xb2   : > { %v869_v61 = vadd.f32 %v1913_v43, %v868_v58  ;;  %v1740_v58 = vld [vmem:[%s1858_s10 + $0x68] sm:$0xff] }
  0xb4   : > { %1670 = vmatmul.msk.bf16.gmra.mxu1 %vm802_vm2, %v1736_v56  ;;  %v945_v3 = vmax.f32 %v869_v61, 0.0 }
  0xb6   : > { %v550_v63 = vpop.f32.mrf.mxu0 }
  0xb7   : > { %v551_v2 = vadd.f32 %v1901_v32, %v550_v63 }
  0xb9   : > { %v870_v62 = vpop.f32.mrf.mxu1  ;;  %v623_v5 = vmax.f32 %v551_v2, 0.0 }
  0xba   : > { %v871_v1 = vadd.f32 %v1913_v43, %v870_v62 }
  0xbb   : > { %v977_v7 = vpack.c.bf16 %v623_v5, %v622_v0 }
  0xbc   : > { %v946_v4 = vmax.f32 %v871_v1, 0.0 }
  0xbd   : > { %1695 = vmatmul.msk.bf16.gmra.mxu3 %vm476_vm1, %v977_v7 }
  0xbe   : > { %v993_v6 = vpack.c.bf16 %v946_v4, %v945_v3  ;;  %v553_v11 = vpop.f32.mrf.mxu0 }
  0xbf   : > { %v554_v12 = vadd.f32 %v1901_v32, %v553_v11  ;;  %v1726_v11 = vld [vmem:[%s1838_s19 + $0x78] sm:$0xff] }
  0xc0   : > { %1678 = vmatmul.msk.bf16.gmra.mxu2 %vm476_vm1, %v993_v6 }
  0xc1   : > { %v873_v10 = vpop.f32.mrf.mxu1  ;;  %1576 = vmatmul.msk.bf16.gmra.mxu0 %vm476_vm1, %v1722_v9  ;;  %v624_v16 = vmax.f32 %v554_v12, 0.0 }
  0xc2   : > { %v874_v13 = vadd.f32 %v1913_v43, %v873_v10  ;;  %v1741_v10 = vld [vmem:[%s1858_s10 + $0x70] sm:$0xff] }
  0xc4   : > { %1671 = vmatmul.msk.bf16.gmra.mxu1 %vm802_vm2, %v1737_v8  ;;  %v947_v19 = vmax.f32 %v874_v13, 0.0 }
  0xc6   : > { %v555_v15 = vpop.f32.mrf.mxu0 }
  0xc7   : > { %v556_v18 = vadd.f32 %v1901_v32, %v555_v15 }
  0xc9   : > { %v875_v14 = vpop.f32.mrf.mxu1  ;;  %v625_v21 = vmax.f32 %v556_v18, 0.0 }
  0xca   : > { %v876_v17 = vadd.f32 %v1913_v43, %v875_v14 }
  0xcb   : > { %v978_v23 = vpack.c.bf16 %v625_v21, %v624_v16 }
  0xcc   : > { %v948_v20 = vmax.f32 %v876_v17, 0.0 }
  0xcd   : > { %1696 = vmatmul.msk.bf16.gmra.mxu3 %vm476_vm1, %v978_v23 }
  0xce   : > { %v994_v22 = vpack.c.bf16 %v948_v20, %v947_v19  ;;  %v558_v27 = vpop.f32.mrf.mxu0 }
  0xcf   : > { %v559_v28 = vadd.f32 %v1901_v32, %v558_v27 }
  0xd0   : > { %1679 = vmatmul.msk.bf16.gmra.mxu2 %vm476_vm1, %v994_v22 }
  0xd1   : > { %v878_v26 = vpop.f32.mrf.mxu1  ;;  %1577 = vmatmul.msk.bf16.gmra.mxu0 %vm476_vm1, %v1723_v25  ;;  %v626_v33 = vmax.f32 %v559_v28, 0.0 }
  0xd2   : > { %v879_v29 = vadd.f32 %v1913_v43, %v878_v26  ;;  %v1742_v26 = vld [vmem:[%s1858_s10 + $0x78] sm:$0xff] }
  0xd4   : > { %1672 = vmatmul.msk.bf16.gmra.mxu1 %vm802_vm2, %v1738_v24  ;;  %v949_v36 = vmax.f32 %v879_v29, 0.0 }
  0xd6   : > { %v560_v31 = vpop.f32.mrf.mxu0 }
  0xd7   : > { %v561_v35 = vadd.f32 %v1901_v32, %v560_v31 }
  0xd9   : > { %v880_v30 = vpop.f32.mrf.mxu1  ;;  %v627_v38 = vmax.f32 %v561_v35, 0.0 }
  0xda   : > { %v881_v34 = vadd.f32 %v1913_v43, %v880_v30 }
  0xdb   : > { %v979_v39 = vpack.c.bf16 %v627_v38, %v626_v33 }
  0xdc   : > { %v950_v37 = vmax.f32 %v881_v34, 0.0 }
  0xdd   : > { %1697 = vmatmul.msk.bf16.gmra.mxu3 %vm476_vm1, %v979_v39 }
  0xde   : > { %v995_v40 = vpack.c.bf16 %v950_v37, %v949_v36  ;;  %v563_v45 = vpop.f32.mrf.mxu0 }
  0xdf   : > { %v564_v46 = vadd.f32 %v1901_v32, %v563_v45 }
  0xe0   : > { %1680 = vmatmul.msk.bf16.gmra.mxu2 %vm476_vm1, %v995_v40 }
  0xe1   : > { %v883_v44 = vpop.f32.mrf.mxu1  ;;  %1578 = vmatmul.msk.bf16.gmra.mxu0 %vm476_vm1, %v1724_v42  ;;  %v628_v50 = vmax.f32 %v564_v46, 0.0 }
  0xe2   : > { %v884_v47 = vadd.f32 %v1913_v43, %v883_v44 }
  0xe4   : > { %1673 = vmatmul.msk.bf16.gmra.mxu1 %vm802_vm2, %v1739_v41  ;;  %v951_v53 = vmax.f32 %v884_v47, 0.0 }
  0xe6   : > { %v565_v49 = vpop.f32.mrf.mxu0 }
  0xe7   : > { %v566_v52 = vadd.f32 %v1901_v32, %v565_v49 }
  0xe9   : > { %v885_v48 = vpop.f32.mrf.mxu1  ;;  %v629_v55 = vmax.f32 %v566_v52, 0.0 }
  0xea   : > { %v886_v51 = vadd.f32 %v1913_v43, %v885_v48 }
  0xeb   : > { %v980_v57 = vpack.c.bf16 %v629_v55, %v628_v50 }
  0xec   : > { %v952_v54 = vmax.f32 %v886_v51, 0.0 }
  0xed   : > { %1698 = vmatmul.msk.bf16.gmra.mxu3 %vm476_vm1, %v980_v57 }
  0xee   : > { %v996_v56 = vpack.c.bf16 %v952_v54, %v951_v53  ;;  %v568_v61 = vpop.f32.mrf.mxu0 }
  0xef   : > { %v569_v62 = vadd.f32 %v1901_v32, %v568_v61  ;;  %v2000_v61 = vld [vmem:[%s2154_s8] ss:$0 sm:$0xff] }
  0xf0   : > { %1681 = vmatmul.msk.bf16.gmra.mxu2 %vm476_vm1, %v996_v56 }
  0xf1   : > { %v888_v60 = vpop.f32.mrf.mxu1  ;;  %1579 = vmatmul.msk.bf16.gmra.mxu0 %vm476_vm1, %v1725_v59  ;;  %v630_v2 = vmax.f32 %v569_v62, 0.0 }
  0xf2   : > { %v889_v63 = vadd.f32 %v1913_v43, %v888_v60 }
  0xf4   : > { %1674 = vmatmul.msk.bf16.gmra.mxu1 %vm802_vm2, %v1740_v58  ;;  %v953_v5 = vmax.f32 %v889_v63, 0.0 }
  0xf6   : > { %v570_v1 = vpop.f32.mrf.mxu0 }
  0xf7   : > { %v571_v4 = vadd.f32 %v1901_v32, %v570_v1 }
  0xf9   : > { %v890_v0 = vpop.f32.mrf.mxu1  ;;  %v631_v7 = vmax.f32 %v571_v4, 0.0 }
  0xfa   : > { %v891_v3 = vadd.f32 %v1913_v43, %v890_v0 }
  0xfb   : > { %v981_v9 = vpack.c.bf16 %v631_v7, %v630_v2 }
  0xfc   : > { %v954_v6 = vmax.f32 %v891_v3, 0.0 }
  0xfd   : > { %1699 = vmatmul.msk.bf16.gmra.mxu3 %vm476_vm1, %v981_v9 }
  0xfe   : > { %v997_v8 = vpack.c.bf16 %v954_v6, %v953_v5  ;;  %v573_v13 = vpop.f32.mrf.mxu0 }
  0xff   : > { %v574_v14 = vadd.f32 %v1901_v32, %v573_v13 }
 0x100   : > { %1682 = vmatmul.msk.bf16.gmra.mxu2 %vm476_vm1, %v997_v8 }
 0x101   : > { %v893_v12 = vpop.f32.mrf.mxu1  ;;  %1580 = vmatmul.msk.bf16.gmra.mxu0 %vm476_vm1, %v1726_v11  ;;  %v632_v18 = vmax.f32 %v574_v14, 0.0 }
 0x102   : > { %v894_v15 = vadd.f32 %v1913_v43, %v893_v12 }
 0x104   : > { %1675 = vmatmul.msk.bf16.gmra.mxu1 %vm802_vm2, %v1741_v10  ;;  %v955_v21 = vmax.f32 %v894_v15, 0.0 }
 0x106   : > { %v575_v17 = vpop.f32.mrf.mxu0 }
 0x107   : > { %v576_v20 = vadd.f32 %v1901_v32, %v575_v17 }
 0x109   : > { %v895_v16 = vpop.f32.mrf.mxu1  ;;  %v633_v23 = vmax.f32 %v576_v20, 0.0 }
 0x10a   : > { %v896_v19 = vadd.f32 %v1913_v43, %v895_v16 }
 0x10b   : > { %v982_v25 = vpack.c.bf16 %v633_v23, %v632_v18 }
 0x10c   : > { %v956_v22 = vmax.f32 %v896_v19, 0.0 }
 0x10d   : > { %1700 = vmatmul.msk.bf16.gmra.mxu3 %vm476_vm1, %v982_v25 }
 0x10e   : > { %v998_v24 = vpack.c.bf16 %v956_v22, %v955_v21  ;;  %v578_v28 = vpop.f32.mrf.mxu0 }
 0x10f   : > { %v579_v29 = vadd.f32 %v1901_v32, %v578_v28 }
 0x110   : > { %1683 = vmatmul.msk.bf16.gmra.mxu2 %vm476_vm1, %v998_v24 }
 0x111   : > { %v898_v27 = vpop.f32.mrf.mxu1  ;;  %v634_v34 = vmax.f32 %v579_v29, 0.0 }
 0x112   : > { %v899_v30 = vadd.f32 %v1913_v43, %v898_v27 }
 0x114   : > { %1676 = vmatmul.msk.bf16.gmra.mxu1 %vm802_vm2, %v1742_v26  ;;  %v957_v37 = vmax.f32 %v899_v30, 0.0 }
 0x116   : > { %v580_v33 = vpop.f32.mrf.mxu0 }
 0x117   : > { %v581_v36 = vadd.f32 %v1901_v32, %v580_v33 }
 0x119   : > { %v900_v31 = vpop.f32.mrf.mxu1  ;;  %v635_v39 = vmax.f32 %v581_v36, 0.0 }
 0x11a   : > { %v901_v35 = vadd.f32 %v1913_v43, %v900_v31 }
 0x11b   : > { %v983_v41 = vpack.c.bf16 %v635_v39, %v634_v34 }
 0x11c   : > { %v958_v38 = vmax.f32 %v901_v35, 0.0 }
 0x11d   : > { %1701 = vmatmul.msk.bf16.gmra.mxu3 %vm476_vm1, %v983_v41 }
 0x11e   : > { %v999_v40 = vpack.c.bf16 %v958_v38, %v957_v37  ;;  %v583_v44 = vpop.f32.mrf.mxu0 }
 0x11f   : > { %v584_v46 = vadd.f32 %v1901_v32, %v583_v44 }
 0x120   : > { %1684 = vmatmul.msk.bf16.gmra.mxu2 %vm476_vm1, %v999_v40  ;;  %v1209_v45 = vpop.f32.mrf.mxu3 }
 0x121   : > { %v903_v42 = vpop.f32.mrf.mxu1  ;;  %v636_v50 = vmax.f32 %v584_v46, 0.0 }
 0x122   : > { %v904_v47 = vadd.f32 %v1913_v43, %v903_v42 }
 0x124   : > { %v959_v54 = vmax.f32 %v904_v47, 0.0 }
 0x126   : > { %v585_v49 = vpop.f32.mrf.mxu0 }
 0x127   : > { %v586_v52 = vadd.f32 %v1901_v32, %v585_v49 }
 0x128   : > { %v1211_v53 = vpop.f32.mrf.mxu3 }
 0x129   : > { %v905_v48 = vpop.f32.mrf.mxu1  ;;  %v637_v56 = vmax.f32 %v586_v52, 0.0 }
 0x12a   : > { %v906_v51 = vadd.f32 %v1913_v43, %v905_v48 }
 0x12b   : > { %v984_v58 = vpack.c.bf16 %v637_v56, %v636_v50 }
 0x12c   : > { %v960_v55 = vmax.f32 %v906_v51, 0.0 }
 0x12d   : > { %1702 = vmatmul.msk.bf16.gmra.mxu3 %vm476_vm1, %v984_v58 }
 0x12e   : > { %v1000_v57 = vpack.c.bf16 %v960_v55, %v959_v54  ;;  %v588_v60 = vpop.f32.mrf.mxu0 }
 0x12f   : > { %v589_v1 = vadd.f32 %v1901_v32, %v588_v60 }
 0x130   : > { %1685 = vmatmul.msk.bf16.gmra.mxu2 %vm476_vm1, %v1000_v57  ;;  %v1214_v63 = vpop.f32.mrf.mxu3 }
 0x131   : > { %v908_v59 = vpop.f32.mrf.mxu1  ;;  %v638_v7 = vmax.f32 %v589_v1, 0.0 }
 0x132   : > { %v909_v3 = vadd.f32 %v1913_v43, %v908_v59 }
 0x133   : > { %v1069_v62 = vpop.f32.mrf.mxu2 }
 0x134   : > { %v1210_v0 = vadd.f32 %v1209_v45, %v1069_v62  ;;  %v961_v13 = vmax.f32 %v909_v3, 0.0 }
 0x136   : > { %v1293_v2 = vadd.f32 %v2000_v61, %v1210_v0  ;;  %v590_v6 = vpop.f32.mrf.mxu0 }
 0x137   : > { %v591_v10 = vadd.f32 %v1901_v32, %v590_v6 }
 0x138   : > { %v1325_v4 = vmax.f32 %v1293_v2, 0.0  ;;  %v1216_v12 = vpop.f32.mrf.mxu3 }
 0x139   : > { %v910_v5 = vpop.f32.mrf.mxu1  ;;  %v639_v15 = vmax.f32 %v591_v10, 0.0 }
 0x13a   : > { %v1357_v8 = vpack.c.bf16 %v1325_v4, %v1325_v4  ;;  %v911_v9 = vadd.f32 %v1913_v43, %v910_v5 }
 0x13b   : > { %v1071_v11 = vpop.f32.mrf.mxu2  ;;  %v985_v18 = vpack.c.bf16 %v639_v15, %v638_v7 }
 0x13c   : > { %1390 = vst.msk [vmem:[%s2009_s24] sm:$0xf] %vm1389_vm3, %v1357_v8  ;;  %v962_v14 = vmax.f32 %v911_v9, 0.0  ;;  %v1212_v16 = vadd.f32 %v1211_v53, %v1071_v11 }
 0x13d   : > { %1703 = vmatmul.msk.bf16.gmra.mxu3 %vm476_vm1, %v985_v18 }
 0x13e   : > { %v1001_v17 = vpack.c.bf16 %v962_v14, %v961_v13  ;;  %v1294_v19 = vadd.f32 %v2000_v61, %v1212_v16  ;;  %v593_v22 = vpop.f32.mrf.mxu0 }
 0x13f   : > { %v594_v27 = vadd.f32 %v1901_v32, %v593_v22 }
 0x140   : > { %v1326_v20 = vmax.f32 %v1294_v19, 0.0  ;;  %1686 = vmatmul.msk.bf16.gmra.mxu2 %vm476_vm1, %v1001_v17  ;;  %v1219_v25 = vpop.f32.mrf.mxu3 }
 0x141   : > { %v913_v21 = vpop.f32.mrf.mxu1  ;;  %v640_v34 = vmax.f32 %v594_v27, 0.0 }
 0x142   : > { %v1358_v23 = vpack.c.bf16 %v1326_v20, %v1326_v20  ;;  %v914_v29 = vadd.f32 %v1913_v43, %v913_v21 }
 0x143   : > { %v1074_v24 = vpop.f32.mrf.mxu2 }
 0x144   : > { %1391 = vst.msk [vmem:[%s2009_s24 + $0x4] sm:$0xf] %vm1389_vm3, %v1358_v23  ;;  %v1215_v26 = vadd.f32 %v1214_v63, %v1074_v24  ;;  %v963_v40 = vmax.f32 %v914_v29, 0.0 }
 0x146   : > { %v1295_v28 = vadd.f32 %v2000_v61, %v1215_v26  ;;  %v595_v33 = vpop.f32.mrf.mxu0 }
 0x147   : > { %v596_v37 = vadd.f32 %v1901_v32, %v595_v33 }
 0x148   : > { %v1327_v30 = vmax.f32 %v1295_v28, 0.0  ;;  %v1221_v39 = vpop.f32.mrf.mxu3 }
 0x149   : > { %v915_v31 = vpop.f32.mrf.mxu1  ;;  %v641_v42 = vmax.f32 %v596_v37, 0.0 }
 0x14a   : > { %v1359_v35 = vpack.c.bf16 %v1327_v30, %v1327_v30  ;;  %v916_v36 = vadd.f32 %v1913_v43, %v915_v31 }
 0x14b   : > { %v1076_v38 = vpop.f32.mrf.mxu2  ;;  %v986_v46 = vpack.c.bf16 %v641_v42, %v640_v34 }
 0x14c   : > { %1392 = vst.msk [vmem:[%s2009_s24 + $0x8] sm:$0xf] %vm1389_vm3, %v1359_v35  ;;  %v964_v41 = vmax.f32 %v916_v36, 0.0  ;;  %v1217_v44 = vadd.f32 %v1216_v12, %v1076_v38 }
 0x14d   : > { %1704 = vmatmul.msk.bf16.gmra.mxu3 %vm476_vm1, %v986_v46 }
 0x14e   : > { %v1002_v45 = vpack.c.bf16 %v964_v41, %v963_v40  ;;  %v1296_v47 = vadd.f32 %v2000_v61, %v1217_v44  ;;  %v598_v50 = vpop.f32.mrf.mxu0 }
 0x14f   : > { %v599_v55 = vadd.f32 %v1901_v32, %v598_v50 }
 0x150   : > { %v1328_v48 = vmax.f32 %v1296_v47, 0.0  ;;  %1687 = vmatmul.msk.bf16.gmra.mxu2 %vm476_vm1, %v1002_v45  ;;  %v1224_v53 = vpop.f32.mrf.mxu3 }
 0x151   : > { %v918_v49 = vpop.f32.mrf.mxu1  ;;  %v642_v62 = vmax.f32 %v599_v55, 0.0 }
 0x152   : > { %v1360_v51 = vpack.c.bf16 %v1328_v48, %v1328_v48  ;;  %v919_v57 = vadd.f32 %v1913_v43, %v918_v49 }
 0x153   : > { %v1079_v52 = vpop.f32.mrf.mxu2 }
 0x154   : > { %1393 = vst.msk [vmem:[%s2009_s24 + $0xc] sm:$0xf] %vm1389_vm3, %v1360_v51  ;;  %v1220_v54 = vadd.f32 %v1219_v25, %v1079_v52  ;;  %v965_v4 = vmax.f32 %v919_v57, 0.0 }
 0x156   : > { %v1297_v56 = vadd.f32 %v2000_v61, %v1220_v54  ;;  %v600_v60 = vpop.f32.mrf.mxu0 }
 0x157   : > { %v601_v1 = vadd.f32 %v1901_v32, %v600_v60 }
 0x158   : > { %v1329_v58 = vmax.f32 %v1297_v56, 0.0  ;;  %v1226_v3 = vpop.f32.mrf.mxu3 }
 0x159   : > { %v920_v59 = vpop.f32.mrf.mxu1  ;;  %v643_v6 = vmax.f32 %v601_v1, 0.0 }
 0x15a   : > { %v1361_v63 = vpack.c.bf16 %v1329_v58, %v1329_v58  ;;  %v921_v0 = vadd.f32 %v1913_v43, %v920_v59 }
 0x15b   : > { %v1081_v2 = vpop.f32.mrf.mxu2  ;;  %v987_v9 = vpack.c.bf16 %v643_v6, %v642_v62 }
 0x15c   : > { %1394 = vst.msk [vmem:[%s2009_s24 + $0x10] sm:$0xf] %vm1389_vm3, %v1361_v63  ;;  %v966_v5 = vmax.f32 %v921_v0, 0.0  ;;  %v1222_v7 = vadd.f32 %v1221_v39, %v1081_v2 }
 0x15d   : > { %1705 = vmatmul.msk.bf16.gmra.mxu3 %vm476_vm1, %v987_v9 }
 0x15e   : > { %v1003_v8 = vpack.c.bf16 %v966_v5, %v965_v4  ;;  %v1298_v10 = vadd.f32 %v2000_v61, %v1222_v7  ;;  %v603_v13 = vpop.f32.mrf.mxu0 }
 0x15f   : > { %v604_v18 = vadd.f32 %v1901_v32, %v603_v13 }
 0x160   : > { %v1330_v11 = vmax.f32 %v1298_v10, 0.0  ;;  %1688 = vmatmul.msk.bf16.gmra.mxu2 %vm476_vm1, %v1003_v8  ;;  %v1229_v16 = vpop.f32.mrf.mxu3 }
 0x161   : > { %v923_v12 = vpop.f32.mrf.mxu1  ;;  %v644_v24 = vmax.f32 %v604_v18, 0.0 }
 0x162   : > { %v1362_v14 = vpack.c.bf16 %v1330_v11, %v1330_v11  ;;  %v924_v20 = vadd.f32 %v1913_v43, %v923_v12 }
 0x163   : > { %v1084_v15 = vpop.f32.mrf.mxu2 }
 0x164   : > { %1395 = vst.msk [vmem:[%s2009_s24 + $0x14] sm:$0xf] %vm1389_vm3, %v1362_v14  ;;  %v1225_v17 = vadd.f32 %v1224_v53, %v1084_v15  ;;  %v967_v30 = vmax.f32 %v924_v20, 0.0 }
 0x166   : > { %v1299_v19 = vadd.f32 %v2000_v61, %v1225_v17  ;;  %v605_v23 = vpop.f32.mrf.mxu0 }
 0x167   : > { %v606_v27 = vadd.f32 %v1901_v32, %v605_v23 }
 0x168   : > { %v1331_v21 = vmax.f32 %v1299_v19, 0.0  ;;  %v1231_v29 = vpop.f32.mrf.mxu3 }
 0x169   : > { %v925_v22 = vpop.f32.mrf.mxu1  ;;  %v645_v33 = vmax.f32 %v606_v27, 0.0 }
 0x16a   : > { %v1363_v25 = vpack.c.bf16 %v1331_v21, %v1331_v21  ;;  %v926_v26 = vadd.f32 %v1913_v43, %v925_v22 }
 0x16b   : > { %v1086_v28 = vpop.f32.mrf.mxu2  ;;  %v988_v36 = vpack.c.bf16 %v645_v33, %v644_v24 }
 0x16c   : > { %1396 = vst.msk [vmem:[%s2009_s24 + $0x18] sm:$0xf] %vm1389_vm3, %v1363_v25  ;;  %v968_v31 = vmax.f32 %v926_v26, 0.0  ;;  %v1227_v34 = vadd.f32 %v1226_v3, %v1086_v28 }
 0x16d   : > { %1706 = vmatmul.msk.bf16.gmra.mxu3 %vm476_vm1, %v988_v36 }
 0x16e   : > { %v1004_v35 = vpack.c.bf16 %v968_v31, %v967_v30  ;;  %v1300_v37 = vadd.f32 %v2000_v61, %v1227_v34  ;;  %v608_v40 = vpop.f32.mrf.mxu0 }
 0x16f   : > { %v609_v46 = vadd.f32 %v1901_v32, %v608_v40 }
 0x170   : > { %v1332_v38 = vmax.f32 %v1300_v37, 0.0  ;;  %1689 = vmatmul.msk.bf16.gmra.mxu2 %vm476_vm1, %v1004_v35  ;;  %v1234_v44 = vpop.f32.mrf.mxu3 }
 0x171   : > { %v928_v39 = vpop.f32.mrf.mxu1  ;;  %v646_v52 = vmax.f32 %v609_v46, 0.0 }
 0x172   : > { %v1364_v41 = vpack.c.bf16 %v1332_v38, %v1332_v38  ;;  %v929_v48 = vadd.f32 %v1913_v43, %v928_v39 }
 0x173   : > { %v1089_v42 = vpop.f32.mrf.mxu2 }
 0x174   : > { %1397 = vst.msk [vmem:[%s2009_s24 + $0x1c] sm:$0xf] %vm1389_vm3, %v1364_v41  ;;  %v1230_v45 = vadd.f32 %v1229_v16, %v1089_v42  ;;  %v969_v58 = vmax.f32 %v929_v48, 0.0 }
 0x176   : > { %v1301_v47 = vadd.f32 %v2000_v61, %v1230_v45  ;;  %v610_v51 = vpop.f32.mrf.mxu0 }
 0x177   : > { %v611_v55 = vadd.f32 %v1901_v32, %v610_v51 }
 0x178   : > { %v1333_v49 = vmax.f32 %v1301_v47, 0.0  ;;  %v1236_v57 = vpop.f32.mrf.mxu3 }
 0x179   : > { %v930_v50 = vpop.f32.mrf.mxu1  ;;  %v647_v60 = vmax.f32 %v611_v55, 0.0 }
 0x17a   : > { %v1365_v53 = vpack.c.bf16 %v1333_v49, %v1333_v49  ;;  %v931_v54 = vadd.f32 %v1913_v43, %v930_v50 }
 0x17b   : > { %v1091_v56 = vpop.f32.mrf.mxu2  ;;  %v989_v0 = vpack.c.bf16 %v647_v60, %v646_v52 }
 0x17c   : > { %1398 = vst.msk [vmem:[%s2009_s24 + $0x20] sm:$0xf] %vm1389_vm3, %v1365_v53  ;;  %v970_v59 = vmax.f32 %v931_v54, 0.0  ;;  %v1232_v62 = vadd.f32 %v1231_v29, %v1091_v56 }
 0x17d   : > { %1707 = vmatmul.msk.bf16.gmra.mxu3 %vm476_vm1, %v989_v0 }
 0x17e   : > { %v1005_v63 = vpack.c.bf16 %v970_v59, %v969_v58  ;;  %v1302_v1 = vadd.f32 %v2000_v61, %v1232_v62  ;;  %v613_v4 = vpop.f32.mrf.mxu0 }
 0x17f   : > { %v614_v9 = vadd.f32 %v1901_v32, %v613_v4 }
 0x180   : > { %v1334_v2 = vmax.f32 %v1302_v1, 0.0  ;;  %1690 = vmatmul.msk.bf16.gmra.mxu2 %vm476_vm1, %v1005_v63  ;;  %v1239_v7 = vpop.f32.mrf.mxu3 }
 0x181   : > { %v933_v3 = vpop.f32.mrf.mxu1  ;;  %v648_v15 = vmax.f32 %v614_v9, 0.0 }
 0x182   : > { %v1366_v5 = vpack.c.bf16 %v1334_v2, %v1334_v2  ;;  %v934_v11 = vadd.f32 %v1913_v43, %v933_v3 }
 0x183   : > { %v1094_v6 = vpop.f32.mrf.mxu2 }
 0x184   : > { %1399 = vst.msk [vmem:[%s2009_s24 + $0x24] sm:$0xf] %vm1389_vm3, %v1366_v5  ;;  %v1235_v8 = vadd.f32 %v1234_v44, %v1094_v6  ;;  %v971_v21 = vmax.f32 %v934_v11, 0.0 }
 0x186   : > { %v1303_v10 = vadd.f32 %v2000_v61, %v1235_v8  ;;  %v615_v14 = vpop.f32.mrf.mxu0 }
 0x187   : > { %v616_v18 = vadd.f32 %v1901_v32, %v615_v14 }
 0x188   : > { %v1335_v12 = vmax.f32 %v1303_v10, 0.0  ;;  %v1241_v20 = vpop.f32.mrf.mxu3 }
 0x189   : > { %v935_v13 = vpop.f32.mrf.mxu1  ;;  %v649_v23 = vmax.f32 %v616_v18, 0.0 }
 0x18a   : > { %v1367_v16 = vpack.c.bf16 %v1335_v12, %v1335_v12  ;;  %v936_v17 = vadd.f32 %v1913_v43, %v935_v13 }
 0x18b   : > { %v1096_v19 = vpop.f32.mrf.mxu2  ;;  %v990_v26 = vpack.c.bf16 %v649_v23, %v648_v15 }
 0x18c   : > { %1400 = vst.msk [vmem:[%s2009_s24 + $0x28] sm:$0xf] %vm1389_vm3, %v1367_v16  ;;  %v972_v22 = vmax.f32 %v936_v17, 0.0  ;;  %v1237_v24 = vadd.f32 %v1236_v57, %v1096_v19 }
 0x18d   : > { %1708 = vmatmul.msk.bf16.gmra.mxu3 %vm476_vm1, %v990_v26 }
 0x18e   : > { %v1006_v25 = vpack.c.bf16 %v972_v22, %v971_v21  ;;  %v1304_v27 = vadd.f32 %v2000_v61, %v1237_v24 }
 0x190   : > { %v1336_v28 = vmax.f32 %v1304_v27, 0.0  ;;  %1691 = vmatmul.msk.bf16.gmra.mxu2 %vm476_vm1, %v1006_v25  ;;  %v1244_v31 = vpop.f32.mrf.mxu3 }
 0x191   : > { %v938_v32 = vpop.f32.mrf.mxu1 }
 0x192   : > { %v1368_v29 = vpack.c.bf16 %v1336_v28, %v1336_v28  ;;  %v939_v35 = vadd.f32 %v1913_v43, %v938_v32 }
 0x193   : > { %v1099_v30 = vpop.f32.mrf.mxu2 }
 0x194   : > { %1401 = vst.msk [vmem:[%s2009_s24 + $0x2c] sm:$0xf] %vm1389_vm3, %v1368_v29  ;;  %v1240_v33 = vadd.f32 %v1239_v7, %v1099_v30  ;;  %v973_v42 = vmax.f32 %v939_v35, 0.0 }
 0x196   : > { %v1305_v34 = vadd.f32 %v2000_v61, %v1240_v33 }
 0x198   : > { %v1337_v36 = vmax.f32 %v1305_v34, 0.0  ;;  %v1246_v41 = vpop.f32.mrf.mxu3 }
 0x199   : > { %v940_v37 = vpop.f32.mrf.mxu1 }
 0x19a   : > { %v1369_v38 = vpack.c.bf16 %v1337_v36, %v1337_v36  ;;  %v941_v39 = vadd.f32 %v1913_v43, %v940_v37 }
 0x19b   : > { %v1101_v40 = vpop.f32.mrf.mxu2 }
 0x19c   : > { %1402 = vst.msk [vmem:[%s2009_s24 + $0x30] sm:$0xf] %vm1389_vm3, %v1369_v38  ;;  %v974_v44 = vmax.f32 %v941_v39, 0.0  ;;  %v1242_v45 = vadd.f32 %v1241_v20, %v1101_v40 }
 0x19e   : > { %v1007_v46 = vpack.c.bf16 %v974_v44, %v973_v42  ;;  %v1306_v47 = vadd.f32 %v2000_v61, %v1242_v45 }
 0x1a0   : > { %v1338_v48 = vmax.f32 %v1306_v47, 0.0  ;;  %1692 = vmatmul.msk.bf16.gmra.mxu2 %vm476_vm1, %v1007_v46  ;;  %v1249_v51 = vpop.f32.mrf.mxu3 }
 0x1a2   : > { %v1370_v49 = vpack.c.bf16 %v1338_v48, %v1338_v48 }
 0x1a3   : > { %v1104_v50 = vpop.f32.mrf.mxu2 }
 0x1a4   : > { %1403 = vst.msk [vmem:[%s2009_s24 + $0x34] sm:$0xf] %vm1389_vm3, %v1370_v49  ;;  %v1245_v43 = vadd.f32 %v1244_v31, %v1104_v50 }
 0x1a6   : > { %v1307_v52 = vadd.f32 %v2000_v61, %v1245_v43 }
 0x1a8   : > { %v1339_v53 = vmax.f32 %v1307_v52, 0.0  ;;  %v1251_v56 = vpop.f32.mrf.mxu3 }
 0x1aa   : > { %v1371_v54 = vpack.c.bf16 %v1339_v53, %v1339_v53 }
 0x1ab   : > { %v1106_v55 = vpop.f32.mrf.mxu2 }
 0x1ac   : > { %1404 = vst.msk [vmem:[%s2009_s24 + $0x38] sm:$0xf] %vm1389_vm3, %v1371_v54  ;;  %v1247_v57 = vadd.f32 %v1246_v41, %v1106_v55 }
 0x1ae   : > { %v1308_v58 = vadd.f32 %v2000_v61, %v1247_v57 }
 0x1b0   : > { %v1340_v59 = vmax.f32 %v1308_v58, 0.0  ;;  %v1254_v63 = vpop.f32.mrf.mxu3 }
 0x1b2   : > { %v1372_v60 = vpack.c.bf16 %v1340_v59, %v1340_v59 }
 0x1b3   : > { %v1109_v62 = vpop.f32.mrf.mxu2 }
 0x1b4   : > { %1405 = vst.msk [vmem:[%s2009_s24 + $0x3c] sm:$0xf] %vm1389_vm3, %v1372_v60  ;;  %v1250_v0 = vadd.f32 %v1249_v51, %v1109_v62 }
 0x1b6   : > { %v1309_v1 = vadd.f32 %v2000_v61, %v1250_v0 }
 0x1b8   : > { %v1341_v2 = vmax.f32 %v1309_v1, 0.0  ;;  %v1256_v5 = vpop.f32.mrf.mxu3 }
 0x1ba   : > { %v1373_v3 = vpack.c.bf16 %v1341_v2, %v1341_v2 }
 0x1bb   : > { %v1111_v4 = vpop.f32.mrf.mxu2 }
 0x1bc   : > { %1406 = vst.msk [vmem:[%s2009_s24 + $0x40] sm:$0xf] %vm1389_vm3, %v1373_v3  ;;  %v1252_v6 = vadd.f32 %v1251_v56, %v1111_v4 }
 0x1be   : > { %v1310_v7 = vadd.f32 %v2000_v61, %v1252_v6 }
 0x1c0   : > { %v1342_v8 = vmax.f32 %v1310_v7, 0.0  ;;  %v1259_v11 = vpop.f32.mrf.mxu3 }
 0x1c2   : > { %v1374_v9 = vpack.c.bf16 %v1342_v8, %v1342_v8 }
 0x1c3   : > { %v1114_v10 = vpop.f32.mrf.mxu2 }
 0x1c4   : > { %1407 = vst.msk [vmem:[%s2009_s24 + $0x44] sm:$0xf] %vm1389_vm3, %v1374_v9  ;;  %v1255_v12 = vadd.f32 %v1254_v63, %v1114_v10 }
 0x1c6   : > { %v1311_v13 = vadd.f32 %v2000_v61, %v1255_v12 }
 0x1c8   : > { %v1343_v14 = vmax.f32 %v1311_v13, 0.0  ;;  %v1261_v17 = vpop.f32.mrf.mxu3 }
 0x1ca   : > { %v1375_v15 = vpack.c.bf16 %v1343_v14, %v1343_v14 }
 0x1cb   : > { %v1116_v16 = vpop.f32.mrf.mxu2 }
 0x1cc   : > { %1408 = vst.msk [vmem:[%s2009_s24 + $0x48] sm:$0xf] %vm1389_vm3, %v1375_v15  ;;  %v1257_v18 = vadd.f32 %v1256_v5, %v1116_v16 }
 0x1ce   : > { %v1312_v19 = vadd.f32 %v2000_v61, %v1257_v18 }
 0x1d0   : > { %v1344_v20 = vmax.f32 %v1312_v19, 0.0  ;;  %v1264_v23 = vpop.f32.mrf.mxu3 }
 0x1d2   : > { %v1376_v21 = vpack.c.bf16 %v1344_v20, %v1344_v20 }
 0x1d3   : > { %v1119_v22 = vpop.f32.mrf.mxu2 }
 0x1d4   : > { %1409 = vst.msk [vmem:[%s2009_s24 + $0x4c] sm:$0xf] %vm1389_vm3, %v1376_v21  ;;  %v1260_v24 = vadd.f32 %v1259_v11, %v1119_v22 }
 0x1d6   : > { %v1313_v25 = vadd.f32 %v2000_v61, %v1260_v24 }
 0x1d8   : > { %v1345_v26 = vmax.f32 %v1313_v25, 0.0  ;;  %v1266_v32 = vpop.f32.mrf.mxu3 }
 0x1da   : > { %v1377_v27 = vpack.c.bf16 %v1345_v26, %v1345_v26 }
 0x1db   : > { %v1121_v28 = vpop.f32.mrf.mxu2 }
 0x1dc   : > { %1410 = vst.msk [vmem:[%s2009_s24 + $0x50] sm:$0xf] %vm1389_vm3, %v1377_v27  ;;  %v1262_v29 = vadd.f32 %v1261_v17, %v1121_v28 }
 0x1de   : > { %v1314_v30 = vadd.f32 %v2000_v61, %v1262_v29 }
 0x1e0   : > { %v1346_v31 = vmax.f32 %v1314_v30, 0.0  ;;  %v1269_v36 = vpop.f32.mrf.mxu3 }
 0x1e2   : > { %v1378_v33 = vpack.c.bf16 %v1346_v31, %v1346_v31 }
 0x1e3   : > { %v1124_v34 = vpop.f32.mrf.mxu2 }
 0x1e4   : > { %1411 = vst.msk [vmem:[%s2009_s24 + $0x54] sm:$0xf] %vm1389_vm3, %v1378_v33  ;;  %v1265_v35 = vadd.f32 %v1264_v23, %v1124_v34 }
 0x1e6   : > { %v1315_v37 = vadd.f32 %v2000_v61, %v1265_v35 }
 0x1e8   : > { %v1347_v38 = vmax.f32 %v1315_v37, 0.0  ;;  %v1271_v44 = vpop.f32.mrf.mxu3 }
 0x1ea   : > { %v1379_v39 = vpack.c.bf16 %v1347_v38, %v1347_v38 }
 0x1eb   : > { %v1126_v40 = vpop.f32.mrf.mxu2 }
 0x1ec   : > { %1412 = vst.msk [vmem:[%s2009_s24 + $0x58] sm:$0xf] %vm1389_vm3, %v1379_v39  ;;  %v1267_v41 = vadd.f32 %v1266_v32, %v1126_v40 }
 0x1ee   : > { %v1316_v42 = vadd.f32 %v2000_v61, %v1267_v41 }
 0x1f0   : > { %v1348_v45 = vmax.f32 %v1316_v42, 0.0  ;;  %v1274_v51 = vpop.f32.mrf.mxu3 }
 0x1f2   : > { %v1380_v46 = vpack.c.bf16 %v1348_v45, %v1348_v45 }
 0x1f3   : > { %v1129_v47 = vpop.f32.mrf.mxu2 }
 0x1f4   : > { %1413 = vst.msk [vmem:[%s2009_s24 + $0x5c] sm:$0xf] %vm1389_vm3, %v1380_v46  ;;  %v1270_v48 = vadd.f32 %v1269_v36, %v1129_v47 }
 0x1f6   : > { %v1317_v49 = vadd.f32 %v2000_v61, %v1270_v48 }
 0x1f8   : > { %v1349_v50 = vmax.f32 %v1317_v49, 0.0  ;;  %v1276_v57 = vpop.f32.mrf.mxu3 }
 0x1fa   : > { %v1381_v43 = vpack.c.bf16 %v1349_v50, %v1349_v50 }
 0x1fb   : > { %v1131_v52 = vpop.f32.mrf.mxu2 }
 0x1fc   : > { %1414 = vst.msk [vmem:[%s2009_s24 + $0x60] sm:$0xf] %vm1389_vm3, %v1381_v43  ;;  %v1272_v53 = vadd.f32 %v1271_v44, %v1131_v52 }
 0x1fe   : > { %v1318_v54 = vadd.f32 %v2000_v61, %v1272_v53 }
 0x200   : > { %v1350_v55 = vmax.f32 %v1318_v54, 0.0  ;;  %v1279_v2 = vpop.f32.mrf.mxu3 }
 0x202   : > { %v1382_v56 = vpack.c.bf16 %v1350_v55, %v1350_v55 }
 0x203   : > { %v1134_v58 = vpop.f32.mrf.mxu2 }
 0x204   : > { %1415 = vst.msk [vmem:[%s2009_s24 + $0x64] sm:$0xf] %vm1389_vm3, %v1382_v56  ;;  %v1275_v59 = vadd.f32 %v1274_v51, %v1134_v58 }
 0x206   : > { %v1319_v60 = vadd.f32 %v2000_v61, %v1275_v59 }
 0x208   : > { %v1351_v62 = vmax.f32 %v1319_v60, 0.0  ;;  %v1281_v9 = vpop.f32.mrf.mxu3 }
 0x20a   : > { %v1383_v63 = vpack.c.bf16 %v1351_v62, %v1351_v62 }
 0x20b   : > { %v1136_v0 = vpop.f32.mrf.mxu2 }
 0x20c   : > { %1416 = vst.msk [vmem:[%s2009_s24 + $0x68] sm:$0xf] %vm1389_vm3, %v1383_v63  ;;  %v1277_v1 = vadd.f32 %v1276_v57, %v1136_v0 }
 0x20e   : > { %v1320_v3 = vadd.f32 %v2000_v61, %v1277_v1 }
 0x210   : > { %v1352_v4 = vmax.f32 %v1320_v3, 0.0  ;;  %v1284_v16 = vpop.f32.mrf.mxu3 }
 0x212   : > { %v1384_v5 = vpack.c.bf16 %v1352_v4, %v1352_v4 }
 0x213   : > { %v1139_v6 = vpop.f32.mrf.mxu2 }
 0x214   : > { %1417 = vst.msk [vmem:[%s2009_s24 + $0x6c] sm:$0xf] %vm1389_vm3, %v1384_v5  ;;  %v1280_v7 = vadd.f32 %v1279_v2, %v1139_v6 }
 0x216   : > { %v1321_v8 = vadd.f32 %v2000_v61, %v1280_v7 }
 0x218   : > { %v1353_v10 = vmax.f32 %v1321_v8, 0.0  ;;  %v1286_v23 = vpop.f32.mrf.mxu3 }
 0x21a   : > { %v1385_v11 = vpack.c.bf16 %v1353_v10, %v1353_v10 }
 0x21b   : > { %v1141_v12 = vpop.f32.mrf.mxu2 }
 0x21c   : > { %1418 = vst.msk [vmem:[%s2009_s24 + $0x70] sm:$0xf] %vm1389_vm3, %v1385_v11  ;;  %v1282_v13 = vadd.f32 %v1281_v9, %v1141_v12 }
 0x21e   : > { %v1322_v14 = vadd.f32 %v2000_v61, %v1282_v13 }
 0x220   : > { %v1354_v15 = vmax.f32 %v1322_v14, 0.0 }
 0x222   : > { %v1386_v17 = vpack.c.bf16 %v1354_v15, %v1354_v15 }
 0x223   : > { %v1144_v18 = vpop.f32.mrf.mxu2 }
 0x224   : > { %1419 = vst.msk [vmem:[%s2009_s24 + $0x74] sm:$0xf] %vm1389_vm3, %v1386_v17  ;;  %v1285_v19 = vadd.f32 %v1284_v16, %v1144_v18 }
 0x226   : > { %v1323_v20 = vadd.f32 %v2000_v61, %v1285_v19 }
 0x228   : > { %v1355_v21 = vmax.f32 %v1323_v20, 0.0 }
 0x22a   : > { %v1387_v22 = vpack.c.bf16 %v1355_v21, %v1355_v21 }
 0x22b   : > { %v1146_v24 = vpop.f32.mrf.mxu2 }
 0x22c   : > { %1420 = vst.msk [vmem:[%s2009_s24 + $0x78] sm:$0xf] %vm1389_vm3, %v1387_v22  ;;  %v1287_v25 = vadd.f32 %v1286_v23, %v1146_v24 }
 0x22e   : > { %v1324_v26 = vadd.f32 %v2000_v61, %v1287_v25 }
 0x230   : > { %v1356_v27 = vmax.f32 %v1324_v26, 0.0 }
 0x232   : > { %v1388_v28 = vpack.c.bf16 %v1356_v27, %v1356_v27 }
 0x234   : > { %1421 = vst.msk [vmem:[%s2009_s24 + $0x7c] sm:$0xf] %vm1389_vm3, %v1388_v28 }
 0x235 PF: > { %s19_s30 = sadd.s32 1, %s1764_s30  }
 0x236   : > { %p16_p4 = scmp.ge.s32.totalorder %s19_s30, 4  }
 0x238   :  { %18 = sbr.rel (!%p16_p4) target bundleno = 1 (0x1), region = 89 }

// kernel: double_crossing_upsample.9
= control target key start
LH: loop header
LB: loop body
LE: loop exit
PB: predicated region body
PF: predicated region fallthrough
CT: control target
= control target key end

     0   :  { %s743_s12 = smov 0   ;;  %s745_s13 = smov 0   ;;  %s809_s0 = inlined_call_operand.vmem [shape: bf16[4,32,256], index: 0, kind: input, shape index: {}]   ;;  %s810_s1 = inlined_call_operand.vmem [shape: bf16[4,256,16], index: 1, kind: input, shape index: {}]   ;;  %s811_s2 = inlined_call_operand.vmem [shape: f32[1,16], index: 2, kind: input, shape index: {}]   ;;  %s812_s3 = inlined_call_operand.vmem [shape: bf16[4,32,16], index: 3, kind: output, shape index: {}]  }
   0x1   :  { %s747_s14 = smov 0  }
   0x2 LB: > { %s25_s15 = sadd.s32 1, %s717_s13  ;;  %p546_p0 = scmp.ge.s32.totalorder %s721_s14, 1  ;;  %s721_s14 = sphi %s747_s14, %s13_s14   ;;  %s717_s13 = sphi %s745_s13, %s814_s13   ;;  %s713_s12 = sphi %s743_s12, %s813_s12  }
   0x3   : > { %p27_p1 = scmp.ge.s32.totalorder %s25_s15, 4  ;;  %p169_p2 = scmp.lt.s32.totalorder %s721_s14, 5 }
   0x5   : > { %s816_s15 = smov (%p27_p1, %s25_s15), 0  ;;  %p170_p3 = pnand %p546_p0, %p169_p2 }
   0x6   : > { %p208_p4 = scmp.lt.s32.totalorder (!%p170_p3), %s713_s12, 3 }
   0x7   : > { %173 = sbr.rel (%p170_p3) target bundleno = 196 (0xc4), region = 32 }
   0xc   : > { %s818_s12 = smov (!%p208_p4, %s713_s12), 3  ;;  %v698_v28 = vld [vmem:[%s811_s2] ss:$0 sm:$0xff]  ;;  %vm435_vm0 = vcmask 125952  }
   0xd   : > { %s636_s16 = sshll.u32 %s818_s12, 7  ;;  %s635_s20 = sshll.u32 %s818_s12, 5 }
   0xe   : > { %s767_s19 = scalar_lea.vmem %s810_s1, %s636_s16  ;;  %s216_s23 = scalar_lea.vmem %s809_s0, %s635_s20 }
   0xf   : > { %v649_v0 = vld [vmem:[%s767_s19 + $0x38] sm:$0xff]  ;;  %v648_v2 = vld [vmem:[%s767_s19 + $0x30] sm:$0xff]  ;;  %v647_v4 = vld [vmem:[%s767_s19 + $0x28] sm:$0xff]  ;;  %s637_s26 = sshll.u32 %s818_s12, 4 }
  0x10   : > { %v657_v1 = vld [vmem:[%s767_s19 + $0x78] sm:$0xff]  ;;  %389 = vmatpush.bf16.msra.mxu0 %v649_v0  ;;  %658 = vmatpush.bf16.msra.mxu2 %v649_v0  ;;  %v656_v3 = vld [vmem:[%s767_s19 + $0x70] sm:$0xff]  ;;  %v655_v5 = vld [vmem:[%s767_s19 + $0x68] sm:$0xff]  ;;  %s231_s29 = scalar_lea.vmem %s812_s3, %s637_s26 }
  0x11   : > { %408 = vmatpush.bf16.msra.mxu1 %v657_v1  ;;  %666 = vmatpush.bf16.msra.mxu3 %v657_v1  ;;  %v646_v6 = vld [vmem:[%s767_s19 + $0x20] sm:$0xff]  ;;  %v645_v8 = vld [vmem:[%s767_s19 + $0x18] sm:$0xff]  ;;  %v644_v10 = vld [vmem:[%s767_s19 + $0x10] sm:$0xff] }
  0x12   : > { %v654_v7 = vld [vmem:[%s767_s19 + $0x60] sm:$0xff]  ;;  %v653_v9 = vld [vmem:[%s767_s19 + $0x58] sm:$0xff]  ;;  %v652_v11 = vld [vmem:[%s767_s19 + $0x50] sm:$0xff] }
  0x13   : > { %v643_v12 = vld [vmem:[%s767_s19 + $0x8] sm:$0xff]  ;;  %v642_v14 = vld [vmem:[%s767_s19] sm:$0xff]  ;;  %v563_v18 = vld [vmem:[%s216_s23 + $0x10] sm:$0xf] }
  0x14   : > { %390 = vmatpush.bf16.msra.mxu0 %v648_v2  ;;  %659 = vmatpush.bf16.msra.mxu2 %v648_v2  ;;  %v651_v13 = vld [vmem:[%s767_s19 + $0x48] sm:$0xff]  ;;  %v650_v15 = vld [vmem:[%s767_s19 + $0x40] sm:$0xff]  ;;  %v641_v19 = vld [vmem:[%s216_s23 + $0x14] sm:$0xf0] }
  0x15   : > { %409 = vmatpush.bf16.msra.mxu1 %v656_v3  ;;  %667 = vmatpush.bf16.msra.mxu3 %v656_v3  ;;  %v555_v16 = vld [vmem:[%s216_s23] sm:$0xf]  ;;  %v639_v17 = vld [vmem:[%s216_s23 + $0x4] sm:$0xf0]  ;;  %v638_v20 = vld [vmem:[%s216_s23 + $0x4] sm:$0xf]  ;;  %v564_v25 = vor.u32 %v641_v19, %v563_v18 }
  0x16   : > { %v557_v21 = vld [vmem:[%s216_s23 + $0x8] sm:$0xf0]  ;;  %v640_v22 = vld [vmem:[%s216_s23 + $0x14] sm:$0xf]  ;;  %v565_v23 = vld [vmem:[%s216_s23 + $0x18] sm:$0xf0]  ;;  %v556_v24 = vor.u32 %v639_v17, %v555_v16 }
  0x17   : > { %v560_v26 = vor.u32 %v638_v20, %v557_v21  ;;  %v568_v27 = vor.u32 %v640_v22, %v565_v23 }
  0x18   : > { %391 = vmatpush.bf16.msra.mxu0 %v647_v4  ;;  %660 = vmatpush.bf16.msra.mxu2 %v647_v4 }
  0x19   : > { %410 = vmatpush.bf16.msra.mxu1 %v655_v5  ;;  %668 = vmatpush.bf16.msra.mxu3 %v655_v5 }
  0x1c   : > { %392 = vmatpush.bf16.msra.mxu0 %v646_v6  ;;  %661 = vmatpush.bf16.msra.mxu2 %v646_v6 }
  0x1d   : > { %411 = vmatpush.bf16.msra.mxu1 %v654_v7  ;;  %669 = vmatpush.bf16.msra.mxu3 %v654_v7 }
  0x20   : > { %393 = vmatpush.bf16.msra.mxu0 %v645_v8  ;;  %662 = vmatpush.bf16.msra.mxu2 %v645_v8 }
  0x21   : > { %412 = vmatpush.bf16.msra.mxu1 %v653_v9  ;;  %670 = vmatpush.bf16.msra.mxu3 %v653_v9 }
  0x24   : > { %394 = vmatpush.bf16.msra.mxu0 %v644_v10  ;;  %663 = vmatpush.bf16.msra.mxu2 %v644_v10 }
  0x25   : > { %413 = vmatpush.bf16.msra.mxu1 %v652_v11  ;;  %671 = vmatpush.bf16.msra.mxu3 %v652_v11 }
  0x28   : > { %395 = vmatpush.bf16.msra.mxu0 %v643_v12  ;;  %664 = vmatpush.bf16.msra.mxu2 %v643_v12 }
  0x29   : > { %414 = vmatpush.bf16.msra.mxu1 %v651_v13  ;;  %672 = vmatpush.bf16.msra.mxu3 %v651_v13 }
  0x2c   : > { %396 = vmatpush.bf16.msra.mxu0 %v642_v14  ;;  %665 = vmatpush.bf16.msra.mxu2 %v642_v14 }
  0x2d   : > { %415 = vmatpush.bf16.msra.mxu1 %v650_v15  ;;  %673 = vmatpush.bf16.msra.mxu3 %v650_v15 }
  0x2f   : > { %397 = vmatmul.bf16.vlgmr.msra.gmra.mxu0 %v556_v24  ;;  %402 = vmatmul.bf16.vlgmr.msra.gmra.mxu2 %v564_v25 }
  0x30   : > { %416 = vmatmul.bf16.vlgmr.msra.gmra.mxu1 %v560_v26  ;;  %421 = vmatmul.bf16.vlgmr.msra.gmra.mxu3 %v568_v27 }
  0xac   : > { %v398_v29 = vpop.f32.mrf.mxu0 }
  0xad   : > { %v399_v30 = vadd.f32 %v698_v28, %v398_v29  ;;  %v417_v31 = vpop.f32.mrf.mxu1 }
  0xaf   : > { %v418_v32 = vadd.f32 %v417_v31, %v399_v30 }
  0xb1   : > { %v427_v33 = vmax.f32 %v418_v32, 0.0 }
  0xb2   : > { %v403_v34 = vpop.f32.mrf.mxu2 }
  0xb3   : > { %v431_v35 = vpack.c.bf16 %v427_v33, %v427_v33  ;;  %v404_v36 = vadd.f32 %v698_v28, %v403_v34  ;;  %v422_v37 = vpop.f32.mrf.mxu3 }
  0xb4   : > { %v400_v38 = vpop.f32.mrf.mxu0 }
  0xb5   : > { %436 = vst.msk [vmem:[%s231_s29] sm:$0xf] %vm435_vm0, %v431_v35  ;;  %v423_v39 = vadd.f32 %v422_v37, %v404_v36  ;;  %v401_v40 = vadd.f32 %v698_v28, %v400_v38  ;;  %v419_v41 = vpop.f32.mrf.mxu1 }
  0xb7   : > { %v429_v42 = vmax.f32 %v423_v39, 0.0  ;;  %v420_v43 = vadd.f32 %v419_v41, %v401_v40 }
  0xb9   : > { %v433_v44 = vpack.c.bf16 %v429_v42, %v429_v42  ;;  %v428_v45 = vmax.f32 %v420_v43, 0.0 }
  0xba   : > { %v405_v46 = vpop.f32.mrf.mxu2 }
  0xbb   : > { %438 = vst.msk [vmem:[%s231_s29 + $0x8] sm:$0xf] %vm435_vm0, %v433_v44  ;;  %v432_v47 = vpack.c.bf16 %v428_v45, %v428_v45  ;;  %v406_v48 = vadd.f32 %v698_v28, %v405_v46  ;;  %v424_v49 = vpop.f32.mrf.mxu3 }
  0xbd   : > { %437 = vst.msk [vmem:[%s231_s29 + $0x4] sm:$0xf] %vm435_vm0, %v432_v47  ;;  %v425_v50 = vadd.f32 %v424_v49, %v406_v48 }
  0xbf   : > { %v430_v51 = vmax.f32 %v425_v50, 0.0 }
  0xc1   : > { %v434_v52 = vpack.c.bf16 %v430_v51, %v430_v51 }
  0xc3   : > { %439 = vst.msk [vmem:[%s231_s29 + $0xc] sm:$0xf] %vm435_vm0, %v434_v52 }
  0xc4 PF: > { %s13_s14 = sadd.s32 1, %s721_s14   ;;  %s813_s12 = smov %s717_s13 }
  0xc5   : > { %p10_p5 = scmp.ge.s32.totalorder %s13_s14, 6   ;;  %s814_s13 = smov %s816_s15 }
  0xc7   :  { %12 = sbr.rel (!%p10_p5) target bundleno = 2 (0x2), region = 65 }

// kernel: double_crossing_upsample.11
= control target key start
LH: loop header
LB: loop body
LE: loop exit
PB: predicated region body
PF: predicated region fallthrough
CT: control target
= control target key end

     0   :  { %s748_s12 = smov 0   ;;  %s750_s13 = smov 0   ;;  %s854_s0 = inlined_call_operand.vmem [shape: bf16[4,128,128], index: 0, kind: input, shape index: {}]   ;;  %s855_s1 = inlined_call_operand.vmem [shape: bf16[4,128,8], index: 1, kind: input, shape index: {}]   ;;  %s856_s2 = inlined_call_operand.vmem [shape: f32[1,8], index: 2, kind: input, shape index: {}]   ;;  %s857_s3 = inlined_call_operand.vmem [shape: bf16[4,128,8], index: 3, kind: output, shape index: {}]  }
   0x1   :  { %s752_s14 = smov 0  }
   0x2 LB: > { %s25_s15 = sadd.s32 1, %s722_s13  ;;  %p563_p0 = scmp.ge.s32.totalorder %s726_s14, 1  ;;  %s726_s14 = sphi %s752_s14, %s13_s14   ;;  %s722_s13 = sphi %s750_s13, %s859_s13   ;;  %s718_s12 = sphi %s748_s12, %s858_s12  }
   0x3   : > { %p27_p1 = scmp.ge.s32.totalorder %s25_s15, 4  ;;  %p168_p2 = scmp.lt.s32.totalorder %s726_s14, 5 }
   0x5   : > { %s861_s15 = smov (%p27_p1, %s25_s15), 0  ;;  %p169_p3 = pnand %p563_p0, %p168_p2 }
   0x6   : > { %p206_p4 = scmp.lt.s32.totalorder (!%p169_p3), %s718_s12, 3 }
   0x7   : > { %172 = sbr.rel (%p169_p3) target bundleno = 212 (0xd4), region = 32 }
   0xc   : > { %s863_s12 = smov (!%p206_p4, %s718_s12), 3  ;;  %v789_v16 = vld [vmem:[%s856_s2] ss:$0 sm:$0xff]  ;;  %vm443_vm0 = vcmask 60416  }
   0xd   : > { %s766_s16 = sshll.u32 %s863_s12, 6 }
   0xe   : > { %s772_s19 = scalar_lea.vmem %s855_s1, %s766_s16  ;;  %s213_s22 = scalar_lea.vmem %s854_s0, %s766_s16 }
   0xf   : > { %v654_v0 = vld [vmem:[%s772_s19 + $0x38] sm:$0xff]  ;;  %v653_v1 = vld [vmem:[%s772_s19 + $0x30] sm:$0xff]  ;;  %v652_v2 = vld [vmem:[%s772_s19 + $0x28] sm:$0xff]  ;;  %s797_s27 = scalar_lea.vmem %s857_s3, %s766_s16 }
  0x10   : > { %362 = vmatpush.bf16.msra.mxu0 %v654_v0  ;;  %655 = vmatpush.bf16.msra.mxu1 %v654_v0  ;;  %v651_v3 = vld [vmem:[%s772_s19 + $0x20] sm:$0xff]  ;;  %v650_v4 = vld [vmem:[%s772_s19 + $0x18] sm:$0xff]  ;;  %v649_v5 = vld [vmem:[%s772_s19 + $0x10] sm:$0xff] }
  0x11   : > { %656 = vmatpush.bf16.msra.mxu2 %v654_v0  ;;  %657 = vmatpush.bf16.msra.mxu3 %v654_v0  ;;  %v648_v6 = vld [vmem:[%s772_s19 + $0x8] sm:$0xff]  ;;  %v647_v7 = vld [vmem:[%s772_s19] sm:$0xff]  ;;  %v641_v9 = vld [vmem:[%s213_s22 + $0x10] sm:$0xff] }
  0x12   : > { %v639_v8 = vld [vmem:[%s213_s22] sm:$0xff]  ;;  %v645_v11 = vld [vmem:[%s213_s22 + $0x30] sm:$0xff]  ;;  %v640_v12 = vld [vmem:[%s213_s22 + $0x8] sm:$0xff] }
  0x13   : > { %v643_v10 = vld [vmem:[%s213_s22 + $0x20] sm:$0xff]  ;;  %v642_v13 = vld [vmem:[%s213_s22 + $0x18] sm:$0xff]  ;;  %v644_v14 = vld [vmem:[%s213_s22 + $0x28] sm:$0xff] }
  0x14   : > { %363 = vmatpush.bf16.msra.mxu0 %v653_v1  ;;  %658 = vmatpush.bf16.msra.mxu1 %v653_v1  ;;  %v646_v15 = vld [vmem:[%s213_s22 + $0x38] sm:$0xff] }
  0x15   : > { %659 = vmatpush.bf16.msra.mxu2 %v653_v1  ;;  %660 = vmatpush.bf16.msra.mxu3 %v653_v1 }
  0x18   : > { %364 = vmatpush.bf16.msra.mxu0 %v652_v2  ;;  %661 = vmatpush.bf16.msra.mxu1 %v652_v2 }
  0x19   : > { %662 = vmatpush.bf16.msra.mxu2 %v652_v2  ;;  %663 = vmatpush.bf16.msra.mxu3 %v652_v2 }
  0x1c   : > { %365 = vmatpush.bf16.msra.mxu0 %v651_v3  ;;  %664 = vmatpush.bf16.msra.mxu1 %v651_v3 }
  0x1d   : > { %665 = vmatpush.bf16.msra.mxu2 %v651_v3  ;;  %666 = vmatpush.bf16.msra.mxu3 %v651_v3 }
  0x20   : > { %366 = vmatpush.bf16.msra.mxu0 %v650_v4  ;;  %667 = vmatpush.bf16.msra.mxu1 %v650_v4 }
  0x21   : > { %668 = vmatpush.bf16.msra.mxu2 %v650_v4  ;;  %669 = vmatpush.bf16.msra.mxu3 %v650_v4 }
  0x24   : > { %367 = vmatpush.bf16.msra.mxu0 %v649_v5  ;;  %670 = vmatpush.bf16.msra.mxu1 %v649_v5 }
  0x25   : > { %671 = vmatpush.bf16.msra.mxu2 %v649_v5  ;;  %672 = vmatpush.bf16.msra.mxu3 %v649_v5 }
  0x28   : > { %368 = vmatpush.bf16.msra.mxu0 %v648_v6  ;;  %673 = vmatpush.bf16.msra.mxu1 %v648_v6 }
  0x29   : > { %674 = vmatpush.bf16.msra.mxu2 %v648_v6  ;;  %675 = vmatpush.bf16.msra.mxu3 %v648_v6 }
  0x2c   : > { %369 = vmatpush.bf16.msra.mxu0 %v647_v7  ;;  %676 = vmatpush.bf16.msra.mxu1 %v647_v7 }
  0x2d   : > { %677 = vmatpush.bf16.msra.mxu2 %v647_v7  ;;  %678 = vmatpush.bf16.msra.mxu3 %v647_v7 }
  0x2f   : > { %370 = vmatmul.bf16.vlgmr.msra.gmra.mxu0 %v639_v8  ;;  %380 = vmatmul.bf16.vlgmr.msra.gmra.mxu1 %v641_v9 }
  0x30   : > { %390 = vmatmul.bf16.vlgmr.msra.gmra.mxu2 %v643_v10  ;;  %400 = vmatmul.bf16.vlgmr.msra.gmra.mxu3 %v645_v11 }
  0x3f   : > { %375 = vmatmul.bf16.gmra.mxu0 %v640_v12  ;;  %385 = vmatmul.bf16.gmra.mxu1 %v642_v13 }
  0x40   : > { %395 = vmatmul.bf16.gmra.mxu2 %v644_v14  ;;  %405 = vmatmul.bf16.gmra.mxu3 %v646_v15 }
  0xac   : > { %v371_v17 = vpop.f32.mrf.mxu0  ;;  %v381_v18 = vpop.f32.mrf.mxu1 }
  0xad   : > { %v372_v19 = vadd.f32 %v789_v16, %v371_v17  ;;  %v382_v20 = vadd.f32 %v789_v16, %v381_v18 }
  0xaf   : > { %v411_v21 = vmax.f32 %v372_v19, 0.0  ;;  %v415_v22 = vmax.f32 %v382_v20, 0.0 }
  0xb1   : > { %v427_v23 = vpack.c.bf16 %v411_v21, %v411_v21  ;;  %v431_v24 = vpack.c.bf16 %v415_v22, %v415_v22 }
  0xb3   : > { %444 = vst.msk [vmem:[%s797_s27] sm:$0xf] %vm443_vm0, %v427_v23  ;;  %v391_v25 = vpop.f32.mrf.mxu2  ;;  %v401_v26 = vpop.f32.mrf.mxu3 }
  0xb4   : > { %448 = vst.msk [vmem:[%s797_s27 + $0x10] sm:$0xf] %vm443_vm0, %v431_v24  ;;  %v392_v27 = vadd.f32 %v789_v16, %v391_v25  ;;  %v402_v28 = vadd.f32 %v789_v16, %v401_v26  ;;  %v373_v29 = vpop.f32.mrf.mxu0  ;;  %v383_v30 = vpop.f32.mrf.mxu1 }
  0xb5   : > { %v374_v31 = vadd.f32 %v789_v16, %v373_v29  ;;  %v384_v32 = vadd.f32 %v789_v16, %v383_v30 }
  0xb6   : > { %v419_v33 = vmax.f32 %v392_v27, 0.0  ;;  %v423_v34 = vmax.f32 %v402_v28, 0.0 }
  0xb7   : > { %v412_v35 = vmax.f32 %v374_v31, 0.0  ;;  %v416_v36 = vmax.f32 %v384_v32, 0.0 }
  0xb8   : > { %v435_v37 = vpack.c.bf16 %v419_v33, %v419_v33  ;;  %v439_v38 = vpack.c.bf16 %v423_v34, %v423_v34 }
  0xb9   : > { %v428_v39 = vpack.c.bf16 %v412_v35, %v412_v35  ;;  %v432_v40 = vpack.c.bf16 %v416_v36, %v416_v36 }
  0xba   : > { %452 = vst.msk [vmem:[%s797_s27 + $0x20] sm:$0xf] %vm443_vm0, %v435_v37 }
  0xbb   : > { %456 = vst.msk [vmem:[%s797_s27 + $0x30] sm:$0xf] %vm443_vm0, %v439_v38  ;;  %v393_v41 = vpop.f32.mrf.mxu2  ;;  %v403_v42 = vpop.f32.mrf.mxu3 }
  0xbc   : > { %445 = vst.msk [vmem:[%s797_s27 + $0x4] sm:$0xf] %vm443_vm0, %v428_v39  ;;  %v394_v43 = vadd.f32 %v789_v16, %v393_v41  ;;  %v404_v44 = vadd.f32 %v789_v16, %v403_v42  ;;  %v376_v45 = vpop.f32.mrf.mxu0  ;;  %v386_v46 = vpop.f32.mrf.mxu1 }
  0xbd   : > { %449 = vst.msk [vmem:[%s797_s27 + $0x14] sm:$0xf] %vm443_vm0, %v432_v40  ;;  %v377_v47 = vadd.f32 %v789_v16, %v376_v45  ;;  %v387_v48 = vadd.f32 %v789_v16, %v386_v46 }
  0xbe   : > { %v420_v49 = vmax.f32 %v394_v43, 0.0  ;;  %v424_v50 = vmax.f32 %v404_v44, 0.0 }
  0xbf   : > { %v413_v51 = vmax.f32 %v377_v47, 0.0  ;;  %v417_v52 = vmax.f32 %v387_v48, 0.0 }
  0xc0   : > { %v436_v53 = vpack.c.bf16 %v420_v49, %v420_v49  ;;  %v440_v54 = vpack.c.bf16 %v424_v50, %v424_v50 }
  0xc1   : > { %v429_v55 = vpack.c.bf16 %v413_v51, %v413_v51  ;;  %v433_v56 = vpack.c.bf16 %v417_v52, %v417_v52 }
  0xc2   : > { %453 = vst.msk [vmem:[%s797_s27 + $0x24] sm:$0xf] %vm443_vm0, %v436_v53 }
  0xc3   : > { %457 = vst.msk [vmem:[%s797_s27 + $0x34] sm:$0xf] %vm443_vm0, %v440_v54  ;;  %v396_v57 = vpop.f32.mrf.mxu2  ;;  %v406_v58 = vpop.f32.mrf.mxu3 }
  0xc4   : > { %446 = vst.msk [vmem:[%s797_s27 + $0x8] sm:$0xf] %vm443_vm0, %v429_v55  ;;  %v397_v59 = vadd.f32 %v789_v16, %v396_v57  ;;  %v407_v60 = vadd.f32 %v789_v16, %v406_v58  ;;  %v378_v61 = vpop.f32.mrf.mxu0  ;;  %v388_v62 = vpop.f32.mrf.mxu1 }
  0xc5   : > { %450 = vst.msk [vmem:[%s797_s27 + $0x18] sm:$0xf] %vm443_vm0, %v433_v56  ;;  %v379_v63 = vadd.f32 %v789_v16, %v378_v61  ;;  %v389_v0 = vadd.f32 %v789_v16, %v388_v62 }
  0xc6   : > { %v421_v1 = vmax.f32 %v397_v59, 0.0  ;;  %v425_v2 = vmax.f32 %v407_v60, 0.0 }
  0xc7   : > { %v414_v3 = vmax.f32 %v379_v63, 0.0  ;;  %v418_v4 = vmax.f32 %v389_v0, 0.0 }
  0xc8   : > { %v437_v5 = vpack.c.bf16 %v421_v1, %v421_v1  ;;  %v441_v6 = vpack.c.bf16 %v425_v2, %v425_v2 }
  0xc9   : > { %v430_v7 = vpack.c.bf16 %v414_v3, %v414_v3  ;;  %v434_v8 = vpack.c.bf16 %v418_v4, %v418_v4 }
  0xca   : > { %454 = vst.msk [vmem:[%s797_s27 + $0x28] sm:$0xf] %vm443_vm0, %v437_v5 }
  0xcb   : > { %458 = vst.msk [vmem:[%s797_s27 + $0x38] sm:$0xf] %vm443_vm0, %v441_v6  ;;  %v398_v9 = vpop.f32.mrf.mxu2  ;;  %v408_v10 = vpop.f32.mrf.mxu3 }
  0xcc   : > { %447 = vst.msk [vmem:[%s797_s27 + $0xc] sm:$0xf] %vm443_vm0, %v430_v7  ;;  %v399_v11 = vadd.f32 %v789_v16, %v398_v9  ;;  %v409_v12 = vadd.f32 %v789_v16, %v408_v10 }
  0xcd   : > { %451 = vst.msk [vmem:[%s797_s27 + $0x1c] sm:$0xf] %vm443_vm0, %v434_v8 }
  0xce   : > { %v422_v13 = vmax.f32 %v399_v11, 0.0  ;;  %v426_v14 = vmax.f32 %v409_v12, 0.0 }
  0xd0   : > { %v438_v15 = vpack.c.bf16 %v422_v13, %v422_v13  ;;  %v442_v17 = vpack.c.bf16 %v426_v14, %v426_v14 }
  0xd2   : > { %455 = vst.msk [vmem:[%s797_s27 + $0x2c] sm:$0xf] %vm443_vm0, %v438_v15 }
  0xd3   : > { %459 = vst.msk [vmem:[%s797_s27 + $0x3c] sm:$0xf] %vm443_vm0, %v442_v17 }
  0xd4 PF: > { %s13_s14 = sadd.s32 1, %s726_s14   ;;  %s858_s12 = smov %s722_s13 }
  0xd5   : > { %p10_p5 = scmp.ge.s32.totalorder %s13_s14, 6   ;;  %s859_s13 = smov %s861_s15 }
  0xd7   :  { %12 = sbr.rel (!%p10_p5) target bundleno = 2 (0x2), region = 65 }

// kernel: double_crossing_upsample.14
= control target key start
LH: loop header
LB: loop body
LE: loop exit
PB: predicated region body
PF: predicated region fallthrough
CT: control target
= control target key end

     0   :  { %s2163_s12 = smov 0   ;;  %s2165_s13 = smov 0   ;;  %s2732_s0 = inlined_call_operand.vmem [shape: bf16[1,2048,8], index: 0, kind: input, shape index: {}]   ;;  %s2733_s1 = inlined_call_operand.vmem [shape: bf16[1,8,4], index: 1, kind: input, shape index: {}]   ;;  %s2734_s2 = inlined_call_operand.vmem [shape: f32[1,4], index: 2, kind: input, shape index: {}]   ;;  %s2735_s3 = inlined_call_operand.vmem [shape: bf16[1,2048,4], index: 3, kind: output, shape index: {}]  }
   0x1   :  { %s2167_s14 = smov 0  }
   0x2 LB: > { %s22_s15 = sadd.s32 1, %s2137_s13  ;;  %p1699_p0 = scmp.ge.s32.totalorder %s2141_s14, 1  ;;  %s2141_s14 = sphi %s2167_s14, %s13_s14   ;;  %s2137_s13 = sphi %s2165_s13, %s2737_s13   ;;  %s2133_s12 = sphi %s2163_s12, %s2736_s12  }
   0x3   : > { %p23_p1 = scmp.ge.s32.totalorder %s22_s15, 2  ;;  %p167_p2 = scmp.lt.s32.totalorder %s2141_s14, 3 }
   0x5   : > { %s2739_s15 = smov (%p23_p1, %s22_s15), 0  ;;  %p168_p3 = pnand %p1699_p0, %p167_p2 }
   0x6   : > { %s1700_s18 = sshll.u32 (!%p168_p3), %s2133_s12, 7 }
   0x7   : > { %171 = sbr.rel (%p168_p3) target bundleno = 406 (0x196), region = 32  ;;  %p206_p4 = scmp.lt.s32.totalorder (!%p168_p3), %s1700_s18, 255 }
   0xc   : > { %v356_v0 = vld [vmem:[%s2733_s1] sm:$0xf]  ;;  %vm874_vm0 = vcmask 1043456   ;;  %s2741_s18 = smov (!%p206_p4, %s1700_s18), 255  ;;  %vm681_vm1 = vcmask 64512   ;;  %vm1463_vm2 = vcmask 27648  }
   0xd   : > { %v876_v1 = vsel %vm874_vm0, %v356_v0, 0  ;;  %s1701_s19 = sshll.u32 %s2741_s18, 2  ;;  %v2261_v34 = vld [vmem:[%s2734_s2] ss:$0 sm:$0xff] }
   0xe   : > { %885 = vmatpush.bf16.msra.mxu0 %v876_v1  ;;  %2090 = vmatpush.bf16.msra.mxu1 %v876_v1  ;;  %s2192_s22 = scalar_lea.vmem %s2732_s0, %s1701_s19  ;;  %s2276_s27 = scalar_lea.vmem %s2735_s3, %s1701_s19 }
   0xf   : > { %2091 = vmatpush.bf16.msra.mxu2 %v876_v1  ;;  %2092 = vmatpush.bf16.msra.mxu3 %v876_v1  ;;  %v2026_v2 = vld [vmem:[%s2192_s22] sm:$0xff]  ;;  %v2027_v6 = vld [vmem:[%s2192_s22 + $0x8] sm:$0xff]  ;;  %v2028_v10 = vld [vmem:[%s2192_s22 + $0x10] sm:$0xff] }
  0x10   : > { %v2042_v3 = vld [vmem:[%s2192_s22 + $0x80] sm:$0xff]  ;;  %v2043_v7 = vld [vmem:[%s2192_s22 + $0x88] sm:$0xff]  ;;  %v2044_v11 = vld [vmem:[%s2192_s22 + $0x90] sm:$0xff] }
  0x11   : > { %v2058_v4 = vld [vmem:[%s2192_s22 + $0x100] sm:$0xff]  ;;  %1960 = vmatmul.msk.bf16.vlgmr.msra.gmra.mxu0 %vm681_vm1, %v2026_v2  ;;  %1976 = vmatmul.msk.bf16.vlgmr.msra.gmra.mxu1 %vm681_vm1, %v2042_v3  ;;  %v2059_v8 = vld [vmem:[%s2192_s22 + $0x108] sm:$0xff]  ;;  %v2060_v12 = vld [vmem:[%s2192_s22 + $0x110] sm:$0xff] }
  0x12   : > { %v2074_v5 = vld [vmem:[%s2192_s22 + $0x180] sm:$0xff]  ;;  %1992 = vmatmul.msk.bf16.vlgmr.msra.gmra.mxu2 %vm681_vm1, %v2058_v4  ;;  %v2075_v9 = vld [vmem:[%s2192_s22 + $0x188] sm:$0xff]  ;;  %v2076_v13 = vld [vmem:[%s2192_s22 + $0x190] sm:$0xff] }
  0x13   : > { %2008 = vmatmul.msk.bf16.vlgmr.msra.gmra.mxu3 %vm681_vm1, %v2074_v5  ;;  %v2029_v14 = vld [vmem:[%s2192_s22 + $0x18] sm:$0xff]  ;;  %v2030_v18 = vld [vmem:[%s2192_s22 + $0x20] sm:$0xff]  ;;  %v2031_v22 = vld [vmem:[%s2192_s22 + $0x28] sm:$0xff] }
  0x14   : > { %v2045_v15 = vld [vmem:[%s2192_s22 + $0x98] sm:$0xff]  ;;  %v2046_v19 = vld [vmem:[%s2192_s22 + $0xa0] sm:$0xff]  ;;  %v2047_v23 = vld [vmem:[%s2192_s22 + $0xa8] sm:$0xff] }
  0x15   : > { %v2061_v16 = vld [vmem:[%s2192_s22 + $0x118] sm:$0xff]  ;;  %v2062_v20 = vld [vmem:[%s2192_s22 + $0x120] sm:$0xff]  ;;  %v2063_v24 = vld [vmem:[%s2192_s22 + $0x128] sm:$0xff] }
  0x16   : > { %v2077_v17 = vld [vmem:[%s2192_s22 + $0x198] sm:$0xff]  ;;  %v2078_v21 = vld [vmem:[%s2192_s22 + $0x1a0] sm:$0xff]  ;;  %v2079_v25 = vld [vmem:[%s2192_s22 + $0x1a8] sm:$0xff] }
  0x17   : > { %v2032_v26 = vld [vmem:[%s2192_s22 + $0x30] sm:$0xff]  ;;  %v2033_v30 = vld [vmem:[%s2192_s22 + $0x38] sm:$0xff]  ;;  %v2034_v35 = vld [vmem:[%s2192_s22 + $0x40] sm:$0xff] }
  0x18   : > { %v2048_v27 = vld [vmem:[%s2192_s22 + $0xb0] sm:$0xff]  ;;  %v2049_v31 = vld [vmem:[%s2192_s22 + $0xb8] sm:$0xff]  ;;  %v2050_v36 = vld [vmem:[%s2192_s22 + $0xc0] sm:$0xff] }
  0x19   : > { %v2064_v28 = vld [vmem:[%s2192_s22 + $0x130] sm:$0xff]  ;;  %v2065_v32 = vld [vmem:[%s2192_s22 + $0x138] sm:$0xff]  ;;  %v2066_v39 = vld [vmem:[%s2192_s22 + $0x140] sm:$0xff] }
  0x1a   : > { %v2080_v29 = vld [vmem:[%s2192_s22 + $0x1b0] sm:$0xff]  ;;  %v2081_v33 = vld [vmem:[%s2192_s22 + $0x1b8] sm:$0xff]  ;;  %v2082_v40 = vld [vmem:[%s2192_s22 + $0x1c0] sm:$0xff] }
  0x1b   : > { %v2035_v1 = vld [vmem:[%s2192_s22 + $0x48] sm:$0xff] }
  0x1c   : > { %v2051_v2 = vld [vmem:[%s2192_s22 + $0xc8] sm:$0xff] }
  0x21   : > { %1961 = vmatmul.msk.bf16.gmra.mxu0 %vm681_vm1, %v2027_v6  ;;  %1977 = vmatmul.msk.bf16.gmra.mxu1 %vm681_vm1, %v2043_v7  ;;  %v2067_v7 = vld [vmem:[%s2192_s22 + $0x148] sm:$0xff] }
  0x22   : > { %1993 = vmatmul.msk.bf16.gmra.mxu2 %vm681_vm1, %v2059_v8  ;;  %v2083_v8 = vld [vmem:[%s2192_s22 + $0x1c8] sm:$0xff] }
  0x23   : > { %2009 = vmatmul.msk.bf16.gmra.mxu3 %vm681_vm1, %v2075_v9 }
  0x31   : > { %1962 = vmatmul.msk.bf16.gmra.mxu0 %vm681_vm1, %v2028_v10  ;;  %1978 = vmatmul.msk.bf16.gmra.mxu1 %vm681_vm1, %v2044_v11 }
  0x32   : > { %1994 = vmatmul.msk.bf16.gmra.mxu2 %vm681_vm1, %v2060_v12 }
  0x33   : > { %2010 = vmatmul.msk.bf16.gmra.mxu3 %vm681_vm1, %v2076_v13 }
  0x41   : > { %1963 = vmatmul.msk.bf16.gmra.mxu0 %vm681_vm1, %v2029_v14  ;;  %1979 = vmatmul.msk.bf16.gmra.mxu1 %vm681_vm1, %v2045_v15 }
  0x42   : > { %1995 = vmatmul.msk.bf16.gmra.mxu2 %vm681_vm1, %v2061_v16 }
  0x43   : > { %2011 = vmatmul.msk.bf16.gmra.mxu3 %vm681_vm1, %v2077_v17 }
  0x51   : > { %1964 = vmatmul.msk.bf16.gmra.mxu0 %vm681_vm1, %v2030_v18  ;;  %1980 = vmatmul.msk.bf16.gmra.mxu1 %vm681_vm1, %v2046_v19 }
  0x52   : > { %1996 = vmatmul.msk.bf16.gmra.mxu2 %vm681_vm1, %v2062_v20 }
  0x53   : > { %2012 = vmatmul.msk.bf16.gmra.mxu3 %vm681_vm1, %v2078_v21 }
  0x61   : > { %1965 = vmatmul.msk.bf16.gmra.mxu0 %vm681_vm1, %v2031_v22  ;;  %1981 = vmatmul.msk.bf16.gmra.mxu1 %vm681_vm1, %v2047_v23 }
  0x62   : > { %1997 = vmatmul.msk.bf16.gmra.mxu2 %vm681_vm1, %v2063_v24 }
  0x63   : > { %2013 = vmatmul.msk.bf16.gmra.mxu3 %vm681_vm1, %v2079_v25 }
  0x71   : > { %1966 = vmatmul.msk.bf16.gmra.mxu0 %vm681_vm1, %v2032_v26  ;;  %1982 = vmatmul.msk.bf16.gmra.mxu1 %vm681_vm1, %v2048_v27 }
  0x72   : > { %1998 = vmatmul.msk.bf16.gmra.mxu2 %vm681_vm1, %v2064_v28 }
  0x73   : > { %2014 = vmatmul.msk.bf16.gmra.mxu3 %vm681_vm1, %v2080_v29 }
  0x81   : > { %1967 = vmatmul.msk.bf16.gmra.mxu0 %vm681_vm1, %v2033_v30  ;;  %1983 = vmatmul.msk.bf16.gmra.mxu1 %vm681_vm1, %v2049_v31 }
  0x82   : > { %1999 = vmatmul.msk.bf16.gmra.mxu2 %vm681_vm1, %v2065_v32 }
  0x83   : > { %2015 = vmatmul.msk.bf16.gmra.mxu3 %vm681_vm1, %v2081_v33 }
  0x8e   : > { %v887_v37 = vpop.f32.mrf.mxu0  ;;  %v967_v38 = vpop.f32.mrf.mxu1 }
  0x8f   : > { %v888_v41 = vadd.f32 %v2261_v34, %v887_v37  ;;  %v968_v42 = vadd.f32 %v2261_v34, %v967_v38  ;;  %v2036_v38 = vld [vmem:[%s2192_s22 + $0x50] sm:$0xff] }
  0x91   : > { %v1207_v43 = vmax.f32 %v888_v41, 0.0  ;;  %v1239_v44 = vmax.f32 %v968_v42, 0.0  ;;  %1968 = vmatmul.msk.bf16.gmra.mxu0 %vm681_vm1, %v2034_v35  ;;  %1984 = vmatmul.msk.bf16.gmra.mxu1 %vm681_vm1, %v2050_v36 }
  0x92   : > { %2000 = vmatmul.msk.bf16.gmra.mxu2 %vm681_vm1, %v2066_v39  ;;  %v2052_v39 = vld [vmem:[%s2192_s22 + $0xd0] sm:$0xff] }
  0x93   : > { %2016 = vmatmul.msk.bf16.gmra.mxu3 %vm681_vm1, %v2082_v40  ;;  %v1335_v45 = vpack.c.bf16 %v1207_v43, %v1207_v43  ;;  %v1367_v46 = vpack.c.bf16 %v1239_v44, %v1239_v44  ;;  %v2068_v44 = vld [vmem:[%s2192_s22 + $0x150] sm:$0xff] }
  0x95   : > { %1464 = vst.msk [vmem:[%s2276_s27] sm:$0xf] %vm1463_vm2, %v1335_v45  ;;  %v1047_v47 = vpop.f32.mrf.mxu2  ;;  %v2084_v45 = vld [vmem:[%s2192_s22 + $0x1d0] sm:$0xff] }
  0x96   : > { %v1127_v48 = vpop.f32.mrf.mxu3  ;;  %1496 = vst.msk [vmem:[%s2276_s27 + $0x80] sm:$0xf] %vm1463_vm2, %v1367_v46  ;;  %v1048_v49 = vadd.f32 %v2261_v34, %v1047_v47  ;;  %v889_v51 = vpop.f32.mrf.mxu0 }
  0x97   : > { %v1128_v50 = vadd.f32 %v2261_v34, %v1127_v48  ;;  %v969_v52 = vpop.f32.mrf.mxu1  ;;  %v890_v53 = vadd.f32 %v2261_v34, %v889_v51 }
  0x98   : > { %v970_v54 = vadd.f32 %v2261_v34, %v969_v52  ;;  %v1271_v55 = vmax.f32 %v1048_v49, 0.0 }
  0x99   : > { %v1303_v56 = vmax.f32 %v1128_v50, 0.0  ;;  %v1208_v57 = vmax.f32 %v890_v53, 0.0 }
  0x9a   : > { %v1240_v58 = vmax.f32 %v970_v54, 0.0  ;;  %v1399_v59 = vpack.c.bf16 %v1271_v55, %v1271_v55 }
  0x9b   : > { %v1431_v60 = vpack.c.bf16 %v1303_v56, %v1303_v56  ;;  %v1336_v61 = vpack.c.bf16 %v1208_v57, %v1208_v57 }
  0x9c   : > { %v1368_v62 = vpack.c.bf16 %v1240_v58, %v1240_v58  ;;  %1528 = vst.msk [vmem:[%s2276_s27 + $0x100] sm:$0xf] %vm1463_vm2, %v1399_v59 }
  0x9d   : > { %1560 = vst.msk [vmem:[%s2276_s27 + $0x180] sm:$0xf] %vm1463_vm2, %v1431_v60  ;;  %v1049_v63 = vpop.f32.mrf.mxu2 }
  0x9e   : > { %v1129_v0 = vpop.f32.mrf.mxu3  ;;  %1465 = vst.msk [vmem:[%s2276_s27 + $0x4] sm:$0xf] %vm1463_vm2, %v1336_v61  ;;  %v1050_v3 = vadd.f32 %v2261_v34, %v1049_v63  ;;  %v892_v5 = vpop.f32.mrf.mxu0 }
  0x9f   : > { %v1130_v4 = vadd.f32 %v2261_v34, %v1129_v0  ;;  %v972_v6 = vpop.f32.mrf.mxu1  ;;  %1497 = vst.msk [vmem:[%s2276_s27 + $0x84] sm:$0xf] %vm1463_vm2, %v1368_v62  ;;  %v893_v9 = vadd.f32 %v2261_v34, %v892_v5 }
  0xa0   : > { %v973_v10 = vadd.f32 %v2261_v34, %v972_v6  ;;  %v1272_v11 = vmax.f32 %v1050_v3, 0.0 }
  0xa1   : > { %v1304_v12 = vmax.f32 %v1130_v4, 0.0  ;;  %v1209_v13 = vmax.f32 %v893_v9, 0.0  ;;  %1969 = vmatmul.msk.bf16.gmra.mxu0 %vm681_vm1, %v2035_v1  ;;  %1985 = vmatmul.msk.bf16.gmra.mxu1 %vm681_vm1, %v2051_v2 }
  0xa2   : > { %v1241_v14 = vmax.f32 %v973_v10, 0.0  ;;  %v1400_v15 = vpack.c.bf16 %v1272_v11, %v1272_v11  ;;  %2001 = vmatmul.msk.bf16.gmra.mxu2 %vm681_vm1, %v2067_v7  ;;  %v2037_v10 = vld [vmem:[%s2192_s22 + $0x58] sm:$0xff] }
  0xa3   : > { %v1432_v16 = vpack.c.bf16 %v1304_v12, %v1304_v12  ;;  %2017 = vmatmul.msk.bf16.gmra.mxu3 %vm681_vm1, %v2083_v8  ;;  %v1337_v17 = vpack.c.bf16 %v1209_v13, %v1209_v13  ;;  %v2053_v11 = vld [vmem:[%s2192_s22 + $0xd8] sm:$0xff] }
  0xa4   : > { %v1369_v18 = vpack.c.bf16 %v1241_v14, %v1241_v14  ;;  %1529 = vst.msk [vmem:[%s2276_s27 + $0x104] sm:$0xf] %vm1463_vm2, %v1400_v15 }
  0xa5   : > { %1561 = vst.msk [vmem:[%s2276_s27 + $0x184] sm:$0xf] %vm1463_vm2, %v1432_v16  ;;  %v1052_v19 = vpop.f32.mrf.mxu2  ;;  %v2069_v16 = vld [vmem:[%s2192_s22 + $0x158] sm:$0xff] }
  0xa6   : > { %v1132_v20 = vpop.f32.mrf.mxu3  ;;  %1466 = vst.msk [vmem:[%s2276_s27 + $0x8] sm:$0xf] %vm1463_vm2, %v1337_v17  ;;  %v1053_v21 = vadd.f32 %v2261_v34, %v1052_v19  ;;  %v894_v23 = vpop.f32.mrf.mxu0  ;;  %v2085_v17 = vld [vmem:[%s2192_s22 + $0x1d8] sm:$0xff] }
  0xa7   : > { %v1133_v22 = vadd.f32 %v2261_v34, %v1132_v20  ;;  %v974_v24 = vpop.f32.mrf.mxu1  ;;  %1498 = vst.msk [vmem:[%s2276_s27 + $0x88] sm:$0xf] %vm1463_vm2, %v1369_v18  ;;  %v895_v25 = vadd.f32 %v2261_v34, %v894_v23 }
  0xa8   : > { %v975_v26 = vadd.f32 %v2261_v34, %v974_v24  ;;  %v1273_v27 = vmax.f32 %v1053_v21, 0.0 }
  0xa9   : > { %v1305_v28 = vmax.f32 %v1133_v22, 0.0  ;;  %v1210_v29 = vmax.f32 %v895_v25, 0.0 }
  0xaa   : > { %v1242_v30 = vmax.f32 %v975_v26, 0.0  ;;  %v1401_v31 = vpack.c.bf16 %v1273_v27, %v1273_v27 }
  0xab   : > { %v1433_v32 = vpack.c.bf16 %v1305_v28, %v1305_v28  ;;  %v1338_v33 = vpack.c.bf16 %v1210_v29, %v1210_v29 }
  0xac   : > { %v1370_v35 = vpack.c.bf16 %v1242_v30, %v1242_v30  ;;  %1530 = vst.msk [vmem:[%s2276_s27 + $0x108] sm:$0xf] %vm1463_vm2, %v1401_v31 }
  0xad   : > { %1562 = vst.msk [vmem:[%s2276_s27 + $0x188] sm:$0xf] %vm1463_vm2, %v1433_v32  ;;  %v1054_v36 = vpop.f32.mrf.mxu2 }
  0xae   : > { %v1134_v37 = vpop.f32.mrf.mxu3  ;;  %1467 = vst.msk [vmem:[%s2276_s27 + $0xc] sm:$0xf] %vm1463_vm2, %v1338_v33  ;;  %v1055_v40 = vadd.f32 %v2261_v34, %v1054_v36  ;;  %v897_v42 = vpop.f32.mrf.mxu0 }
  0xaf   : > { %v1135_v41 = vadd.f32 %v2261_v34, %v1134_v37  ;;  %v977_v43 = vpop.f32.mrf.mxu1  ;;  %1499 = vst.msk [vmem:[%s2276_s27 + $0x8c] sm:$0xf] %vm1463_vm2, %v1370_v35  ;;  %v898_v46 = vadd.f32 %v2261_v34, %v897_v42 }
  0xb0   : > { %v978_v47 = vadd.f32 %v2261_v34, %v977_v43  ;;  %v1274_v48 = vmax.f32 %v1055_v40, 0.0 }
  0xb1   : > { %v1306_v49 = vmax.f32 %v1135_v41, 0.0  ;;  %v1211_v50 = vmax.f32 %v898_v46, 0.0  ;;  %1970 = vmatmul.msk.bf16.gmra.mxu0 %vm681_vm1, %v2036_v38  ;;  %1986 = vmatmul.msk.bf16.gmra.mxu1 %vm681_vm1, %v2052_v39 }
  0xb2   : > { %v1243_v51 = vmax.f32 %v978_v47, 0.0  ;;  %v1402_v52 = vpack.c.bf16 %v1274_v48, %v1274_v48  ;;  %2002 = vmatmul.msk.bf16.gmra.mxu2 %vm681_vm1, %v2068_v44  ;;  %v2038_v47 = vld [vmem:[%s2192_s22 + $0x60] sm:$0xff] }
  0xb3   : > { %v1434_v53 = vpack.c.bf16 %v1306_v49, %v1306_v49  ;;  %2018 = vmatmul.msk.bf16.gmra.mxu3 %vm681_vm1, %v2084_v45  ;;  %v1339_v54 = vpack.c.bf16 %v1211_v50, %v1211_v50  ;;  %v2054_v48 = vld [vmem:[%s2192_s22 + $0xe0] sm:$0xff] }
  0xb4   : > { %v1371_v55 = vpack.c.bf16 %v1243_v51, %v1243_v51  ;;  %1531 = vst.msk [vmem:[%s2276_s27 + $0x10c] sm:$0xf] %vm1463_vm2, %v1402_v52 }
  0xb5   : > { %1563 = vst.msk [vmem:[%s2276_s27 + $0x18c] sm:$0xf] %vm1463_vm2, %v1434_v53  ;;  %v1057_v56 = vpop.f32.mrf.mxu2  ;;  %v2070_v53 = vld [vmem:[%s2192_s22 + $0x160] sm:$0xff] }
  0xb6   : > { %v1137_v57 = vpop.f32.mrf.mxu3  ;;  %1468 = vst.msk [vmem:[%s2276_s27 + $0x10] sm:$0xf] %vm1463_vm2, %v1339_v54  ;;  %v1058_v58 = vadd.f32 %v2261_v34, %v1057_v56  ;;  %v899_v60 = vpop.f32.mrf.mxu0  ;;  %v2086_v54 = vld [vmem:[%s2192_s22 + $0x1e0] sm:$0xff] }
  0xb7   : > { %v1138_v59 = vadd.f32 %v2261_v34, %v1137_v57  ;;  %v979_v61 = vpop.f32.mrf.mxu1  ;;  %1500 = vst.msk [vmem:[%s2276_s27 + $0x90] sm:$0xf] %vm1463_vm2, %v1371_v55  ;;  %v900_v62 = vadd.f32 %v2261_v34, %v899_v60 }
  0xb8   : > { %v980_v63 = vadd.f32 %v2261_v34, %v979_v61  ;;  %v1275_v0 = vmax.f32 %v1058_v58, 0.0 }
  0xb9   : > { %v1307_v1 = vmax.f32 %v1138_v59, 0.0  ;;  %v1212_v2 = vmax.f32 %v900_v62, 0.0 }
  0xba   : > { %v1244_v3 = vmax.f32 %v980_v63, 0.0  ;;  %v1403_v4 = vpack.c.bf16 %v1275_v0, %v1275_v0 }
  0xbb   : > { %v1435_v5 = vpack.c.bf16 %v1307_v1, %v1307_v1  ;;  %v1340_v6 = vpack.c.bf16 %v1212_v2, %v1212_v2 }
  0xbc   : > { %v1372_v7 = vpack.c.bf16 %v1244_v3, %v1244_v3  ;;  %1532 = vst.msk [vmem:[%s2276_s27 + $0x110] sm:$0xf] %vm1463_vm2, %v1403_v4 }
  0xbd   : > { %1564 = vst.msk [vmem:[%s2276_s27 + $0x190] sm:$0xf] %vm1463_vm2, %v1435_v5  ;;  %v1059_v8 = vpop.f32.mrf.mxu2 }
  0xbe   : > { %v1139_v9 = vpop.f32.mrf.mxu3  ;;  %1469 = vst.msk [vmem:[%s2276_s27 + $0x14] sm:$0xf] %vm1463_vm2, %v1340_v6  ;;  %v1060_v12 = vadd.f32 %v2261_v34, %v1059_v8  ;;  %v902_v14 = vpop.f32.mrf.mxu0 }
  0xbf   : > { %v1140_v13 = vadd.f32 %v2261_v34, %v1139_v9  ;;  %v982_v15 = vpop.f32.mrf.mxu1  ;;  %1501 = vst.msk [vmem:[%s2276_s27 + $0x94] sm:$0xf] %vm1463_vm2, %v1372_v7  ;;  %v903_v18 = vadd.f32 %v2261_v34, %v902_v14 }
  0xc0   : > { %v983_v19 = vadd.f32 %v2261_v34, %v982_v15  ;;  %v1276_v20 = vmax.f32 %v1060_v12, 0.0 }
  0xc1   : > { %v1308_v21 = vmax.f32 %v1140_v13, 0.0  ;;  %v1213_v22 = vmax.f32 %v903_v18, 0.0  ;;  %1971 = vmatmul.msk.bf16.gmra.mxu0 %vm681_vm1, %v2037_v10  ;;  %1987 = vmatmul.msk.bf16.gmra.mxu1 %vm681_vm1, %v2053_v11 }
  0xc2   : > { %v1245_v23 = vmax.f32 %v983_v19, 0.0  ;;  %v1404_v24 = vpack.c.bf16 %v1276_v20, %v1276_v20  ;;  %2003 = vmatmul.msk.bf16.gmra.mxu2 %vm681_vm1, %v2069_v16  ;;  %v2039_v19 = vld [vmem:[%s2192_s22 + $0x68] sm:$0xff] }
  0xc3   : > { %v1436_v25 = vpack.c.bf16 %v1308_v21, %v1308_v21  ;;  %2019 = vmatmul.msk.bf16.gmra.mxu3 %vm681_vm1, %v2085_v17  ;;  %v1341_v26 = vpack.c.bf16 %v1213_v22, %v1213_v22  ;;  %v2055_v20 = vld [vmem:[%s2192_s22 + $0xe8] sm:$0xff] }
  0xc4   : > { %v1373_v27 = vpack.c.bf16 %v1245_v23, %v1245_v23  ;;  %1533 = vst.msk [vmem:[%s2276_s27 + $0x114] sm:$0xf] %vm1463_vm2, %v1404_v24 }
  0xc5   : > { %1565 = vst.msk [vmem:[%s2276_s27 + $0x194] sm:$0xf] %vm1463_vm2, %v1436_v25  ;;  %v1062_v28 = vpop.f32.mrf.mxu2  ;;  %v2071_v25 = vld [vmem:[%s2192_s22 + $0x168] sm:$0xff] }
  0xc6   : > { %v1142_v29 = vpop.f32.mrf.mxu3  ;;  %1470 = vst.msk [vmem:[%s2276_s27 + $0x18] sm:$0xf] %vm1463_vm2, %v1341_v26  ;;  %v1063_v30 = vadd.f32 %v2261_v34, %v1062_v28  ;;  %v904_v32 = vpop.f32.mrf.mxu0  ;;  %v2087_v26 = vld [vmem:[%s2192_s22 + $0x1e8] sm:$0xff] }
  0xc7   : > { %v1143_v31 = vadd.f32 %v2261_v34, %v1142_v29  ;;  %v984_v33 = vpop.f32.mrf.mxu1  ;;  %1502 = vst.msk [vmem:[%s2276_s27 + $0x98] sm:$0xf] %vm1463_vm2, %v1373_v27  ;;  %v905_v35 = vadd.f32 %v2261_v34, %v904_v32 }
  0xc8   : > { %v985_v36 = vadd.f32 %v2261_v34, %v984_v33  ;;  %v1277_v37 = vmax.f32 %v1063_v30, 0.0 }
  0xc9   : > { %v1309_v38 = vmax.f32 %v1143_v31, 0.0  ;;  %v1214_v39 = vmax.f32 %v905_v35, 0.0 }
  0xca   : > { %v1246_v40 = vmax.f32 %v985_v36, 0.0  ;;  %v1405_v41 = vpack.c.bf16 %v1277_v37, %v1277_v37 }
  0xcb   : > { %v1437_v42 = vpack.c.bf16 %v1309_v38, %v1309_v38  ;;  %v1342_v43 = vpack.c.bf16 %v1214_v39, %v1214_v39 }
  0xcc   : > { %v1374_v44 = vpack.c.bf16 %v1246_v40, %v1246_v40  ;;  %1534 = vst.msk [vmem:[%s2276_s27 + $0x118] sm:$0xf] %vm1463_vm2, %v1405_v41 }
  0xcd   : > { %1566 = vst.msk [vmem:[%s2276_s27 + $0x198] sm:$0xf] %vm1463_vm2, %v1437_v42  ;;  %v1064_v45 = vpop.f32.mrf.mxu2 }
  0xce   : > { %v1144_v46 = vpop.f32.mrf.mxu3  ;;  %1471 = vst.msk [vmem:[%s2276_s27 + $0x1c] sm:$0xf] %vm1463_vm2, %v1342_v43  ;;  %v1065_v49 = vadd.f32 %v2261_v34, %v1064_v45  ;;  %v907_v51 = vpop.f32.mrf.mxu0 }
  0xcf   : > { %v1145_v50 = vadd.f32 %v2261_v34, %v1144_v46  ;;  %v987_v52 = vpop.f32.mrf.mxu1  ;;  %1503 = vst.msk [vmem:[%s2276_s27 + $0x9c] sm:$0xf] %vm1463_vm2, %v1374_v44  ;;  %v908_v55 = vadd.f32 %v2261_v34, %v907_v51 }
  0xd0   : > { %v988_v56 = vadd.f32 %v2261_v34, %v987_v52  ;;  %v1278_v57 = vmax.f32 %v1065_v49, 0.0 }
  0xd1   : > { %v1310_v58 = vmax.f32 %v1145_v50, 0.0  ;;  %v1215_v59 = vmax.f32 %v908_v55, 0.0  ;;  %1972 = vmatmul.msk.bf16.gmra.mxu0 %vm681_vm1, %v2038_v47  ;;  %1988 = vmatmul.msk.bf16.gmra.mxu1 %vm681_vm1, %v2054_v48 }
  0xd2   : > { %v1247_v60 = vmax.f32 %v988_v56, 0.0  ;;  %v1406_v61 = vpack.c.bf16 %v1278_v57, %v1278_v57  ;;  %2004 = vmatmul.msk.bf16.gmra.mxu2 %vm681_vm1, %v2070_v53  ;;  %v2040_v56 = vld [vmem:[%s2192_s22 + $0x70] sm:$0xff] }
  0xd3   : > { %v1438_v62 = vpack.c.bf16 %v1310_v58, %v1310_v58  ;;  %2020 = vmatmul.msk.bf16.gmra.mxu3 %vm681_vm1, %v2086_v54  ;;  %v1343_v63 = vpack.c.bf16 %v1215_v59, %v1215_v59  ;;  %v2056_v57 = vld [vmem:[%s2192_s22 + $0xf0] sm:$0xff] }
  0xd4   : > { %v1375_v0 = vpack.c.bf16 %v1247_v60, %v1247_v60  ;;  %1535 = vst.msk [vmem:[%s2276_s27 + $0x11c] sm:$0xf] %vm1463_vm2, %v1406_v61 }
  0xd5   : > { %1567 = vst.msk [vmem:[%s2276_s27 + $0x19c] sm:$0xf] %vm1463_vm2, %v1438_v62  ;;  %v1067_v1 = vpop.f32.mrf.mxu2  ;;  %v2072_v62 = vld [vmem:[%s2192_s22 + $0x170] sm:$0xff] }
  0xd6   : > { %v1147_v2 = vpop.f32.mrf.mxu3  ;;  %1472 = vst.msk [vmem:[%s2276_s27 + $0x20] sm:$0xf] %vm1463_vm2, %v1343_v63  ;;  %v1068_v3 = vadd.f32 %v2261_v34, %v1067_v1  ;;  %v909_v5 = vpop.f32.mrf.mxu0  ;;  %v2088_v63 = vld [vmem:[%s2192_s22 + $0x1f0] sm:$0xff] }
  0xd7   : > { %v1148_v4 = vadd.f32 %v2261_v34, %v1147_v2  ;;  %v989_v6 = vpop.f32.mrf.mxu1  ;;  %1504 = vst.msk [vmem:[%s2276_s27 + $0xa0] sm:$0xf] %vm1463_vm2, %v1375_v0  ;;  %v910_v7 = vadd.f32 %v2261_v34, %v909_v5 }
  0xd8   : > { %v990_v8 = vadd.f32 %v2261_v34, %v989_v6  ;;  %v1279_v9 = vmax.f32 %v1068_v3, 0.0 }
  0xd9   : > { %v1311_v10 = vmax.f32 %v1148_v4, 0.0  ;;  %v1216_v11 = vmax.f32 %v910_v7, 0.0 }
  0xda   : > { %v1248_v12 = vmax.f32 %v990_v8, 0.0  ;;  %v1407_v13 = vpack.c.bf16 %v1279_v9, %v1279_v9 }
  0xdb   : > { %v1439_v14 = vpack.c.bf16 %v1311_v10, %v1311_v10  ;;  %v1344_v15 = vpack.c.bf16 %v1216_v11, %v1216_v11 }
  0xdc   : > { %v1376_v16 = vpack.c.bf16 %v1248_v12, %v1248_v12  ;;  %1536 = vst.msk [vmem:[%s2276_s27 + $0x120] sm:$0xf] %vm1463_vm2, %v1407_v13 }
  0xdd   : > { %1568 = vst.msk [vmem:[%s2276_s27 + $0x1a0] sm:$0xf] %vm1463_vm2, %v1439_v14  ;;  %v1069_v17 = vpop.f32.mrf.mxu2 }
  0xde   : > { %v1149_v18 = vpop.f32.mrf.mxu3  ;;  %1473 = vst.msk [vmem:[%s2276_s27 + $0x24] sm:$0xf] %vm1463_vm2, %v1344_v15  ;;  %v1070_v21 = vadd.f32 %v2261_v34, %v1069_v17  ;;  %v912_v23 = vpop.f32.mrf.mxu0 }
  0xdf   : > { %v1150_v22 = vadd.f32 %v2261_v34, %v1149_v18  ;;  %v992_v24 = vpop.f32.mrf.mxu1  ;;  %1505 = vst.msk [vmem:[%s2276_s27 + $0xa4] sm:$0xf] %vm1463_vm2, %v1376_v16  ;;  %v913_v27 = vadd.f32 %v2261_v34, %v912_v23 }
  0xe0   : > { %v993_v28 = vadd.f32 %v2261_v34, %v992_v24  ;;  %v1280_v29 = vmax.f32 %v1070_v21, 0.0 }
  0xe1   : > { %v1312_v30 = vmax.f32 %v1150_v22, 0.0  ;;  %v1217_v31 = vmax.f32 %v913_v27, 0.0  ;;  %1973 = vmatmul.msk.bf16.gmra.mxu0 %vm681_vm1, %v2039_v19  ;;  %1989 = vmatmul.msk.bf16.gmra.mxu1 %vm681_vm1, %v2055_v20 }
  0xe2   : > { %v1249_v32 = vmax.f32 %v993_v28, 0.0  ;;  %v1408_v33 = vpack.c.bf16 %v1280_v29, %v1280_v29  ;;  %2005 = vmatmul.msk.bf16.gmra.mxu2 %vm681_vm1, %v2071_v25  ;;  %v2041_v28 = vld [vmem:[%s2192_s22 + $0x78] sm:$0xff] }
  0xe3   : > { %v1440_v35 = vpack.c.bf16 %v1312_v30, %v1312_v30  ;;  %2021 = vmatmul.msk.bf16.gmra.mxu3 %vm681_vm1, %v2087_v26  ;;  %v1345_v36 = vpack.c.bf16 %v1217_v31, %v1217_v31  ;;  %v2057_v29 = vld [vmem:[%s2192_s22 + $0xf8] sm:$0xff] }
  0xe4   : > { %v1377_v37 = vpack.c.bf16 %v1249_v32, %v1249_v32  ;;  %1537 = vst.msk [vmem:[%s2276_s27 + $0x124] sm:$0xf] %vm1463_vm2, %v1408_v33 }
  0xe5   : > { %1569 = vst.msk [vmem:[%s2276_s27 + $0x1a4] sm:$0xf] %vm1463_vm2, %v1440_v35  ;;  %v1072_v38 = vpop.f32.mrf.mxu2  ;;  %v2073_v35 = vld [vmem:[%s2192_s22 + $0x178] sm:$0xff] }
  0xe6   : > { %v1152_v39 = vpop.f32.mrf.mxu3  ;;  %1474 = vst.msk [vmem:[%s2276_s27 + $0x28] sm:$0xf] %vm1463_vm2, %v1345_v36  ;;  %v1073_v40 = vadd.f32 %v2261_v34, %v1072_v38  ;;  %v914_v42 = vpop.f32.mrf.mxu0  ;;  %v2089_v36 = vld [vmem:[%s2192_s22 + $0x1f8] sm:$0xff] }
  0xe7   : > { %v1153_v41 = vadd.f32 %v2261_v34, %v1152_v39  ;;  %v994_v43 = vpop.f32.mrf.mxu1  ;;  %1506 = vst.msk [vmem:[%s2276_s27 + $0xa8] sm:$0xf] %vm1463_vm2, %v1377_v37  ;;  %v915_v44 = vadd.f32 %v2261_v34, %v914_v42 }
  0xe8   : > { %v995_v45 = vadd.f32 %v2261_v34, %v994_v43  ;;  %v1281_v46 = vmax.f32 %v1073_v40, 0.0 }
  0xe9   : > { %v1313_v47 = vmax.f32 %v1153_v41, 0.0  ;;  %v1218_v48 = vmax.f32 %v915_v44, 0.0 }
  0xea   : > { %v1250_v49 = vmax.f32 %v995_v45, 0.0  ;;  %v1409_v50 = vpack.c.bf16 %v1281_v46, %v1281_v46 }
  0xeb   : > { %v1441_v51 = vpack.c.bf16 %v1313_v47, %v1313_v47  ;;  %v1346_v52 = vpack.c.bf16 %v1218_v48, %v1218_v48 }
  0xec   : > { %v1378_v53 = vpack.c.bf16 %v1250_v49, %v1250_v49  ;;  %1538 = vst.msk [vmem:[%s2276_s27 + $0x128] sm:$0xf] %vm1463_vm2, %v1409_v50 }
  0xed   : > { %1570 = vst.msk [vmem:[%s2276_s27 + $0x1a8] sm:$0xf] %vm1463_vm2, %v1441_v51  ;;  %v1074_v54 = vpop.f32.mrf.mxu2 }
  0xee   : > { %v1154_v55 = vpop.f32.mrf.mxu3  ;;  %1475 = vst.msk [vmem:[%s2276_s27 + $0x2c] sm:$0xf] %vm1463_vm2, %v1346_v52  ;;  %v1075_v58 = vadd.f32 %v2261_v34, %v1074_v54  ;;  %v917_v60 = vpop.f32.mrf.mxu0 }
  0xef   : > { %v1155_v59 = vadd.f32 %v2261_v34, %v1154_v55  ;;  %v997_v61 = vpop.f32.mrf.mxu1  ;;  %1507 = vst.msk [vmem:[%s2276_s27 + $0xac] sm:$0xf] %vm1463_vm2, %v1378_v53  ;;  %v918_v0 = vadd.f32 %v2261_v34, %v917_v60 }
  0xf0   : > { %v998_v1 = vadd.f32 %v2261_v34, %v997_v61  ;;  %v1282_v2 = vmax.f32 %v1075_v58, 0.0 }
  0xf1   : > { %v1314_v3 = vmax.f32 %v1155_v59, 0.0  ;;  %v1219_v4 = vmax.f32 %v918_v0, 0.0  ;;  %1974 = vmatmul.msk.bf16.gmra.mxu0 %vm681_vm1, %v2040_v56  ;;  %1990 = vmatmul.msk.bf16.gmra.mxu1 %vm681_vm1, %v2056_v57 }
  0xf2   : > { %v1251_v5 = vmax.f32 %v998_v1, 0.0  ;;  %v1410_v6 = vpack.c.bf16 %v1282_v2, %v1282_v2  ;;  %2006 = vmatmul.msk.bf16.gmra.mxu2 %vm681_vm1, %v2072_v62 }
  0xf3   : > { %v1442_v7 = vpack.c.bf16 %v1314_v3, %v1314_v3  ;;  %2022 = vmatmul.msk.bf16.gmra.mxu3 %vm681_vm1, %v2088_v63  ;;  %v1347_v8 = vpack.c.bf16 %v1219_v4, %v1219_v4 }
  0xf4   : > { %v1379_v9 = vpack.c.bf16 %v1251_v5, %v1251_v5  ;;  %1539 = vst.msk [vmem:[%s2276_s27 + $0x12c] sm:$0xf] %vm1463_vm2, %v1410_v6 }
  0xf5   : > { %1571 = vst.msk [vmem:[%s2276_s27 + $0x1ac] sm:$0xf] %vm1463_vm2, %v1442_v7  ;;  %v1077_v10 = vpop.f32.mrf.mxu2 }
  0xf6   : > { %v1157_v11 = vpop.f32.mrf.mxu3  ;;  %1476 = vst.msk [vmem:[%s2276_s27 + $0x30] sm:$0xf] %vm1463_vm2, %v1347_v8  ;;  %v1078_v12 = vadd.f32 %v2261_v34, %v1077_v10  ;;  %v919_v14 = vpop.f32.mrf.mxu0 }
  0xf7   : > { %v1158_v13 = vadd.f32 %v2261_v34, %v1157_v11  ;;  %v999_v15 = vpop.f32.mrf.mxu1  ;;  %1508 = vst.msk [vmem:[%s2276_s27 + $0xb0] sm:$0xf] %vm1463_vm2, %v1379_v9  ;;  %v920_v16 = vadd.f32 %v2261_v34, %v919_v14 }
  0xf8   : > { %v1000_v17 = vadd.f32 %v2261_v34, %v999_v15  ;;  %v1283_v18 = vmax.f32 %v1078_v12, 0.0 }
  0xf9   : > { %v1315_v19 = vmax.f32 %v1158_v13, 0.0  ;;  %v1220_v20 = vmax.f32 %v920_v16, 0.0 }
  0xfa   : > { %v1252_v21 = vmax.f32 %v1000_v17, 0.0  ;;  %v1411_v22 = vpack.c.bf16 %v1283_v18, %v1283_v18 }
  0xfb   : > { %v1443_v23 = vpack.c.bf16 %v1315_v19, %v1315_v19  ;;  %v1348_v24 = vpack.c.bf16 %v1220_v20, %v1220_v20 }
  0xfc   : > { %v1380_v25 = vpack.c.bf16 %v1252_v21, %v1252_v21  ;;  %1540 = vst.msk [vmem:[%s2276_s27 + $0x130] sm:$0xf] %vm1463_vm2, %v1411_v22 }
  0xfd   : > { %1572 = vst.msk [vmem:[%s2276_s27 + $0x1b0] sm:$0xf] %vm1463_vm2, %v1443_v23  ;;  %v1079_v26 = vpop.f32.mrf.mxu2 }
  0xfe   : > { %v1159_v27 = vpop.f32.mrf.mxu3  ;;  %1477 = vst.msk [vmem:[%s2276_s27 + $0x34] sm:$0xf] %vm1463_vm2, %v1348_v24  ;;  %v1080_v30 = vadd.f32 %v2261_v34, %v1079_v26  ;;  %v922_v32 = vpop.f32.mrf.mxu0 }
  0xff   : > { %v1160_v31 = vadd.f32 %v2261_v34, %v1159_v27  ;;  %v1002_v33 = vpop.f32.mrf.mxu1  ;;  %1509 = vst.msk [vmem:[%s2276_s27 + $0xb4] sm:$0xf] %vm1463_vm2, %v1380_v25  ;;  %v923_v37 = vadd.f32 %v2261_v34, %v922_v32 }
 0x100   : > { %v1003_v38 = vadd.f32 %v2261_v34, %v1002_v33  ;;  %v1284_v39 = vmax.f32 %v1080_v30, 0.0 }
 0x101   : > { %v1316_v40 = vmax.f32 %v1160_v31, 0.0  ;;  %v1221_v41 = vmax.f32 %v923_v37, 0.0  ;;  %1975 = vmatmul.msk.bf16.gmra.mxu0 %vm681_vm1, %v2041_v28  ;;  %1991 = vmatmul.msk.bf16.gmra.mxu1 %vm681_vm1, %v2057_v29 }
 0x102   : > { %v1253_v42 = vmax.f32 %v1003_v38, 0.0  ;;  %v1412_v43 = vpack.c.bf16 %v1284_v39, %v1284_v39  ;;  %2007 = vmatmul.msk.bf16.gmra.mxu2 %vm681_vm1, %v2073_v35 }
 0x103   : > { %v1444_v44 = vpack.c.bf16 %v1316_v40, %v1316_v40  ;;  %2023 = vmatmul.msk.bf16.gmra.mxu3 %vm681_vm1, %v2089_v36  ;;  %v1349_v45 = vpack.c.bf16 %v1221_v41, %v1221_v41 }
 0x104   : > { %v1381_v46 = vpack.c.bf16 %v1253_v42, %v1253_v42  ;;  %1541 = vst.msk [vmem:[%s2276_s27 + $0x134] sm:$0xf] %vm1463_vm2, %v1412_v43 }
 0x105   : > { %1573 = vst.msk [vmem:[%s2276_s27 + $0x1b4] sm:$0xf] %vm1463_vm2, %v1444_v44  ;;  %v1082_v47 = vpop.f32.mrf.mxu2 }
 0x106   : > { %v1162_v48 = vpop.f32.mrf.mxu3  ;;  %1478 = vst.msk [vmem:[%s2276_s27 + $0x38] sm:$0xf] %vm1463_vm2, %v1349_v45  ;;  %v1083_v49 = vadd.f32 %v2261_v34, %v1082_v47  ;;  %v924_v51 = vpop.f32.mrf.mxu0 }
 0x107   : > { %v1163_v50 = vadd.f32 %v2261_v34, %v1162_v48  ;;  %v1004_v52 = vpop.f32.mrf.mxu1  ;;  %1510 = vst.msk [vmem:[%s2276_s27 + $0xb8] sm:$0xf] %vm1463_vm2, %v1381_v46  ;;  %v925_v53 = vadd.f32 %v2261_v34, %v924_v51 }
 0x108   : > { %v1005_v54 = vadd.f32 %v2261_v34, %v1004_v52  ;;  %v1285_v55 = vmax.f32 %v1083_v49, 0.0 }
 0x109   : > { %v1317_v56 = vmax.f32 %v1163_v50, 0.0  ;;  %v1222_v57 = vmax.f32 %v925_v53, 0.0 }
 0x10a   : > { %v1254_v58 = vmax.f32 %v1005_v54, 0.0  ;;  %v1413_v59 = vpack.c.bf16 %v1285_v55, %v1285_v55 }
 0x10b   : > { %v1445_v60 = vpack.c.bf16 %v1317_v56, %v1317_v56  ;;  %v1350_v61 = vpack.c.bf16 %v1222_v57, %v1222_v57 }
 0x10c   : > { %v1382_v62 = vpack.c.bf16 %v1254_v58, %v1254_v58  ;;  %1542 = vst.msk [vmem:[%s2276_s27 + $0x138] sm:$0xf] %vm1463_vm2, %v1413_v59 }
 0x10d   : > { %1574 = vst.msk [vmem:[%s2276_s27 + $0x1b8] sm:$0xf] %vm1463_vm2, %v1445_v60  ;;  %v1084_v63 = vpop.f32.mrf.mxu2 }
 0x10e   : > { %v1164_v0 = vpop.f32.mrf.mxu3  ;;  %1479 = vst.msk [vmem:[%s2276_s27 + $0x3c] sm:$0xf] %vm1463_vm2, %v1350_v61  ;;  %v1085_v1 = vadd.f32 %v2261_v34, %v1084_v63  ;;  %v927_v3 = vpop.f32.mrf.mxu0 }
 0x10f   : > { %v1165_v2 = vadd.f32 %v2261_v34, %v1164_v0  ;;  %v1007_v4 = vpop.f32.mrf.mxu1  ;;  %1511 = vst.msk [vmem:[%s2276_s27 + $0xbc] sm:$0xf] %vm1463_vm2, %v1382_v62  ;;  %v928_v5 = vadd.f32 %v2261_v34, %v927_v3 }
 0x110   : > { %v1008_v6 = vadd.f32 %v2261_v34, %v1007_v4  ;;  %v1286_v7 = vmax.f32 %v1085_v1, 0.0 }
 0x111   : > { %v1318_v8 = vmax.f32 %v1165_v2, 0.0  ;;  %v1223_v9 = vmax.f32 %v928_v5, 0.0 }
 0x112   : > { %v1255_v10 = vmax.f32 %v1008_v6, 0.0  ;;  %v1414_v11 = vpack.c.bf16 %v1286_v7, %v1286_v7 }
 0x113   : > { %v1446_v12 = vpack.c.bf16 %v1318_v8, %v1318_v8  ;;  %v1351_v13 = vpack.c.bf16 %v1223_v9, %v1223_v9 }
 0x114   : > { %v1383_v14 = vpack.c.bf16 %v1255_v10, %v1255_v10  ;;  %1543 = vst.msk [vmem:[%s2276_s27 + $0x13c] sm:$0xf] %vm1463_vm2, %v1414_v11 }
 0x115   : > { %1575 = vst.msk [vmem:[%s2276_s27 + $0x1bc] sm:$0xf] %vm1463_vm2, %v1446_v12  ;;  %v1087_v15 = vpop.f32.mrf.mxu2 }
 0x116   : > { %v1167_v16 = vpop.f32.mrf.mxu3  ;;  %1480 = vst.msk [vmem:[%s2276_s27 + $0x40] sm:$0xf] %vm1463_vm2, %v1351_v13  ;;  %v1088_v17 = vadd.f32 %v2261_v34, %v1087_v15  ;;  %v929_v19 = vpop.f32.mrf.mxu0 }
 0x117   : > { %v1168_v18 = vadd.f32 %v2261_v34, %v1167_v16  ;;  %v1009_v20 = vpop.f32.mrf.mxu1  ;;  %1512 = vst.msk [vmem:[%s2276_s27 + $0xc0] sm:$0xf] %vm1463_vm2, %v1383_v14  ;;  %v930_v21 = vadd.f32 %v2261_v34, %v929_v19 }
 0x118   : > { %v1010_v22 = vadd.f32 %v2261_v34, %v1009_v20  ;;  %v1287_v23 = vmax.f32 %v1088_v17, 0.0 }
 0x119   : > { %v1319_v24 = vmax.f32 %v1168_v18, 0.0  ;;  %v1224_v25 = vmax.f32 %v930_v21, 0.0 }
 0x11a   : > { %v1256_v26 = vmax.f32 %v1010_v22, 0.0  ;;  %v1415_v27 = vpack.c.bf16 %v1287_v23, %v1287_v23 }
 0x11b   : > { %v1447_v28 = vpack.c.bf16 %v1319_v24, %v1319_v24  ;;  %v1352_v29 = vpack.c.bf16 %v1224_v25, %v1224_v25 }
 0x11c   : > { %v1384_v30 = vpack.c.bf16 %v1256_v26, %v1256_v26  ;;  %1544 = vst.msk [vmem:[%s2276_s27 + $0x140] sm:$0xf] %vm1463_vm2, %v1415_v27 }
 0x11d   : > { %1576 = vst.msk [vmem:[%s2276_s27 + $0x1c0] sm:$0xf] %vm1463_vm2, %v1447_v28  ;;  %v1089_v31 = vpop.f32.mrf.mxu2 }
 0x11e   : > { %v1169_v32 = vpop.f32.mrf.mxu3  ;;  %1481 = vst.msk [vmem:[%s2276_s27 + $0x44] sm:$0xf] %vm1463_vm2, %v1352_v29  ;;  %v1090_v33 = vadd.f32 %v2261_v34, %v1089_v31  ;;  %v932_v36 = vpop.f32.mrf.mxu0 }
 0x11f   : > { %v1170_v35 = vadd.f32 %v2261_v34, %v1169_v32  ;;  %v1012_v37 = vpop.f32.mrf.mxu1  ;;  %1513 = vst.msk [vmem:[%s2276_s27 + $0xc4] sm:$0xf] %vm1463_vm2, %v1384_v30  ;;  %v933_v38 = vadd.f32 %v2261_v34, %v932_v36 }
 0x120   : > { %v1013_v39 = vadd.f32 %v2261_v34, %v1012_v37  ;;  %v1288_v40 = vmax.f32 %v1090_v33, 0.0 }
 0x121   : > { %v1320_v41 = vmax.f32 %v1170_v35, 0.0  ;;  %v1225_v42 = vmax.f32 %v933_v38, 0.0 }
 0x122   : > { %v1257_v43 = vmax.f32 %v1013_v39, 0.0  ;;  %v1416_v44 = vpack.c.bf16 %v1288_v40, %v1288_v40 }
 0x123   : > { %v1448_v45 = vpack.c.bf16 %v1320_v41, %v1320_v41  ;;  %v1353_v46 = vpack.c.bf16 %v1225_v42, %v1225_v42 }
 0x124   : > { %v1385_v47 = vpack.c.bf16 %v1257_v43, %v1257_v43  ;;  %1545 = vst.msk [vmem:[%s2276_s27 + $0x144] sm:$0xf] %vm1463_vm2, %v1416_v44 }
 0x125   : > { %1577 = vst.msk [vmem:[%s2276_s27 + $0x1c4] sm:$0xf] %vm1463_vm2, %v1448_v45  ;;  %v1092_v48 = vpop.f32.mrf.mxu2 }
 0x126   : > { %v1172_v49 = vpop.f32.mrf.mxu3  ;;  %1482 = vst.msk [vmem:[%s2276_s27 + $0x48] sm:$0xf] %vm1463_vm2, %v1353_v46  ;;  %v1093_v50 = vadd.f32 %v2261_v34, %v1092_v48  ;;  %v934_v52 = vpop.f32.mrf.mxu0 }
 0x127   : > { %v1173_v51 = vadd.f32 %v2261_v34, %v1172_v49  ;;  %v1014_v53 = vpop.f32.mrf.mxu1  ;;  %1514 = vst.msk [vmem:[%s2276_s27 + $0xc8] sm:$0xf] %vm1463_vm2, %v1385_v47  ;;  %v935_v54 = vadd.f32 %v2261_v34, %v934_v52 }
 0x128   : > { %v1015_v55 = vadd.f32 %v2261_v34, %v1014_v53  ;;  %v1289_v56 = vmax.f32 %v1093_v50, 0.0 }
 0x129   : > { %v1321_v57 = vmax.f32 %v1173_v51, 0.0  ;;  %v1226_v58 = vmax.f32 %v935_v54, 0.0 }
 0x12a   : > { %v1258_v59 = vmax.f32 %v1015_v55, 0.0  ;;  %v1417_v60 = vpack.c.bf16 %v1289_v56, %v1289_v56 }
 0x12b   : > { %v1449_v61 = vpack.c.bf16 %v1321_v57, %v1321_v57  ;;  %v1354_v62 = vpack.c.bf16 %v1226_v58, %v1226_v58 }
 0x12c   : > { %v1386_v63 = vpack.c.bf16 %v1258_v59, %v1258_v59  ;;  %1546 = vst.msk [vmem:[%s2276_s27 + $0x148] sm:$0xf] %vm1463_vm2, %v1417_v60 }
 0x12d   : > { %1578 = vst.msk [vmem:[%s2276_s27 + $0x1c8] sm:$0xf] %vm1463_vm2, %v1449_v61  ;;  %v1094_v0 = vpop.f32.mrf.mxu2 }
 0x12e   : > { %v1174_v1 = vpop.f32.mrf.mxu3  ;;  %1483 = vst.msk [vmem:[%s2276_s27 + $0x4c] sm:$0xf] %vm1463_vm2, %v1354_v62  ;;  %v1095_v2 = vadd.f32 %v2261_v34, %v1094_v0  ;;  %v937_v4 = vpop.f32.mrf.mxu0 }
 0x12f   : > { %v1175_v3 = vadd.f32 %v2261_v34, %v1174_v1  ;;  %v1017_v5 = vpop.f32.mrf.mxu1  ;;  %1515 = vst.msk [vmem:[%s2276_s27 + $0xcc] sm:$0xf] %vm1463_vm2, %v1386_v63  ;;  %v938_v6 = vadd.f32 %v2261_v34, %v937_v4 }
 0x130   : > { %v1018_v7 = vadd.f32 %v2261_v34, %v1017_v5  ;;  %v1290_v8 = vmax.f32 %v1095_v2, 0.0 }
 0x131   : > { %v1322_v9 = vmax.f32 %v1175_v3, 0.0  ;;  %v1227_v10 = vmax.f32 %v938_v6, 0.0 }
 0x132   : > { %v1259_v11 = vmax.f32 %v1018_v7, 0.0  ;;  %v1418_v12 = vpack.c.bf16 %v1290_v8, %v1290_v8 }
 0x133   : > { %v1450_v13 = vpack.c.bf16 %v1322_v9, %v1322_v9  ;;  %v1355_v14 = vpack.c.bf16 %v1227_v10, %v1227_v10 }
 0x134   : > { %v1387_v15 = vpack.c.bf16 %v1259_v11, %v1259_v11  ;;  %1547 = vst.msk [vmem:[%s2276_s27 + $0x14c] sm:$0xf] %vm1463_vm2, %v1418_v12 }
 0x135   : > { %1579 = vst.msk [vmem:[%s2276_s27 + $0x1cc] sm:$0xf] %vm1463_vm2, %v1450_v13  ;;  %v1097_v16 = vpop.f32.mrf.mxu2 }
 0x136   : > { %v1177_v17 = vpop.f32.mrf.mxu3  ;;  %1484 = vst.msk [vmem:[%s2276_s27 + $0x50] sm:$0xf] %vm1463_vm2, %v1355_v14  ;;  %v1098_v18 = vadd.f32 %v2261_v34, %v1097_v16  ;;  %v939_v20 = vpop.f32.mrf.mxu0 }
 0x137   : > { %v1178_v19 = vadd.f32 %v2261_v34, %v1177_v17  ;;  %v1019_v21 = vpop.f32.mrf.mxu1  ;;  %1516 = vst.msk [vmem:[%s2276_s27 + $0xd0] sm:$0xf] %vm1463_vm2, %v1387_v15  ;;  %v940_v22 = vadd.f32 %v2261_v34, %v939_v20 }
 0x138   : > { %v1020_v23 = vadd.f32 %v2261_v34, %v1019_v21  ;;  %v1291_v24 = vmax.f32 %v1098_v18, 0.0 }
 0x139   : > { %v1323_v25 = vmax.f32 %v1178_v19, 0.0  ;;  %v1228_v26 = vmax.f32 %v940_v22, 0.0 }
 0x13a   : > { %v1260_v27 = vmax.f32 %v1020_v23, 0.0  ;;  %v1419_v28 = vpack.c.bf16 %v1291_v24, %v1291_v24 }
 0x13b   : > { %v1451_v29 = vpack.c.bf16 %v1323_v25, %v1323_v25  ;;  %v1356_v30 = vpack.c.bf16 %v1228_v26, %v1228_v26 }
 0x13c   : > { %v1388_v31 = vpack.c.bf16 %v1260_v27, %v1260_v27  ;;  %1548 = vst.msk [vmem:[%s2276_s27 + $0x150] sm:$0xf] %vm1463_vm2, %v1419_v28 }
 0x13d   : > { %1580 = vst.msk [vmem:[%s2276_s27 + $0x1d0] sm:$0xf] %vm1463_vm2, %v1451_v29  ;;  %v1099_v32 = vpop.f32.mrf.mxu2 }
 0x13e   : > { %v1179_v33 = vpop.f32.mrf.mxu3  ;;  %1485 = vst.msk [vmem:[%s2276_s27 + $0x54] sm:$0xf] %vm1463_vm2, %v1356_v30  ;;  %v1100_v35 = vadd.f32 %v2261_v34, %v1099_v32  ;;  %v942_v37 = vpop.f32.mrf.mxu0 }
 0x13f   : > { %v1180_v36 = vadd.f32 %v2261_v34, %v1179_v33  ;;  %v1022_v38 = vpop.f32.mrf.mxu1  ;;  %1517 = vst.msk [vmem:[%s2276_s27 + $0xd4] sm:$0xf] %vm1463_vm2, %v1388_v31  ;;  %v943_v39 = vadd.f32 %v2261_v34, %v942_v37 }
 0x140   : > { %v1023_v40 = vadd.f32 %v2261_v34, %v1022_v38  ;;  %v1292_v41 = vmax.f32 %v1100_v35, 0.0  ;;  %v2605_v34 = vld [vmem:[%s2734_s2] ss:$0 sm:$0xff] }
 0x141   : > { %v1324_v42 = vmax.f32 %v1180_v36, 0.0  ;;  %v1229_v43 = vmax.f32 %v943_v39, 0.0 }
 0x142   : > { %v1261_v44 = vmax.f32 %v1023_v40, 0.0  ;;  %v1420_v45 = vpack.c.bf16 %v1292_v41, %v1292_v41 }
 0x143   : > { %v1452_v46 = vpack.c.bf16 %v1324_v42, %v1324_v42  ;;  %v1357_v47 = vpack.c.bf16 %v1229_v43, %v1229_v43 }
 0x144   : > { %v1389_v48 = vpack.c.bf16 %v1261_v44, %v1261_v44  ;;  %1549 = vst.msk [vmem:[%s2276_s27 + $0x154] sm:$0xf] %vm1463_vm2, %v1420_v45 }
 0x145   : > { %1581 = vst.msk [vmem:[%s2276_s27 + $0x1d4] sm:$0xf] %vm1463_vm2, %v1452_v46  ;;  %v1102_v49 = vpop.f32.mrf.mxu2 }
 0x146   : > { %v1182_v50 = vpop.f32.mrf.mxu3  ;;  %1486 = vst.msk [vmem:[%s2276_s27 + $0x58] sm:$0xf] %vm1463_vm2, %v1357_v47  ;;  %v1103_v51 = vadd.f32 %v2605_v34, %v1102_v49  ;;  %v944_v53 = vpop.f32.mrf.mxu0 }
 0x147   : > { %v1183_v52 = vadd.f32 %v2605_v34, %v1182_v50  ;;  %v1024_v54 = vpop.f32.mrf.mxu1  ;;  %1518 = vst.msk [vmem:[%s2276_s27 + $0xd8] sm:$0xf] %vm1463_vm2, %v1389_v48  ;;  %v945_v55 = vadd.f32 %v2605_v34, %v944_v53 }
 0x148   : > { %v1025_v56 = vadd.f32 %v2605_v34, %v1024_v54  ;;  %v1293_v57 = vmax.f32 %v1103_v51, 0.0 }
 0x149   : > { %v1325_v58 = vmax.f32 %v1183_v52, 0.0  ;;  %v1230_v59 = vmax.f32 %v945_v55, 0.0 }
 0x14a   : > { %v1262_v60 = vmax.f32 %v1025_v56, 0.0  ;;  %v1421_v61 = vpack.c.bf16 %v1293_v57, %v1293_v57 }
 0x14b   : > { %v1453_v62 = vpack.c.bf16 %v1325_v58, %v1325_v58  ;;  %v1358_v63 = vpack.c.bf16 %v1230_v59, %v1230_v59 }
 0x14c   : > { %v1390_v0 = vpack.c.bf16 %v1262_v60, %v1262_v60  ;;  %1550 = vst.msk [vmem:[%s2276_s27 + $0x158] sm:$0xf] %vm1463_vm2, %v1421_v61 }
 0x14d   : > { %1582 = vst.msk [vmem:[%s2276_s27 + $0x1d8] sm:$0xf] %vm1463_vm2, %v1453_v62  ;;  %v1104_v1 = vpop.f32.mrf.mxu2 }
 0x14e   : > { %v1184_v2 = vpop.f32.mrf.mxu3  ;;  %1487 = vst.msk [vmem:[%s2276_s27 + $0x5c] sm:$0xf] %vm1463_vm2, %v1358_v63  ;;  %v1105_v3 = vadd.f32 %v2605_v34, %v1104_v1  ;;  %v947_v5 = vpop.f32.mrf.mxu0 }
 0x14f   : > { %v1185_v4 = vadd.f32 %v2605_v34, %v1184_v2  ;;  %v1027_v6 = vpop.f32.mrf.mxu1  ;;  %1519 = vst.msk [vmem:[%s2276_s27 + $0xdc] sm:$0xf] %vm1463_vm2, %v1390_v0  ;;  %v948_v7 = vadd.f32 %v2605_v34, %v947_v5 }
 0x150   : > { %v1028_v8 = vadd.f32 %v2605_v34, %v1027_v6  ;;  %v1294_v9 = vmax.f32 %v1105_v3, 0.0 }
 0x151   : > { %v1326_v10 = vmax.f32 %v1185_v4, 0.0  ;;  %v1231_v11 = vmax.f32 %v948_v7, 0.0 }
 0x152   : > { %v1263_v12 = vmax.f32 %v1028_v8, 0.0  ;;  %v1422_v13 = vpack.c.bf16 %v1294_v9, %v1294_v9 }
 0x153   : > { %v1454_v14 = vpack.c.bf16 %v1326_v10, %v1326_v10  ;;  %v1359_v15 = vpack.c.bf16 %v1231_v11, %v1231_v11 }
 0x154   : > { %v1391_v16 = vpack.c.bf16 %v1263_v12, %v1263_v12  ;;  %1551 = vst.msk [vmem:[%s2276_s27 + $0x15c] sm:$0xf] %vm1463_vm2, %v1422_v13 }
 0x155   : > { %1583 = vst.msk [vmem:[%s2276_s27 + $0x1dc] sm:$0xf] %vm1463_vm2, %v1454_v14  ;;  %v1107_v17 = vpop.f32.mrf.mxu2 }
 0x156   : > { %v1187_v18 = vpop.f32.mrf.mxu3  ;;  %1488 = vst.msk [vmem:[%s2276_s27 + $0x60] sm:$0xf] %vm1463_vm2, %v1359_v15  ;;  %v1108_v19 = vadd.f32 %v2605_v34, %v1107_v17  ;;  %v949_v21 = vpop.f32.mrf.mxu0 }
 0x157   : > { %v1188_v20 = vadd.f32 %v2605_v34, %v1187_v18  ;;  %v1029_v22 = vpop.f32.mrf.mxu1  ;;  %1520 = vst.msk [vmem:[%s2276_s27 + $0xe0] sm:$0xf] %vm1463_vm2, %v1391_v16  ;;  %v950_v23 = vadd.f32 %v2605_v34, %v949_v21 }
 0x158   : > { %v1030_v24 = vadd.f32 %v2605_v34, %v1029_v22  ;;  %v1295_v25 = vmax.f32 %v1108_v19, 0.0 }
 0x159   : > { %v1327_v26 = vmax.f32 %v1188_v20, 0.0  ;;  %v1232_v27 = vmax.f32 %v950_v23, 0.0 }
 0x15a   : > { %v1264_v28 = vmax.f32 %v1030_v24, 0.0  ;;  %v1423_v29 = vpack.c.bf16 %v1295_v25, %v1295_v25 }
 0x15b   : > { %v1455_v30 = vpack.c.bf16 %v1327_v26, %v1327_v26  ;;  %v1360_v31 = vpack.c.bf16 %v1232_v27, %v1232_v27 }
 0x15c   : > { %v1392_v32 = vpack.c.bf16 %v1264_v28, %v1264_v28  ;;  %1552 = vst.msk [vmem:[%s2276_s27 + $0x160] sm:$0xf] %vm1463_vm2, %v1423_v29 }
 0x15d   : > { %1584 = vst.msk [vmem:[%s2276_s27 + $0x1e0] sm:$0xf] %vm1463_vm2, %v1455_v30  ;;  %v1109_v33 = vpop.f32.mrf.mxu2 }
 0x15e   : > { %v1189_v35 = vpop.f32.mrf.mxu3  ;;  %1489 = vst.msk [vmem:[%s2276_s27 + $0x64] sm:$0xf] %vm1463_vm2, %v1360_v31  ;;  %v1110_v36 = vadd.f32 %v2605_v34, %v1109_v33  ;;  %v952_v38 = vpop.f32.mrf.mxu0 }
 0x15f   : > { %v1190_v37 = vadd.f32 %v2605_v34, %v1189_v35  ;;  %v1032_v39 = vpop.f32.mrf.mxu1  ;;  %1521 = vst.msk [vmem:[%s2276_s27 + $0xe4] sm:$0xf] %vm1463_vm2, %v1392_v32  ;;  %v953_v40 = vadd.f32 %v2605_v34, %v952_v38 }
 0x160   : > { %v1033_v41 = vadd.f32 %v2605_v34, %v1032_v39  ;;  %v1296_v42 = vmax.f32 %v1110_v36, 0.0 }
 0x161   : > { %v1328_v43 = vmax.f32 %v1190_v37, 0.0  ;;  %v1233_v44 = vmax.f32 %v953_v40, 0.0 }
 0x162   : > { %v1265_v45 = vmax.f32 %v1033_v41, 0.0  ;;  %v1424_v46 = vpack.c.bf16 %v1296_v42, %v1296_v42 }
 0x163   : > { %v1456_v47 = vpack.c.bf16 %v1328_v43, %v1328_v43  ;;  %v1361_v48 = vpack.c.bf16 %v1233_v44, %v1233_v44 }
 0x164   : > { %v1393_v49 = vpack.c.bf16 %v1265_v45, %v1265_v45  ;;  %1553 = vst.msk [vmem:[%s2276_s27 + $0x164] sm:$0xf] %vm1463_vm2, %v1424_v46 }
 0x165   : > { %1585 = vst.msk [vmem:[%s2276_s27 + $0x1e4] sm:$0xf] %vm1463_vm2, %v1456_v47  ;;  %v1112_v50 = vpop.f32.mrf.mxu2 }
 0x166   : > { %v1192_v51 = vpop.f32.mrf.mxu3  ;;  %1490 = vst.msk [vmem:[%s2276_s27 + $0x68] sm:$0xf] %vm1463_vm2, %v1361_v48  ;;  %v1113_v52 = vadd.f32 %v2605_v34, %v1112_v50  ;;  %v954_v54 = vpop.f32.mrf.mxu0 }
 0x167   : > { %v1193_v53 = vadd.f32 %v2605_v34, %v1192_v51  ;;  %v1034_v55 = vpop.f32.mrf.mxu1  ;;  %1522 = vst.msk [vmem:[%s2276_s27 + $0xe8] sm:$0xf] %vm1463_vm2, %v1393_v49  ;;  %v955_v56 = vadd.f32 %v2605_v34, %v954_v54 }
 0x168   : > { %v1035_v57 = vadd.f32 %v2605_v34, %v1034_v55  ;;  %v1297_v58 = vmax.f32 %v1113_v52, 0.0 }
 0x169   : > { %v1329_v59 = vmax.f32 %v1193_v53, 0.0  ;;  %v1234_v60 = vmax.f32 %v955_v56, 0.0 }
 0x16a   : > { %v1266_v61 = vmax.f32 %v1035_v57, 0.0  ;;  %v1425_v62 = vpack.c.bf16 %v1297_v58, %v1297_v58 }
 0x16b   : > { %v1457_v63 = vpack.c.bf16 %v1329_v59, %v1329_v59  ;;  %v1362_v0 = vpack.c.bf16 %v1234_v60, %v1234_v60 }
 0x16c   : > { %v1394_v1 = vpack.c.bf16 %v1266_v61, %v1266_v61  ;;  %1554 = vst.msk [vmem:[%s2276_s27 + $0x168] sm:$0xf] %vm1463_vm2, %v1425_v62 }
 0x16d   : > { %1586 = vst.msk [vmem:[%s2276_s27 + $0x1e8] sm:$0xf] %vm1463_vm2, %v1457_v63  ;;  %v1114_v2 = vpop.f32.mrf.mxu2 }
 0x16e   : > { %v1194_v3 = vpop.f32.mrf.mxu3  ;;  %1491 = vst.msk [vmem:[%s2276_s27 + $0x6c] sm:$0xf] %vm1463_vm2, %v1362_v0  ;;  %v1115_v4 = vadd.f32 %v2605_v34, %v1114_v2  ;;  %v957_v6 = vpop.f32.mrf.mxu0 }
 0x16f   : > { %v1195_v5 = vadd.f32 %v2605_v34, %v1194_v3  ;;  %v1037_v7 = vpop.f32.mrf.mxu1  ;;  %1523 = vst.msk [vmem:[%s2276_s27 + $0xec] sm:$0xf] %vm1463_vm2, %v1394_v1  ;;  %v958_v8 = vadd.f32 %v2605_v34, %v957_v6 }
 0x170   : > { %v1038_v9 = vadd.f32 %v2605_v34, %v1037_v7  ;;  %v1298_v10 = vmax.f32 %v1115_v4, 0.0 }
 0x171   : > { %v1330_v11 = vmax.f32 %v1195_v5, 0.0  ;;  %v1235_v12 = vmax.f32 %v958_v8, 0.0 }
 0x172   : > { %v1267_v13 = vmax.f32 %v1038_v9, 0.0  ;;  %v1426_v14 = vpack.c.bf16 %v1298_v10, %v1298_v10 }
 0x173   : > { %v1458_v15 = vpack.c.bf16 %v1330_v11, %v1330_v11  ;;  %v1363_v16 = vpack.c.bf16 %v1235_v12, %v1235_v12 }
 0x174   : > { %v1395_v17 = vpack.c.bf16 %v1267_v13, %v1267_v13  ;;  %1555 = vst.msk [vmem:[%s2276_s27 + $0x16c] sm:$0xf] %vm1463_vm2, %v1426_v14 }
 0x175   : > { %1587 = vst.msk [vmem:[%s2276_s27 + $0x1ec] sm:$0xf] %vm1463_vm2, %v1458_v15  ;;  %v1117_v18 = vpop.f32.mrf.mxu2 }
 0x176   : > { %v1197_v19 = vpop.f32.mrf.mxu3  ;;  %1492 = vst.msk [vmem:[%s2276_s27 + $0x70] sm:$0xf] %vm1463_vm2, %v1363_v16  ;;  %v1118_v20 = vadd.f32 %v2605_v34, %v1117_v18  ;;  %v959_v22 = vpop.f32.mrf.mxu0 }
 0x177   : > { %v1198_v21 = vadd.f32 %v2605_v34, %v1197_v19  ;;  %v1039_v23 = vpop.f32.mrf.mxu1  ;;  %1524 = vst.msk [vmem:[%s2276_s27 + $0xf0] sm:$0xf] %vm1463_vm2, %v1395_v17  ;;  %v960_v24 = vadd.f32 %v2605_v34, %v959_v22 }
 0x178   : > { %v1040_v25 = vadd.f32 %v2605_v34, %v1039_v23  ;;  %v1299_v26 = vmax.f32 %v1118_v20, 0.0 }
 0x179   : > { %v1331_v27 = vmax.f32 %v1198_v21, 0.0  ;;  %v1236_v28 = vmax.f32 %v960_v24, 0.0 }
 0x17a   : > { %v1268_v29 = vmax.f32 %v1040_v25, 0.0  ;;  %v1427_v30 = vpack.c.bf16 %v1299_v26, %v1299_v26 }
 0x17b   : > { %v1459_v31 = vpack.c.bf16 %v1331_v27, %v1331_v27  ;;  %v1364_v32 = vpack.c.bf16 %v1236_v28, %v1236_v28 }
 0x17c   : > { %v1396_v33 = vpack.c.bf16 %v1268_v29, %v1268_v29  ;;  %1556 = vst.msk [vmem:[%s2276_s27 + $0x170] sm:$0xf] %vm1463_vm2, %v1427_v30 }
 0x17d   : > { %1588 = vst.msk [vmem:[%s2276_s27 + $0x1f0] sm:$0xf] %vm1463_vm2, %v1459_v31  ;;  %v1119_v35 = vpop.f32.mrf.mxu2 }
 0x17e   : > { %v1199_v36 = vpop.f32.mrf.mxu3  ;;  %1493 = vst.msk [vmem:[%s2276_s27 + $0x74] sm:$0xf] %vm1463_vm2, %v1364_v32  ;;  %v1120_v37 = vadd.f32 %v2605_v34, %v1119_v35  ;;  %v962_v39 = vpop.f32.mrf.mxu0 }
 0x17f   : > { %v1200_v38 = vadd.f32 %v2605_v34, %v1199_v36  ;;  %v1042_v40 = vpop.f32.mrf.mxu1  ;;  %1525 = vst.msk [vmem:[%s2276_s27 + $0xf4] sm:$0xf] %vm1463_vm2, %v1396_v33  ;;  %v963_v41 = vadd.f32 %v2605_v34, %v962_v39 }
 0x180   : > { %v1043_v42 = vadd.f32 %v2605_v34, %v1042_v40  ;;  %v1300_v43 = vmax.f32 %v1120_v37, 0.0 }
 0x181   : > { %v1332_v44 = vmax.f32 %v1200_v38, 0.0  ;;  %v1237_v45 = vmax.f32 %v963_v41, 0.0 }
 0x182   : > { %v1269_v46 = vmax.f32 %v1043_v42, 0.0  ;;  %v1428_v47 = vpack.c.bf16 %v1300_v43, %v1300_v43 }
 0x183   : > { %v1460_v48 = vpack.c.bf16 %v1332_v44, %v1332_v44  ;;  %v1365_v49 = vpack.c.bf16 %v1237_v45, %v1237_v45 }
 0x184   : > { %v1397_v50 = vpack.c.bf16 %v1269_v46, %v1269_v46  ;;  %1557 = vst.msk [vmem:[%s2276_s27 + $0x174] sm:$0xf] %vm1463_vm2, %v1428_v47 }
 0x185   : > { %1589 = vst.msk [vmem:[%s2276_s27 + $0x1f4] sm:$0xf] %vm1463_vm2, %v1460_v48  ;;  %v1122_v51 = vpop.f32.mrf.mxu2 }
 0x186   : > { %v1202_v52 = vpop.f32.mrf.mxu3  ;;  %1494 = vst.msk [vmem:[%s2276_s27 + $0x78] sm:$0xf] %vm1463_vm2, %v1365_v49  ;;  %v1123_v53 = vadd.f32 %v2605_v34, %v1122_v51  ;;  %v964_v55 = vpop.f32.mrf.mxu0 }
 0x187   : > { %v1203_v54 = vadd.f32 %v2605_v34, %v1202_v52  ;;  %v1044_v56 = vpop.f32.mrf.mxu1  ;;  %1526 = vst.msk [vmem:[%s2276_s27 + $0xf8] sm:$0xf] %vm1463_vm2, %v1397_v50  ;;  %v965_v57 = vadd.f32 %v2605_v34, %v964_v55 }
 0x188   : > { %v1045_v58 = vadd.f32 %v2605_v34, %v1044_v56  ;;  %v1301_v59 = vmax.f32 %v1123_v53, 0.0 }
 0x189   : > { %v1333_v60 = vmax.f32 %v1203_v54, 0.0  ;;  %v1238_v61 = vmax.f32 %v965_v57, 0.0 }
 0x18a   : > { %v1270_v62 = vmax.f32 %v1045_v58, 0.0  ;;  %v1429_v63 = vpack.c.bf16 %v1301_v59, %v1301_v59 }
 0x18b   : > { %v1461_v0 = vpack.c.bf16 %v1333_v60, %v1333_v60  ;;  %v1366_v1 = vpack.c.bf16 %v1238_v61, %v1238_v61 }
 0x18c   : > { %v1398_v2 = vpack.c.bf16 %v1270_v62, %v1270_v62  ;;  %1558 = vst.msk [vmem:[%s2276_s27 + $0x178] sm:$0xf] %vm1463_vm2, %v1429_v63 }
 0x18d   : > { %1590 = vst.msk [vmem:[%s2276_s27 + $0x1f8] sm:$0xf] %vm1463_vm2, %v1461_v0  ;;  %v1124_v3 = vpop.f32.mrf.mxu2 }
 0x18e   : > { %v1204_v4 = vpop.f32.mrf.mxu3  ;;  %1495 = vst.msk [vmem:[%s2276_s27 + $0x7c] sm:$0xf] %vm1463_vm2, %v1366_v1  ;;  %v1125_v5 = vadd.f32 %v2605_v34, %v1124_v3 }
 0x18f   : > { %v1205_v6 = vadd.f32 %v2605_v34, %v1204_v4  ;;  %1527 = vst.msk [vmem:[%s2276_s27 + $0xfc] sm:$0xf] %vm1463_vm2, %v1398_v2 }
 0x190   : > { %v1302_v7 = vmax.f32 %v1125_v5, 0.0 }
 0x191   : > { %v1334_v8 = vmax.f32 %v1205_v6, 0.0 }
 0x192   : > { %v1430_v9 = vpack.c.bf16 %v1302_v7, %v1302_v7 }
 0x193   : > { %v1462_v10 = vpack.c.bf16 %v1334_v8, %v1334_v8 }
 0x194   : > { %1559 = vst.msk [vmem:[%s2276_s27 + $0x17c] sm:$0xf] %vm1463_vm2, %v1430_v9 }
 0x195   : > { %1591 = vst.msk [vmem:[%s2276_s27 + $0x1fc] sm:$0xf] %vm1463_vm2, %v1462_v10 }
 0x196 PF: > { %s13_s14 = sadd.s32 1, %s2141_s14   ;;  %s2736_s12 = smov %s2137_s13 }
 0x197   : > { %p10_p5 = scmp.ge.s32.totalorder %s13_s14, 4   ;;  %s2737_s13 = smov %s2739_s15 }
 0x199   :  { %12 = sbr.rel (!%p10_p5) target bundleno = 2 (0x2), region = 65 }

// kernel: double_crossing_upsample.13
= control target key start
LH: loop header
LB: loop body
LE: loop exit
PB: predicated region body
PF: predicated region fallthrough
CT: control target
= control target key end

     0   :  { %s1358_s12 = smov 0   ;;  %s1360_s13 = smov 0   ;;  %s1667_s0 = inlined_call_operand.vmem [shape: bf16[4,512,64], index: 0, kind: input, shape index: {}]   ;;  %s1668_s1 = inlined_call_operand.vmem [shape: bf16[4,64,4], index: 1, kind: input, shape index: {}]   ;;  %s1669_s2 = inlined_call_operand.vmem [shape: f32[1,4], index: 2, kind: input, shape index: {}]   ;;  %s1670_s3 = inlined_call_operand.vmem [shape: bf16[4,512,4], index: 3, kind: output, shape index: {}]  }
   0x1   :  { %s1362_s14 = smov 0  }
   0x2 LB: > { %s25_s15 = sadd.s32 1, %s1332_s13  ;;  %p1053_p0 = scmp.ge.s32.totalorder %s1336_s14, 1  ;;  %s1336_s14 = sphi %s1362_s14, %s13_s14   ;;  %s1332_s13 = sphi %s1360_s13, %s1672_s13   ;;  %s1328_s12 = sphi %s1358_s12, %s1671_s12  }
   0x3   : > { %p27_p1 = scmp.ge.s32.totalorder %s25_s15, 4  ;;  %p168_p2 = scmp.lt.s32.totalorder %s1336_s14, 5 }
   0x5   : > { %s1674_s15 = smov (%p27_p1, %s25_s15), 0  ;;  %p169_p3 = pnand %p1053_p0, %p168_p2 }
   0x6   : > { %p206_p4 = scmp.lt.s32.totalorder (!%p169_p3), %s1328_s12, 3 }
   0x7   : > { %172 = sbr.rel (%p169_p3) target bundleno = 292 (0x124), region = 32 }
   0xc   : > { %s1676_s12 = smov (!%p206_p4, %s1328_s12), 3  ;;  %vm491_vm0 = vcmask 523264   ;;  %v1457_v36 = vld [vmem:[%s1669_s2] ss:$0 sm:$0xff]  ;;  %vm885_vm1 = vcmask 27648  }
   0xd   : > { %s1239_s16 = sshll.u32 %s1676_s12, 5  ;;  %s1238_s20 = sshll.u32 %s1676_s12, 8 }
   0xe   : > { %s219_s19 = scalar_lea.vmem %s1668_s1, %s1239_s16  ;;  %s1388_s23 = scalar_lea.vmem %s1667_s0, %s1238_s20 }
   0xf   : > { %v1276_v0 = vld [vmem:[%s219_s19 + $0x18] sm:$0xff]  ;;  %v1275_v1 = vld [vmem:[%s219_s19 + $0x10] sm:$0xff]  ;;  %v1274_v2 = vld [vmem:[%s219_s19 + $0x8] sm:$0xff]  ;;  %s1466_s28 = scalar_lea.vmem %s1670_s3, %s1238_s20 }
  0x10   : > { %592 = vmatpush.bf16.msra.mxu0 %v1276_v0  ;;  %1277 = vmatpush.bf16.msra.mxu1 %v1276_v0  ;;  %v1273_v3 = vld [vmem:[%s219_s19] sm:$0xff]  ;;  %v1242_v8 = vld [vmem:[%s1388_s23 + $0x8] sm:$0xff]  ;;  %v1243_v12 = vld [vmem:[%s1388_s23 + $0x10] sm:$0xff] }
  0x11   : > { %1278 = vmatpush.bf16.msra.mxu2 %v1276_v0  ;;  %1279 = vmatpush.bf16.msra.mxu3 %v1276_v0  ;;  %v1241_v4 = vld [vmem:[%s1388_s23] sm:$0xff]  ;;  %v1250_v9 = vld [vmem:[%s1388_s23 + $0x48] sm:$0xff]  ;;  %v1251_v13 = vld [vmem:[%s1388_s23 + $0x50] sm:$0xff] }
  0x12   : > { %v1249_v5 = vld [vmem:[%s1388_s23 + $0x40] sm:$0xff]  ;;  %v1258_v10 = vld [vmem:[%s1388_s23 + $0x88] sm:$0xff]  ;;  %v1259_v14 = vld [vmem:[%s1388_s23 + $0x90] sm:$0xff] }
  0x13   : > { %v1257_v6 = vld [vmem:[%s1388_s23 + $0x80] sm:$0xff]  ;;  %v1266_v11 = vld [vmem:[%s1388_s23 + $0xc8] sm:$0xff]  ;;  %v1267_v15 = vld [vmem:[%s1388_s23 + $0xd0] sm:$0xff] }
  0x14   : > { %593 = vmatpush.bf16.msra.mxu0 %v1275_v1  ;;  %1280 = vmatpush.bf16.msra.mxu1 %v1275_v1  ;;  %v1265_v7 = vld [vmem:[%s1388_s23 + $0xc0] sm:$0xff]  ;;  %v1244_v16 = vld [vmem:[%s1388_s23 + $0x18] sm:$0xff]  ;;  %v1246_v24 = vld [vmem:[%s1388_s23 + $0x28] sm:$0xff] }
  0x15   : > { %1281 = vmatpush.bf16.msra.mxu2 %v1275_v1  ;;  %1282 = vmatpush.bf16.msra.mxu3 %v1275_v1  ;;  %v1252_v17 = vld [vmem:[%s1388_s23 + $0x58] sm:$0xff]  ;;  %v1245_v20 = vld [vmem:[%s1388_s23 + $0x20] sm:$0xff]  ;;  %v1254_v25 = vld [vmem:[%s1388_s23 + $0x68] sm:$0xff] }
  0x16   : > { %v1260_v18 = vld [vmem:[%s1388_s23 + $0x98] sm:$0xff]  ;;  %v1253_v21 = vld [vmem:[%s1388_s23 + $0x60] sm:$0xff]  ;;  %v1262_v26 = vld [vmem:[%s1388_s23 + $0xa8] sm:$0xff] }
  0x17   : > { %v1268_v19 = vld [vmem:[%s1388_s23 + $0xd8] sm:$0xff]  ;;  %v1261_v22 = vld [vmem:[%s1388_s23 + $0xa0] sm:$0xff]  ;;  %v1270_v27 = vld [vmem:[%s1388_s23 + $0xe8] sm:$0xff] }
  0x18   : > { %594 = vmatpush.bf16.msra.mxu0 %v1274_v2  ;;  %1283 = vmatpush.bf16.msra.mxu1 %v1274_v2  ;;  %v1269_v23 = vld [vmem:[%s1388_s23 + $0xe0] sm:$0xff]  ;;  %v1247_v28 = vld [vmem:[%s1388_s23 + $0x30] sm:$0xff]  ;;  %v1248_v32 = vld [vmem:[%s1388_s23 + $0x38] sm:$0xff] }
  0x19   : > { %1284 = vmatpush.bf16.msra.mxu2 %v1274_v2  ;;  %1285 = vmatpush.bf16.msra.mxu3 %v1274_v2  ;;  %v1255_v29 = vld [vmem:[%s1388_s23 + $0x70] sm:$0xff]  ;;  %v1256_v33 = vld [vmem:[%s1388_s23 + $0x78] sm:$0xff] }
  0x1a   : > { %v1263_v30 = vld [vmem:[%s1388_s23 + $0xb0] sm:$0xff]  ;;  %v1264_v34 = vld [vmem:[%s1388_s23 + $0xb8] sm:$0xff] }
  0x1b   : > { %v1271_v31 = vld [vmem:[%s1388_s23 + $0xf0] sm:$0xff]  ;;  %v1272_v35 = vld [vmem:[%s1388_s23 + $0xf8] sm:$0xff] }
  0x1c   : > { %595 = vmatpush.bf16.msra.mxu0 %v1273_v3  ;;  %1286 = vmatpush.bf16.msra.mxu1 %v1273_v3 }
  0x1d   : > { %1287 = vmatpush.bf16.msra.mxu2 %v1273_v3  ;;  %1288 = vmatpush.bf16.msra.mxu3 %v1273_v3 }
  0x1f   : > { %1204 = vmatmul.msk.bf16.vlgmr.msra.gmra.mxu0 %vm491_vm0, %v1241_v4  ;;  %1212 = vmatmul.msk.bf16.vlgmr.msra.gmra.mxu1 %vm491_vm0, %v1249_v5 }
  0x20   : > { %1220 = vmatmul.msk.bf16.vlgmr.msra.gmra.mxu2 %vm491_vm0, %v1257_v6  ;;  %1228 = vmatmul.msk.bf16.vlgmr.msra.gmra.mxu3 %vm491_vm0, %v1265_v7 }
  0x2f   : > { %1205 = vmatmul.msk.bf16.gmra.mxu0 %vm491_vm0, %v1242_v8  ;;  %1213 = vmatmul.msk.bf16.gmra.mxu1 %vm491_vm0, %v1250_v9 }
  0x30   : > { %1221 = vmatmul.msk.bf16.gmra.mxu2 %vm491_vm0, %v1258_v10  ;;  %1229 = vmatmul.msk.bf16.gmra.mxu3 %vm491_vm0, %v1266_v11 }
  0x3f   : > { %1206 = vmatmul.msk.bf16.gmra.mxu0 %vm491_vm0, %v1243_v12  ;;  %1214 = vmatmul.msk.bf16.gmra.mxu1 %vm491_vm0, %v1251_v13 }
  0x40   : > { %1222 = vmatmul.msk.bf16.gmra.mxu2 %vm491_vm0, %v1259_v14  ;;  %1230 = vmatmul.msk.bf16.gmra.mxu3 %vm491_vm0, %v1267_v15 }
  0x4f   : > { %1207 = vmatmul.msk.bf16.gmra.mxu0 %vm491_vm0, %v1244_v16  ;;  %1215 = vmatmul.msk.bf16.gmra.mxu1 %vm491_vm0, %v1252_v17 }
  0x50   : > { %1223 = vmatmul.msk.bf16.gmra.mxu2 %vm491_vm0, %v1260_v18  ;;  %1231 = vmatmul.msk.bf16.gmra.mxu3 %vm491_vm0, %v1268_v19 }
  0x5f   : > { %1208 = vmatmul.msk.bf16.gmra.mxu0 %vm491_vm0, %v1245_v20  ;;  %1216 = vmatmul.msk.bf16.gmra.mxu1 %vm491_vm0, %v1253_v21 }
  0x60   : > { %1224 = vmatmul.msk.bf16.gmra.mxu2 %vm491_vm0, %v1261_v22  ;;  %1232 = vmatmul.msk.bf16.gmra.mxu3 %vm491_vm0, %v1269_v23 }
  0x6f   : > { %1209 = vmatmul.msk.bf16.gmra.mxu0 %vm491_vm0, %v1246_v24  ;;  %1217 = vmatmul.msk.bf16.gmra.mxu1 %vm491_vm0, %v1254_v25 }
  0x70   : > { %1225 = vmatmul.msk.bf16.gmra.mxu2 %vm491_vm0, %v1262_v26  ;;  %1233 = vmatmul.msk.bf16.gmra.mxu3 %vm491_vm0, %v1270_v27 }
  0x7f   : > { %1210 = vmatmul.msk.bf16.gmra.mxu0 %vm491_vm0, %v1247_v28  ;;  %1218 = vmatmul.msk.bf16.gmra.mxu1 %vm491_vm0, %v1255_v29 }
  0x80   : > { %1226 = vmatmul.msk.bf16.gmra.mxu2 %vm491_vm0, %v1263_v30  ;;  %1234 = vmatmul.msk.bf16.gmra.mxu3 %vm491_vm0, %v1271_v31 }
  0x8f   : > { %1211 = vmatmul.msk.bf16.gmra.mxu0 %vm491_vm0, %v1248_v32  ;;  %1219 = vmatmul.msk.bf16.gmra.mxu1 %vm491_vm0, %v1256_v33 }
  0x90   : > { %1227 = vmatmul.msk.bf16.gmra.mxu2 %vm491_vm0, %v1264_v34  ;;  %1235 = vmatmul.msk.bf16.gmra.mxu3 %vm491_vm0, %v1272_v35 }
  0x9c   : > { %v597_v37 = vpop.f32.mrf.mxu0  ;;  %v637_v38 = vpop.f32.mrf.mxu1 }
  0x9d   : > { %v598_v39 = vadd.f32 %v1457_v36, %v597_v37  ;;  %v638_v40 = vadd.f32 %v1457_v36, %v637_v38 }
  0x9f   : > { %v757_v41 = vmax.f32 %v598_v39, 0.0  ;;  %v773_v42 = vmax.f32 %v638_v40, 0.0 }
  0xa1   : > { %v821_v43 = vpack.c.bf16 %v757_v41, %v757_v41  ;;  %v837_v44 = vpack.c.bf16 %v773_v42, %v773_v42 }
  0xa3   : > { %886 = vst.msk [vmem:[%s1466_s28] sm:$0xf] %vm885_vm1, %v821_v43  ;;  %v677_v45 = vpop.f32.mrf.mxu2  ;;  %v717_v46 = vpop.f32.mrf.mxu3 }
  0xa4   : > { %902 = vst.msk [vmem:[%s1466_s28 + $0x40] sm:$0xf] %vm885_vm1, %v837_v44  ;;  %v678_v47 = vadd.f32 %v1457_v36, %v677_v45  ;;  %v718_v48 = vadd.f32 %v1457_v36, %v717_v46  ;;  %v599_v49 = vpop.f32.mrf.mxu0  ;;  %v639_v50 = vpop.f32.mrf.mxu1 }
  0xa5   : > { %v600_v51 = vadd.f32 %v1457_v36, %v599_v49  ;;  %v640_v52 = vadd.f32 %v1457_v36, %v639_v50 }
  0xa6   : > { %v789_v53 = vmax.f32 %v678_v47, 0.0  ;;  %v805_v54 = vmax.f32 %v718_v48, 0.0 }
  0xa7   : > { %v758_v55 = vmax.f32 %v600_v51, 0.0  ;;  %v774_v56 = vmax.f32 %v640_v52, 0.0 }
  0xa8   : > { %v853_v57 = vpack.c.bf16 %v789_v53, %v789_v53  ;;  %v869_v58 = vpack.c.bf16 %v805_v54, %v805_v54 }
  0xa9   : > { %v822_v59 = vpack.c.bf16 %v758_v55, %v758_v55  ;;  %v838_v60 = vpack.c.bf16 %v774_v56, %v774_v56 }
  0xaa   : > { %918 = vst.msk [vmem:[%s1466_s28 + $0x80] sm:$0xf] %vm885_vm1, %v853_v57 }
  0xab   : > { %934 = vst.msk [vmem:[%s1466_s28 + $0xc0] sm:$0xf] %vm885_vm1, %v869_v58  ;;  %v679_v61 = vpop.f32.mrf.mxu2  ;;  %v719_v62 = vpop.f32.mrf.mxu3 }
  0xac   : > { %887 = vst.msk [vmem:[%s1466_s28 + $0x4] sm:$0xf] %vm885_vm1, %v822_v59  ;;  %v680_v63 = vadd.f32 %v1457_v36, %v679_v61  ;;  %v720_v0 = vadd.f32 %v1457_v36, %v719_v62  ;;  %v602_v1 = vpop.f32.mrf.mxu0  ;;  %v642_v2 = vpop.f32.mrf.mxu1 }
  0xad   : > { %903 = vst.msk [vmem:[%s1466_s28 + $0x44] sm:$0xf] %vm885_vm1, %v838_v60  ;;  %v603_v3 = vadd.f32 %v1457_v36, %v602_v1  ;;  %v643_v4 = vadd.f32 %v1457_v36, %v642_v2 }
  0xae   : > { %v790_v5 = vmax.f32 %v680_v63, 0.0  ;;  %v806_v6 = vmax.f32 %v720_v0, 0.0 }
  0xaf   : > { %v759_v7 = vmax.f32 %v603_v3, 0.0  ;;  %v775_v8 = vmax.f32 %v643_v4, 0.0 }
  0xb0   : > { %v854_v9 = vpack.c.bf16 %v790_v5, %v790_v5  ;;  %v870_v10 = vpack.c.bf16 %v806_v6, %v806_v6 }
  0xb1   : > { %v823_v11 = vpack.c.bf16 %v759_v7, %v759_v7  ;;  %v839_v12 = vpack.c.bf16 %v775_v8, %v775_v8 }
  0xb2   : > { %919 = vst.msk [vmem:[%s1466_s28 + $0x84] sm:$0xf] %vm885_vm1, %v854_v9 }
  0xb3   : > { %935 = vst.msk [vmem:[%s1466_s28 + $0xc4] sm:$0xf] %vm885_vm1, %v870_v10  ;;  %v682_v13 = vpop.f32.mrf.mxu2  ;;  %v722_v14 = vpop.f32.mrf.mxu3 }
  0xb4   : > { %888 = vst.msk [vmem:[%s1466_s28 + $0x8] sm:$0xf] %vm885_vm1, %v823_v11  ;;  %v683_v15 = vadd.f32 %v1457_v36, %v682_v13  ;;  %v723_v16 = vadd.f32 %v1457_v36, %v722_v14  ;;  %v604_v17 = vpop.f32.mrf.mxu0  ;;  %v644_v18 = vpop.f32.mrf.mxu1 }
  0xb5   : > { %904 = vst.msk [vmem:[%s1466_s28 + $0x48] sm:$0xf] %vm885_vm1, %v839_v12  ;;  %v605_v19 = vadd.f32 %v1457_v36, %v604_v17  ;;  %v645_v20 = vadd.f32 %v1457_v36, %v644_v18 }
  0xb6   : > { %v791_v21 = vmax.f32 %v683_v15, 0.0  ;;  %v807_v22 = vmax.f32 %v723_v16, 0.0 }
  0xb7   : > { %v760_v23 = vmax.f32 %v605_v19, 0.0  ;;  %v776_v24 = vmax.f32 %v645_v20, 0.0 }
  0xb8   : > { %v855_v25 = vpack.c.bf16 %v791_v21, %v791_v21  ;;  %v871_v26 = vpack.c.bf16 %v807_v22, %v807_v22 }
  0xb9   : > { %v824_v27 = vpack.c.bf16 %v760_v23, %v760_v23  ;;  %v840_v28 = vpack.c.bf16 %v776_v24, %v776_v24 }
  0xba   : > { %920 = vst.msk [vmem:[%s1466_s28 + $0x88] sm:$0xf] %vm885_vm1, %v855_v25 }
  0xbb   : > { %936 = vst.msk [vmem:[%s1466_s28 + $0xc8] sm:$0xf] %vm885_vm1, %v871_v26  ;;  %v684_v29 = vpop.f32.mrf.mxu2  ;;  %v724_v30 = vpop.f32.mrf.mxu3 }
  0xbc   : > { %889 = vst.msk [vmem:[%s1466_s28 + $0xc] sm:$0xf] %vm885_vm1, %v824_v27  ;;  %v685_v31 = vadd.f32 %v1457_v36, %v684_v29  ;;  %v725_v32 = vadd.f32 %v1457_v36, %v724_v30  ;;  %v607_v33 = vpop.f32.mrf.mxu0  ;;  %v647_v34 = vpop.f32.mrf.mxu1 }
  0xbd   : > { %905 = vst.msk [vmem:[%s1466_s28 + $0x4c] sm:$0xf] %vm885_vm1, %v840_v28  ;;  %v608_v35 = vadd.f32 %v1457_v36, %v607_v33  ;;  %v648_v37 = vadd.f32 %v1457_v36, %v647_v34 }
  0xbe   : > { %v792_v38 = vmax.f32 %v685_v31, 0.0  ;;  %v808_v39 = vmax.f32 %v725_v32, 0.0 }
  0xbf   : > { %v761_v40 = vmax.f32 %v608_v35, 0.0  ;;  %v777_v41 = vmax.f32 %v648_v37, 0.0 }
  0xc0   : > { %v856_v42 = vpack.c.bf16 %v792_v38, %v792_v38  ;;  %v872_v43 = vpack.c.bf16 %v808_v39, %v808_v39 }
  0xc1   : > { %v825_v44 = vpack.c.bf16 %v761_v40, %v761_v40  ;;  %v841_v45 = vpack.c.bf16 %v777_v41, %v777_v41 }
  0xc2   : > { %921 = vst.msk [vmem:[%s1466_s28 + $0x8c] sm:$0xf] %vm885_vm1, %v856_v42 }
  0xc3   : > { %937 = vst.msk [vmem:[%s1466_s28 + $0xcc] sm:$0xf] %vm885_vm1, %v872_v43  ;;  %v687_v46 = vpop.f32.mrf.mxu2  ;;  %v727_v47 = vpop.f32.mrf.mxu3 }
  0xc4   : > { %890 = vst.msk [vmem:[%s1466_s28 + $0x10] sm:$0xf] %vm885_vm1, %v825_v44  ;;  %v688_v48 = vadd.f32 %v1457_v36, %v687_v46  ;;  %v728_v49 = vadd.f32 %v1457_v36, %v727_v47  ;;  %v609_v50 = vpop.f32.mrf.mxu0  ;;  %v649_v51 = vpop.f32.mrf.mxu1 }
  0xc5   : > { %906 = vst.msk [vmem:[%s1466_s28 + $0x50] sm:$0xf] %vm885_vm1, %v841_v45  ;;  %v610_v52 = vadd.f32 %v1457_v36, %v609_v50  ;;  %v650_v53 = vadd.f32 %v1457_v36, %v649_v51 }
  0xc6   : > { %v793_v54 = vmax.f32 %v688_v48, 0.0  ;;  %v809_v55 = vmax.f32 %v728_v49, 0.0 }
  0xc7   : > { %v762_v56 = vmax.f32 %v610_v52, 0.0  ;;  %v778_v57 = vmax.f32 %v650_v53, 0.0 }
  0xc8   : > { %v857_v58 = vpack.c.bf16 %v793_v54, %v793_v54  ;;  %v873_v59 = vpack.c.bf16 %v809_v55, %v809_v55 }
  0xc9   : > { %v826_v60 = vpack.c.bf16 %v762_v56, %v762_v56  ;;  %v842_v61 = vpack.c.bf16 %v778_v57, %v778_v57 }
  0xca   : > { %922 = vst.msk [vmem:[%s1466_s28 + $0x90] sm:$0xf] %vm885_vm1, %v857_v58 }
  0xcb   : > { %938 = vst.msk [vmem:[%s1466_s28 + $0xd0] sm:$0xf] %vm885_vm1, %v873_v59  ;;  %v689_v62 = vpop.f32.mrf.mxu2  ;;  %v729_v63 = vpop.f32.mrf.mxu3 }
  0xcc   : > { %891 = vst.msk [vmem:[%s1466_s28 + $0x14] sm:$0xf] %vm885_vm1, %v826_v60  ;;  %v690_v0 = vadd.f32 %v1457_v36, %v689_v62  ;;  %v730_v1 = vadd.f32 %v1457_v36, %v729_v63  ;;  %v612_v2 = vpop.f32.mrf.mxu0  ;;  %v652_v3 = vpop.f32.mrf.mxu1 }
  0xcd   : > { %907 = vst.msk [vmem:[%s1466_s28 + $0x54] sm:$0xf] %vm885_vm1, %v842_v61  ;;  %v613_v4 = vadd.f32 %v1457_v36, %v612_v2  ;;  %v653_v5 = vadd.f32 %v1457_v36, %v652_v3 }
  0xce   : > { %v794_v6 = vmax.f32 %v690_v0, 0.0  ;;  %v810_v7 = vmax.f32 %v730_v1, 0.0 }
  0xcf   : > { %v763_v8 = vmax.f32 %v613_v4, 0.0  ;;  %v779_v9 = vmax.f32 %v653_v5, 0.0 }
  0xd0   : > { %v858_v10 = vpack.c.bf16 %v794_v6, %v794_v6  ;;  %v874_v11 = vpack.c.bf16 %v810_v7, %v810_v7 }
  0xd1   : > { %v827_v12 = vpack.c.bf16 %v763_v8, %v763_v8  ;;  %v843_v13 = vpack.c.bf16 %v779_v9, %v779_v9 }
  0xd2   : > { %923 = vst.msk [vmem:[%s1466_s28 + $0x94] sm:$0xf] %vm885_vm1, %v858_v10 }
  0xd3   : > { %939 = vst.msk [vmem:[%s1466_s28 + $0xd4] sm:$0xf] %vm885_vm1, %v874_v11  ;;  %v692_v14 = vpop.f32.mrf.mxu2  ;;  %v732_v15 = vpop.f32.mrf.mxu3 }
  0xd4   : > { %892 = vst.msk [vmem:[%s1466_s28 + $0x18] sm:$0xf] %vm885_vm1, %v827_v12  ;;  %v693_v16 = vadd.f32 %v1457_v36, %v692_v14  ;;  %v733_v17 = vadd.f32 %v1457_v36, %v732_v15  ;;  %v614_v18 = vpop.f32.mrf.mxu0  ;;  %v654_v19 = vpop.f32.mrf.mxu1 }
  0xd5   : > { %908 = vst.msk [vmem:[%s1466_s28 + $0x58] sm:$0xf] %vm885_vm1, %v843_v13  ;;  %v615_v20 = vadd.f32 %v1457_v36, %v614_v18  ;;  %v655_v21 = vadd.f32 %v1457_v36, %v654_v19 }
  0xd6   : > { %v795_v22 = vmax.f32 %v693_v16, 0.0  ;;  %v811_v23 = vmax.f32 %v733_v17, 0.0 }
  0xd7   : > { %v764_v24 = vmax.f32 %v615_v20, 0.0  ;;  %v780_v25 = vmax.f32 %v655_v21, 0.0 }
  0xd8   : > { %v859_v26 = vpack.c.bf16 %v795_v22, %v795_v22  ;;  %v875_v27 = vpack.c.bf16 %v811_v23, %v811_v23 }
  0xd9   : > { %v828_v28 = vpack.c.bf16 %v764_v24, %v764_v24  ;;  %v844_v29 = vpack.c.bf16 %v780_v25, %v780_v25 }
  0xda   : > { %924 = vst.msk [vmem:[%s1466_s28 + $0x98] sm:$0xf] %vm885_vm1, %v859_v26 }
  0xdb   : > { %940 = vst.msk [vmem:[%s1466_s28 + $0xd8] sm:$0xf] %vm885_vm1, %v875_v27  ;;  %v694_v30 = vpop.f32.mrf.mxu2  ;;  %v734_v31 = vpop.f32.mrf.mxu3 }
  0xdc   : > { %893 = vst.msk [vmem:[%s1466_s28 + $0x1c] sm:$0xf] %vm885_vm1, %v828_v28  ;;  %v695_v32 = vadd.f32 %v1457_v36, %v694_v30  ;;  %v735_v33 = vadd.f32 %v1457_v36, %v734_v31  ;;  %v617_v34 = vpop.f32.mrf.mxu0  ;;  %v657_v35 = vpop.f32.mrf.mxu1 }
  0xdd   : > { %909 = vst.msk [vmem:[%s1466_s28 + $0x5c] sm:$0xf] %vm885_vm1, %v844_v29  ;;  %v618_v37 = vadd.f32 %v1457_v36, %v617_v34  ;;  %v658_v38 = vadd.f32 %v1457_v36, %v657_v35 }
  0xde   : > { %v796_v39 = vmax.f32 %v695_v32, 0.0  ;;  %v812_v40 = vmax.f32 %v735_v33, 0.0 }
  0xdf   : > { %v765_v41 = vmax.f32 %v618_v37, 0.0  ;;  %v781_v42 = vmax.f32 %v658_v38, 0.0 }
  0xe0   : > { %v860_v43 = vpack.c.bf16 %v796_v39, %v796_v39  ;;  %v876_v44 = vpack.c.bf16 %v812_v40, %v812_v40 }
  0xe1   : > { %v829_v45 = vpack.c.bf16 %v765_v41, %v765_v41  ;;  %v845_v46 = vpack.c.bf16 %v781_v42, %v781_v42 }
  0xe2   : > { %925 = vst.msk [vmem:[%s1466_s28 + $0x9c] sm:$0xf] %vm885_vm1, %v860_v43 }
  0xe3   : > { %941 = vst.msk [vmem:[%s1466_s28 + $0xdc] sm:$0xf] %vm885_vm1, %v876_v44  ;;  %v697_v47 = vpop.f32.mrf.mxu2  ;;  %v737_v48 = vpop.f32.mrf.mxu3 }
  0xe4   : > { %894 = vst.msk [vmem:[%s1466_s28 + $0x20] sm:$0xf] %vm885_vm1, %v829_v45  ;;  %v698_v49 = vadd.f32 %v1457_v36, %v697_v47  ;;  %v738_v50 = vadd.f32 %v1457_v36, %v737_v48  ;;  %v619_v51 = vpop.f32.mrf.mxu0  ;;  %v659_v52 = vpop.f32.mrf.mxu1 }
  0xe5   : > { %910 = vst.msk [vmem:[%s1466_s28 + $0x60] sm:$0xf] %vm885_vm1, %v845_v46  ;;  %v620_v53 = vadd.f32 %v1457_v36, %v619_v51  ;;  %v660_v54 = vadd.f32 %v1457_v36, %v659_v52 }
  0xe6   : > { %v797_v55 = vmax.f32 %v698_v49, 0.0  ;;  %v813_v56 = vmax.f32 %v738_v50, 0.0 }
  0xe7   : > { %v766_v57 = vmax.f32 %v620_v53, 0.0  ;;  %v782_v58 = vmax.f32 %v660_v54, 0.0 }
  0xe8   : > { %v861_v59 = vpack.c.bf16 %v797_v55, %v797_v55  ;;  %v877_v60 = vpack.c.bf16 %v813_v56, %v813_v56 }
  0xe9   : > { %v830_v61 = vpack.c.bf16 %v766_v57, %v766_v57  ;;  %v846_v62 = vpack.c.bf16 %v782_v58, %v782_v58 }
  0xea   : > { %926 = vst.msk [vmem:[%s1466_s28 + $0xa0] sm:$0xf] %vm885_vm1, %v861_v59 }
  0xeb   : > { %942 = vst.msk [vmem:[%s1466_s28 + $0xe0] sm:$0xf] %vm885_vm1, %v877_v60  ;;  %v699_v63 = vpop.f32.mrf.mxu2  ;;  %v739_v0 = vpop.f32.mrf.mxu3 }
  0xec   : > { %895 = vst.msk [vmem:[%s1466_s28 + $0x24] sm:$0xf] %vm885_vm1, %v830_v61  ;;  %v700_v1 = vadd.f32 %v1457_v36, %v699_v63  ;;  %v740_v2 = vadd.f32 %v1457_v36, %v739_v0  ;;  %v622_v3 = vpop.f32.mrf.mxu0  ;;  %v662_v4 = vpop.f32.mrf.mxu1 }
  0xed   : > { %911 = vst.msk [vmem:[%s1466_s28 + $0x64] sm:$0xf] %vm885_vm1, %v846_v62  ;;  %v623_v5 = vadd.f32 %v1457_v36, %v622_v3  ;;  %v663_v6 = vadd.f32 %v1457_v36, %v662_v4 }
  0xee   : > { %v798_v7 = vmax.f32 %v700_v1, 0.0  ;;  %v814_v8 = vmax.f32 %v740_v2, 0.0 }
  0xef   : > { %v767_v9 = vmax.f32 %v623_v5, 0.0  ;;  %v783_v10 = vmax.f32 %v663_v6, 0.0 }
  0xf0   : > { %v862_v11 = vpack.c.bf16 %v798_v7, %v798_v7  ;;  %v878_v12 = vpack.c.bf16 %v814_v8, %v814_v8 }
  0xf1   : > { %v831_v13 = vpack.c.bf16 %v767_v9, %v767_v9  ;;  %v847_v14 = vpack.c.bf16 %v783_v10, %v783_v10 }
  0xf2   : > { %927 = vst.msk [vmem:[%s1466_s28 + $0xa4] sm:$0xf] %vm885_vm1, %v862_v11 }
  0xf3   : > { %943 = vst.msk [vmem:[%s1466_s28 + $0xe4] sm:$0xf] %vm885_vm1, %v878_v12  ;;  %v702_v15 = vpop.f32.mrf.mxu2  ;;  %v742_v16 = vpop.f32.mrf.mxu3 }
  0xf4   : > { %896 = vst.msk [vmem:[%s1466_s28 + $0x28] sm:$0xf] %vm885_vm1, %v831_v13  ;;  %v703_v17 = vadd.f32 %v1457_v36, %v702_v15  ;;  %v743_v18 = vadd.f32 %v1457_v36, %v742_v16  ;;  %v624_v19 = vpop.f32.mrf.mxu0  ;;  %v664_v20 = vpop.f32.mrf.mxu1 }
  0xf5   : > { %912 = vst.msk [vmem:[%s1466_s28 + $0x68] sm:$0xf] %vm885_vm1, %v847_v14  ;;  %v625_v21 = vadd.f32 %v1457_v36, %v624_v19  ;;  %v665_v22 = vadd.f32 %v1457_v36, %v664_v20 }
  0xf6   : > { %v799_v23 = vmax.f32 %v703_v17, 0.0  ;;  %v815_v24 = vmax.f32 %v743_v18, 0.0 }
  0xf7   : > { %v768_v25 = vmax.f32 %v625_v21, 0.0  ;;  %v784_v26 = vmax.f32 %v665_v22, 0.0 }
  0xf8   : > { %v863_v27 = vpack.c.bf16 %v799_v23, %v799_v23  ;;  %v879_v28 = vpack.c.bf16 %v815_v24, %v815_v24 }
  0xf9   : > { %v832_v29 = vpack.c.bf16 %v768_v25, %v768_v25  ;;  %v848_v30 = vpack.c.bf16 %v784_v26, %v784_v26 }
  0xfa   : > { %928 = vst.msk [vmem:[%s1466_s28 + $0xa8] sm:$0xf] %vm885_vm1, %v863_v27 }
  0xfb   : > { %944 = vst.msk [vmem:[%s1466_s28 + $0xe8] sm:$0xf] %vm885_vm1, %v879_v28  ;;  %v704_v31 = vpop.f32.mrf.mxu2  ;;  %v744_v32 = vpop.f32.mrf.mxu3 }
  0xfc   : > { %897 = vst.msk [vmem:[%s1466_s28 + $0x2c] sm:$0xf] %vm885_vm1, %v832_v29  ;;  %v705_v33 = vadd.f32 %v1457_v36, %v704_v31  ;;  %v745_v34 = vadd.f32 %v1457_v36, %v744_v32  ;;  %v627_v35 = vpop.f32.mrf.mxu0  ;;  %v667_v37 = vpop.f32.mrf.mxu1 }
  0xfd   : > { %913 = vst.msk [vmem:[%s1466_s28 + $0x6c] sm:$0xf] %vm885_vm1, %v848_v30  ;;  %v628_v38 = vadd.f32 %v1457_v36, %v627_v35  ;;  %v668_v39 = vadd.f32 %v1457_v36, %v667_v37 }
  0xfe   : > { %v800_v40 = vmax.f32 %v705_v33, 0.0  ;;  %v816_v41 = vmax.f32 %v745_v34, 0.0 }
  0xff   : > { %v769_v42 = vmax.f32 %v628_v38, 0.0  ;;  %v785_v43 = vmax.f32 %v668_v39, 0.0 }
 0x100   : > { %v864_v44 = vpack.c.bf16 %v800_v40, %v800_v40  ;;  %v880_v45 = vpack.c.bf16 %v816_v41, %v816_v41 }
 0x101   : > { %v833_v46 = vpack.c.bf16 %v769_v42, %v769_v42  ;;  %v849_v47 = vpack.c.bf16 %v785_v43, %v785_v43 }
 0x102   : > { %929 = vst.msk [vmem:[%s1466_s28 + $0xac] sm:$0xf] %vm885_vm1, %v864_v44 }
 0x103   : > { %945 = vst.msk [vmem:[%s1466_s28 + $0xec] sm:$0xf] %vm885_vm1, %v880_v45  ;;  %v707_v48 = vpop.f32.mrf.mxu2  ;;  %v747_v49 = vpop.f32.mrf.mxu3 }
 0x104   : > { %898 = vst.msk [vmem:[%s1466_s28 + $0x30] sm:$0xf] %vm885_vm1, %v833_v46  ;;  %v708_v50 = vadd.f32 %v1457_v36, %v707_v48  ;;  %v748_v51 = vadd.f32 %v1457_v36, %v747_v49  ;;  %v629_v52 = vpop.f32.mrf.mxu0  ;;  %v669_v53 = vpop.f32.mrf.mxu1 }
 0x105   : > { %914 = vst.msk [vmem:[%s1466_s28 + $0x70] sm:$0xf] %vm885_vm1, %v849_v47  ;;  %v630_v54 = vadd.f32 %v1457_v36, %v629_v52  ;;  %v670_v55 = vadd.f32 %v1457_v36, %v669_v53 }
 0x106   : > { %v801_v56 = vmax.f32 %v708_v50, 0.0  ;;  %v817_v57 = vmax.f32 %v748_v51, 0.0 }
 0x107   : > { %v770_v58 = vmax.f32 %v630_v54, 0.0  ;;  %v786_v59 = vmax.f32 %v670_v55, 0.0 }
 0x108   : > { %v865_v60 = vpack.c.bf16 %v801_v56, %v801_v56  ;;  %v881_v61 = vpack.c.bf16 %v817_v57, %v817_v57 }
 0x109   : > { %v834_v62 = vpack.c.bf16 %v770_v58, %v770_v58  ;;  %v850_v63 = vpack.c.bf16 %v786_v59, %v786_v59 }
 0x10a   : > { %930 = vst.msk [vmem:[%s1466_s28 + $0xb0] sm:$0xf] %vm885_vm1, %v865_v60 }
 0x10b   : > { %946 = vst.msk [vmem:[%s1466_s28 + $0xf0] sm:$0xf] %vm885_vm1, %v881_v61  ;;  %v709_v0 = vpop.f32.mrf.mxu2  ;;  %v749_v1 = vpop.f32.mrf.mxu3 }
 0x10c   : > { %899 = vst.msk [vmem:[%s1466_s28 + $0x34] sm:$0xf] %vm885_vm1, %v834_v62  ;;  %v710_v2 = vadd.f32 %v1457_v36, %v709_v0  ;;  %v750_v3 = vadd.f32 %v1457_v36, %v749_v1  ;;  %v632_v4 = vpop.f32.mrf.mxu0  ;;  %v672_v5 = vpop.f32.mrf.mxu1 }
 0x10d   : > { %915 = vst.msk [vmem:[%s1466_s28 + $0x74] sm:$0xf] %vm885_vm1, %v850_v63  ;;  %v633_v6 = vadd.f32 %v1457_v36, %v632_v4  ;;  %v673_v7 = vadd.f32 %v1457_v36, %v672_v5 }
 0x10e   : > { %v802_v8 = vmax.f32 %v710_v2, 0.0  ;;  %v818_v9 = vmax.f32 %v750_v3, 0.0 }
 0x10f   : > { %v771_v10 = vmax.f32 %v633_v6, 0.0  ;;  %v787_v11 = vmax.f32 %v673_v7, 0.0 }
 0x110   : > { %v866_v12 = vpack.c.bf16 %v802_v8, %v802_v8  ;;  %v882_v13 = vpack.c.bf16 %v818_v9, %v818_v9 }
 0x111   : > { %v835_v14 = vpack.c.bf16 %v771_v10, %v771_v10  ;;  %v851_v15 = vpack.c.bf16 %v787_v11, %v787_v11 }
 0x112   : > { %931 = vst.msk [vmem:[%s1466_s28 + $0xb4] sm:$0xf] %vm885_vm1, %v866_v12 }
 0x113   : > { %947 = vst.msk [vmem:[%s1466_s28 + $0xf4] sm:$0xf] %vm885_vm1, %v882_v13  ;;  %v712_v16 = vpop.f32.mrf.mxu2  ;;  %v752_v17 = vpop.f32.mrf.mxu3 }
 0x114   : > { %900 = vst.msk [vmem:[%s1466_s28 + $0x38] sm:$0xf] %vm885_vm1, %v835_v14  ;;  %v713_v18 = vadd.f32 %v1457_v36, %v712_v16  ;;  %v753_v19 = vadd.f32 %v1457_v36, %v752_v17  ;;  %v634_v20 = vpop.f32.mrf.mxu0  ;;  %v674_v21 = vpop.f32.mrf.mxu1 }
 0x115   : > { %916 = vst.msk [vmem:[%s1466_s28 + $0x78] sm:$0xf] %vm885_vm1, %v851_v15  ;;  %v635_v22 = vadd.f32 %v1457_v36, %v634_v20  ;;  %v675_v23 = vadd.f32 %v1457_v36, %v674_v21 }
 0x116   : > { %v803_v24 = vmax.f32 %v713_v18, 0.0  ;;  %v819_v25 = vmax.f32 %v753_v19, 0.0 }
 0x117   : > { %v772_v26 = vmax.f32 %v635_v22, 0.0  ;;  %v788_v27 = vmax.f32 %v675_v23, 0.0 }
 0x118   : > { %v867_v28 = vpack.c.bf16 %v803_v24, %v803_v24  ;;  %v883_v29 = vpack.c.bf16 %v819_v25, %v819_v25 }
 0x119   : > { %v836_v30 = vpack.c.bf16 %v772_v26, %v772_v26  ;;  %v852_v31 = vpack.c.bf16 %v788_v27, %v788_v27 }
 0x11a   : > { %932 = vst.msk [vmem:[%s1466_s28 + $0xb8] sm:$0xf] %vm885_vm1, %v867_v28 }
 0x11b   : > { %948 = vst.msk [vmem:[%s1466_s28 + $0xf8] sm:$0xf] %vm885_vm1, %v883_v29  ;;  %v714_v32 = vpop.f32.mrf.mxu2  ;;  %v754_v33 = vpop.f32.mrf.mxu3 }
 0x11c   : > { %901 = vst.msk [vmem:[%s1466_s28 + $0x3c] sm:$0xf] %vm885_vm1, %v836_v30  ;;  %v715_v34 = vadd.f32 %v1457_v36, %v714_v32  ;;  %v755_v35 = vadd.f32 %v1457_v36, %v754_v33 }
 0x11d   : > { %917 = vst.msk [vmem:[%s1466_s28 + $0x7c] sm:$0xf] %vm885_vm1, %v852_v31 }
 0x11e   : > { %v804_v37 = vmax.f32 %v715_v34, 0.0  ;;  %v820_v38 = vmax.f32 %v755_v35, 0.0 }
 0x120   : > { %v868_v39 = vpack.c.bf16 %v804_v37, %v804_v37  ;;  %v884_v40 = vpack.c.bf16 %v820_v38, %v820_v38 }
 0x122   : > { %933 = vst.msk [vmem:[%s1466_s28 + $0xbc] sm:$0xf] %vm885_vm1, %v868_v39 }
 0x123   : > { %949 = vst.msk [vmem:[%s1466_s28 + $0xfc] sm:$0xf] %vm885_vm1, %v884_v40 }
 0x124 PF: > { %s13_s14 = sadd.s32 1, %s1336_s14   ;;  %s1671_s12 = smov %s1332_s13 }
 0x125   : > { %p10_p5 = scmp.ge.s32.totalorder %s13_s14, 6   ;;  %s1672_s13 = smov %s1674_s15 }
 0x127   :  { %12 = sbr.rel (!%p10_p5) target bundleno = 2 (0x2), region = 65 }

// kernel: double_crossing_upsample.15
= control target key start
LH: loop header
LB: loop body
LE: loop exit
PB: predicated region body
PF: predicated region fallthrough
CT: control target
= control target key end

     0   :  { %s2822_s20 = smov 0   ;;  %s2824_s21 = smov 0   ;;  %s3799_s0 = inlined_call_operand.vmem [shape: bf16[4,2048,32], index: 0, kind: input, shape index: {}]   ;;  %s3800_s1 = inlined_call_operand.vmem [shape: bf16[4,32,2], index: 1, kind: input, shape index: {}]   ;;  %s3801_s2 = inlined_call_operand.vmem [shape: f32[1,2], index: 2, kind: input, shape index: {}]   ;;  %s3802_s3 = inlined_call_operand.vmem [shape: f32[1,2], index: 3, kind: input, shape index: {}]   ;;  %s3803_s4 = inlined_call_operand.<no memory space> [shape: f32[1,1], index: 4, kind: input, shape index: {}]   ;;  %s3804_s5 = inlined_call_operand.vmem [shape: f32[4,2048,1], index: 5, kind: output, shape index: {}]  }
   0x1   :  { %v10_v0 = vstv %s3803_s4  ;;  %s2826_s22 = smov 0   ;;  %s2828_s23 = smov 0  }
   0x2   :  { %11 = vst [vmem:[#allocation2] sm:$0x1] %v10_v0  ;;  %s2830_s24 = smov 0  }
   0x3 LB: > { %s26_s4 = sadd.s32 1, %s2779_s22  ;;  %s29_s25 = sadd.s32 1, %s2783_s23  ;;  %s2787_s24 = sphi %s2830_s24, %s17_s24   ;;  %s2783_s23 = sphi %s2828_s23, %s3808_s23   ;;  %s2779_s22 = sphi %s2826_s22, %s3807_s22   ;;  %s2775_s21 = sphi %s2824_s21, %s3806_s21   ;;  %s2771_s20 = sphi %s2822_s20, %s3805_s20  }
   0x4   : > { %p27_p0 = scmp.ge.s32.totalorder %s26_s4, 2  ;;  %p2289_p1 = scmp.ge.s32.totalorder %s2787_s24, 1 }
   0x5   : > { %p220_p2 = scmp.lt.s32.totalorder %s2787_s24, 9 }
   0x6   : > { %s3810_s4 = smov (%p27_p0, %s26_s4), 0  ;;  %s3812_s25 = smov (!%p27_p0, %s29_s25), %s2783_s23 }
   0x7   : > { %p221_p3 = pnand %p2289_p1, %p220_p2  ;;  %p31_p4 = scmp.ge.s32.totalorder %s3812_s25, 4 }
   0x8   : > { %s2290_s26 = sshll.u32 (!%p221_p3), %s2771_s20, 7  ;;  %p262_p5 = scmp.lt.s32.totalorder (!%p221_p3), %s2775_s21, 3 }
   0x9   : > { %s3814_s25 = smov (%p31_p4, %s3812_s25), 0  ;;  %224 = sbr.rel (%p221_p3) target bundleno = 620 (0x26c), region = 40 }
   0xa   : > { %p264_p6 = scmp.lt.s32.totalorder (!%p221_p3), %s2290_s26, 255 }
   0xe   : > { %s3816_s21 = smov (!%p262_p5, %s2775_s21), 3  ;;  %s3818_s26 = smov (!%p264_p6, %s2290_s26), 255  ;;  %vm755_vm0 = vcmask 261120   ;;  %v2930_v35 = vld [vmem:[%s3801_s2] ss:$0 sm:$0xff]  ;;  %vm1537_vm1 = vcmask 15360  }
   0xf   : > { %s2291_s27 = sshll.u32 %s3816_s21, 8  ;;  %s2628_s28 = sshll.u32 %s3816_s21, 4  ;;  %v2936_v39 = vld [vmem:[%s3802_s3] ss:$0 sm:$0xff]  ;;  %vm2054_vm2 = vcmask 7168  }
  0x10   : > { %s2852_s29 = sadd.s32 %s2291_s27, %s3818_s26  ;;  %s275_s7 = scalar_lea.vmem %s3800_s1, %s2628_s28 }
  0x11   : > { %v2694_v1 = vld [vmem:[%s275_s7 + $0x8] sm:$0xff]  ;;  %s2292_s8 = sshll.u32 %s2852_s29, 2  ;;  %v2693_v2 = vld [vmem:[%s275_s7] sm:$0xff]  ;;  %s2297_s16 = sshll.u32 %s2852_s29, 3 }
  0x12   : > { %954 = vmatpush.bf16.msra.mxu0 %v2694_v1  ;;  %2696 = vmatpush.bf16.msra.mxu2 %v2694_v1  ;;  %s2861_s11 = scalar_lea.vmem %s3799_s0, %s2292_s8  ;;  %s3125_s19 = scalar_lea.vmem %s3804_s5, %s2297_s16 }
  0x13   : > { %2697 = vmatpush.bf16.msra.mxu3 %v2694_v1  ;;  %2695 = vmatpush.bf16.msra.mxu1 %v2694_v1  ;;  %v2629_v3 = vld [vmem:[%s2861_s11] sm:$0xff]  ;;  %v2630_v7 = vld [vmem:[%s2861_s11 + $0x8] sm:$0xff]  ;;  %v2631_v11 = vld [vmem:[%s2861_s11 + $0x10] sm:$0xff] }
  0x14   : > { %v2661_v4 = vld [vmem:[%s2861_s11 + $0x100] sm:$0xff]  ;;  %v2662_v8 = vld [vmem:[%s2861_s11 + $0x108] sm:$0xff]  ;;  %v2663_v12 = vld [vmem:[%s2861_s11 + $0x110] sm:$0xff] }
  0x15   : > { %v2677_v5 = vld [vmem:[%s2861_s11 + $0x180] sm:$0xff]  ;;  %v2678_v9 = vld [vmem:[%s2861_s11 + $0x188] sm:$0xff]  ;;  %v2679_v13 = vld [vmem:[%s2861_s11 + $0x190] sm:$0xff] }
  0x16   : > { %955 = vmatpush.bf16.msra.mxu0 %v2693_v2  ;;  %2699 = vmatpush.bf16.msra.mxu2 %v2693_v2  ;;  %v2645_v6 = vld [vmem:[%s2861_s11 + $0x80] sm:$0xff]  ;;  %v2646_v10 = vld [vmem:[%s2861_s11 + $0x88] sm:$0xff]  ;;  %v2647_v14 = vld [vmem:[%s2861_s11 + $0x90] sm:$0xff] }
  0x17   : > { %2700 = vmatpush.bf16.msra.mxu3 %v2693_v2  ;;  %2698 = vmatpush.bf16.msra.mxu1 %v2693_v2  ;;  %v2664_v15 = vld [vmem:[%s2861_s11 + $0x118] sm:$0xff]  ;;  %v2665_v19 = vld [vmem:[%s2861_s11 + $0x120] sm:$0xff]  ;;  %v2634_v23 = vld [vmem:[%s2861_s11 + $0x28] sm:$0xff] }
  0x18   : > { %v2632_v16 = vld [vmem:[%s2861_s11 + $0x18] sm:$0xff]  ;;  %v2633_v20 = vld [vmem:[%s2861_s11 + $0x20] sm:$0xff]  ;;  %v2666_v24 = vld [vmem:[%s2861_s11 + $0x128] sm:$0xff] }
  0x19   : > { %2562 = vmatmul.msk.bf16.vlgmr.msra.gmra.mxu0 %vm755_vm0, %v2629_v3  ;;  %2594 = vmatmul.msk.bf16.vlgmr.msra.gmra.mxu2 %vm755_vm0, %v2661_v4  ;;  %v2680_v17 = vld [vmem:[%s2861_s11 + $0x198] sm:$0xff]  ;;  %v2649_v21 = vld [vmem:[%s2861_s11 + $0xa0] sm:$0xff]  ;;  %v2682_v25 = vld [vmem:[%s2861_s11 + $0x1a8] sm:$0xff] }
  0x1a   : > { %2610 = vmatmul.msk.bf16.vlgmr.msra.gmra.mxu3 %vm755_vm0, %v2677_v5  ;;  %2578 = vmatmul.msk.bf16.vlgmr.msra.gmra.mxu1 %vm755_vm0, %v2645_v6  ;;  %v2648_v18 = vld [vmem:[%s2861_s11 + $0x98] sm:$0xff]  ;;  %v2681_v22 = vld [vmem:[%s2861_s11 + $0x1a0] sm:$0xff]  ;;  %v2650_v26 = vld [vmem:[%s2861_s11 + $0xa8] sm:$0xff] }
  0x1b   : > { %v2667_v27 = vld [vmem:[%s2861_s11 + $0x130] sm:$0xff]  ;;  %v2668_v31 = vld [vmem:[%s2861_s11 + $0x138] sm:$0xff]  ;;  %v2637_v52 = vld [vmem:[%s2861_s11 + $0x40] sm:$0xff] }
  0x1c   : > { %v2635_v28 = vld [vmem:[%s2861_s11 + $0x30] sm:$0xff]  ;;  %v2636_v32 = vld [vmem:[%s2861_s11 + $0x38] sm:$0xff]  ;;  %v2669_v53 = vld [vmem:[%s2861_s11 + $0x140] sm:$0xff] }
  0x1d   : > { %v2683_v29 = vld [vmem:[%s2861_s11 + $0x1b0] sm:$0xff]  ;;  %v2652_v33 = vld [vmem:[%s2861_s11 + $0xb8] sm:$0xff]  ;;  %v2685_v54 = vld [vmem:[%s2861_s11 + $0x1c0] sm:$0xff] }
  0x1e   : > { %v2651_v30 = vld [vmem:[%s2861_s11 + $0xb0] sm:$0xff]  ;;  %v2684_v34 = vld [vmem:[%s2861_s11 + $0x1b8] sm:$0xff]  ;;  %v2653_v5 = vld [vmem:[%s2861_s11 + $0xc0] sm:$0xff] }
  0x29   : > { %2563 = vmatmul.msk.bf16.gmra.mxu0 %vm755_vm0, %v2630_v7  ;;  %2595 = vmatmul.msk.bf16.gmra.mxu2 %vm755_vm0, %v2662_v8 }
  0x2a   : > { %2611 = vmatmul.msk.bf16.gmra.mxu3 %vm755_vm0, %v2678_v9  ;;  %2579 = vmatmul.msk.bf16.gmra.mxu1 %vm755_vm0, %v2646_v10 }
  0x39   : > { %2564 = vmatmul.msk.bf16.gmra.mxu0 %vm755_vm0, %v2631_v11  ;;  %2596 = vmatmul.msk.bf16.gmra.mxu2 %vm755_vm0, %v2663_v12 }
  0x3a   : > { %2612 = vmatmul.msk.bf16.gmra.mxu3 %vm755_vm0, %v2679_v13  ;;  %2580 = vmatmul.msk.bf16.gmra.mxu1 %vm755_vm0, %v2647_v14 }
  0x49   : > { %2597 = vmatmul.msk.bf16.gmra.mxu2 %vm755_vm0, %v2664_v15  ;;  %2565 = vmatmul.msk.bf16.gmra.mxu0 %vm755_vm0, %v2632_v16 }
  0x4a   : > { %2613 = vmatmul.msk.bf16.gmra.mxu3 %vm755_vm0, %v2680_v17  ;;  %2581 = vmatmul.msk.bf16.gmra.mxu1 %vm755_vm0, %v2648_v18 }
  0x59   : > { %2598 = vmatmul.msk.bf16.gmra.mxu2 %vm755_vm0, %v2665_v19  ;;  %2566 = vmatmul.msk.bf16.gmra.mxu0 %vm755_vm0, %v2633_v20 }
  0x5a   : > { %2582 = vmatmul.msk.bf16.gmra.mxu1 %vm755_vm0, %v2649_v21  ;;  %2614 = vmatmul.msk.bf16.gmra.mxu3 %vm755_vm0, %v2681_v22 }
  0x69   : > { %2567 = vmatmul.msk.bf16.gmra.mxu0 %vm755_vm0, %v2634_v23  ;;  %2599 = vmatmul.msk.bf16.gmra.mxu2 %vm755_vm0, %v2666_v24 }
  0x6a   : > { %2615 = vmatmul.msk.bf16.gmra.mxu3 %vm755_vm0, %v2682_v25  ;;  %2583 = vmatmul.msk.bf16.gmra.mxu1 %vm755_vm0, %v2650_v26  ;;  %v2670_v25 = vld [vmem:[%s2861_s11 + $0x148] sm:$0xff] }
  0x79   : > { %2600 = vmatmul.msk.bf16.gmra.mxu2 %vm755_vm0, %v2667_v27  ;;  %2568 = vmatmul.msk.bf16.gmra.mxu0 %vm755_vm0, %v2635_v28 }
  0x7a   : > { %2616 = vmatmul.msk.bf16.gmra.mxu3 %vm755_vm0, %v2683_v29  ;;  %2584 = vmatmul.msk.bf16.gmra.mxu1 %vm755_vm0, %v2651_v30 }
  0x89   : > { %2601 = vmatmul.msk.bf16.gmra.mxu2 %vm755_vm0, %v2668_v31  ;;  %2569 = vmatmul.msk.bf16.gmra.mxu0 %vm755_vm0, %v2636_v32 }
  0x8a   : > { %2585 = vmatmul.msk.bf16.gmra.mxu1 %vm755_vm0, %v2652_v33  ;;  %2617 = vmatmul.msk.bf16.gmra.mxu3 %vm755_vm0, %v2684_v34 }
  0x96   : > { %v957_v36 = vpop.f32.mrf.mxu0 }
  0x97   : > { %v958_v37 = vadd.f32 %v2930_v35, %v957_v36  ;;  %v1037_v38 = vpop.f32.mrf.mxu1 }
  0x98   : > { %v1038_v40 = vadd.f32 %v2930_v35, %v1037_v38 }
  0x99   : > { %v1277_v41 = vmax.f32 %v958_v37, 0.0  ;;  %2570 = vmatmul.msk.bf16.gmra.mxu0 %vm755_vm0, %v2637_v52  ;;  %2602 = vmatmul.msk.bf16.gmra.mxu2 %vm755_vm0, %v2669_v53 }
  0x9a   : > { %v1309_v42 = vmax.f32 %v1038_v40, 0.0  ;;  %2618 = vmatmul.msk.bf16.gmra.mxu3 %vm755_vm0, %v2685_v54  ;;  %2586 = vmatmul.msk.bf16.gmra.mxu1 %vm755_vm0, %v2653_v5 }
  0x9b   : > { %v1409_v43 = vmul.f32 %v2936_v39, %v1277_v41 }
  0x9c   : > { %v1117_v44 = vpop.f32.mrf.mxu2  ;;  %v1441_v45 = vmul.f32 %v2936_v39, %v1309_v42 }
  0x9d   : > { %v1118_v46 = vadd.f32 %v2930_v35, %v1117_v44  ;;  %v1197_v47 = vpop.f32.mrf.mxu3  ;;  %v1538_v48 = vsel %vm1537_vm1, %v1409_v43, 0.0 }
  0x9e   : > { %v1198_v49 = vadd.f32 %v2930_v35, %v1197_v47  ;;  %v959_v50 = vpop.f32.mrf.mxu0  ;;  %1539 = vadd.xlane.f32.xlu0 %v1538_v48  ;;  %v1634_v51 = vsel %vm1537_vm1, %v1441_v45, 0.0  ;;  %v2638_v45 = vld [vmem:[%s2861_s11 + $0x48] sm:$0xff] }
  0x9f   : > { %v1341_v55 = vmax.f32 %v1118_v46, 0.0  ;;  %v1039_v56 = vpop.f32.mrf.mxu1  ;;  %1635 = vadd.xlane.f32.xlu2 %v1634_v51  ;;  %v960_v58 = vadd.f32 %v2930_v35, %v959_v50  ;;  %v2686_v46 = vld [vmem:[%s2861_s11 + $0x1c8] sm:$0xff] }
  0xa0   : > { %v1373_v57 = vmax.f32 %v1198_v49, 0.0  ;;  %v1040_v10 = vadd.f32 %v2930_v35, %v1039_v56 }
  0xa1   : > { %v1473_v59 = vmul.f32 %v2936_v39, %v1341_v55  ;;  %v1278_v63 = vmax.f32 %v960_v58, 0.0 }
  0xa2   : > { %v1505_v60 = vmul.f32 %v2936_v39, %v1373_v57  ;;  %v1310_v18 = vmax.f32 %v1040_v10, 0.0 }
  0xa3   : > { %v1730_v61 = vsel %vm1537_vm1, %v1473_v59, 0.0  ;;  %v1410_v12 = vmul.f32 %v2936_v39, %v1278_v63 }
  0xa4   : > { %v1119_v62 = vpop.f32.mrf.mxu2  ;;  %1731 = vadd.xlane.f32.xlu1 %v1730_v61  ;;  %v1826_v2 = vsel %vm1537_vm1, %v1505_v60, 0.0  ;;  %v1442_v30 = vmul.f32 %v2936_v39, %v1310_v18  ;;  %v2654_v61 = vld [vmem:[%s2861_s11 + $0xc8] sm:$0xff] }
  0xa5   : > { %v1120_v0 = vadd.f32 %v2930_v35, %v1119_v62  ;;  %v1199_v1 = vpop.f32.mrf.mxu3  ;;  %v1541_v20 = vsel %vm1537_vm1, %v1410_v12, 0.0 }
  0xa6   : > { %v1200_v3 = vadd.f32 %v2930_v35, %v1199_v1  ;;  %v962_v4 = vpop.f32.mrf.mxu0  ;;  %1827 = vadd.xlane.f32.xlu0 %v1826_v2  ;;  %v1637_v40 = vsel %vm1537_vm1, %v1442_v30, 0.0  ;;  %v2687_v30 = vld [vmem:[%s2861_s11 + $0x1d0] sm:$0xff] }
  0xa7   : > { %v1342_v6 = vmax.f32 %v1120_v0, 0.0  ;;  %v963_v7 = vadd.f32 %v2930_v35, %v962_v4  ;;  %v1042_v8 = vpop.f32.mrf.mxu1 }
  0xa8   : > { %v1374_v9 = vmax.f32 %v1200_v3, 0.0  ;;  %v1043_v22 = vadd.f32 %v2930_v35, %v1042_v8 }
  0xa9   : > { %v1474_v11 = vmul.f32 %v2936_v39, %v1342_v6  ;;  %v1279_v13 = vmax.f32 %v963_v7, 0.0  ;;  %2603 = vmatmul.msk.bf16.gmra.mxu2 %vm755_vm0, %v2670_v25  ;;  %2571 = vmatmul.msk.bf16.gmra.mxu0 %vm755_vm0, %v2638_v45 }
  0xaa   : > { %v1506_v14 = vmul.f32 %v2936_v39, %v1374_v9  ;;  %v1311_v31 = vmax.f32 %v1043_v22, 0.0  ;;  %2619 = vmatmul.msk.bf16.gmra.mxu3 %vm755_vm0, %v2686_v46  ;;  %2587 = vmatmul.msk.bf16.gmra.mxu1 %vm755_vm0, %v2654_v61 }
  0xab   : > { %v1733_v15 = vsel %vm1537_vm1, %v1474_v11, 0.0  ;;  %v1411_v24 = vmul.f32 %v2936_v39, %v1279_v13  ;;  %v2671_v13 = vld [vmem:[%s2861_s11 + $0x150] sm:$0xff] }
  0xac   : > { %v1829_v16 = vsel %vm1537_vm1, %v1506_v14, 0.0  ;;  %1734 = vadd.xlane.f32.xlu2 %v1733_v15  ;;  %v1122_v17 = vpop.f32.mrf.mxu2  ;;  %v1443_v44 = vmul.f32 %v2936_v39, %v1311_v31 }
  0xad   : > { %v1202_v19 = vpop.f32.mrf.mxu3  ;;  %1830 = vadd.xlane.f32.xlu1 %v1829_v16  ;;  %v1123_v27 = vadd.f32 %v2930_v35, %v1122_v17  ;;  %v1544_v34 = vsel %vm1537_vm1, %v1411_v24, 0.0 }
  0xae   : > { %v1203_v21 = vadd.f32 %v2930_v35, %v1202_v19  ;;  %v964_v23 = vpop.f32.mrf.mxu0  ;;  %1542 = vadd.xlane.f32.xlu0 %v1541_v20  ;;  %v1640_v53 = vsel %vm1537_vm1, %v1443_v44, 0.0 }
  0xaf   : > { %v1044_v26 = vpop.f32.mrf.mxu1  ;;  %v1343_v36 = vmax.f32 %v1123_v27, 0.0  ;;  %v965_v49 = vadd.f32 %v2930_v35, %v964_v23 }
  0xb0   : > { %v1375_v28 = vmax.f32 %v1203_v21, 0.0  ;;  %v1045_v29 = vadd.f32 %v2930_v35, %v1044_v26 }
  0xb1   : > { %v1475_v48 = vmul.f32 %v2936_v39, %v1343_v36  ;;  %v1280_v55 = vmax.f32 %v965_v49, 0.0 }
  0xb2   : > { %v1312_v32 = vmax.f32 %v1045_v29, 0.0  ;;  %v1507_v33 = vmul.f32 %v2936_v39, %v1375_v28  ;;  %v2639_v28 = vld [vmem:[%s2861_s11 + $0x50] sm:$0xff] }
  0xb3   : > { %v1736_v54 = vsel %vm1537_vm1, %v1475_v48, 0.0  ;;  %v1412_v0 = vmul.f32 %v2936_v39, %v1280_v55  ;;  %v2655_v29 = vld [vmem:[%s2861_s11 + $0xd0] sm:$0xff] }
  0xb4   : > { %v1832_v37 = vsel %vm1537_vm1, %v1507_v33, 0.0  ;;  %v1124_v38 = vpop.f32.mrf.mxu2  ;;  %v1444_v42 = vmul.f32 %v2936_v39, %v1312_v32 }
  0xb5   : > { %1833 = vadd.xlane.f32.xlu2 %v1832_v37  ;;  %1545 = vadd.xlane.f32.xlu1 %v1544_v34  ;;  %v1204_v41 = vpop.f32.mrf.mxu3  ;;  %v1125_v63 = vadd.f32 %v2930_v35, %v1124_v38  ;;  %v1547_v7 = vsel %vm1537_vm1, %v1412_v0, 0.0  ;;  %v2640_v0 = vld [vmem:[%s2861_s11 + $0x58] sm:$0xff] }
  0xb6   : > { %1638 = vadd.xlane.f32.xlu0 %v1637_v40  ;;  %v967_v43 = vpop.f32.mrf.mxu0  ;;  %v1205_v50 = vadd.f32 %v2930_v35, %v1204_v41  ;;  %v1643_v51 = vsel %vm1537_vm1, %v1444_v42, 0.0 }
  0xb7   : > { %v968_v47 = vadd.f32 %v2930_v35, %v967_v43  ;;  %v1047_v58 = vpop.f32.mrf.mxu1  ;;  %v1344_v6 = vmax.f32 %v1125_v63, 0.0 }
  0xb8   : > { %v1376_v57 = vmax.f32 %v1205_v50, 0.0  ;;  %v1048_v62 = vadd.f32 %v2930_v35, %v1047_v58 }
  0xb9   : > { %v1281_v52 = vmax.f32 %v968_v47, 0.0  ;;  %v1476_v16 = vmul.f32 %v2936_v39, %v1344_v6  ;;  %2604 = vmatmul.msk.bf16.gmra.mxu2 %vm755_vm0, %v2671_v13  ;;  %2572 = vmatmul.msk.bf16.gmra.mxu0 %vm755_vm0, %v2639_v28 }
  0xba   : > { %v1508_v1 = vmul.f32 %v2936_v39, %v1376_v57  ;;  %v1313_v4 = vmax.f32 %v1048_v62, 0.0  ;;  %2588 = vmatmul.msk.bf16.gmra.mxu1 %vm755_vm0, %v2655_v29  ;;  %2620 = vmatmul.msk.bf16.gmra.mxu3 %vm755_vm0, %v2687_v30 }
  0xbb   : > { %v1413_v60 = vmul.f32 %v2936_v39, %v1281_v52  ;;  %v1739_v23 = vsel %vm1537_vm1, %v1476_v16, 0.0 }
  0xbc   : > { %v1127_v56 = vpop.f32.mrf.mxu2  ;;  %v1835_v9 = vsel %vm1537_vm1, %v1508_v1, 0.0  ;;  %v1445_v14 = vmul.f32 %v2936_v39, %v1313_v4  ;;  %v2672_v1 = vld [vmem:[%s2861_s11 + $0x158] sm:$0xff] }
  0xbd   : > { %1644 = vadd.xlane.f32.xlu2 %v1643_v51  ;;  %1641 = vadd.xlane.f32.xlu1 %v1640_v53  ;;  %v1128_v59 = vadd.f32 %v2930_v35, %v1127_v56  ;;  %v1550_v3 = vsel %vm1537_vm1, %v1413_v60, 0.0  ;;  %v1207_v5 = vpop.f32.mrf.mxu3 }
  0xbe   : > { %1737 = vadd.xlane.f32.xlu0 %v1736_v54  ;;  %v969_v8 = vpop.f32.mrf.mxu0  ;;  %v1208_v10 = vadd.f32 %v2930_v35, %v1207_v5  ;;  %v1646_v21 = vsel %vm1537_vm1, %v1445_v14, 0.0 }
  0xbf   : > { %v1345_v2 = vmax.f32 %v1128_v59, 0.0  ;;  %v970_v15 = vadd.f32 %v2930_v35, %v969_v8  ;;  %v1049_v20 = vpop.f32.mrf.mxu1 }
  0xc0   : > { %v1377_v18 = vmax.f32 %v1208_v10, 0.0  ;;  %v1050_v32 = vadd.f32 %v2930_v35, %v1049_v20 }
  0xc1   : > { %v1477_v12 = vmul.f32 %v2936_v39, %v1345_v2  ;;  %v1282_v22 = vmax.f32 %v970_v15, 0.0  ;;  %v2688_v2 = vld [vmem:[%s2861_s11 + $0x1d8] sm:$0xff] }
  0xc2   : > { %v1509_v27 = vmul.f32 %v2936_v39, %v1377_v18  ;;  %v1314_v42 = vmax.f32 %v1050_v32, 0.0 }
  0xc3   : > { %v1742_v19 = vsel %vm1537_vm1, %v1477_v12, 0.0  ;;  %v1414_v34 = vmul.f32 %v2936_v39, %v1282_v22 }
  0xc4   : > { %v1129_v11 = vpop.f32.mrf.mxu2  ;;  %v1838_v37 = vsel %vm1537_vm1, %v1509_v27, 0.0  ;;  %v1446_v52 = vmul.f32 %v2936_v39, %v1314_v42 }
  0xc5   : > { %1551 = vadd.xlane.f32.xlu2 %v1550_v3  ;;  %1548 = vadd.xlane.f32.xlu1 %v1547_v7  ;;  %v1130_v17 = vadd.f32 %v2930_v35, %v1129_v11  ;;  %v1209_v25 = vpop.f32.mrf.mxu3  ;;  %v1553_v44 = vsel %vm1537_vm1, %v1414_v34, 0.0 }
  0xc6   : > { %1836 = vadd.xlane.f32.xlu0 %v1835_v9  ;;  %v972_v26 = vpop.f32.mrf.mxu0  ;;  %v1210_v33 = vadd.f32 %v2930_v35, %v1209_v25  ;;  %v1649_v59 = vsel %vm1537_vm1, %v1446_v52, 0.0  ;;  %v2641_v52 = vld [vmem:[%s2861_s11 + $0x60] sm:$0xff] }
  0xc7   : > { %v1346_v24 = vmax.f32 %v1130_v17, 0.0  ;;  %v973_v31 = vadd.f32 %v2930_v35, %v972_v26  ;;  %v1052_v41 = vpop.f32.mrf.mxu1  ;;  %v2656_v17 = vld [vmem:[%s2861_s11 + $0xd8] sm:$0xff] }
  0xc8   : > { %v1378_v43 = vmax.f32 %v1210_v33, 0.0  ;;  %v1053_v47 = vadd.f32 %v2930_v35, %v1052_v41 }
  0xc9   : > { %v1478_v36 = vmul.f32 %v2936_v39, %v1346_v24  ;;  %v1283_v38 = vmax.f32 %v973_v31, 0.0  ;;  %2573 = vmatmul.msk.bf16.gmra.mxu0 %vm755_vm0, %v2640_v0  ;;  %2605 = vmatmul.msk.bf16.gmra.mxu2 %vm755_vm0, %v2672_v1 }
  0xca   : > { %v1510_v51 = vmul.f32 %v2936_v39, %v1378_v43  ;;  %v1315_v54 = vmax.f32 %v1053_v47, 0.0  ;;  %2621 = vmatmul.msk.bf16.gmra.mxu3 %vm755_vm0, %v2688_v2  ;;  %2589 = vmatmul.msk.bf16.gmra.mxu1 %vm755_vm0, %v2656_v17 }
  0xcb   : > { %v1745_v45 = vsel %vm1537_vm1, %v1478_v36, 0.0  ;;  %v1415_v50 = vmul.f32 %v2936_v39, %v1283_v38  ;;  %v2673_v36 = vld [vmem:[%s2861_s11 + $0x160] sm:$0xff] }
  0xcc   : > { %v1132_v40 = vpop.f32.mrf.mxu2  ;;  %v1841_v58 = vsel %vm1537_vm1, %v1510_v51, 0.0  ;;  %v1447_v62 = vmul.f32 %v2936_v39, %v1315_v54 }
  0xcd   : > { %1743 = vadd.xlane.f32.xlu2 %v1742_v19  ;;  %1740 = vadd.xlane.f32.xlu1 %v1739_v23  ;;  %v1133_v46 = vadd.f32 %v2930_v35, %v1132_v40  ;;  %v1212_v48 = vpop.f32.mrf.mxu3  ;;  %v1556_v57 = vsel %vm1537_vm1, %v1415_v50, 0.0 }
  0xce   : > { %1647 = vadd.xlane.f32.xlu0 %v1646_v21  ;;  %v1213_v49 = vadd.f32 %v2930_v35, %v1212_v48  ;;  %v974_v55 = vpop.f32.mrf.mxu0  ;;  %v1652_v7 = vsel %vm1537_vm1, %v1447_v62, 0.0 }
  0xcf   : > { %v1347_v53 = vmax.f32 %v1133_v46, 0.0  ;;  %v1054_v61 = vpop.f32.mrf.mxu1  ;;  %v975_v4 = vadd.f32 %v2930_v35, %v974_v55  ;;  %v2689_v55 = vld [vmem:[%s2861_s11 + $0x1e0] sm:$0xff] }
  0xd0   : > { %v1379_v56 = vmax.f32 %v1213_v49, 0.0  ;;  %v1055_v6 = vadd.f32 %v2930_v35, %v1054_v61 }
  0xd1   : > { %v1479_v63 = vmul.f32 %v2936_v39, %v1347_v53  ;;  %v1284_v12 = vmax.f32 %v975_v4, 0.0 }
  0xd2   : > { %v1511_v3 = vmul.f32 %v2936_v39, %v1379_v56  ;;  %v1316_v14 = vmax.f32 %v1055_v6, 0.0 }
  0xd3   : > { %v1748_v8 = vsel %vm1537_vm1, %v1479_v63, 0.0  ;;  %v1416_v21 = vmul.f32 %v2936_v39, %v1284_v12 }
  0xd4   : > { %v1134_v60 = vpop.f32.mrf.mxu2  ;;  %v1844_v10 = vsel %vm1537_vm1, %v1511_v3, 0.0  ;;  %v1448_v22 = vmul.f32 %v2936_v39, %v1316_v14 }
  0xd5   : > { %1554 = vadd.xlane.f32.xlu2 %v1553_v44  ;;  %1839 = vadd.xlane.f32.xlu1 %v1838_v37  ;;  %v1135_v5 = vadd.f32 %v2930_v35, %v1134_v60  ;;  %v1214_v9 = vpop.f32.mrf.mxu3  ;;  %v1559_v29 = vsel %vm1537_vm1, %v1416_v21, 0.0 }
  0xd6   : > { %1746 = vadd.xlane.f32.xlu0 %v1745_v45  ;;  %v977_v11 = vpop.f32.mrf.mxu0  ;;  %v1215_v19 = vadd.f32 %v2930_v35, %v1214_v9  ;;  %v1655_v30 = vsel %vm1537_vm1, %v1448_v22, 0.0 }
  0xd7   : > { %v1348_v13 = vmax.f32 %v1135_v5, 0.0  ;;  %v978_v15 = vadd.f32 %v2930_v35, %v977_v11  ;;  %v1057_v24 = vpop.f32.mrf.mxu1  ;;  %v2657_v5 = vld [vmem:[%s2861_s11 + $0xe0] sm:$0xff] }
  0xd8   : > { %v1380_v27 = vmax.f32 %v1215_v19, 0.0  ;;  %v1058_v31 = vadd.f32 %v2930_v35, %v1057_v24 }
  0xd9   : > { %v1480_v20 = vmul.f32 %v2936_v39, %v1348_v13  ;;  %v1285_v23 = vmax.f32 %v978_v15, 0.0  ;;  %2606 = vmatmul.msk.bf16.gmra.mxu2 %vm755_vm0, %v2673_v36  ;;  %2574 = vmatmul.msk.bf16.gmra.mxu0 %vm755_vm0, %v2641_v52 }
  0xda   : > { %v1512_v38 = vmul.f32 %v2936_v39, %v1380_v27  ;;  %v1317_v41 = vmax.f32 %v1058_v31, 0.0  ;;  %2622 = vmatmul.msk.bf16.gmra.mxu3 %vm755_vm0, %v2689_v55  ;;  %2590 = vmatmul.msk.bf16.gmra.mxu1 %vm755_vm0, %v2657_v5 }
  0xdb   : > { %v1751_v28 = vsel %vm1537_vm1, %v1480_v20, 0.0  ;;  %v1417_v34 = vmul.f32 %v2936_v39, %v1285_v23 }
  0xdc   : > { %v1137_v16 = vpop.f32.mrf.mxu2  ;;  %v1847_v46 = vsel %vm1537_vm1, %v1512_v38, 0.0  ;;  %v1449_v51 = vmul.f32 %v2936_v39, %v1317_v41  ;;  %v2658_v38 = vld [vmem:[%s2861_s11 + $0xe8] sm:$0xff] }
  0xdd   : > { %1842 = vadd.xlane.f32.xlu2 %v1841_v58  ;;  %1650 = vadd.xlane.f32.xlu1 %v1649_v59  ;;  %v1138_v18 = vadd.f32 %v2930_v35, %v1137_v16  ;;  %v1217_v26 = vpop.f32.mrf.mxu3  ;;  %v1562_v43 = vsel %vm1537_vm1, %v1417_v34, 0.0  ;;  %v3112_v34 = vld [vmem:[#allocation2] ss:$0 sm:$0xff]  ;;  %v2642_v41 = vld [vmem:[%s2861_s11 + $0x68] sm:$0xff] }
  0xde   : > { %1557 = vadd.xlane.f32.xlu0 %v1556_v57  ;;  %v979_v32 = vpop.f32.mrf.mxu0  ;;  %v1218_v33 = vadd.f32 %v2930_v35, %v1217_v26  ;;  %v1658_v59 = vsel %vm1537_vm1, %v1449_v51, 0.0 }
  0xdf   : > { %v1349_v25 = vmax.f32 %v1138_v18, 0.0  ;;  %v980_v40 = vadd.f32 %v2930_v35, %v979_v32  ;;  %v1059_v48 = vpop.f32.mrf.mxu1 }
  0xe0   : > { %v1381_v42 = vmax.f32 %v1218_v33, 0.0  ;;  %v1060_v53 = vadd.f32 %v2930_v35, %v1059_v48 }
  0xe1   : > { %v1481_v37 = vmul.f32 %v2936_v39, %v1349_v25  ;;  %v1286_v47 = vmax.f32 %v980_v40, 0.0  ;;  %v2674_v25 = vld [vmem:[%s2861_s11 + $0x168] sm:$0xff] }
  0xe2   : > { %v1513_v50 = vmul.f32 %v2936_v39, %v1381_v42  ;;  %v1318_v62 = vmax.f32 %v1060_v53, 0.0 }
  0xe3   : > { %v1754_v45 = vsel %vm1537_vm1, %v1481_v37, 0.0  ;;  %v1418_v57 = vmul.f32 %v2936_v39, %v1286_v47  ;;  %v2690_v47 = vld [vmem:[%s2861_s11 + $0x1e8] sm:$0xff] }
  0xe4   : > { %v1139_v44 = vpop.f32.mrf.mxu2  ;;  %v1850_v58 = vsel %vm1537_vm1, %v1513_v50, 0.0 }
  0xe5   : > { %1653 = vadd.xlane.f32.xlu2 %v1652_v7  ;;  %1749 = vadd.xlane.f32.xlu1 %v1748_v8  ;;  %v1219_v49 = vpop.f32.mrf.mxu3  ;;  %v1140_v54 = vadd.f32 %v2930_v35, %v1139_v44  ;;  %v1565_v1 = vsel %vm1537_vm1, %v1418_v57, 0.0  ;;  %v1450_v7 = vmul.f32 %v2936_v39, %v1318_v62 }
  0xe6   : > { %1845 = vadd.xlane.f32.xlu0 %v1844_v10  ;;  %v1220_v56 = vadd.f32 %v2930_v35, %v1219_v49  ;;  %v982_v60 = vpop.f32.mrf.mxu0 }
  0xe7   : > { %v1350_v63 = vmax.f32 %v1140_v54, 0.0  ;;  %v983_v2 = vadd.f32 %v2930_v35, %v982_v60  ;;  %v1062_v3 = vpop.f32.mrf.mxu1  ;;  %v1661_v14 = vsel %vm1537_vm1, %v1450_v7, 0.0 }
  0xe8   : > { %v1382_v0 = vmax.f32 %v1220_v56, 0.0  ;;  %v1063_v6 = vadd.f32 %v2930_v35, %v1062_v3 }
  0xe9   : > { %v1482_v8 = vmul.f32 %v2936_v39, %v1350_v63  ;;  %v1287_v10 = vmax.f32 %v983_v2, 0.0  ;;  %2607 = vmatmul.msk.bf16.gmra.mxu2 %vm755_vm0, %v2674_v25  ;;  %2575 = vmatmul.msk.bf16.gmra.mxu0 %vm755_vm0, %v2642_v41 }
  0xea   : > { %v1514_v9 = vmul.f32 %v2936_v39, %v1382_v0  ;;  %v1319_v12 = vmax.f32 %v1063_v6, 0.0  ;;  %2591 = vmatmul.msk.bf16.gmra.mxu1 %vm755_vm0, %v2658_v38  ;;  %2623 = vmatmul.msk.bf16.gmra.mxu3 %vm755_vm0, %v2690_v47 }
  0xeb   : > { %v1757_v15 = vsel %vm1537_vm1, %v1482_v8, 0.0  ;;  %v1419_v21 = vmul.f32 %v2936_v39, %v1287_v10 }
  0xec   : > { %v1142_v61 = vpop.f32.mrf.mxu2  ;;  %v1853_v17 = vsel %vm1537_vm1, %v1514_v9, 0.0  ;;  %v1451_v22 = vmul.f32 %v2936_v39, %v1319_v12 }
  0xed   : > { %1752 = vadd.xlane.f32.xlu2 %v1751_v28  ;;  %1560 = vadd.xlane.f32.xlu1 %v1559_v29  ;;  %v1143_v4 = vadd.f32 %v2930_v35, %v1142_v61  ;;  %v1222_v13 = vpop.f32.mrf.mxu3  ;;  %v1568_v28 = vsel %vm1537_vm1, %v1419_v21, 0.0 }
  0xee   : > { %1656 = vadd.xlane.f32.xlu0 %v1655_v30  ;;  %v984_v16 = vpop.f32.mrf.mxu0  ;;  %v1223_v18 = vadd.f32 %v2930_v35, %v1222_v13  ;;  %v1664_v30 = vsel %vm1537_vm1, %v1451_v22, 0.0 }
  0xef   : > { %v1351_v11 = vmax.f32 %v1143_v4, 0.0  ;;  %v985_v23 = vadd.f32 %v2930_v35, %v984_v16  ;;  %v1064_v29 = vpop.f32.mrf.mxu1 }
  0xf0   : > { %v1383_v26 = vmax.f32 %v1223_v18, 0.0  ;;  %v1065_v42 = vadd.f32 %v2930_v35, %v1064_v29 }
  0xf1   : > { %v1483_v20 = vmul.f32 %v2936_v39, %v1351_v11  ;;  %v1288_v31 = vmax.f32 %v985_v23, 0.0 }
  0xf2   : > { %v1515_v37 = vmul.f32 %v2936_v39, %v1383_v26  ;;  %v1320_v55 = vmax.f32 %v1065_v42, 0.0 }
  0xf3   : > { %v1760_v27 = vsel %vm1537_vm1, %v1483_v20, 0.0  ;;  %v1420_v44 = vmul.f32 %v2936_v39, %v1288_v31 }
  0xf4   : > { %v1144_v19 = vpop.f32.mrf.mxu2  ;;  %v1856_v49 = vsel %vm1537_vm1, %v1515_v37, 0.0  ;;  %v1452_v3 = vmul.f32 %v2936_v39, %v1320_v55 }
  0xf5   : > { %1563 = vadd.xlane.f32.xlu2 %v1562_v43  ;;  %1848 = vadd.xlane.f32.xlu1 %v1847_v46  ;;  %v1145_v24 = vadd.f32 %v2930_v35, %v1144_v19  ;;  %v1224_v33 = vpop.f32.mrf.mxu3  ;;  %v1571_v57 = vsel %vm1537_vm1, %v1420_v44, 0.0 }
  0xf6   : > { %1755 = vadd.xlane.f32.xlu0 %v1754_v45  ;;  %v987_v36 = vpop.f32.mrf.mxu0  ;;  %v1225_v43 = vadd.f32 %v2930_v35, %v1224_v33  ;;  %v1667_v12 = vsel %vm1537_vm1, %v1452_v3, 0.0 }
  0xf7   : > { %v1352_v32 = vmax.f32 %v1145_v24, 0.0  ;;  %v988_v40 = vadd.f32 %v2930_v35, %v987_v36  ;;  %v1067_v54 = vpop.f32.mrf.mxu1 }
  0xf8   : > { %v1384_v56 = vmax.f32 %v1225_v43, 0.0  ;;  %v1068_v60 = vadd.f32 %v2930_v35, %v1067_v54  ;;  %v2659_v43 = vld [vmem:[%s2861_s11 + $0xf0] sm:$0xff] }
  0xf9   : > { %v1484_v46 = vmul.f32 %v2936_v39, %v1352_v32  ;;  %v1289_v51 = vmax.f32 %v988_v40, 0.0 }
  0xfa   : > { %v1516_v2 = vmul.f32 %v2936_v39, %v1384_v56  ;;  %v1321_v7 = vmax.f32 %v1068_v60, 0.0  ;;  %2592 = vmatmul.msk.bf16.gmra.mxu1 %vm755_vm0, %v2659_v43 }
  0xfb   : > { %v1421_v0 = vmul.f32 %v2936_v39, %v1289_v51 }
  0xfc   : > { %v1147_v52 = vpop.f32.mrf.mxu2  ;;  %v1859_v11 = vsel %vm1537_vm1, %v1516_v2, 0.0 }
  0xfd   : > { %1851 = vadd.xlane.f32.xlu2 %v1850_v58  ;;  %1659 = vadd.xlane.f32.xlu1 %v1658_v59  ;;  %v1763_v58 = vsel %vm1537_vm1, %v1484_v46, 0.0  ;;  %v1148_v59 = vadd.f32 %v2930_v35, %v1147_v52  ;;  %v1227_v61 = vpop.f32.mrf.mxu3  ;;  %v1574_v10 = vsel %vm1537_vm1, %v1421_v0, 0.0 }
  0xfe   : > { %1566 = vadd.xlane.f32.xlu0 %v1565_v1  ;;  %v1228_v63 = vadd.f32 %v2930_v35, %v1227_v61  ;;  %v989_v8 = vpop.f32.mrf.mxu0 }
  0xff   : > { %v1353_v5 = vmax.f32 %v1148_v59, 0.0  ;;  %v990_v20 = vadd.f32 %v2930_v35, %v989_v8 }
 0x100   : > { %v1385_v9 = vmax.f32 %v1228_v63, 0.0 }
 0x101   : > { %v1485_v16 = vmul.f32 %v2936_v39, %v1353_v5  ;;  %v1290_v37 = vmax.f32 %v990_v20, 0.0 }
 0x102   : > { %v1517_v19 = vmul.f32 %v2936_v39, %v1385_v9 }
 0x103   : > { %v1766_v31 = vsel %vm1537_vm1, %v1485_v16, 0.0 }
 0x104   : > { %v1149_v13 = vpop.f32.mrf.mxu2  ;;  %v1862_v33 = vsel %vm1537_vm1, %v1517_v19, 0.0 }
 0x105   : > { %1662 = vadd.xlane.f32.xlu2 %v1661_v14  ;;  %1758 = vadd.xlane.f32.xlu1 %v1757_v15  ;;  %v1069_v14 = vpop.f32.mrf.mxu1  ;;  %v1453_v15 = vmul.f32 %v2936_v39, %v1321_v7  ;;  %v1150_v21 = vadd.f32 %v2930_v35, %v1149_v13  ;;  %v1229_v32 = vpop.f32.mrf.mxu3 }
 0x106   : > { %1854 = vadd.xlane.f32.xlu0 %v1853_v17  ;;  %v2643_v17 = vld [vmem:[%s2861_s11 + $0x70] sm:$0xff]  ;;  %v1070_v26 = vadd.f32 %v2930_v35, %v1069_v14  ;;  %v992_v36 = vpop.f32.mrf.mxu0 }
 0x107   : > { %2576 = vmatmul.msk.bf16.gmra.mxu0 %vm755_vm0, %v2643_v17  ;;  %v1354_v38 = vmax.f32 %v1150_v21, 0.0  ;;  %v993_v41 = vadd.f32 %v2930_v35, %v992_v36 }
 0x108   : > { %v1322_v40 = vmax.f32 %v1070_v26, 0.0 }
 0x109   : > { %v1291_v55 = vmax.f32 %v993_v41, 0.0 }
 0x10b   : > { %v1423_v2 = vmul.f32 %v2936_v39, %v1291_v55 }
 0x10c   : > { %v1152_v42 = vpop.f32.mrf.mxu2 }
 0x10d   : > { %1761 = vadd.xlane.f32.xlu2 %v1760_v27  ;;  %1569 = vadd.xlane.f32.xlu1 %v1568_v28  ;;  %v2675_v27 = vld [vmem:[%s2861_s11 + $0x170] sm:$0xff]  ;;  %v1153_v44 = vadd.f32 %v2930_v35, %v1152_v42  ;;  %v1072_v56 = vpop.f32.mrf.mxu1 }
 0x10e   : > { %1665 = vadd.xlane.f32.xlu0 %v1664_v30  ;;  %v2691_v28 = vld [vmem:[%s2861_s11 + $0x1f0] sm:$0xff]  ;;  %v1670_v30 = vsel %vm1537_vm1, %v1453_v15, 0.0  ;;  %2608 = vmatmul.msk.bf16.gmra.mxu2 %vm755_vm0, %v2675_v27  ;;  %v1073_v63 = vadd.f32 %v2930_v35, %v1072_v56  ;;  %v994_v0 = vpop.f32.mrf.mxu0  ;;  %v1580_v15 = vsel %vm1537_vm1, %v1423_v2, 0.0 }
 0x10f   : > { %2624 = vmatmul.msk.bf16.gmra.mxu3 %vm755_vm0, %v2691_v28 }
 0x111   : > { %v1540_v45 = vpop.xlane.xlu0 %1539 }
 0x112   : > { %v1926_v48 = vadd.f32 %v3112_v34, %v1540_v45  ;;  %v1636_v50 = vpop.xlane.xlu2 %1635  ;;  %v1230_v45 = vadd.f32 %v2930_v35, %v1229_v32 }
 0x113   : > { %v1958_v53 = vadd.f32 %v3112_v34, %v1636_v50 }
 0x114   : > { %2055 = vst.msk [vmem:[%s3125_s19] sm:$0xff] %vm2054_vm2, %v1926_v48  ;;  %v1486_v48 = vmul.f32 %v2936_v39, %v1354_v38  ;;  %v1386_v59 = vmax.f32 %v1230_v45, 0.0  ;;  %v1154_v16 = vpop.f32.mrf.mxu2 }
 0x115   : > { %1572 = vadd.xlane.f32.xlu2 %v1571_v57  ;;  %1857 = vadd.xlane.f32.xlu1 %v1856_v49  ;;  %2087 = vst.msk [vmem:[%s3125_s19 + $0x100] sm:$0xff] %vm2054_vm2, %v1958_v53  ;;  %v1422_v49 = vmul.f32 %v2936_v39, %v1290_v37  ;;  %v1454_v53 = vmul.f32 %v2936_v39, %v1322_v40  ;;  %v1355_v57 = vmax.f32 %v1153_v44, 0.0  ;;  %v1074_v20 = vpop.f32.mrf.mxu1  ;;  %v2692_v37 = vld [vmem:[%s2861_s11 + $0x1f8] sm:$0xff] }
 0x116   : > { %1764 = vadd.xlane.f32.xlu0 %v1763_v58  ;;  %v1232_v58 = vpop.f32.mrf.mxu3  ;;  %v1769_v60 = vsel %vm1537_vm1, %v1486_v48, 0.0  ;;  %v1075_v26 = vadd.f32 %v2930_v35, %v1074_v20  ;;  %v1155_v27 = vadd.f32 %v2930_v35, %v1154_v16  ;;  %v997_v42 = vpop.f32.mrf.mxu0 }
 0x117   : > { %v1732_v62 = vpop.xlane.xlu1 %1731  ;;  %v1577_v61 = vsel %vm1537_vm1, %v1422_v49, 0.0  ;;  %v1487_v3 = vmul.f32 %v2936_v39, %v1355_v57  ;;  %v998_v48 = vadd.f32 %v2930_v35, %v997_v42 }
 0x118   : > { %v1990_v1 = vadd.f32 %v3112_v34, %v1732_v62  ;;  %v1673_v62 = vsel %vm1537_vm1, %v1454_v53, 0.0  ;;  %v1324_v44 = vmax.f32 %v1075_v26, 0.0  ;;  %v1356_v45 = vmax.f32 %v1155_v27, 0.0 }
 0x119   : > { %v1828_v4 = vpop.xlane.xlu0 %1827  ;;  %v1772_v17 = vsel %vm1537_vm1, %v1487_v3, 0.0  ;;  %v3264_v3 = vld [vmem:[%s3801_s2] ss:$0 sm:$0xff] }
 0x11a   : > { %2119 = vst.msk [vmem:[%s3125_s19 + $0x200] sm:$0xff] %vm2054_vm2, %v1990_v1  ;;  %v2022_v6 = vadd.f32 %v3112_v34, %v1828_v4  ;;  %v1233_v1 = vadd.f32 %v2930_v35, %v1232_v58  ;;  %v1488_v55 = vmul.f32 %v2936_v39, %v1356_v45 }
 0x11c   : > { %2151 = vst.msk [vmem:[%s3125_s19 + $0x300] sm:$0xff] %vm2054_vm2, %v2022_v6  ;;  %v1518_v6 = vmul.f32 %v2936_v39, %v1386_v59  ;;  %v1387_v14 = vmax.f32 %v1233_v1, 0.0  ;;  %v1157_v43 = vpop.f32.mrf.mxu2  ;;  %v1775_v1 = vsel %vm1537_vm1, %v1488_v55, 0.0 }
 0x11d   : > { %1860 = vadd.xlane.f32.xlu2 %v1859_v11  ;;  %1668 = vadd.xlane.f32.xlu1 %v1667_v12  ;;  %v2676_v11 = vld [vmem:[%s2861_s11 + $0x178] sm:$0xff]  ;;  %v1323_v12 = vmax.f32 %v1073_v63, 0.0  ;;  %v1077_v49 = vpop.f32.mrf.mxu1 }
 0x11e   : > { %1575 = vadd.xlane.f32.xlu0 %v1574_v10  ;;  %v995_v10 = vadd.f32 %v2930_v35, %v994_v0  ;;  %2609 = vmatmul.msk.bf16.gmra.mxu2 %vm755_vm0, %v2676_v11  ;;  %v1234_v21 = vpop.f32.mrf.mxu3  ;;  %v999_v2 = vpop.f32.mrf.mxu0 }
 0x11f   : > { %v1735_v18 = vpop.xlane.xlu2 %1734  ;;  %2625 = vmatmul.msk.bf16.gmra.mxu3 %vm755_vm0, %v2692_v37 }
 0x120   : > { %v1831_v22 = vpop.xlane.xlu1 %1830  ;;  %v1991_v23 = vadd.f32 %v3112_v34, %v1735_v18  ;;  %v1865_v18 = vsel %vm1537_vm1, %v1518_v6, 0.0  ;;  %v1292_v19 = vmax.f32 %v995_v10, 0.0  ;;  %v3270_v6 = vld [vmem:[%s3802_s3] ss:$0 sm:$0xff]  ;;  %v1000_v10 = vadd.f32 %v3264_v3, %v999_v2 }
 0x121   : > { %v2023_v24 = vadd.f32 %v3112_v34, %v1831_v22  ;;  %v1543_v25 = vpop.xlane.xlu0 %1542  ;;  %v1519_v22 = vmul.f32 %v2936_v39, %v1387_v14 }
 0x122   : > { %2120 = vst.msk [vmem:[%s3125_s19 + $0x208] sm:$0xff] %vm2054_vm2, %v1991_v23  ;;  %v1927_v29 = vadd.f32 %v3112_v34, %v1543_v25  ;;  %v1455_v23 = vmul.f32 %v2936_v39, %v1323_v12  ;;  %v2660_v25 = vld [vmem:[%s2861_s11 + $0xf8] sm:$0xff]  ;;  %v1424_v36 = vmul.f32 %v2936_v39, %v1292_v19 }
 0x123   : > { %2152 = vst.msk [vmem:[%s3125_s19 + $0x308] sm:$0xff] %vm2054_vm2, %v2023_v24  ;;  %v2644_v24 = vld [vmem:[%s2861_s11 + $0x78] sm:$0xff]  ;;  %2593 = vmatmul.msk.bf16.gmra.mxu1 %vm755_vm0, %v2660_v25  ;;  %v1868_v40 = vsel %vm1537_vm1, %v1519_v22, 0.0 }
 0x124   : > { %2056 = vst.msk [vmem:[%s3125_s19 + $0x8] sm:$0xff] %vm2054_vm2, %v1927_v29  ;;  %2577 = vmatmul.msk.bf16.gmra.mxu0 %vm755_vm0, %v2644_v24  ;;  %v1676_v41 = vsel %vm1537_vm1, %v1455_v23, 0.0  ;;  %v1294_v23 = vmax.f32 %v1000_v10, 0.0 }
 0x125   : > { %1671 = vadd.xlane.f32.xlu2 %v1670_v30  ;;  %1767 = vadd.xlane.f32.xlu1 %v1766_v31 }
 0x126   : > { %1863 = vadd.xlane.f32.xlu0 %v1862_v33  ;;  %v1235_v33 = vadd.f32 %v2930_v35, %v1234_v21  ;;  %v1237_v63 = vpop.f32.mrf.mxu3  ;;  %v1079_v21 = vpop.f32.mrf.mxu1 }
 0x127   : > { %v1002_v26 = vpop.f32.mrf.mxu0 }
 0x128   : > { %v1834_v46 = vpop.xlane.xlu2 %1833  ;;  %v1546_v47 = vpop.xlane.xlu1 %1545 }
 0x129   : > { %v2024_v50 = vadd.f32 %v3112_v34, %v1834_v46  ;;  %v1928_v51 = vadd.f32 %v3112_v34, %v1546_v47  ;;  %v1639_v52 = vpop.xlane.xlu0 %1638  ;;  %v1388_v46 = vmax.f32 %v1235_v33, 0.0  ;;  %v1583_v47 = vsel %vm1537_vm1, %v1424_v36, 0.0 }
 0x12a   : > { %v1959_v54 = vadd.f32 %v3112_v34, %v1639_v52  ;;  %v1426_v33 = vmul.f32 %v3270_v6, %v1294_v23 }
 0x12b   : > { %2153 = vst.msk [vmem:[%s3125_s19 + $0x310] sm:$0xff] %vm2054_vm2, %v2024_v50  ;;  %v1158_v50 = vadd.f32 %v2930_v35, %v1157_v43  ;;  %v1520_v59 = vmul.f32 %v2936_v39, %v1388_v46 }
 0x12c   : > { %2057 = vst.msk [vmem:[%s3125_s19 + $0x10] sm:$0xff] %vm2054_vm2, %v1928_v51  ;;  %v1078_v51 = vadd.f32 %v2930_v35, %v1077_v49 }
 0x12d   : > { %2088 = vst.msk [vmem:[%s3125_s19 + $0x108] sm:$0xff] %vm2054_vm2, %v1959_v54  ;;  %1770 = vadd.xlane.f32.xlu2 %v1769_v60  ;;  %1578 = vadd.xlane.f32.xlu1 %v1577_v61  ;;  %v1456_v54 = vmul.f32 %v2936_v39, %v1324_v44  ;;  %v1293_v60 = vmax.f32 %v998_v48, 0.0  ;;  %v1871_v39 = vsel %vm1537_vm1, %v1520_v59, 0.0  ;;  %v1589_v48 = vsel %vm1537_vm1, %v1426_v33, 0.0 }
 0x12e   : > { %1674 = vadd.xlane.f32.xlu0 %v1673_v62  ;;  %v1357_v62 = vmax.f32 %v1158_v50, 0.0  ;;  %v1325_v35 = vmax.f32 %v1078_v51, 0.0  ;;  %v1239_v25 = vpop.f32.mrf.mxu3  ;;  %v1082_v45 = vpop.f32.mrf.mxu1 }
 0x12f   : > { %v1679_v0 = vsel %vm1537_vm1, %v1456_v54, 0.0  ;;  %v1083_v51 = vadd.f32 %v3264_v3, %v1082_v45 }
 0x130   : > { %v1645_v4 = vpop.xlane.xlu2 %1644  ;;  %v1642_v5 = vpop.xlane.xlu1 %1641 }
 0x131   : > { %v1961_v7 = vadd.f32 %v3112_v34, %v1645_v4  ;;  %v1960_v8 = vadd.f32 %v3112_v34, %v1642_v5  ;;  %v1738_v9 = vpop.xlane.xlu0 %1737  ;;  %v1238_v4 = vadd.f32 %v3264_v3, %v1237_v63  ;;  %v1159_v5 = vpop.f32.mrf.mxu2  ;;  %v1327_v63 = vmax.f32 %v1083_v51, 0.0 }
 0x132   : > { %v1992_v13 = vadd.f32 %v3112_v34, %v1738_v9  ;;  %v1457_v9 = vmul.f32 %v3270_v6, %v1325_v35  ;;  %v1160_v16 = vadd.f32 %v3264_v3, %v1159_v5 }
 0x133   : > { %2090 = vst.msk [vmem:[%s3125_s19 + $0x118] sm:$0xff] %vm2054_vm2, %v1961_v7  ;;  %v1489_v7 = vmul.f32 %v3270_v6, %v1357_v62 }
 0x134   : > { %2089 = vst.msk [vmem:[%s3125_s19 + $0x110] sm:$0xff] %vm2054_vm2, %v1960_v8  ;;  %v1425_v8 = vmul.f32 %v3270_v6, %v1293_v60  ;;  %v1682_v22 = vsel %vm1537_vm1, %v1457_v9, 0.0  ;;  %v1358_v24 = vmax.f32 %v1160_v16, 0.0 }
 0x135   : > { %2121 = vst.msk [vmem:[%s3125_s19 + $0x210] sm:$0xff] %vm2054_vm2, %v1992_v13  ;;  %1581 = vadd.xlane.f32.xlu2 %v1580_v15  ;;  %1866 = vadd.xlane.f32.xlu1 %v1865_v18  ;;  %v1778_v19 = vsel %vm1537_vm1, %v1489_v7, 0.0 }
 0x136   : > { %1773 = vadd.xlane.f32.xlu0 %v1772_v17  ;;  %v1389_v17 = vmax.f32 %v1238_v4, 0.0  ;;  %v1586_v20 = vsel %vm1537_vm1, %v1425_v8, 0.0  ;;  %v1084_v7 = vpop.f32.mrf.mxu1  ;;  %v1459_v8 = vmul.f32 %v3270_v6, %v1327_v63 }
 0x138   : > { %v1552_v28 = vpop.xlane.xlu2 %1551  ;;  %v1549_v29 = vpop.xlane.xlu1 %1548  ;;  %v1521_v27 = vmul.f32 %v3270_v6, %v1389_v17 }
 0x139   : > { %v1930_v30 = vadd.f32 %v3112_v34, %v1552_v28  ;;  %v1929_v31 = vadd.f32 %v3112_v34, %v1549_v29  ;;  %v1837_v32 = vpop.xlane.xlu0 %1836  ;;  %v1003_v28 = vadd.f32 %v3264_v3, %v1002_v26  ;;  %v1080_v29 = vadd.f32 %v3264_v3, %v1079_v21  ;;  %v1162_v44 = vpop.f32.mrf.mxu2 }
 0x13a   : > { %v2025_v38 = vadd.f32 %v3112_v34, %v1837_v32  ;;  %v1874_v42 = vsel %vm1537_vm1, %v1521_v27, 0.0  ;;  %v1163_v50 = vadd.f32 %v3264_v3, %v1162_v44 }
 0x13b   : > { %2059 = vst.msk [vmem:[%s3125_s19 + $0x20] sm:$0xff] %vm2054_vm2, %v1930_v30  ;;  %v1240_v30 = vadd.f32 %v3264_v3, %v1239_v25  ;;  %v1295_v43 = vmax.f32 %v1003_v28, 0.0  ;;  %v1326_v46 = vmax.f32 %v1080_v29, 0.0 }
 0x13c   : > { %2058 = vst.msk [vmem:[%s3125_s19 + $0x18] sm:$0xff] %vm2054_vm2, %v1929_v31  ;;  %v1359_v62 = vmax.f32 %v1163_v50, 0.0 }
 0x13d   : > { %2154 = vst.msk [vmem:[%s3125_s19 + $0x318] sm:$0xff] %vm2054_vm2, %v2025_v38  ;;  %1869 = vadd.xlane.f32.xlu2 %v1868_v40  ;;  %1677 = vadd.xlane.f32.xlu1 %v1676_v41  ;;  %v1490_v40 = vmul.f32 %v3270_v6, %v1358_v24  ;;  %v1427_v54 = vmul.f32 %v3270_v6, %v1295_v43 }
 0x13e   : > { %1584 = vadd.xlane.f32.xlu0 %v1583_v47  ;;  %v1390_v47 = vmax.f32 %v1240_v30, 0.0  ;;  %v1491_v9 = vmul.f32 %v3270_v6, %v1359_v62  ;;  %v1087_v45 = vpop.f32.mrf.mxu1 }
 0x13f   : > { %v1781_v49 = vsel %vm1537_vm1, %v1490_v40, 0.0  ;;  %v1592_v2 = vsel %vm1537_vm1, %v1427_v54, 0.0 }
 0x140   : > { %v1744_v52 = vpop.xlane.xlu2 %1743  ;;  %v1741_v53 = vpop.xlane.xlu1 %1740  ;;  %v1784_v21 = vsel %vm1537_vm1, %v1491_v9, 0.0 }
 0x141   : > { %v1994_v56 = vadd.f32 %v3112_v34, %v1744_v52  ;;  %v1993_v57 = vadd.f32 %v3112_v34, %v1741_v53  ;;  %v1648_v58 = vpop.xlane.xlu0 %1647  ;;  %v1242_v52 = vpop.f32.mrf.mxu3 }
 0x142   : > { %v1962_v61 = vadd.f32 %v3112_v34, %v1648_v58  ;;  %v1243_v53 = vadd.f32 %v3264_v3, %v1242_v52  ;;  %v1458_v58 = vmul.f32 %v3270_v6, %v1326_v46  ;;  %v1164_v5 = vpop.f32.mrf.mxu2  ;;  %v1088_v52 = vadd.f32 %v3264_v3, %v1087_v45 }
 0x143   : > { %2123 = vst.msk [vmem:[%s3125_s19 + $0x220] sm:$0xff] %vm2054_vm2, %v1994_v56 }
 0x144   : > { %2122 = vst.msk [vmem:[%s3125_s19 + $0x218] sm:$0xff] %vm2054_vm2, %v1993_v57  ;;  %v1522_v57 = vmul.f32 %v3270_v6, %v1390_v47  ;;  %v1685_v4 = vsel %vm1537_vm1, %v1458_v58, 0.0  ;;  %v1329_v63 = vmax.f32 %v1088_v52, 0.0 }
 0x145   : > { %2091 = vst.msk [vmem:[%s3125_s19 + $0x120] sm:$0xff] %vm2054_vm2, %v1962_v61  ;;  %1680 = vadd.xlane.f32.xlu2 %v1679_v0  ;;  %1776 = vadd.xlane.f32.xlu1 %v1775_v1  ;;  %v1004_v0 = vpop.f32.mrf.mxu0  ;;  %v1391_v1 = vmax.f32 %v1243_v53, 0.0 }
 0x146   : > { %1872 = vadd.xlane.f32.xlu0 %v1871_v39  ;;  %v1877_v39 = vsel %vm1537_vm1, %v1522_v57, 0.0 }
 0x147   : > { %v1523_v10 = vmul.f32 %v3270_v6, %v1391_v1 }
 0x148   : > { %v1555_v11 = vpop.xlane.xlu2 %1554  ;;  %v1840_v12 = vpop.xlane.xlu1 %1839 }
 0x149   : > { %v1931_v13 = vadd.f32 %v3112_v34, %v1555_v11  ;;  %v2026_v14 = vadd.f32 %v3112_v34, %v1840_v12  ;;  %v1747_v15 = vpop.xlane.xlu0 %1746  ;;  %v1005_v11 = vadd.f32 %v3264_v3, %v1004_v0  ;;  %v1165_v12 = vadd.f32 %v3264_v3, %v1164_v5 }
 0x14a   : > { %v1995_v18 = vadd.f32 %v3112_v34, %v1747_v15  ;;  %v1880_v23 = vsel %vm1537_vm1, %v1523_v10, 0.0  ;;  %v1167_v29 = vpop.f32.mrf.mxu2 }
 0x14b   : > { %2060 = vst.msk [vmem:[%s3125_s19 + $0x28] sm:$0xff] %vm2054_vm2, %v1931_v13  ;;  %v1296_v25 = vmax.f32 %v1005_v11, 0.0  ;;  %v1360_v26 = vmax.f32 %v1165_v12, 0.0  ;;  %v1168_v30 = vadd.f32 %v3264_v3, %v1167_v29  ;;  %v1461_v11 = vmul.f32 %v3270_v6, %v1329_v63 }
 0x14c   : > { %2155 = vst.msk [vmem:[%s3125_s19 + $0x320] sm:$0xff] %vm2054_vm2, %v2026_v14 }
 0x14d   : > { %2124 = vst.msk [vmem:[%s3125_s19 + $0x228] sm:$0xff] %vm2054_vm2, %v1995_v18  ;;  %1779 = vadd.xlane.f32.xlu2 %v1778_v19  ;;  %1587 = vadd.xlane.f32.xlu1 %v1586_v20  ;;  %v1085_v18 = vadd.f32 %v3264_v3, %v1084_v7  ;;  %v1688_v20 = vsel %vm1537_vm1, %v1459_v8, 0.0  ;;  %v1007_v24 = vpop.f32.mrf.mxu0  ;;  %v1361_v46 = vmax.f32 %v1168_v30, 0.0  ;;  %v1089_v8 = vpop.f32.mrf.mxu1 }
 0x14e   : > { %1683 = vadd.xlane.f32.xlu0 %v1682_v22  ;;  %v1244_v22 = vpop.f32.mrf.mxu3  ;;  %v1008_v28 = vadd.f32 %v3264_v3, %v1007_v24  ;;  %v1090_v12 = vadd.f32 %v3264_v3, %v1089_v8 }
 0x14f   : > { %v1328_v27 = vmax.f32 %v1085_v18, 0.0 }
 0x150   : > { %v1843_v31 = vpop.xlane.xlu2 %1842  ;;  %v1651_v32 = vpop.xlane.xlu1 %1650  ;;  %v1297_v44 = vmax.f32 %v1008_v28, 0.0 }
 0x151   : > { %v2027_v36 = vadd.f32 %v3112_v34, %v1843_v31  ;;  %v1963_v37 = vadd.f32 %v3112_v34, %v1651_v32  ;;  %v1558_v38 = vpop.xlane.xlu0 %1557  ;;  %v1245_v31 = vadd.f32 %v3264_v3, %v1244_v22 }
 0x152   : > { %v1932_v41 = vadd.f32 %v3112_v34, %v1558_v38 }
 0x153   : > { %2156 = vst.msk [vmem:[%s3125_s19 + $0x328] sm:$0xff] %vm2054_vm2, %v2027_v36  ;;  %v1492_v36 = vmul.f32 %v3270_v6, %v1360_v26  ;;  %v1330_v26 = vmax.f32 %v1090_v12, 0.0 }
 0x154   : > { %2092 = vst.msk [vmem:[%s3125_s19 + $0x128] sm:$0xff] %vm2054_vm2, %v1963_v37  ;;  %v1428_v37 = vmul.f32 %v3270_v6, %v1296_v25 }
 0x155   : > { %2061 = vst.msk [vmem:[%s3125_s19 + $0x30] sm:$0xff] %vm2054_vm2, %v1932_v41  ;;  %1590 = vadd.xlane.f32.xlu2 %v1589_v48  ;;  %1875 = vadd.xlane.f32.xlu1 %v1874_v42  ;;  %v1460_v42 = vmul.f32 %v3270_v6, %v1328_v27  ;;  %v1392_v48 = vmax.f32 %v1245_v31, 0.0  ;;  %v1009_v53 = vpop.f32.mrf.mxu0  ;;  %v1092_v31 = vpop.f32.mrf.mxu1 }
 0x156   : > { %1782 = vadd.xlane.f32.xlu0 %v1781_v49  ;;  %v1247_v47 = vpop.f32.mrf.mxu3  ;;  %v1787_v49 = vsel %vm1537_vm1, %v1492_v36, 0.0  ;;  %v1595_v50 = vsel %vm1537_vm1, %v1428_v37, 0.0 }
 0x157   : > { %v1691_v51 = vsel %vm1537_vm1, %v1460_v42, 0.0  ;;  %v1248_v54 = vadd.f32 %v3264_v3, %v1247_v47 }
 0x158   : > { %v1654_v55 = vpop.xlane.xlu2 %1653  ;;  %v1750_v56 = vpop.xlane.xlu1 %1749 }
 0x159   : > { %v1964_v59 = vadd.f32 %v3112_v34, %v1654_v55  ;;  %v1996_v60 = vadd.f32 %v3112_v34, %v1750_v56  ;;  %v1846_v61 = vpop.xlane.xlu0 %1845  ;;  %v1429_v55 = vmul.f32 %v3270_v6, %v1297_v44  ;;  %v1493_v56 = vmul.f32 %v3270_v6, %v1361_v46 }
 0x15a   : > { %v2028_v35 = vadd.f32 %v3112_v34, %v1846_v61  ;;  %v1393_v1 = vmax.f32 %v1248_v54, 0.0 }
 0x15b   : > { %2093 = vst.msk [vmem:[%s3125_s19 + $0x130] sm:$0xff] %vm2054_vm2, %v1964_v59  ;;  %v1524_v59 = vmul.f32 %v3270_v6, %v1392_v48 }
 0x15c   : > { %2125 = vst.msk [vmem:[%s3125_s19 + $0x230] sm:$0xff] %vm2054_vm2, %v1996_v60  ;;  %v1525_v10 = vmul.f32 %v3270_v6, %v1393_v1 }
 0x15d   : > { %2157 = vst.msk [vmem:[%s3125_s19 + $0x330] sm:$0xff] %vm2054_vm2, %v2028_v35  ;;  %1878 = vadd.xlane.f32.xlu2 %v1877_v39  ;;  %1686 = vadd.xlane.f32.xlu1 %v1685_v4  ;;  %v1010_v35 = vadd.f32 %v3264_v3, %v1009_v53  ;;  %v1169_v39 = vpop.f32.mrf.mxu2  ;;  %v1790_v4 = vsel %vm1537_vm1, %v1493_v56, 0.0  ;;  %v1883_v5 = vsel %vm1537_vm1, %v1524_v59, 0.0  ;;  %v1012_v24 = vpop.f32.mrf.mxu0 }
 0x15e   : > { %1593 = vadd.xlane.f32.xlu0 %v1592_v2  ;;  %v1598_v2 = vsel %vm1537_vm1, %v1429_v55, 0.0  ;;  %v1249_v9 = vpop.f32.mrf.mxu3  ;;  %v1886_v22 = vsel %vm1537_vm1, %v1525_v10, 0.0  ;;  %v1013_v30 = vadd.f32 %v3264_v3, %v1012_v24 }
 0x15f   : > { %v1298_v7 = vmax.f32 %v1010_v35, 0.0 }
 0x160   : > { %v1753_v13 = vpop.xlane.xlu2 %1752  ;;  %v1561_v14 = vpop.xlane.xlu1 %1560  ;;  %v1299_v45 = vmax.f32 %v1013_v30, 0.0 }
 0x161   : > { %v1997_v15 = vadd.f32 %v3112_v34, %v1753_v13  ;;  %v1933_v16 = vadd.f32 %v3112_v34, %v1561_v14  ;;  %v1657_v17 = vpop.xlane.xlu0 %1656  ;;  %v1170_v13 = vadd.f32 %v3264_v3, %v1169_v39 }
 0x162   : > { %v1965_v19 = vadd.f32 %v3112_v34, %v1657_v17 }
 0x163   : > { %2126 = vst.msk [vmem:[%s3125_s19 + $0x238] sm:$0xff] %vm2054_vm2, %v1997_v15  ;;  %v1362_v27 = vmax.f32 %v1170_v13, 0.0 }
 0x164   : > { %2062 = vst.msk [vmem:[%s3125_s19 + $0x38] sm:$0xff] %vm2054_vm2, %v1933_v16 }
 0x165   : > { %2094 = vst.msk [vmem:[%s3125_s19 + $0x138] sm:$0xff] %vm2054_vm2, %v1965_v19  ;;  %1689 = vadd.xlane.f32.xlu2 %v1688_v20  ;;  %1785 = vadd.xlane.f32.xlu1 %v1784_v21  ;;  %v1250_v19 = vadd.f32 %v3264_v3, %v1249_v9  ;;  %v1430_v20 = vmul.f32 %v3270_v6, %v1298_v7  ;;  %v1172_v25 = vpop.f32.mrf.mxu2  ;;  %v1014_v52 = vpop.f32.mrf.mxu0 }
 0x166   : > { %1881 = vadd.xlane.f32.xlu0 %v1880_v23  ;;  %v1694_v23 = vsel %vm1537_vm1, %v1461_v11, 0.0  ;;  %v1015_v59 = vadd.f32 %v3264_v3, %v1014_v52 }
 0x167   : > { %v1394_v28 = vmax.f32 %v1250_v19, 0.0  ;;  %v1601_v29 = vsel %vm1537_vm1, %v1430_v20, 0.0 }
 0x168   : > { %v1564_v32 = vpop.xlane.xlu2 %1563  ;;  %v1849_v33 = vpop.xlane.xlu1 %1848  ;;  %v1300_v8 = vmax.f32 %v1015_v59, 0.0 }
 0x169   : > { %v1934_v38 = vadd.f32 %v3112_v34, %v1564_v32  ;;  %v2029_v40 = vadd.f32 %v3112_v34, %v1849_v33  ;;  %v1756_v41 = vpop.xlane.xlu0 %1755  ;;  %v1173_v32 = vadd.f32 %v3264_v3, %v1172_v25  ;;  %v1093_v33 = vadd.f32 %v3264_v3, %v1092_v31 }
 0x16a   : > { %v1998_v43 = vadd.f32 %v3112_v34, %v1756_v41  ;;  %v1526_v44 = vmul.f32 %v3270_v6, %v1394_v28  ;;  %v1432_v19 = vmul.f32 %v3270_v6, %v1300_v8 }
 0x16b   : > { %2063 = vst.msk [vmem:[%s3125_s19 + $0x40] sm:$0xff] %vm2054_vm2, %v1934_v38  ;;  %v1462_v38 = vmul.f32 %v3270_v6, %v1330_v26  ;;  %v1363_v47 = vmax.f32 %v1173_v32, 0.0  ;;  %v1331_v48 = vmax.f32 %v1093_v33, 0.0 }
 0x16c   : > { %2158 = vst.msk [vmem:[%s3125_s19 + $0x338] sm:$0xff] %vm2054_vm2, %v2029_v40  ;;  %v1494_v40 = vmul.f32 %v3270_v6, %v1362_v27  ;;  %v1889_v53 = vsel %vm1537_vm1, %v1526_v44, 0.0  ;;  %v1607_v30 = vsel %vm1537_vm1, %v1432_v19, 0.0 }
 0x16d   : > { %2127 = vst.msk [vmem:[%s3125_s19 + $0x240] sm:$0xff] %vm2054_vm2, %v1998_v43  ;;  %1788 = vadd.xlane.f32.xlu2 %v1787_v49  ;;  %1596 = vadd.xlane.f32.xlu1 %v1595_v50  ;;  %v1252_v49 = vpop.f32.mrf.mxu3  ;;  %v1697_v50 = vsel %vm1537_vm1, %v1462_v38, 0.0  ;;  %v1174_v54 = vpop.f32.mrf.mxu2  ;;  %v1495_v56 = vmul.f32 %v3270_v6, %v1363_v47 }
 0x16e   : > { %1692 = vadd.xlane.f32.xlu0 %v1691_v51  ;;  %v1793_v51 = vsel %vm1537_vm1, %v1494_v40, 0.0  ;;  %v1253_v55 = vadd.f32 %v3264_v3, %v1252_v49  ;;  %v1175_v1 = vadd.f32 %v3264_v3, %v1174_v54  ;;  %v1017_v11 = vpop.f32.mrf.mxu0 }
 0x16f   : > { %v1018_v13 = vadd.f32 %v3264_v3, %v1017_v11 }
 0x170   : > { %v1852_v57 = vpop.xlane.xlu2 %1851  ;;  %v1660_v58 = vpop.xlane.xlu1 %1659  ;;  %v1364_v9 = vmax.f32 %v1175_v1, 0.0 }
 0x171   : > { %v2030_v60 = vadd.f32 %v3112_v34, %v1852_v57  ;;  %v1966_v61 = vadd.f32 %v3112_v34, %v1660_v58  ;;  %v1567_v62 = vpop.xlane.xlu0 %1566  ;;  %v1431_v57 = vmul.f32 %v3270_v6, %v1299_v45  ;;  %v1463_v58 = vmul.f32 %v3270_v6, %v1331_v48 }
 0x172   : > { %v1935_v0 = vadd.f32 %v3112_v34, %v1567_v62  ;;  %v1301_v27 = vmax.f32 %v1018_v13, 0.0 }
 0x173   : > { %2159 = vst.msk [vmem:[%s3125_s19 + $0x340] sm:$0xff] %vm2054_vm2, %v2030_v60  ;;  %v1700_v7 = vsel %vm1537_vm1, %v1463_v58, 0.0 }
 0x174   : > { %2095 = vst.msk [vmem:[%s3125_s19 + $0x140] sm:$0xff] %vm2054_vm2, %v1966_v61  ;;  %v1433_v38 = vmul.f32 %v3270_v6, %v1301_v27 }
 0x175   : > { %2064 = vst.msk [vmem:[%s3125_s19 + $0x48] sm:$0xff] %vm2054_vm2, %v1935_v0  ;;  %1599 = vadd.xlane.f32.xlu2 %v1598_v2  ;;  %1884 = vadd.xlane.f32.xlu1 %v1883_v5  ;;  %v1094_v0 = vpop.f32.mrf.mxu1  ;;  %v1395_v2 = vmax.f32 %v1253_v55, 0.0  ;;  %v1604_v5 = vsel %vm1537_vm1, %v1431_v57, 0.0  ;;  %v1254_v10 = vpop.f32.mrf.mxu3 }
 0x176   : > { %1791 = vadd.xlane.f32.xlu0 %v1790_v4  ;;  %v1796_v4 = vsel %vm1537_vm1, %v1495_v56, 0.0  ;;  %v1019_v49 = vpop.f32.mrf.mxu0 }
 0x177   : > { %v1527_v12 = vmul.f32 %v3270_v6, %v1395_v2  ;;  %v1020_v59 = vadd.f32 %v3264_v3, %v1019_v49 }
 0x178   : > { %v1663_v14 = vpop.xlane.xlu2 %1662  ;;  %v1759_v15 = vpop.xlane.xlu1 %1758 }
 0x179   : > { %v1967_v16 = vadd.f32 %v3112_v34, %v1663_v14  ;;  %v1999_v17 = vadd.f32 %v3112_v34, %v1759_v15  ;;  %v1855_v18 = vpop.xlane.xlu0 %1854  ;;  %v1177_v14 = vpop.f32.mrf.mxu2  ;;  %v1095_v15 = vadd.f32 %v3264_v3, %v1094_v0  ;;  %v1892_v26 = vsel %vm1537_vm1, %v1527_v12, 0.0 }
 0x17a   : > { %v2031_v21 = vadd.f32 %v3112_v34, %v1855_v18  ;;  %v1178_v32 = vadd.f32 %v3264_v3, %v1177_v14  ;;  %v1302_v11 = vmax.f32 %v1020_v59, 0.0 }
 0x17b   : > { %2096 = vst.msk [vmem:[%s3125_s19 + $0x148] sm:$0xff] %vm2054_vm2, %v1967_v16  ;;  %v1255_v16 = vadd.f32 %v3264_v3, %v1254_v10  ;;  %v1332_v28 = vmax.f32 %v1095_v15, 0.0 }
 0x17c   : > { %2128 = vst.msk [vmem:[%s3125_s19 + $0x248] sm:$0xff] %vm2054_vm2, %v1999_v17  ;;  %v1365_v47 = vmax.f32 %v1178_v32, 0.0 }
 0x17d   : > { %2160 = vst.msk [vmem:[%s3125_s19 + $0x348] sm:$0xff] %vm2054_vm2, %v2031_v21  ;;  %1887 = vadd.xlane.f32.xlu2 %v1886_v22  ;;  %1695 = vadd.xlane.f32.xlu1 %v1694_v23  ;;  %v1496_v23 = vmul.f32 %v3270_v6, %v1364_v9  ;;  %v1097_v24 = vpop.f32.mrf.mxu1 }
 0x17e   : > { %1602 = vadd.xlane.f32.xlu0 %v1601_v29  ;;  %v1396_v29 = vmax.f32 %v1255_v16, 0.0  ;;  %v1098_v33 = vadd.f32 %v3264_v3, %v1097_v24  ;;  %v1497_v57 = vmul.f32 %v3270_v6, %v1365_v47  ;;  %v1022_v9 = vpop.f32.mrf.mxu0 }
 0x17f   : > { %v1799_v31 = vsel %vm1537_vm1, %v1496_v23, 0.0  ;;  %v1023_v15 = vadd.f32 %v3264_v3, %v1022_v9 }
 0x180   : > { %v1762_v36 = vpop.xlane.xlu2 %1761  ;;  %v1570_v37 = vpop.xlane.xlu1 %1569 }
 0x181   : > { %v2000_v41 = vadd.f32 %v3112_v34, %v1762_v36  ;;  %v1936_v42 = vadd.f32 %v3112_v34, %v1570_v37  ;;  %v1666_v43 = vpop.xlane.xlu0 %1665  ;;  %v1257_v36 = vpop.f32.mrf.mxu3  ;;  %v1303_v27 = vmax.f32 %v1023_v15, 0.0 }
 0x182   : > { %v1968_v46 = vadd.f32 %v3112_v34, %v1666_v43  ;;  %v1258_v37 = vadd.f32 %v3264_v3, %v1257_v36  ;;  %v1464_v43 = vmul.f32 %v3270_v6, %v1332_v28 }
 0x183   : > { %2129 = vst.msk [vmem:[%s3125_s19 + $0x250] sm:$0xff] %vm2054_vm2, %v2000_v41 }
 0x184   : > { %2065 = vst.msk [vmem:[%s3125_s19 + $0x50] sm:$0xff] %vm2054_vm2, %v1936_v42  ;;  %v1528_v42 = vmul.f32 %v3270_v6, %v1396_v29  ;;  %v1397_v52 = vmax.f32 %v1258_v37, 0.0  ;;  %v1703_v56 = vsel %vm1537_vm1, %v1464_v43, 0.0 }
 0x185   : > { %2097 = vst.msk [vmem:[%s3125_s19 + $0x150] sm:$0xff] %vm2054_vm2, %v1968_v46  ;;  %1698 = vadd.xlane.f32.xlu2 %v1697_v50  ;;  %1794 = vadd.xlane.f32.xlu1 %v1793_v51  ;;  %v1333_v50 = vmax.f32 %v1098_v33, 0.0  ;;  %v1179_v51 = vpop.f32.mrf.mxu2  ;;  %v1099_v54 = vpop.f32.mrf.mxu1 }
 0x186   : > { %1890 = vadd.xlane.f32.xlu0 %v1889_v53  ;;  %v1610_v53 = vsel %vm1537_vm1, %v1433_v38, 0.0  ;;  %v1895_v55 = vsel %vm1537_vm1, %v1528_v42, 0.0  ;;  %v1529_v58 = vmul.f32 %v3270_v6, %v1397_v52  ;;  %v1100_v2 = vadd.f32 %v3264_v3, %v1099_v54  ;;  %v1024_v38 = vpop.f32.mrf.mxu0 }
 0x188   : > { %v1573_v60 = vpop.xlane.xlu2 %1572  ;;  %v1858_v61 = vpop.xlane.xlu1 %1857  ;;  %v1898_v8 = vsel %vm1537_vm1, %v1529_v58, 0.0  ;;  %v1334_v13 = vmax.f32 %v1100_v2, 0.0 }
 0x189   : > { %v1937_v62 = vadd.f32 %v3112_v34, %v1573_v60  ;;  %v2032_v35 = vadd.f32 %v3112_v34, %v1858_v61  ;;  %v1765_v63 = vpop.xlane.xlu0 %1764  ;;  %v1180_v60 = vadd.f32 %v3264_v3, %v1179_v51 }
 0x18a   : > { %v2001_v39 = vadd.f32 %v3112_v34, %v1765_v63 }
 0x18b   : > { %2066 = vst.msk [vmem:[%s3125_s19 + $0x58] sm:$0xff] %vm2054_vm2, %v1937_v62  ;;  %v1366_v12 = vmax.f32 %v1180_v60, 0.0 }
 0x18c   : > { %2161 = vst.msk [vmem:[%s3125_s19 + $0x350] sm:$0xff] %vm2054_vm2, %v2032_v35  ;;  %v3474_v35 = vld [vmem:[#allocation2] ss:$0 sm:$0xff] }
 0x18d   : > { %2130 = vst.msk [vmem:[%s3125_s19 + $0x258] sm:$0xff] %vm2054_vm2, %v2001_v39  ;;  %1797 = vadd.xlane.f32.xlu2 %v1796_v4  ;;  %1605 = vadd.xlane.f32.xlu1 %v1604_v5  ;;  %v1259_v4 = vpop.f32.mrf.mxu3  ;;  %v1182_v10 = vpop.f32.mrf.mxu2 }
 0x18e   : > { %1701 = vadd.xlane.f32.xlu0 %v1700_v7  ;;  %v1802_v7 = vsel %vm1537_vm1, %v1497_v57, 0.0  ;;  %v1102_v14 = vpop.f32.mrf.mxu1  ;;  %v1183_v16 = vadd.f32 %v3264_v3, %v1182_v10 }
 0x18f   : > { %v1103_v37 = vadd.f32 %v3264_v3, %v1102_v14 }
 0x190   : > { %v1861_v17 = vpop.xlane.xlu2 %1860  ;;  %v1669_v18 = vpop.xlane.xlu1 %1668  ;;  %v1367_v28 = vmax.f32 %v1183_v16, 0.0 }
 0x191   : > { %v2033_v20 = vadd.f32 %v3112_v34, %v1861_v17  ;;  %v1969_v21 = vadd.f32 %v3112_v34, %v1669_v18  ;;  %v1576_v22 = vpop.xlane.xlu0 %1575  ;;  %v1260_v17 = vadd.f32 %v3264_v3, %v1259_v4  ;;  %v1335_v51 = vmax.f32 %v1103_v37, 0.0 }
 0x192   : > { %v1938_v25 = vadd.f32 %v3112_v34, %v1576_v22  ;;  %v1499_v43 = vmul.f32 %v3270_v6, %v1367_v28 }
 0x193   : > { %2162 = vst.msk [vmem:[%s3125_s19 + $0x358] sm:$0xff] %vm2054_vm2, %v2033_v20  ;;  %v1498_v20 = vmul.f32 %v3270_v6, %v1366_v12  ;;  %v1467_v60 = vmul.f32 %v3270_v6, %v1335_v51 }
 0x194   : > { %2098 = vst.msk [vmem:[%s3125_s19 + $0x158] sm:$0xff] %vm2054_vm2, %v1969_v21  ;;  %v1434_v21 = vmul.f32 %v3270_v6, %v1302_v11  ;;  %v1027_v11 = vpop.f32.mrf.mxu0 }
 0x195   : > { %2067 = vst.msk [vmem:[%s3125_s19 + $0x60] sm:$0xff] %vm2054_vm2, %v1938_v25  ;;  %1608 = vadd.xlane.f32.xlu2 %v1607_v30  ;;  %1893 = vadd.xlane.f32.xlu1 %v1892_v26  ;;  %v1466_v25 = vmul.f32 %v3270_v6, %v1334_v13  ;;  %v1262_v29 = vpop.f32.mrf.mxu3  ;;  %v1398_v30 = vmax.f32 %v1260_v17, 0.0  ;;  %v1184_v36 = vpop.f32.mrf.mxu2  ;;  %v1712_v10 = vsel %vm1537_vm1, %v1467_v60, 0.0  ;;  %v1028_v16 = vadd.f32 %v3264_v3, %v1027_v11 }
 0x196   : > { %1800 = vadd.xlane.f32.xlu0 %v1799_v31  ;;  %v1805_v31 = vsel %vm1537_vm1, %v1498_v20, 0.0  ;;  %v1613_v32 = vsel %vm1537_vm1, %v1434_v21, 0.0  ;;  %v1104_v42 = vpop.f32.mrf.mxu1 }
 0x197   : > { %v1709_v33 = vsel %vm1537_vm1, %v1466_v25, 0.0 }
 0x198   : > { %v1672_v40 = vpop.xlane.xlu2 %1671  ;;  %v1768_v41 = vpop.xlane.xlu1 %1767 }
 0x199   : > { %v1970_v44 = vadd.f32 %v3112_v34, %v1672_v40  ;;  %v2002_v45 = vadd.f32 %v3112_v34, %v1768_v41  ;;  %v1864_v46 = vpop.xlane.xlu0 %1863  ;;  %v1263_v40 = vadd.f32 %v3264_v3, %v1262_v29  ;;  %v1435_v41 = vmul.f32 %v3270_v6, %v1303_v27 }
 0x19a   : > { %v2034_v48 = vadd.f32 %v3112_v34, %v1864_v46  ;;  %v1465_v34 = vmul.f32 %v3270_v6, %v1333_v50  ;;  %v1530_v46 = vmul.f32 %v3270_v6, %v1398_v30  ;;  %v1025_v50 = vadd.f32 %v3264_v3, %v1024_v38 }
 0x19b   : > { %2099 = vst.msk [vmem:[%s3125_s19 + $0x160] sm:$0xff] %vm2054_vm2, %v1970_v44  ;;  %v1616_v54 = vsel %vm1537_vm1, %v1435_v41, 0.0  ;;  %v1305_v29 = vmax.f32 %v1028_v16, 0.0 }
 0x19c   : > { %2131 = vst.msk [vmem:[%s3125_s19 + $0x260] sm:$0xff] %vm2054_vm2, %v2002_v45  ;;  %v1706_v5 = vsel %vm1537_vm1, %v1465_v34, 0.0  ;;  %v1304_v34 = vmax.f32 %v1025_v50, 0.0  ;;  %v1029_v37 = vpop.f32.mrf.mxu0 }
 0x19d   : > { %2163 = vst.msk [vmem:[%s3125_s19 + $0x360] sm:$0xff] %vm2054_vm2, %v2034_v48  ;;  %1896 = vadd.xlane.f32.xlu2 %v1895_v55  ;;  %1704 = vadd.xlane.f32.xlu1 %v1703_v56  ;;  %v1808_v55 = vsel %vm1537_vm1, %v1499_v43, 0.0  ;;  %v1901_v56 = vsel %vm1537_vm1, %v1530_v46, 0.0  ;;  %v1187_v57 = vpop.f32.mrf.mxu2  ;;  %v1264_v58 = vpop.f32.mrf.mxu3  ;;  %v1437_v43 = vmul.f32 %v3270_v6, %v1305_v29 }
 0x19e   : > { %1611 = vadd.xlane.f32.xlu0 %v1610_v53  ;;  %v1399_v53 = vmax.f32 %v1263_v40, 0.0  ;;  %v1188_v17 = vadd.f32 %v3264_v3, %v1187_v57 }
 0x1a0   : > { %v1771_v61 = vpop.xlane.xlu2 %1770  ;;  %v1579_v62 = vpop.xlane.xlu1 %1578  ;;  %v1531_v59 = vmul.f32 %v3270_v6, %v1399_v53 }
 0x1a1   : > { %v2003_v63 = vadd.f32 %v3474_v35, %v1771_v61  ;;  %v1939_v0 = vadd.f32 %v3474_v35, %v1579_v62  ;;  %v1675_v1 = vpop.xlane.xlu0 %1674  ;;  %v1107_v61 = vpop.f32.mrf.mxu1  ;;  %v1105_v62 = vadd.f32 %v3264_v3, %v1104_v42 }
 0x1a2   : > { %v1971_v39 = vadd.f32 %v3474_v35, %v1675_v1  ;;  %v1904_v9 = vsel %vm1537_vm1, %v1531_v59, 0.0 }
 0x1a3   : > { %2132 = vst.msk [vmem:[%s3125_s19 + $0x268] sm:$0xff] %vm2054_vm2, %v2003_v63  ;;  %v1185_v63 = vadd.f32 %v3264_v3, %v1184_v36  ;;  %v1336_v12 = vmax.f32 %v1105_v62, 0.0 }
 0x1a4   : > { %2068 = vst.msk [vmem:[%s3125_s19 + $0x68] sm:$0xff] %vm2054_vm2, %v1939_v0  ;;  %v1032_v60 = vpop.f32.mrf.mxu0 }
 0x1a5   : > { %2100 = vst.msk [vmem:[%s3125_s19 + $0x168] sm:$0xff] %vm2054_vm2, %v1971_v39  ;;  %1707 = vadd.xlane.f32.xlu2 %v1706_v5  ;;  %1803 = vadd.xlane.f32.xlu1 %v1802_v7  ;;  %v1265_v5 = vadd.f32 %v3264_v3, %v1264_v58  ;;  %v1436_v7 = vmul.f32 %v3270_v6, %v1304_v34  ;;  %v1368_v13 = vmax.f32 %v1185_v63, 0.0  ;;  %v1267_v38 = vpop.f32.mrf.mxu3 }
 0x1a6   : > { %1899 = vadd.xlane.f32.xlu0 %v1898_v8  ;;  %v1268_v41 = vadd.f32 %v3264_v3, %v1267_v38  ;;  %v1033_v63 = vadd.f32 %v3264_v3, %v1032_v60 }
 0x1a7   : > { %v1400_v14 = vmax.f32 %v1265_v5, 0.0  ;;  %v1619_v15 = vsel %vm1537_vm1, %v1436_v7, 0.0 }
 0x1a8   : > { %v1582_v18 = vpop.xlane.xlu2 %1581  ;;  %v1867_v19 = vpop.xlane.xlu1 %1866  ;;  %v1401_v53 = vmax.f32 %v1268_v41, 0.0 }
 0x1a9   : > { %v1940_v22 = vadd.f32 %v3474_v35, %v1582_v18  ;;  %v2035_v23 = vadd.f32 %v3474_v35, %v1867_v19  ;;  %v1774_v24 = vpop.xlane.xlu0 %1773  ;;  %v1108_v18 = vadd.f32 %v3264_v3, %v1107_v61  ;;  %v1189_v19 = vpop.f32.mrf.mxu2  ;;  %v1532_v27 = vmul.f32 %v3270_v6, %v1400_v14 }
 0x1aa   : > { %v2004_v26 = vadd.f32 %v3474_v35, %v1774_v24  ;;  %v1109_v28 = vpop.f32.mrf.mxu1  ;;  %v1190_v51 = vadd.f32 %v3264_v3, %v1189_v19  ;;  %v1533_v62 = vmul.f32 %v3270_v6, %v1401_v53 }
 0x1ab   : > { %2069 = vst.msk [vmem:[%s3125_s19 + $0x70] sm:$0xff] %vm2054_vm2, %v1940_v22  ;;  %v1468_v22 = vmul.f32 %v3270_v6, %v1336_v12  ;;  %v1907_v40 = vsel %vm1537_vm1, %v1532_v27, 0.0 }
 0x1ac   : > { %2164 = vst.msk [vmem:[%s3125_s19 + $0x368] sm:$0xff] %vm2054_vm2, %v2035_v23  ;;  %v1500_v23 = vmul.f32 %v3270_v6, %v1368_v13  ;;  %v1370_v59 = vmax.f32 %v1190_v51, 0.0  ;;  %v1910_v11 = vsel %vm1537_vm1, %v1533_v62, 0.0  ;;  %v1307_v13 = vmax.f32 %v1033_v63, 0.0  ;;  %v1034_v38 = vpop.f32.mrf.mxu0 }
 0x1ad   : > { %2133 = vst.msk [vmem:[%s3125_s19 + $0x270] sm:$0xff] %vm2054_vm2, %v2004_v26  ;;  %1806 = vadd.xlane.f32.xlu2 %v1805_v31  ;;  %1614 = vadd.xlane.f32.xlu1 %v1613_v32  ;;  %v1369_v31 = vmax.f32 %v1188_v17, 0.0  ;;  %v1337_v32 = vmax.f32 %v1108_v18, 0.0  ;;  %v1269_v12 = vpop.f32.mrf.mxu3 }
 0x1ae   : > { %1710 = vadd.xlane.f32.xlu0 %v1709_v33  ;;  %v1715_v33 = vsel %vm1537_vm1, %v1468_v22, 0.0  ;;  %v1811_v36 = vsel %vm1537_vm1, %v1500_v23, 0.0  ;;  %v1439_v22 = vmul.f32 %v3270_v6, %v1307_v13 }
 0x1af   : > { %v1501_v42 = vmul.f32 %v3270_v6, %v1369_v31 }
 0x1b0   : > { %v1870_v44 = vpop.xlane.xlu2 %1869  ;;  %v1678_v45 = vpop.xlane.xlu1 %1677 }
 0x1b1   : > { %v2036_v47 = vadd.f32 %v3474_v35, %v1870_v44  ;;  %v1972_v48 = vadd.f32 %v3474_v35, %v1678_v45  ;;  %v1585_v49 = vpop.xlane.xlu0 %1584  ;;  %v1469_v44 = vmul.f32 %v3270_v6, %v1337_v32  ;;  %v1030_v45 = vadd.f32 %v3264_v3, %v1029_v37 }
 0x1b2   : > { %v1941_v52 = vadd.f32 %v3474_v35, %v1585_v49  ;;  %v1112_v57 = vpop.f32.mrf.mxu1  ;;  %v1628_v37 = vsel %vm1537_vm1, %v1439_v22, 0.0 }
 0x1b3   : > { %2165 = vst.msk [vmem:[%s3125_s19 + $0x370] sm:$0xff] %vm2054_vm2, %v2036_v47  ;;  %v1718_v34 = vsel %vm1537_vm1, %v1469_v44, 0.0  ;;  %v1306_v58 = vmax.f32 %v1030_v45, 0.0  ;;  %v1113_v61 = vadd.f32 %v3264_v3, %v1112_v57 }
 0x1b4   : > { %2101 = vst.msk [vmem:[%s3125_s19 + $0x170] sm:$0xff] %vm2054_vm2, %v1972_v48 }
 0x1b5   : > { %2070 = vst.msk [vmem:[%s3125_s19 + $0x78] sm:$0xff] %vm2054_vm2, %v1941_v52  ;;  %1617 = vadd.xlane.f32.xlu2 %v1616_v54  ;;  %1902 = vadd.xlane.f32.xlu1 %v1901_v56  ;;  %v1192_v52 = vpop.f32.mrf.mxu2  ;;  %v1622_v56 = vsel %vm1537_vm1, %v1437_v43, 0.0  ;;  %v2748_v43 = vld [vmem:[%s3801_s2] ss:$0 sm:$0xff] }
 0x1b6   : > { %1809 = vadd.xlane.f32.xlu0 %v1808_v55  ;;  %v1814_v55 = vsel %vm1537_vm1, %v1501_v42, 0.0  ;;  %v1193_v18 = vadd.f32 %v3264_v3, %v1192_v52  ;;  %v1270_v44 = vadd.f32 %v2748_v43, %v1269_v12  ;;  %v1035_v45 = vadd.f32 %v2748_v43, %v1034_v38 }
 0x1b8   : > { %v1681_v0 = vpop.xlane.xlu2 %1680  ;;  %v1777_v1 = vpop.xlane.xlu1 %1776 }
 0x1b9   : > { %v1973_v2 = vadd.f32 %v3474_v35, %v1681_v0  ;;  %v2005_v39 = vadd.f32 %v3474_v35, %v1777_v1  ;;  %v1873_v4 = vpop.xlane.xlu0 %1872  ;;  %v1110_v0 = vadd.f32 %v3264_v3, %v1109_v28 }
 0x1ba   : > { %v2037_v8 = vadd.f32 %v3474_v35, %v1873_v4  ;;  %v1114_v19 = vpop.f32.mrf.mxu1 }
 0x1bb   : > { %2102 = vst.msk [vmem:[%s3125_s19 + $0x178] sm:$0xff] %vm2054_vm2, %v1973_v2  ;;  %v1115_v29 = vadd.f32 %v3264_v3, %v1114_v19 }
 0x1bc   : > { %2134 = vst.msk [vmem:[%s3125_s19 + $0x278] sm:$0xff] %vm2054_vm2, %v2005_v39  ;;  %v1438_v39 = vmul.f32 %v3270_v6, %v1306_v58 }
 0x1bd   : > { %2166 = vst.msk [vmem:[%s3125_s19 + $0x378] sm:$0xff] %vm2054_vm2, %v2037_v8  ;;  %1905 = vadd.xlane.f32.xlu2 %v1904_v9  ;;  %1713 = vadd.xlane.f32.xlu1 %v1712_v10  ;;  %v1502_v8 = vmul.f32 %v3270_v6, %v1370_v59  ;;  %v1339_v10 = vmax.f32 %v1113_v61, 0.0  ;;  %v1194_v14 = vpop.f32.mrf.mxu2 }
 0x1be   : > { %1620 = vadd.xlane.f32.xlu0 %v1619_v15  ;;  %v1338_v15 = vmax.f32 %v1110_v0, 0.0  ;;  %v1625_v16 = vsel %vm1537_vm1, %v1438_v39, 0.0 }
 0x1bf   : > { %v1817_v17 = vsel %vm1537_vm1, %v1502_v8, 0.0 }
 0x1c0   : > { %v1780_v20 = vpop.xlane.xlu2 %1779  ;;  %v1588_v21 = vpop.xlane.xlu1 %1587 }
 0x1c1   : > { %v2006_v24 = vadd.f32 %v3474_v35, %v1780_v20  ;;  %v1942_v25 = vadd.f32 %v3474_v35, %v1588_v21  ;;  %v1684_v26 = vpop.xlane.xlu0 %1683  ;;  %v1195_v20 = vadd.f32 %v3264_v3, %v1194_v14  ;;  %v1471_v21 = vmul.f32 %v3270_v6, %v1339_v10  ;;  %v2747_v3 = vld [vmem:[%s3802_s3] ss:$0 sm:$0xff] }
 0x1c2   : > { %v1974_v30 = vadd.f32 %v3474_v35, %v1684_v26 }
 0x1c3   : > { %2135 = vst.msk [vmem:[%s3125_s19 + $0x280] sm:$0xff] %vm2054_vm2, %v2006_v24  ;;  %v1372_v32 = vmax.f32 %v1195_v20, 0.0 }
 0x1c4   : > { %2071 = vst.msk [vmem:[%s3125_s19 + $0x80] sm:$0xff] %vm2054_vm2, %v1942_v25  ;;  %v1470_v25 = vmul.f32 %v3270_v6, %v1338_v15 }
 0x1c5   : > { %2103 = vst.msk [vmem:[%s3125_s19 + $0x180] sm:$0xff] %vm2054_vm2, %v1974_v30  ;;  %1716 = vadd.xlane.f32.xlu2 %v1715_v33  ;;  %1812 = vadd.xlane.f32.xlu1 %v1811_v36  ;;  %v1371_v30 = vmax.f32 %v1193_v18, 0.0  ;;  %v1724_v33 = vsel %vm1537_vm1, %v1471_v21, 0.0  ;;  %v1272_v36 = vpop.f32.mrf.mxu3  ;;  %v1504_v41 = vmul.f32 %v2747_v3, %v1372_v32 }
 0x1c6   : > { %1908 = vadd.xlane.f32.xlu0 %v1907_v40  ;;  %v1721_v6 = vsel %vm1537_vm1, %v1470_v25, 0.0  ;;  %v1340_v40 = vmax.f32 %v1115_v29, 0.0 }
 0x1c7   : > { %v1503_v42 = vmul.f32 %v2747_v3, %v1371_v30 }
 0x1c8   : > { %v1591_v46 = vpop.xlane.xlu2 %1590  ;;  %v1876_v47 = vpop.xlane.xlu1 %1875  ;;  %v1472_v52 = vmul.f32 %v2747_v3, %v1340_v40 }
 0x1c9   : > { %v1943_v48 = vadd.f32 %v3474_v35, %v1591_v46  ;;  %v2038_v49 = vadd.f32 %v3474_v35, %v1876_v47  ;;  %v1783_v50 = vpop.xlane.xlu0 %1782 }
 0x1ca   : > { %v2007_v54 = vadd.f32 %v3474_v35, %v1783_v50  ;;  %v1727_v59 = vsel %vm1537_vm1, %v1472_v52, 0.0 }
 0x1cb   : > { %2072 = vst.msk [vmem:[%s3125_s19 + $0x88] sm:$0xff] %vm2054_vm2, %v1943_v48  ;;  %v1273_v48 = vadd.f32 %v2748_v43, %v1272_v36 }
 0x1cc   : > { %2167 = vst.msk [vmem:[%s3125_s19 + $0x380] sm:$0xff] %vm2054_vm2, %v2038_v49 }
 0x1cd   : > { %2136 = vst.msk [vmem:[%s3125_s19 + $0x288] sm:$0xff] %vm2054_vm2, %v2007_v54  ;;  %1815 = vadd.xlane.f32.xlu2 %v1814_v55  ;;  %1623 = vadd.xlane.f32.xlu1 %v1622_v56  ;;  %v1823_v54 = vsel %vm1537_vm1, %v1504_v41, 0.0  ;;  %v1820_v55 = vsel %vm1537_vm1, %v1503_v42, 0.0  ;;  %v1402_v56 = vmax.f32 %v1270_v44, 0.0  ;;  %v1403_v57 = vmax.f32 %v1273_v48, 0.0  ;;  %v1274_v58 = vpop.f32.mrf.mxu3 }
 0x1ce   : > { %1719 = vadd.xlane.f32.xlu0 %v1718_v34  ;;  %v1308_v34 = vmax.f32 %v1035_v45, 0.0  ;;  %v1275_v60 = vadd.f32 %v2748_v43, %v1274_v58 }
 0x1cf   : > { %v1534_v63 = vmul.f32 %v2747_v3, %v1402_v56 }
 0x1d0   : > { %v1879_v1 = vpop.xlane.xlu2 %1878  ;;  %v1687_v2 = vpop.xlane.xlu1 %1686  ;;  %v1440_v0 = vmul.f32 %v2747_v3, %v1308_v34 }
 0x1d1   : > { %v2039_v4 = vadd.f32 %v3474_v35, %v1879_v1  ;;  %v1975_v5 = vadd.f32 %v3474_v35, %v1687_v2  ;;  %v1594_v7 = vpop.xlane.xlu0 %1593  ;;  %v1913_v8 = vsel %vm1537_vm1, %v1534_v63, 0.0 }
 0x1d2   : > { %v1944_v9 = vadd.f32 %v3474_v35, %v1594_v7  ;;  %v1404_v7 = vmax.f32 %v1275_v60, 0.0 }
 0x1d3   : > { %2168 = vst.msk [vmem:[%s3125_s19 + $0x388] sm:$0xff] %vm2054_vm2, %v2039_v4  ;;  %v1535_v4 = vmul.f32 %v2747_v3, %v1403_v57 }
 0x1d4   : > { %2104 = vst.msk [vmem:[%s3125_s19 + $0x188] sm:$0xff] %vm2054_vm2, %v1975_v5  ;;  %v1536_v13 = vmul.f32 %v2747_v3, %v1404_v7 }
 0x1d5   : > { %2073 = vst.msk [vmem:[%s3125_s19 + $0x90] sm:$0xff] %vm2054_vm2, %v1944_v9  ;;  %1626 = vadd.xlane.f32.xlu2 %v1625_v16  ;;  %1911 = vadd.xlane.f32.xlu1 %v1910_v11  ;;  %v1631_v9 = vsel %vm1537_vm1, %v1440_v0, 0.0  ;;  %v1916_v10 = vsel %vm1537_vm1, %v1535_v4, 0.0 }
 0x1d6   : > { %1818 = vadd.xlane.f32.xlu0 %v1817_v17  ;;  %v1919_v18 = vsel %vm1537_vm1, %v1536_v13, 0.0 }
 0x1d8   : > { %v1690_v23 = vpop.xlane.xlu2 %1689  ;;  %v1786_v24 = vpop.xlane.xlu1 %1785 }
 0x1d9   : > { %v1976_v26 = vadd.f32 %v3474_v35, %v1690_v23  ;;  %v2008_v27 = vadd.f32 %v3474_v35, %v1786_v24  ;;  %v1882_v28 = vpop.xlane.xlu0 %1881 }
 0x1da   : > { %v2040_v31 = vadd.f32 %v3474_v35, %v1882_v28 }
 0x1db   : > { %2105 = vst.msk [vmem:[%s3125_s19 + $0x190] sm:$0xff] %vm2054_vm2, %v1976_v26 }
 0x1dc   : > { %2137 = vst.msk [vmem:[%s3125_s19 + $0x290] sm:$0xff] %vm2054_vm2, %v2008_v27 }
 0x1dd   : > { %2169 = vst.msk [vmem:[%s3125_s19 + $0x390] sm:$0xff] %vm2054_vm2, %v2040_v31  ;;  %1725 = vadd.xlane.f32.xlu2 %v1724_v33  ;;  %1722 = vadd.xlane.f32.xlu1 %v1721_v6 }
 0x1de   : > { %1629 = vadd.xlane.f32.xlu0 %v1628_v37 }
 0x1e0   : > { %v1789_v46 = vpop.xlane.xlu2 %1788  ;;  %v1597_v47 = vpop.xlane.xlu1 %1596 }
 0x1e1   : > { %v2009_v49 = vadd.f32 %v3474_v35, %v1789_v46  ;;  %v1945_v50 = vadd.f32 %v3474_v35, %v1597_v47  ;;  %v1693_v51 = vpop.xlane.xlu0 %1692 }
 0x1e2   : > { %v1977_v53 = vadd.f32 %v3474_v35, %v1693_v51 }
 0x1e3   : > { %2138 = vst.msk [vmem:[%s3125_s19 + $0x298] sm:$0xff] %vm2054_vm2, %v2009_v49 }
 0x1e4   : > { %2074 = vst.msk [vmem:[%s3125_s19 + $0x98] sm:$0xff] %vm2054_vm2, %v1945_v50 }
 0x1e5   : > { %2106 = vst.msk [vmem:[%s3125_s19 + $0x198] sm:$0xff] %vm2054_vm2, %v1977_v53  ;;  %1824 = vadd.xlane.f32.xlu2 %v1823_v54  ;;  %1821 = vadd.xlane.f32.xlu1 %v1820_v55 }
 0x1e6   : > { %1728 = vadd.xlane.f32.xlu0 %v1727_v59 }
 0x1e8   : > { %v1600_v61 = vpop.xlane.xlu2 %1599  ;;  %v1885_v62 = vpop.xlane.xlu1 %1884 }
 0x1e9   : > { %v1946_v1 = vadd.f32 %v3474_v35, %v1600_v61  ;;  %v2041_v2 = vadd.f32 %v3474_v35, %v1885_v62  ;;  %v1792_v39 = vpop.xlane.xlu0 %1791 }
 0x1ea   : > { %v2010_v5 = vadd.f32 %v3474_v35, %v1792_v39 }
 0x1eb   : > { %2075 = vst.msk [vmem:[%s3125_s19 + $0xa0] sm:$0xff] %vm2054_vm2, %v1946_v1 }
 0x1ec   : > { %2170 = vst.msk [vmem:[%s3125_s19 + $0x398] sm:$0xff] %vm2054_vm2, %v2041_v2 }
 0x1ed   : > { %2139 = vst.msk [vmem:[%s3125_s19 + $0x2a0] sm:$0xff] %vm2054_vm2, %v2010_v5  ;;  %1914 = vadd.xlane.f32.xlu2 %v1913_v8  ;;  %1632 = vadd.xlane.f32.xlu1 %v1631_v9 }
 0x1ee   : > { %1917 = vadd.xlane.f32.xlu0 %v1916_v10 }
 0x1f0   : > { %v1888_v11 = vpop.xlane.xlu2 %1887  ;;  %v1696_v12 = vpop.xlane.xlu1 %1695 }
 0x1f1   : > { %v2042_v14 = vadd.f32 %v3474_v35, %v1888_v11  ;;  %v1978_v15 = vadd.f32 %v3474_v35, %v1696_v12  ;;  %v1603_v16 = vpop.xlane.xlu0 %1602 }
 0x1f2   : > { %v1947_v17 = vadd.f32 %v3474_v35, %v1603_v16 }
 0x1f3   : > { %2171 = vst.msk [vmem:[%s3125_s19 + $0x3a0] sm:$0xff] %vm2054_vm2, %v2042_v14 }
 0x1f4   : > { %2107 = vst.msk [vmem:[%s3125_s19 + $0x1a0] sm:$0xff] %vm2054_vm2, %v1978_v15 }
 0x1f5   : > { %2076 = vst.msk [vmem:[%s3125_s19 + $0xa8] sm:$0xff] %vm2054_vm2, %v1947_v17  ;;  %1920 = vadd.xlane.f32.xlu1 %v1919_v18 }
 0x1f8   : > { %v1699_v19 = vpop.xlane.xlu2 %1698  ;;  %v1795_v20 = vpop.xlane.xlu1 %1794 }
 0x1f9   : > { %v1979_v21 = vadd.f32 %v3474_v35, %v1699_v19  ;;  %v2011_v22 = vadd.f32 %v3474_v35, %v1795_v20  ;;  %v1891_v23 = vpop.xlane.xlu0 %1890 }
 0x1fa   : > { %v2043_v24 = vadd.f32 %v3474_v35, %v1891_v23 }
 0x1fb   : > { %2108 = vst.msk [vmem:[%s3125_s19 + $0x1a8] sm:$0xff] %vm2054_vm2, %v1979_v21 }
 0x1fc   : > { %2140 = vst.msk [vmem:[%s3125_s19 + $0x2a8] sm:$0xff] %vm2054_vm2, %v2011_v22 }
 0x1fd   : > { %2172 = vst.msk [vmem:[%s3125_s19 + $0x3a8] sm:$0xff] %vm2054_vm2, %v2043_v24 }
 0x200   : > { %v1798_v25 = vpop.xlane.xlu2 %1797  ;;  %v1606_v26 = vpop.xlane.xlu1 %1605 }
 0x201   : > { %v2012_v27 = vadd.f32 %v3474_v35, %v1798_v25  ;;  %v1948_v28 = vadd.f32 %v3474_v35, %v1606_v26  ;;  %v1702_v29 = vpop.xlane.xlu0 %1701 }
 0x202   : > { %v1980_v30 = vadd.f32 %v3474_v35, %v1702_v29 }
 0x203   : > { %2141 = vst.msk [vmem:[%s3125_s19 + $0x2b0] sm:$0xff] %vm2054_vm2, %v2012_v27 }
 0x204   : > { %2077 = vst.msk [vmem:[%s3125_s19 + $0xb0] sm:$0xff] %vm2054_vm2, %v1948_v28 }
 0x205   : > { %2109 = vst.msk [vmem:[%s3125_s19 + $0x1b0] sm:$0xff] %vm2054_vm2, %v1980_v30 }
 0x208   : > { %v1609_v31 = vpop.xlane.xlu2 %1608  ;;  %v1894_v32 = vpop.xlane.xlu1 %1893 }
 0x209   : > { %v1949_v33 = vadd.f32 %v3474_v35, %v1609_v31  ;;  %v2044_v36 = vadd.f32 %v3474_v35, %v1894_v32  ;;  %v1801_v37 = vpop.xlane.xlu0 %1800 }
 0x20a   : > { %v2013_v6 = vadd.f32 %v3474_v35, %v1801_v37 }
 0x20b   : > { %2078 = vst.msk [vmem:[%s3125_s19 + $0xb8] sm:$0xff] %vm2054_vm2, %v1949_v33 }
 0x20c   : > { %2173 = vst.msk [vmem:[%s3125_s19 + $0x3b0] sm:$0xff] %vm2054_vm2, %v2044_v36 }
 0x20d   : > { %2142 = vst.msk [vmem:[%s3125_s19 + $0x2b8] sm:$0xff] %vm2054_vm2, %v2013_v6 }
 0x210   : > { %v1897_v38 = vpop.xlane.xlu2 %1896  ;;  %v1705_v40 = vpop.xlane.xlu1 %1704 }
 0x211   : > { %v2045_v3 = vadd.f32 %v3474_v35, %v1897_v38  ;;  %v1981_v41 = vadd.f32 %v3474_v35, %v1705_v40  ;;  %v1612_v42 = vpop.xlane.xlu0 %1611 }
 0x212   : > { %v1950_v43 = vadd.f32 %v3474_v35, %v1612_v42 }
 0x213   : > { %2174 = vst.msk [vmem:[%s3125_s19 + $0x3b8] sm:$0xff] %vm2054_vm2, %v2045_v3 }
 0x214   : > { %2110 = vst.msk [vmem:[%s3125_s19 + $0x1b8] sm:$0xff] %vm2054_vm2, %v1981_v41 }
 0x215   : > { %2079 = vst.msk [vmem:[%s3125_s19 + $0xc0] sm:$0xff] %vm2054_vm2, %v1950_v43 }
 0x218   : > { %v1708_v44 = vpop.xlane.xlu2 %1707  ;;  %v1804_v45 = vpop.xlane.xlu1 %1803 }
 0x219   : > { %v1982_v46 = vadd.f32 %v3474_v35, %v1708_v44  ;;  %v2014_v47 = vadd.f32 %v3474_v35, %v1804_v45  ;;  %v1900_v48 = vpop.xlane.xlu0 %1899 }
 0x21a   : > { %v2046_v49 = vadd.f32 %v3474_v35, %v1900_v48 }
 0x21b   : > { %2111 = vst.msk [vmem:[%s3125_s19 + $0x1c0] sm:$0xff] %vm2054_vm2, %v1982_v46 }
 0x21c   : > { %2143 = vst.msk [vmem:[%s3125_s19 + $0x2c0] sm:$0xff] %vm2054_vm2, %v2014_v47 }
 0x21d   : > { %2175 = vst.msk [vmem:[%s3125_s19 + $0x3c0] sm:$0xff] %vm2054_vm2, %v2046_v49 }
 0x220   : > { %v1807_v50 = vpop.xlane.xlu2 %1806  ;;  %v1615_v51 = vpop.xlane.xlu1 %1614 }
 0x221   : > { %v2015_v52 = vadd.f32 %v3474_v35, %v1807_v50  ;;  %v1951_v53 = vadd.f32 %v3474_v35, %v1615_v51  ;;  %v1711_v54 = vpop.xlane.xlu0 %1710 }
 0x222   : > { %v1983_v55 = vadd.f32 %v3474_v35, %v1711_v54 }
 0x223   : > { %2144 = vst.msk [vmem:[%s3125_s19 + $0x2c8] sm:$0xff] %vm2054_vm2, %v2015_v52 }
 0x224   : > { %2080 = vst.msk [vmem:[%s3125_s19 + $0xc8] sm:$0xff] %vm2054_vm2, %v1951_v53 }
 0x225   : > { %2112 = vst.msk [vmem:[%s3125_s19 + $0x1c8] sm:$0xff] %vm2054_vm2, %v1983_v55 }
 0x228   : > { %v1618_v56 = vpop.xlane.xlu2 %1617  ;;  %v1903_v34 = vpop.xlane.xlu1 %1902 }
 0x229   : > { %v1952_v57 = vadd.f32 %v3474_v35, %v1618_v56  ;;  %v2047_v58 = vadd.f32 %v3474_v35, %v1903_v34  ;;  %v1810_v59 = vpop.xlane.xlu0 %1809 }
 0x22a   : > { %v2016_v60 = vadd.f32 %v3474_v35, %v1810_v59 }
 0x22b   : > { %2081 = vst.msk [vmem:[%s3125_s19 + $0xd0] sm:$0xff] %vm2054_vm2, %v1952_v57 }
 0x22c   : > { %2176 = vst.msk [vmem:[%s3125_s19 + $0x3c8] sm:$0xff] %vm2054_vm2, %v2047_v58 }
 0x22d   : > { %2145 = vst.msk [vmem:[%s3125_s19 + $0x2d0] sm:$0xff] %vm2054_vm2, %v2016_v60 }
 0x230   : > { %v1906_v61 = vpop.xlane.xlu2 %1905  ;;  %v1714_v62 = vpop.xlane.xlu1 %1713 }
 0x231   : > { %v2048_v63 = vadd.f32 %v3474_v35, %v1906_v61  ;;  %v1984_v0 = vadd.f32 %v3474_v35, %v1714_v62  ;;  %v1621_v1 = vpop.xlane.xlu0 %1620 }
 0x232   : > { %v1953_v2 = vadd.f32 %v3474_v35, %v1621_v1 }
 0x233   : > { %2177 = vst.msk [vmem:[%s3125_s19 + $0x3d0] sm:$0xff] %vm2054_vm2, %v2048_v63 }
 0x234   : > { %2113 = vst.msk [vmem:[%s3125_s19 + $0x1d0] sm:$0xff] %vm2054_vm2, %v1984_v0 }
 0x235   : > { %2082 = vst.msk [vmem:[%s3125_s19 + $0xd8] sm:$0xff] %vm2054_vm2, %v1953_v2 }
 0x238   : > { %v1717_v39 = vpop.xlane.xlu2 %1716  ;;  %v1813_v4 = vpop.xlane.xlu1 %1812 }
 0x239   : > { %v1985_v5 = vadd.f32 %v3474_v35, %v1717_v39  ;;  %v2017_v7 = vadd.f32 %v3474_v35, %v1813_v4  ;;  %v1909_v8 = vpop.xlane.xlu0 %1908 }
 0x23a   : > { %v2049_v9 = vadd.f32 %v3474_v35, %v1909_v8 }
 0x23b   : > { %2114 = vst.msk [vmem:[%s3125_s19 + $0x1d8] sm:$0xff] %vm2054_vm2, %v1985_v5 }
 0x23c   : > { %2146 = vst.msk [vmem:[%s3125_s19 + $0x2d8] sm:$0xff] %vm2054_vm2, %v2017_v7 }
 0x23d   : > { %2178 = vst.msk [vmem:[%s3125_s19 + $0x3d8] sm:$0xff] %vm2054_vm2, %v2049_v9 }
 0x240   : > { %v1816_v10 = vpop.xlane.xlu2 %1815  ;;  %v1624_v11 = vpop.xlane.xlu1 %1623 }
 0x241   : > { %v2018_v12 = vadd.f32 %v3474_v35, %v1816_v10  ;;  %v1954_v13 = vadd.f32 %v3474_v35, %v1624_v11  ;;  %v1720_v14 = vpop.xlane.xlu0 %1719 }
 0x242   : > { %v1986_v15 = vadd.f32 %v3474_v35, %v1720_v14 }
 0x243   : > { %2147 = vst.msk [vmem:[%s3125_s19 + $0x2e0] sm:$0xff] %vm2054_vm2, %v2018_v12 }
 0x244   : > { %2083 = vst.msk [vmem:[%s3125_s19 + $0xe0] sm:$0xff] %vm2054_vm2, %v1954_v13 }
 0x245   : > { %2115 = vst.msk [vmem:[%s3125_s19 + $0x1e0] sm:$0xff] %vm2054_vm2, %v1986_v15 }
 0x248   : > { %v1627_v16 = vpop.xlane.xlu2 %1626  ;;  %v1912_v17 = vpop.xlane.xlu1 %1911 }
 0x249   : > { %v1955_v18 = vadd.f32 %v3474_v35, %v1627_v16  ;;  %v2050_v19 = vadd.f32 %v3474_v35, %v1912_v17  ;;  %v1819_v20 = vpop.xlane.xlu0 %1818 }
 0x24a   : > { %v2019_v21 = vadd.f32 %v3474_v35, %v1819_v20 }
 0x24b   : > { %2084 = vst.msk [vmem:[%s3125_s19 + $0xe8] sm:$0xff] %vm2054_vm2, %v1955_v18 }
 0x24c   : > { %2179 = vst.msk [vmem:[%s3125_s19 + $0x3e0] sm:$0xff] %vm2054_vm2, %v2050_v19 }
 0x24d   : > { %2148 = vst.msk [vmem:[%s3125_s19 + $0x2e8] sm:$0xff] %vm2054_vm2, %v2019_v21 }
 0x250   : > { %v1726_v22 = vpop.xlane.xlu2 %1725  ;;  %v1723_v23 = vpop.xlane.xlu1 %1722 }
 0x251   : > { %v1988_v24 = vadd.f32 %v3474_v35, %v1726_v22  ;;  %v1987_v25 = vadd.f32 %v3474_v35, %v1723_v23  ;;  %v1630_v26 = vpop.xlane.xlu0 %1629 }
 0x252   : > { %v1956_v27 = vadd.f32 %v3474_v35, %v1630_v26 }
 0x253   : > { %2117 = vst.msk [vmem:[%s3125_s19 + $0x1f0] sm:$0xff] %vm2054_vm2, %v1988_v24 }
 0x254   : > { %2116 = vst.msk [vmem:[%s3125_s19 + $0x1e8] sm:$0xff] %vm2054_vm2, %v1987_v25 }
 0x255   : > { %2085 = vst.msk [vmem:[%s3125_s19 + $0xf0] sm:$0xff] %vm2054_vm2, %v1956_v27 }
 0x258   : > { %v1825_v28 = vpop.xlane.xlu2 %1824  ;;  %v1822_v29 = vpop.xlane.xlu1 %1821 }
 0x259   : > { %v2021_v30 = vadd.f32 %v3474_v35, %v1825_v28  ;;  %v2020_v31 = vadd.f32 %v3474_v35, %v1822_v29  ;;  %v1729_v32 = vpop.xlane.xlu0 %1728 }
 0x25a   : > { %v1989_v33 = vadd.f32 %v3474_v35, %v1729_v32 }
 0x25b   : > { %2150 = vst.msk [vmem:[%s3125_s19 + $0x2f8] sm:$0xff] %vm2054_vm2, %v2021_v30 }
 0x25c   : > { %2149 = vst.msk [vmem:[%s3125_s19 + $0x2f0] sm:$0xff] %vm2054_vm2, %v2020_v31 }
 0x25d   : > { %2118 = vst.msk [vmem:[%s3125_s19 + $0x1f8] sm:$0xff] %vm2054_vm2, %v1989_v33 }
 0x260   : > { %v1915_v36 = vpop.xlane.xlu2 %1914  ;;  %v1633_v37 = vpop.xlane.xlu1 %1632 }
 0x261   : > { %v2051_v6 = vadd.f32 %v3474_v35, %v1915_v36  ;;  %v1957_v38 = vadd.f32 %v3474_v35, %v1633_v37  ;;  %v1918_v40 = vpop.xlane.xlu0 %1917 }
 0x262   : > { %v2052_v3 = vadd.f32 %v3474_v35, %v1918_v40 }
 0x263   : > { %2180 = vst.msk [vmem:[%s3125_s19 + $0x3e8] sm:$0xff] %vm2054_vm2, %v2051_v6 }
 0x264   : > { %2086 = vst.msk [vmem:[%s3125_s19 + $0xf8] sm:$0xff] %vm2054_vm2, %v1957_v38 }
 0x265   : > { %2181 = vst.msk [vmem:[%s3125_s19 + $0x3f0] sm:$0xff] %vm2054_vm2, %v2052_v3 }
 0x268   : > { %v1921_v41 = vpop.xlane.xlu1 %1920 }
 0x269   : > { %v2053_v42 = vadd.f32 %v3474_v35, %v1921_v41 }
 0x26b   : > { %2182 = vst.msk [vmem:[%s3125_s19 + $0x3f8] sm:$0xff] %vm2054_vm2, %v2053_v42 }
 0x26c PF: > { %s17_s24 = sadd.s32 1, %s2787_s24   ;;  %s3805_s20 = smov %s2779_s22 }
 0x26d   : > { %p14_p7 = scmp.ge.s32.totalorder %s17_s24, 10   ;;  %s3806_s21 = smov %s2783_s23 }
 0x26e   : > { %s3807_s22 = smov %s3810_s4  ;;  %s3808_s23 = smov %s3814_s25 }
 0x26f   :  { %16 = sbr.rel (!%p14_p7) target bundleno = 3 (0x3), region = 73 }

</bundles_post_ra>
